<compile_context>
chip_gen: v5e
topology: v5e:2x2
jax: 0.10.0
libtpu: 0.0.40
codegen_flags: <defaults>
</compile_context>

<pallas_src>
import jax
import jax.numpy as jnp
from jax.experimental import pallas as pl
from jax.experimental.pallas import tpu as pltpu

EPS = 1e-5
CP = 128                        # lane-padded channel width (lane-dense stores)
VMEM_LIMIT = 32 * 1024 * 1024   # safe scoped-VMEM limit on v5e/v6e/v7x


def _round_up(v, m):
    return (v + m - 1) // m * m


def _pick_tile_rows(rows, max_rows=4096):
    """Largest multiple-of-8 divisor of `rows`, capped at max_rows."""
    best = 8
    for cand in range(8, min(rows, max_rows) + 1, 8):
        if rows % cand == 0:
            best = cand
    return best


def resnet_block_forward(x_nchw, w1, g1, b1, w2, g2, b2):
    """ResNetBlock forward (stride=1, downsample=None, cin == cout)."""
    n, cin, h, w = x_nchw.shape
    cout = w1.shape[0]
    assert cin == cout, "identity path requires in_channels == out_channels"
    assert cout <= CP

    wp = _round_up(w + 2, 8)      # padded row width, 8-aligned sublane stride
    hv = h * wp                   # conv rows per image (pad columns masked)
    p_rows = (h + 2) * wp         # rows of the flattened zero-padded image
    cnt = float(n * h * w)        # BN population size (valid pixels only)
    k1 = 3 * cin                  # dx-packed conv1 input lane width

    # Megacore split of the stats passes (v7x has 2 TCs; harmless elsewhere).
    G = 2 if (n >= 2 and n % 2 == 0) else 1
    inner = n // G

    # ---------------- layout glue (XLA, done once, bf16 where possible) -------
    x_nhwc = jnp.transpose(x_nchw, (0, 2, 3, 1)).astype(jnp.float32)
    xpad = jnp.pad(x_nhwc, ((0, 0), (1, 1), (1, wp - w - 1), (0, 0)))
    xflat = jnp.pad(xpad.reshape(n, p_rows, cin), ((0, 0), (0, 2), (0, 0)))
    # dx-packed input: x3[n, r, dx*cin + c] = padded_image_flat[n, r + dx, c]
    x3 = jnp.concatenate([xflat[:, dx:dx + p_rows, :] for dx in range(3)],
                         axis=2).astype(jnp.bfloat16)       # (n, p_rows, 3*cin)

    def conv1_weight(wt):
        co, ci = wt.shape[0], wt.shape[1]
        m = jnp.transpose(wt, (2, 3, 1, 0)).reshape(9 * ci, co)   # (dy,dx,ci)-major
        return jnp.pad(m, ((0, 0), (0, CP - co))).astype(jnp.bfloat16)

    def conv2_weight(wt):
        co, ci = wt.shape[0], wt.shape[1]
        m = jnp.transpose(wt, (2, 3, 1, 0))                       # (3,3,ci,co)
        m = jnp.pad(m, ((0, 0), (0, 0), (0, CP - ci), (0, CP - co)))
        return m.reshape(9 * CP, CP).astype(jnp.bfloat16)

    w1m = conv1_weight(w1)        # (9*cin, CP)
    w2m = conv2_weight(w2)        # (9*CP, CP)

    g1p = jnp.pad(g1, (0, CP - cout)).reshape(1, CP).astype(jnp.float32)
    b1p = jnp.pad(b1, (0, CP - cout)).reshape(1, CP).astype(jnp.float32)
    g2p = jnp.pad(g2, (0, CP - cout)).reshape(1, CP).astype(jnp.float32)
    b2p = jnp.pad(b2, (0, CP - cout)).reshape(1, CP).astype(jnp.float32)

    # 1.0 on rows that are real output pixels, 0.0 on the width-pad rows.
    valid = ((jnp.arange(hv) % wp) < w).astype(jnp.float32).reshape(hv, 1)

    # identity laid out to match y2's flattened (h, wp) rows, lane-padded (f32
    # to keep the residual add exact).
    id_flat = jnp.pad(x_nhwc, ((0, 0), (0, 0), (0, wp - w), (0, CP - cin)))
    id_flat = id_flat.reshape(n * hv, CP)

    # ---------------------------- kernel helpers ------------------------------
    def conv1_patch(x_ref):
        # three 8-aligned sublane slices (dx already packed along lanes)
        return jnp.concatenate(
            [x_ref[0, dy * wp:dy * wp + hv, :] for dy in range(3)], axis=1)

    def accumulate_stats(z, mask, sum_ref, sumsq_ref):
        zm = z * mask
        s = jnp.sum(zm.reshape(hv // 8, 8, CP), axis=0)           # (8, CP)
        ss = jnp.sum((zm * z).reshape(hv // 8, 8, CP), axis=0)    # (8, CP)

        @pl.when(pl.program_id(1) == 0)
        def _():
            sum_ref[...] = s
            sumsq_ref[...] = ss

        @pl.when(pl.program_id(1) > 0)
        def _():
            sum_ref[...] = sum_ref[...] + s
            sumsq_ref[...] = sumsq_ref[...] + ss

    # ---- kernel A: conv1 (single K=9*cin dot) + bn1 statistics ---------------
    def conv1_stats_kernel(x_ref, w_ref, mask_ref, sum_ref, sumsq_ref):
        z1 = jnp.dot(conv1_patch(x_ref), w_ref[...],
                     preferred_element_type=jnp.float32)          # (hv, CP) f32
        accumulate_stats(z1, mask_ref[...], sum_ref, sumsq_ref)

    # ---- kernel B: recompute conv1, bn1+relu in VMEM, conv2, bn2 stats -------
    def conv2_stats_kernel(x_ref, w1_ref, sc1_ref, sh1_ref, w2_ref, mask_ref,
                           y2_ref, sum_ref, sumsq_ref, a1s_ref):
        z1 = jnp.dot(conv1_patch(x_ref), w1_ref[...],
                     preferred_element_type=jnp.float32)
        a1 = jnp.maximum(z1 * sc1_ref[...] + sh1_ref[...], 0.0) * mask_ref[...]

        # a1s packs three dx-shifted copies of the zero-padded activation along
        # lanes: a1s[q, dx*CP + c] = padded_a1[q + dx, c].  Padding margins are
        # zeroed once per core; interiors are fully overwritten every step.
        @pl.when(pl.program_id(1) == 0)
        def _():
            a1s_ref[...] = jnp.zeros_like(a1s_ref)

        a1_bf = a1.astype(jnp.bfloat16)
        a1s_ref[wp + 1:wp + 1 + hv, 0 * CP:1 * CP] = a1_bf   # dx = 0
        a1s_ref[wp:wp + hv, 1 * CP:2 * CP] = a1_bf           # dx = 1 (aligned)
        a1s_ref[wp - 1:wp - 1 + hv, 2 * CP:3 * CP] = a1_bf   # dx = 2

        # conv2: 3 aligned (hv, 3*CP) reads, lane-concat -> one K = 9*CP dot
        patch2 = jnp.concatenate(
            [a1s_ref[dy * wp:dy * wp + hv, :] for dy in range(3)], axis=1)
        z2 = jnp.dot(patch2, w2_ref[...], preferred_element_type=jnp.float32)
        y2_ref[0] = z2.astype(jnp.bfloat16)
        accumulate_stats(z2, mask_ref[...], sum_ref, sumsq_ref)

    # ---- kernel C: bn2 + residual + relu (row-tiled, lane-dense, parallel) ---
    def bn_add_relu_kernel(y2_ref, id_ref, sc2_ref, sh2_ref, o_ref):
        y = (y2_ref[...].astype(jnp.float32) * sc2_ref[...] + sh2_ref[...]
             + id_ref[...])
        o_ref[...] = jnp.maximum(y, 0.0)

    def scale_shift(s_part, ss_part, gamma, beta):
        s = jnp.sum(s_part, axis=0, keepdims=True)      # fold sublane+core partials
        ss = jnp.sum(ss_part, axis=0, keepdims=True)
        mean = s / cnt
        var = jnp.maximum(ss / cnt - mean * mean, 0.0)  # biased, training-mode BN
        scale = gamma * jax.lax.rsqrt(var + EPS)
        return scale, beta - mean * scale

    # ------------------------------- specs -------------------------------------
    x_spec = pl.BlockSpec((1, p_rows, k1), lambda g, i: (g * inner + i, 0, 0))
    w1_spec = pl.BlockSpec((9 * cin, CP), lambda g, i: (0, 0))
    w2_spec = pl.BlockSpec((9 * CP, CP), lambda g, i: (0, 0))
    chan_spec = pl.BlockSpec((1, CP), lambda g, i: (0, 0))
    mask_spec = pl.BlockSpec((hv, 1), lambda g, i: (0, 0))
    stat_spec = pl.BlockSpec((8, CP), lambda g, i: (g, 0))
    stat_shape = jax.ShapeDtypeStruct((8 * G, CP), jnp.float32)

    stats_params = pltpu.CompilerParams(
        dimension_semantics=("parallel", "arbitrary"),
        vmem_limit_bytes=VMEM_LIMIT)

    # -------- pass 1: bn1 statistics (conv1 output never written to HBM) ------
    sum1, sumsq1 = pl.pallas_call(
        conv1_stats_kernel,
        grid=(G, inner),
        in_specs=[x_spec, w1_spec, mask_spec],
        out_specs=[stat_spec, stat_spec],
        out_shape=[stat_shape, stat_shape],
        compiler_params=stats_params,
    )(x3, w1m, valid)
    scale1, shift1 = scale_shift(sum1, sumsq1, g1p, b1p)

    # -------- pass 2: conv2 raw output (bf16) + bn2 statistics -----------------
    y2, sum2, sumsq2 = pl.pallas_call(
        conv2_stats_kernel,
        grid=(G, inner),
        in_specs=[x_spec, w1_spec, chan_spec, chan_spec, w2_spec, mask_spec],
        out_specs=[pl.BlockSpec((1, hv, CP), lambda g, i: (g * inner + i, 0, 0)),
                   stat_spec, stat_spec],
        out_shape=[jax.ShapeDtypeStruct((n, hv, CP), jnp.bfloat16),
                   stat_shape, stat_shape],
        scratch_shapes=[pltpu.VMEM((p_rows, 3 * CP), jnp.bfloat16)],
        compiler_params=stats_params,
    )(x3, w1m, scale1, shift1, w2m, valid)
    scale2, shift2 = scale_shift(sum2, sumsq2, g2p, b2p)

    # -------- pass 3: bn2 + identity + relu ------------------------------------
    rows = n * hv
    tr = _pick_tile_rows(rows)
    y2_flat = y2.reshape(rows, CP)

    out_flat = pl.pallas_call(
        bn_add_relu_kernel,
        grid=(rows // tr,),
        in_specs=[pl.BlockSpec((tr, CP), lambda i: (i, 0)),
                  pl.BlockSpec((tr, CP), lambda i: (i, 0)),
                  pl.BlockSpec((1, CP), lambda i: (0, 0)),
                  pl.BlockSpec((1, CP), lambda i: (0, 0))],
        out_specs=pl.BlockSpec((tr, CP), lambda i: (i, 0)),
        out_shape=jax.ShapeDtypeStruct((rows, CP), jnp.float32),
        compiler_params=pltpu.CompilerParams(
            dimension_semantics=("parallel",),
            vmem_limit_bytes=VMEM_LIMIT),
    )(y2_flat, id_flat, scale2, shift2)

    out = out_flat.reshape(n, h, wp, CP)[:, :, :w, :cout]
    return jnp.transpose(out, (0, 3, 1, 2))


if __name__ == "__main__":
    # Small deterministic setup consistent with the module:
    # in_channels = out_channels = 4, stride = 1, downsample = None.
    N, C, H, W = 2, 4, 16, 16
    COUT = 4

    key = jax.random.PRNGKey(0)
    kx, kw1, kw2 = jax.random.split(key, 3)

    x = jax.random.normal(kx, (N, C, H, W), dtype=jnp.float32)
    # Conv weights (bias=False), PyTorch layout (Cout, Cin, 3, 3).
    w1 = jax.random.normal(kw1, (COUT, C, 3, 3), dtype=jnp.float32) * (2.0 / (9 * C)) ** 0.5
    w2 = jax.random.normal(kw2, (COUT, COUT, 3, 3), dtype=jnp.float32) * (2.0 / (9 * COUT)) ** 0.5
    # BatchNorm2d default init: weight=1, bias=0.
    g1 = jnp.ones((COUT,), jnp.float32)
    b1 = jnp.zeros((COUT,), jnp.float32)
    g2 = jnp.ones((COUT,), jnp.float32)
    b2 = jnp.zeros((COUT,), jnp.float32)

    fwd = jax.jit(resnet_block_forward)
    out = fwd(x, w1, g1, b1, w2, g2, b2)
    jax.block_until_ready(out)
    assert out.shape == (N, COUT, H, W)
    assert bool(jnp.all(jnp.isfinite(out)))
    print("KERNEL_OK")
</pallas_src>

<mosaic_0001>
module attributes {stable_mosaic.version = 11 : i64} {
  func.func @conv1_stats_kernel(%arg0: i32, %arg1: i32, %arg2: memref<1x432x12xbf16, #tpu.memory_space<vmem>>, %arg3: memref<36x128xbf16, #tpu.memory_space<vmem>>, %arg4: memref<384x1xf32, #tpu.memory_space<vmem>>, %arg5: memref<8x128xf32, #tpu.memory_space<vmem>>, %arg6: memref<8x128xf32, #tpu.memory_space<vmem>>) attributes {dimension_semantics = [#tpu.dimension_semantics<parallel>, #tpu.dimension_semantics<arbitrary>], iteration_bounds = array<i64: 2, 1>, scalar_prefetch = 0 : i64, scratch_operands = 0 : i64, tpu.core_type = #tpu.core_type<tc>, window_params = [{transform_indices = @transform_0, window_bounds = array<i64: 1, 432, 12>}, {pipeline_mode = #tpu.pipeline_mode<synchronous>, transform_indices = @transform_1, window_bounds = array<i64: 36, 128>}, {pipeline_mode = #tpu.pipeline_mode<synchronous>, transform_indices = @transform_2, window_bounds = array<i64: 384, 1>}, {transform_indices = @transform_3, window_bounds = array<i64: 8, 128>}, {transform_indices = @transform_4, window_bounds = array<i64: 8, 128>}]} {
    %c0 = arith.constant 0 : index
    %c0_0 = arith.constant 0 : index
    %c0_1 = arith.constant 0 : index
    %0 = vector.load %arg2[%c0, %c0_0, %c0_1] : memref<1x432x12xbf16, #tpu.memory_space<vmem>>, vector<1x384x12xbf16>
    %1 = vector.shape_cast %0 : vector<1x384x12xbf16> to vector<384x12xbf16>
    %c0_2 = arith.constant 0 : index
    %c24 = arith.constant 24 : index
    %c0_3 = arith.constant 0 : index
    %2 = vector.load %arg2[%c0_2, %c24, %c0_3] : memref<1x432x12xbf16, #tpu.memory_space<vmem>>, vector<1x384x12xbf16>
    %3 = vector.shape_cast %2 : vector<1x384x12xbf16> to vector<384x12xbf16>
    %c0_4 = arith.constant 0 : index
    %c48 = arith.constant 48 : index
    %c0_5 = arith.constant 0 : index
    %4 = vector.load %arg2[%c0_4, %c48, %c0_5] : memref<1x432x12xbf16, #tpu.memory_space<vmem>>, vector<1x384x12xbf16>
    %5 = vector.shape_cast %4 : vector<1x384x12xbf16> to vector<384x12xbf16>
    %6 = tpu.concatenate %1, %3, %5 in 1 : vector<384x12xbf16>, vector<384x12xbf16>, vector<384x12xbf16> -> vector<384x36xbf16>
    %c0_6 = arith.constant 0 : index
    %c0_7 = arith.constant 0 : index
    %7 = vector.load %arg3[%c0_6, %c0_7] : memref<36x128xbf16, #tpu.memory_space<vmem>>, vector<36x128xbf16>
    %cst = arith.constant dense<0.000000e+00> : vector<384x128xf32>
    %8 = tpu.matmul %6, %7, %cst {dimension_numbers = #tpu.dot_dimension_numbers<[1], [0], [0], [1], [0, 0, 1, 1], [], []>} : vector<384x36xbf16>, vector<36x128xbf16>, vector<384x128xf32> -> vector<384x128xf32>
    %c0_8 = arith.constant 0 : index
    %c0_9 = arith.constant 0 : index
    %9 = vector.load %arg4[%c0_8, %c0_9] : memref<384x1xf32, #tpu.memory_space<vmem>>, vector<384x1xf32>
    %10 = vector.broadcast %9 : vector<384x1xf32> to vector<384x128xf32>
    %11 = arith.mulf %8, %10 : vector<384x128xf32>
    %12 = vector.shape_cast %11 : vector<384x128xf32> to vector<48x8x128xf32>
    %cst_10 = arith.constant dense<0.000000e+00> : vector<8x128xf32>
    %13 = vector.multi_reduction <add>, %12, %cst_10 [0] : vector<48x8x128xf32> to vector<8x128xf32>
    %14 = arith.mulf %11, %8 : vector<384x128xf32>
    %15 = vector.shape_cast %14 : vector<384x128xf32> to vector<48x8x128xf32>
    %cst_11 = arith.constant dense<0.000000e+00> : vector<8x128xf32>
    %16 = vector.multi_reduction <add>, %15, %cst_11 [0] : vector<48x8x128xf32> to vector<8x128xf32>
    %c0_i32 = arith.constant 0 : i32
    %17 = arith.cmpi eq, %arg1, %c0_i32 : i32
    %18 = arith.extui %17 : i1 to i32
    %c0_i32_12 = arith.constant 0 : i32
    %19 = arith.cmpi ne, %18, %c0_i32_12 : i32
    scf.if %19 {
      %c0_15 = arith.constant 0 : index
      %c0_16 = arith.constant 0 : index
      %23 = vector.load %arg5[%c0_15, %c0_16] : memref<8x128xf32, #tpu.memory_space<vmem>>, vector<8x128xf32>
      tpu.vector_store %arg5[%c0_15, %c0_16], %13 {strides = array<i32>} : memref<8x128xf32, #tpu.memory_space<vmem>>, vector<8x128xf32>,
      %c0_17 = arith.constant 0 : index
      %c0_18 = arith.constant 0 : index
      %24 = vector.load %arg6[%c0_17, %c0_18] : memref<8x128xf32, #tpu.memory_space<vmem>>, vector<8x128xf32>
      tpu.vector_store %arg6[%c0_17, %c0_18], %16 {strides = array<i32>} : memref<8x128xf32, #tpu.memory_space<vmem>>, vector<8x128xf32>,
    } else {
    }
    %c0_i32_13 = arith.constant 0 : i32
    %20 = arith.cmpi sgt, %arg1, %c0_i32_13 : i32
    %21 = arith.extui %20 : i1 to i32
    %c0_i32_14 = arith.constant 0 : i32
    %22 = arith.cmpi ne, %21, %c0_i32_14 : i32
    scf.if %22 {
      %c0_15 = arith.constant 0 : index
      %c0_16 = arith.constant 0 : index
      %23 = vector.load %arg5[%c0_15, %c0_16] : memref<8x128xf32, #tpu.memory_space<vmem>>, vector<8x128xf32>
      %24 = arith.addf %23, %13 : vector<8x128xf32>
      %c0_17 = arith.constant 0 : index
      %c0_18 = arith.constant 0 : index
      %25 = vector.load %arg5[%c0_17, %c0_18] : memref<8x128xf32, #tpu.memory_space<vmem>>, vector<8x128xf32>
      tpu.vector_store %arg5[%c0_17, %c0_18], %24 {strides = array<i32>} : memref<8x128xf32, #tpu.memory_space<vmem>>, vector<8x128xf32>,
      %c0_19 = arith.constant 0 : index
      %c0_20 = arith.constant 0 : index
      %26 = vector.load %arg6[%c0_19, %c0_20] : memref<8x128xf32, #tpu.memory_space<vmem>>, vector<8x128xf32>
      %27 = arith.addf %26, %16 : vector<8x128xf32>
      %c0_21 = arith.constant 0 : index
      %c0_22 = arith.constant 0 : index
      %28 = vector.load %arg6[%c0_21, %c0_22] : memref<8x128xf32, #tpu.memory_space<vmem>>, vector<8x128xf32>
      tpu.vector_store %arg6[%c0_21, %c0_22], %27 {strides = array<i32>} : memref<8x128xf32, #tpu.memory_space<vmem>>, vector<8x128xf32>,
    } else {
    }
    return
  }
  func.func @transform_0(%arg0: i32, %arg1: i32) -> (i32, i32, i32) {
    %c1_i32 = arith.constant 1 : i32
    %0 = arith.muli %arg0, %c1_i32 : i32
    %1 = arith.addi %0, %arg1 : i32
    %c0_i32 = arith.constant 0 : i32
    %c0_i32_0 = arith.constant 0 : i32
    %c0_i32_1 = arith.constant 0 : i32
    return %1, %c0_i32, %c0_i32_0 : i32, i32, i32
  }
  func.func @transform_1(%arg0: i32, %arg1: i32) -> (i32, i32) {
    %c0_i32 = arith.constant 0 : i32
    %c0_i32_0 = arith.constant 0 : i32
    %c0_i32_1 = arith.constant 0 : i32
    return %c0_i32, %c0_i32_0 : i32, i32
  }
  func.func @transform_2(%arg0: i32, %arg1: i32) -> (i32, i32) {
    %c0_i32 = arith.constant 0 : i32
    %c0_i32_0 = arith.constant 0 : i32
    %c0_i32_1 = arith.constant 0 : i32
    return %c0_i32, %c0_i32_0 : i32, i32
  }
  func.func @transform_3(%arg0: i32, %arg1: i32) -> (i32, i32) {
    %c0_i32 = arith.constant 0 : i32
    %c0_i32_0 = arith.constant 0 : i32
    return %arg0, %c0_i32 : i32, i32
  }
  func.func @transform_4(%arg0: i32, %arg1: i32) -> (i32, i32) {
    %c0_i32 = arith.constant 0 : i32
    %c0_i32_0 = arith.constant 0 : i32
    return %arg0, %c0_i32 : i32, i32
  }
}

module attributes {stable_mosaic.version = 11 : i64} {
  func.func @conv2_stats_kernel(%arg0: i32, %arg1: i32, %arg2: memref<1x432x12xbf16, #tpu.memory_space<vmem>>, %arg3: memref<36x128xbf16, #tpu.memory_space<vmem>>, %arg4: memref<1x128xf32, #tpu.memory_space<vmem>>, %arg5: memref<1x128xf32, #tpu.memory_space<vmem>>, %arg6: memref<1152x128xbf16, #tpu.memory_space<vmem>>, %arg7: memref<384x1xf32, #tpu.memory_space<vmem>>, %arg8: memref<1x384x128xbf16, #tpu.memory_space<vmem>>, %arg9: memref<8x128xf32, #tpu.memory_space<vmem>>, %arg10: memref<8x128xf32, #tpu.memory_space<vmem>>, %arg11: memref<432x384xbf16, #tpu.memory_space<vmem>>) attributes {dimension_semantics = [#tpu.dimension_semantics<parallel>, #tpu.dimension_semantics<arbitrary>], iteration_bounds = array<i64: 2, 1>, scalar_prefetch = 0 : i64, scratch_operands = 1 : i64, tpu.core_type = #tpu.core_type<tc>, window_params = [{transform_indices = @transform_0, window_bounds = array<i64: 1, 432, 12>}, {pipeline_mode = #tpu.pipeline_mode<synchronous>, transform_indices = @transform_1, window_bounds = array<i64: 36, 128>}, {pipeline_mode = #tpu.pipeline_mode<synchronous>, transform_indices = @transform_2, window_bounds = array<i64: 1, 128>}, {pipeline_mode = #tpu.pipeline_mode<synchronous>, transform_indices = @transform_3, window_bounds = array<i64: 1, 128>}, {pipeline_mode = #tpu.pipeline_mode<synchronous>, transform_indices = @transform_4, window_bounds = array<i64: 1152, 128>}, {pipeline_mode = #tpu.pipeline_mode<synchronous>, transform_indices = @transform_5, window_bounds = array<i64: 384, 1>}, {transform_indices = @transform_6, window_bounds = array<i64: 1, 384, 128>}, {transform_indices = @transform_7, window_bounds = array<i64: 8, 128>}, {transform_indices = @transform_8, window_bounds = array<i64: 8, 128>}]} {
    %c0 = arith.constant 0 : index
    %c0_0 = arith.constant 0 : index
    %c0_1 = arith.constant 0 : index
    %0 = vector.load %arg2[%c0, %c0_0, %c0_1] : memref<1x432x12xbf16, #tpu.memory_space<vmem>>, vector<1x384x12xbf16>
    %1 = vector.shape_cast %0 : vector<1x384x12xbf16> to vector<384x12xbf16>
    %c0_2 = arith.constant 0 : index
    %c24 = arith.constant 24 : index
    %c0_3 = arith.constant 0 : index
    %2 = vector.load %arg2[%c0_2, %c24, %c0_3] : memref<1x432x12xbf16, #tpu.memory_space<vmem>>, vector<1x384x12xbf16>
    %3 = vector.shape_cast %2 : vector<1x384x12xbf16> to vector<384x12xbf16>
    %c0_4 = arith.constant 0 : index
    %c48 = arith.constant 48 : index
    %c0_5 = arith.constant 0 : index
    %4 = vector.load %arg2[%c0_4, %c48, %c0_5] : memref<1x432x12xbf16, #tpu.memory_space<vmem>>, vector<1x384x12xbf16>
    %5 = vector.shape_cast %4 : vector<1x384x12xbf16> to vector<384x12xbf16>
    %6 = tpu.concatenate %1, %3, %5 in 1 : vector<384x12xbf16>, vector<384x12xbf16>, vector<384x12xbf16> -> vector<384x36xbf16>
    %c0_6 = arith.constant 0 : index
    %c0_7 = arith.constant 0 : index
    %7 = vector.load %arg3[%c0_6, %c0_7] : memref<36x128xbf16, #tpu.memory_space<vmem>>, vector<36x128xbf16>
    %cst = arith.constant dense<0.000000e+00> : vector<384x128xf32>
    %8 = tpu.matmul %6, %7, %cst {dimension_numbers = #tpu.dot_dimension_numbers<[1], [0], [0], [1], [0, 0, 1, 1], [], []>} : vector<384x36xbf16>, vector<36x128xbf16>, vector<384x128xf32> -> vector<384x128xf32>
    %c0_8 = arith.constant 0 : index
    %c0_9 = arith.constant 0 : index
    %9 = vector.load %arg4[%c0_8, %c0_9] : memref<1x128xf32, #tpu.memory_space<vmem>>, vector<1x128xf32>
    %10 = vector.broadcast %9 : vector<1x128xf32> to vector<384x128xf32>
    %11 = arith.mulf %8, %10 : vector<384x128xf32>
    %c0_10 = arith.constant 0 : index
    %c0_11 = arith.constant 0 : index
    %12 = vector.load %arg5[%c0_10, %c0_11] : memref<1x128xf32, #tpu.memory_space<vmem>>, vector<1x128xf32>
    %13 = vector.broadcast %12 : vector<1x128xf32> to vector<384x128xf32>
    %14 = arith.addf %11, %13 : vector<384x128xf32>
    %cst_12 = arith.constant 0.000000e+00 : f32
    %15 = vector.broadcast %cst_12 : f32 to vector<384x128xf32>
    %16 = arith.maximumf %14, %15 : vector<384x128xf32>
    %c0_13 = arith.constant 0 : index
    %c0_14 = arith.constant 0 : index
    %17 = vector.load %arg7[%c0_13, %c0_14] : memref<384x1xf32, #tpu.memory_space<vmem>>, vector<384x1xf32>
    %18 = vector.broadcast %17 : vector<384x1xf32> to vector<384x128xf32>
    %19 = arith.mulf %16, %18 : vector<384x128xf32>
    %c0_i32 = arith.constant 0 : i32
    %20 = arith.cmpi eq, %arg1, %c0_i32 : i32
    %21 = arith.extui %20 : i1 to i32
    %c0_i32_15 = arith.constant 0 : i32
    %22 = arith.cmpi ne, %21, %c0_i32_15 : i32
    scf.if %22 {
      %cst_38 = arith.constant 0.000000e+00 : bf16
      %51 = vector.broadcast %cst_38 : bf16 to vector<432x384xbf16>
      %c0_39 = arith.constant 0 : index
      %c0_40 = arith.constant 0 : index
      %52 = vector.load %arg11[%c0_39, %c0_40] : memref<432x384xbf16, #tpu.memory_space<vmem>>, vector<432x384xbf16>
      tpu.vector_store %arg11[%c0_39, %c0_40], %51 {strides = array<i32>} : memref<432x384xbf16, #tpu.memory_space<vmem>>, vector<432x384xbf16>,
    } else {
    }
    %23 = arith.truncf %19 : vector<384x128xf32> to vector<384x128xbf16>
    %c25 = arith.constant 25 : index
    %c0_16 = arith.constant 0 : index
    %24 = vector.load %arg11[%c25, %c0_16] : memref<432x384xbf16, #tpu.memory_space<vmem>>, vector<384x128xbf16>
    tpu.vector_store %arg11[%c25, %c0_16], %23 {strides = array<i32>} : memref<432x384xbf16, #tpu.memory_space<vmem>>, vector<384x128xbf16>,
    %c24_17 = arith.constant 24 : index
    %c128 = arith.constant 128 : index
    %25 = vector.load %arg11[%c24_17, %c128] : memref<432x384xbf16, #tpu.memory_space<vmem>>, vector<384x128xbf16>
    tpu.vector_store %arg11[%c24_17, %c128], %23 {strides = array<i32>} : memref<432x384xbf16, #tpu.memory_space<vmem>>, vector<384x128xbf16>,
    %c23 = arith.constant 23 : index
    %c256 = arith.constant 256 : index
    %26 = vector.load %arg11[%c23, %c256] : memref<432x384xbf16, #tpu.memory_space<vmem>>, vector<384x128xbf16>
    tpu.vector_store %arg11[%c23, %c256], %23 {strides = array<i32>} : memref<432x384xbf16, #tpu.memory_space<vmem>>, vector<384x128xbf16>,
    %c0_18 = arith.constant 0 : index
    %c0_19 = arith.constant 0 : index
    %27 = vector.load %arg11[%c0_18, %c0_19] : memref<432x384xbf16, #tpu.memory_space<vmem>>, vector<384x384xbf16>
    %c24_20 = arith.constant 24 : index
    %c0_21 = arith.constant 0 : index
    %28 = vector.load %arg11[%c24_20, %c0_21] : memref<432x384xbf16, #tpu.memory_space<vmem>>, vector<384x384xbf16>
    %c48_22 = arith.constant 48 : index
    %c0_23 = arith.constant 0 : index
    %29 = vector.load %arg11[%c48_22, %c0_23] : memref<432x384xbf16, #tpu.memory_space<vmem>>, vector<384x384xbf16>
    %30 = tpu.concatenate %27, %28, %29 in 1 : vector<384x384xbf16>, vector<384x384xbf16>, vector<384x384xbf16> -> vector<384x1152xbf16>
    %c0_24 = arith.constant 0 : index
    %c0_25 = arith.constant 0 : index
    %31 = vector.load %arg6[%c0_24, %c0_25] : memref<1152x128xbf16, #tpu.memory_space<vmem>>, vector<1152x128xbf16>
    %cst_26 = arith.constant dense<0.000000e+00> : vector<384x128xf32>
    %32 = tpu.matmul %30, %31, %cst_26 {dimension_numbers = #tpu.dot_dimension_numbers<[1], [0], [0], [1], [0, 0, 1, 1], [], []>} : vector<384x1152xbf16>, vector<1152x128xbf16>, vector<384x128xf32> -> vector<384x128xf32>
    %33 = arith.truncf %32 : vector<384x128xf32> to vector<384x128xbf16>
    %c0_27 = arith.constant 0 : index
    %c0_28 = arith.constant 0 : index
    %c0_29 = arith.constant 0 : index
    %34 = vector.load %arg8[%c0_27, %c0_28, %c0_29] : memref<1x384x128xbf16, #tpu.memory_space<vmem>>, vector<1x384x128xbf16>
    %35 = vector.shape_cast %34 : vector<1x384x128xbf16> to vector<384x128xbf16>
    %36 = vector.shape_cast %33 : vector<384x128xbf16> to vector<1x384x128xbf16>
    tpu.vector_store %arg8[%c0_27, %c0_28, %c0_29], %36 {strides = array<i32>} : memref<1x384x128xbf16, #tpu.memory_space<vmem>>, vector<1x384x128xbf16>,
    %c0_30 = arith.constant 0 : index
    %c0_31 = arith.constant 0 : index
    %37 = vector.load %arg7[%c0_30, %c0_31] : memref<384x1xf32, #tpu.memory_space<vmem>>, vector<384x1xf32>
    %38 = vector.broadcast %37 : vector<384x1xf32> to vector<384x128xf32>
    %39 = arith.mulf %32, %38 : vector<384x128xf32>
    %40 = vector.shape_cast %39 : vector<384x128xf32> to vector<48x8x128xf32>
    %cst_32 = arith.constant dense<0.000000e+00> : vector<8x128xf32>
    %41 = vector.multi_reduction <add>, %40, %cst_32 [0] : vector<48x8x128xf32> to vector<8x128xf32>
    %42 = arith.mulf %39, %32 : vector<384x128xf32>
    %43 = vector.shape_cast %42 : vector<384x128xf32> to vector<48x8x128xf32>
    %cst_33 = arith.constant dense<0.000000e+00> : vector<8x128xf32>
    %44 = vector.multi_reduction <add>, %43, %cst_33 [0] : vector<48x8x128xf32> to vector<8x128xf32>
    %c0_i32_34 = arith.constant 0 : i32
    %45 = arith.cmpi eq, %arg1, %c0_i32_34 : i32
    %46 = arith.extui %45 : i1 to i32
    %c0_i32_35 = arith.constant 0 : i32
    %47 = arith.cmpi ne, %46, %c0_i32_35 : i32
    scf.if %47 {
      %c0_38 = arith.constant 0 : index
      %c0_39 = arith.constant 0 : index
      %51 = vector.load %arg9[%c0_38, %c0_39] : memref<8x128xf32, #tpu.memory_space<vmem>>, vector<8x128xf32>
      tpu.vector_store %arg9[%c0_38, %c0_39], %41 {strides = array<i32>} : memref<8x128xf32, #tpu.memory_space<vmem>>, vector<8x128xf32>,
      %c0_40 = arith.constant 0 : index
      %c0_41 = arith.constant 0 : index
      %52 = vector.load %arg10[%c0_40, %c0_41] : memref<8x128xf32, #tpu.memory_space<vmem>>, vector<8x128xf32>
      tpu.vector_store %arg10[%c0_40, %c0_41], %44 {strides = array<i32>} : memref<8x128xf32, #tpu.memory_space<vmem>>, vector<8x128xf32>,
    } else {
    }
    %c0_i32_36 = arith.constant 0 : i32
    %48 = arith.cmpi sgt, %arg1, %c0_i32_36 : i32
    %49 = arith.extui %48 : i1 to i32
    %c0_i32_37 = arith.constant 0 : i32
    %50 = arith.cmpi ne, %49, %c0_i32_37 : i32
    scf.if %50 {
      %c0_38 = arith.constant 0 : index
      %c0_39 = arith.constant 0 : index
      %51 = vector.load %arg9[%c0_38, %c0_39] : memref<8x128xf32, #tpu.memory_space<vmem>>, vector<8x128xf32>
      %52 = arith.addf %51, %41 : vector<8x128xf32>
      %c0_40 = arith.constant 0 : index
      %c0_41 = arith.constant 0 : index
      %53 = vector.load %arg9[%c0_40, %c0_41] : memref<8x128xf32, #tpu.memory_space<vmem>>, vector<8x128xf32>
      tpu.vector_store %arg9[%c0_40, %c0_41], %52 {strides = array<i32>} : memref<8x128xf32, #tpu.memory_space<vmem>>, vector<8x128xf32>,
      %c0_42 = arith.constant 0 : index
      %c0_43 = arith.constant 0 : index
      %54 = vector.load %arg10[%c0_42, %c0_43] : memref<8x128xf32, #tpu.memory_space<vmem>>, vector<8x128xf32>
      %55 = arith.addf %54, %44 : vector<8x128xf32>
      %c0_44 = arith.constant 0 : index
      %c0_45 = arith.constant 0 : index
      %56 = vector.load %arg10[%c0_44, %c0_45] : memref<8x128xf32, #tpu.memory_space<vmem>>, vector<8x128xf32>
      tpu.vector_store %arg10[%c0_44, %c0_45], %55 {strides = array<i32>} : memref<8x128xf32, #tpu.memory_space<vmem>>, vector<8x128xf32>,
    } else {
    }
    return
  }
  func.func @transform_0(%arg0: i32, %arg1: i32) -> (i32, i32, i32) {
    %c1_i32 = arith.constant 1 : i32
    %0 = arith.muli %arg0, %c1_i32 : i32
    %1 = arith.addi %0, %arg1 : i32
    %c0_i32 = arith.constant 0 : i32
    %c0_i32_0 = arith.constant 0 : i32
    %c0_i32_1 = arith.constant 0 : i32
    return %1, %c0_i32, %c0_i32_0 : i32, i32, i32
  }
  func.func @transform_1(%arg0: i32, %arg1: i32) -> (i32, i32) {
    %c0_i32 = arith.constant 0 : i32
    %c0_i32_0 = arith.constant 0 : i32
    %c0_i32_1 = arith.constant 0 : i32
    return %c0_i32, %c0_i32_0 : i32, i32
  }
  func.func @transform_2(%arg0: i32, %arg1: i32) -> (i32, i32) {
    %c0_i32 = arith.constant 0 : i32
    %c0_i32_0 = arith.constant 0 : i32
    %c0_i32_1 = arith.constant 0 : i32
    return %c0_i32, %c0_i32_0 : i32, i32
  }
  func.func @transform_3(%arg0: i32, %arg1: i32) -> (i32, i32) {
    %c0_i32 = arith.constant 0 : i32
    %c0_i32_0 = arith.constant 0 : i32
    %c0_i32_1 = arith.constant 0 : i32
    return %c0_i32, %c0_i32_0 : i32, i32
  }
  func.func @transform_4(%arg0: i32, %arg1: i32) -> (i32, i32) {
    %c0_i32 = arith.constant 0 : i32
    %c0_i32_0 = arith.constant 0 : i32
    %c0_i32_1 = arith.constant 0 : i32
    return %c0_i32, %c0_i32_0 : i32, i32
  }
  func.func @transform_5(%arg0: i32, %arg1: i32) -> (i32, i32) {
    %c0_i32 = arith.constant 0 : i32
    %c0_i32_0 = arith.constant 0 : i32
    %c0_i32_1 = arith.constant 0 : i32
    return %c0_i32, %c0_i32_0 : i32, i32
  }
  func.func @transform_6(%arg0: i32, %arg1: i32) -> (i32, i32, i32) {
    %c1_i32 = arith.constant 1 : i32
    %0 = arith.muli %arg0, %c1_i32 : i32
    %1 = arith.addi %0, %arg1 : i32
    %c0_i32 = arith.constant 0 : i32
    %c0_i32_0 = arith.constant 0 : i32
    %c0_i32_1 = arith.constant 0 : i32
    return %1, %c0_i32, %c0_i32_0 : i32, i32, i32
  }
  func.func @transform_7(%arg0: i32, %arg1: i32) -> (i32, i32) {
    %c0_i32 = arith.constant 0 : i32
    %c0_i32_0 = arith.constant 0 : i32
    return %arg0, %c0_i32 : i32, i32
  }
  func.func @transform_8(%arg0: i32, %arg1: i32) -> (i32, i32) {
    %c0_i32 = arith.constant 0 : i32
    %c0_i32_0 = arith.constant 0 : i32
    return %arg0, %c0_i32 : i32, i32
  }
}

module attributes {stable_mosaic.version = 11 : i64} {
  func.func @bn_add_relu_kernel(%arg0: i32, %arg1: memref<768x128xbf16, #tpu.memory_space<vmem>>, %arg2: memref<768x128xf32, #tpu.memory_space<vmem>>, %arg3: memref<1x128xf32, #tpu.memory_space<vmem>>, %arg4: memref<1x128xf32, #tpu.memory_space<vmem>>, %arg5: memref<768x128xf32, #tpu.memory_space<vmem>>) attributes {dimension_semantics = [#tpu.dimension_semantics<parallel>], iteration_bounds = array<i64: 1>, scalar_prefetch = 0 : i64, scratch_operands = 0 : i64, tpu.core_type = #tpu.core_type<tc>, window_params = [{transform_indices = @transform_0, window_bounds = array<i64: 768, 128>}, {transform_indices = @transform_1, window_bounds = array<i64: 768, 128>}, {pipeline_mode = #tpu.pipeline_mode<synchronous>, transform_indices = @transform_2, window_bounds = array<i64: 1, 128>}, {pipeline_mode = #tpu.pipeline_mode<synchronous>, transform_indices = @transform_3, window_bounds = array<i64: 1, 128>}, {transform_indices = @transform_4, window_bounds = array<i64: 768, 128>}]} {
    %c0 = arith.constant 0 : index
    %c0_0 = arith.constant 0 : index
    %0 = vector.load %arg1[%c0, %c0_0] : memref<768x128xbf16, #tpu.memory_space<vmem>>, vector<768x128xbf16>
    %1 = arith.extf %0 : vector<768x128xbf16> to vector<768x128xf32>
    %c0_1 = arith.constant 0 : index
    %c0_2 = arith.constant 0 : index
    %2 = vector.load %arg3[%c0_1, %c0_2] : memref<1x128xf32, #tpu.memory_space<vmem>>, vector<1x128xf32>
    %3 = vector.broadcast %2 : vector<1x128xf32> to vector<768x128xf32>
    %4 = arith.mulf %1, %3 : vector<768x128xf32>
    %c0_3 = arith.constant 0 : index
    %c0_4 = arith.constant 0 : index
    %5 = vector.load %arg4[%c0_3, %c0_4] : memref<1x128xf32, #tpu.memory_space<vmem>>, vector<1x128xf32>
    %6 = vector.broadcast %5 : vector<1x128xf32> to vector<768x128xf32>
    %7 = arith.addf %4, %6 : vector<768x128xf32>
    %c0_5 = arith.constant 0 : index
    %c0_6 = arith.constant 0 : index
    %8 = vector.load %arg2[%c0_5, %c0_6] : memref<768x128xf32, #tpu.memory_space<vmem>>, vector<768x128xf32>
    %9 = arith.addf %7, %8 : vector<768x128xf32>
    %cst = arith.constant 0.000000e+00 : f32
    %10 = vector.broadcast %cst : f32 to vector<768x128xf32>
    %11 = arith.maximumf %9, %10 : vector<768x128xf32>
    %c0_7 = arith.constant 0 : index
    %c0_8 = arith.constant 0 : index
    %12 = vector.load %arg5[%c0_7, %c0_8] : memref<768x128xf32, #tpu.memory_space<vmem>>, vector<768x128xf32>
    tpu.vector_store %arg5[%c0_7, %c0_8], %11 {strides = array<i32>} : memref<768x128xf32, #tpu.memory_space<vmem>>, vector<768x128xf32>,
    return
  }
  func.func @transform_0(%arg0: i32) -> (i32, i32) {
    %c0_i32 = arith.constant 0 : i32
    %c0_i32_0 = arith.constant 0 : i32
    return %arg0, %c0_i32 : i32, i32
  }
  func.func @transform_1(%arg0: i32) -> (i32, i32) {
    %c0_i32 = arith.constant 0 : i32
    %c0_i32_0 = arith.constant 0 : i32
    return %arg0, %c0_i32 : i32, i32
  }
  func.func @transform_2(%arg0: i32) -> (i32, i32) {
    %c0_i32 = arith.constant 0 : i32
    %c0_i32_0 = arith.constant 0 : i32
    %c0_i32_1 = arith.constant 0 : i32
    return %c0_i32, %c0_i32_0 : i32, i32
  }
  func.func @transform_3(%arg0: i32) -> (i32, i32) {
    %c0_i32 = arith.constant 0 : i32
    %c0_i32_0 = arith.constant 0 : i32
    %c0_i32_1 = arith.constant 0 : i32
    return %c0_i32, %c0_i32_0 : i32, i32
  }
  func.func @transform_4(%arg0: i32) -> (i32, i32) {
    %c0_i32 = arith.constant 0 : i32
    %c0_i32_0 = arith.constant 0 : i32
    return %arg0, %c0_i32 : i32, i32
  }
}

</mosaic_0001>

<bundles_post_ra>
// kernel: resnet_block_forward.3
= control target key start
LH: loop header
LB: loop body
LE: loop exit
PB: predicated region body
PF: predicated region fallthrough
CT: control target
= control target key end

     0   :  { %s1885_s15 = smov 0   ;;  %s1887_s16 = smov 0   ;;  %s2563_s0 = inlined_call_operand.vmem [shape: bf16[2,432,12], index: 0, kind: input, shape index: {}]   ;;  %s2564_s1 = inlined_call_operand.vmem [shape: bf16[36,128], index: 1, kind: input, shape index: {}]   ;;  %s2565_s2 = inlined_call_operand.vmem [shape: f32[384,1], index: 2, kind: input, shape index: {}]   ;;  %s2566_s3 = inlined_call_operand.vmem [shape: f32[16,128], index: 3, kind: output, shape index: {0}]   ;;  %s2567_s4 = inlined_call_operand.vmem [shape: f32[16,128], index: 4, kind: output, shape index: {1}]  }
   0x1   :  { %s1889_s17 = smov 0  }
   0x2 LB: > { %s27_s18 = sadd.s32 1, %s1851_s16  ;;  %p1450_p0 = scmp.ge.s32.totalorder %s1855_s17, 1  ;;  %s1855_s17 = sphi %s1889_s17, %s15_s17   ;;  %s1851_s16 = sphi %s1887_s16, %s2569_s16   ;;  %s1847_s15 = sphi %s1885_s15, %s2568_s15  }
   0x3   : > { %p29_p1 = scmp.ge.s32.totalorder %s27_s18, 2  ;;  %p181_p2 = scmp.lt.s32.totalorder %s1855_s17, 3 }
   0x5   : > { %s2571_s18 = smov (%p29_p1, %s27_s18), 0  ;;  %p182_p3 = pnand %p1450_p0, %p181_p2 }
   0x6   : > { %p212_p4 = scmp.lt.s32.totalorder (!%p182_p3), %s1847_s15, 1  ;;  %s1857_s23 = smov (!%p182_p3), 12  }
   0x7   : > { %185 = sbr.rel (%p182_p3) target bundleno = 491 (0x1eb), region = 32  ;;  %s1858_s24 = smov (!%p182_p3), 24  }
   0xc   : > { %s2573_s15 = smov (!%p212_p4, %s1847_s15), 1  ;;  %vm536_vm0 = vcmask 97280   ;;  %v1859_v40 = vmov 0   ;;  %v861_v63 = vld [vmem:[%s2565_s2 + $0x8] sm:$0xff]  ;;  %vm727_vm1 = vcmask 1041408   ;;  %vm678_vm2 = vcmask 293888  }
   0xd   : > { %s1802_s19 = smul.u32 216, %s2573_s15  ;;  %1831 = vset.pattern.permute.xlu1 %v1859_v40  ;;  %1830 = vset.pattern.permute.xlu0 %v1859_v40  ;;  %vm609_vm3 = vcmask 195584  }
   0xe   : > { %1832 = vset.pattern.permute.xlu2 %v1859_v40 }
   0xf   : > { %s1909_s22 = scalar_lea.vmem %s2563_s0, %s1802_s19  ;;  %s1452_s19 = sshll.u32 %s2573_s15, 3 }
  0x10   : > { %v1745_v0 = vld [vmem:[%s1909_s22 + $0x2c] sm:$0xff]   ;;  %v1741_v1 = vld [vmem:[%s1909_s22 + $0x1c] sm:$0xff]   ;;  %v1747_v3 = vld [vmem:[%s1909_s22 + $0x34] sm:$0xff]   ;;  %s225_s26 = scalar_lea.vmem %s2567_s4, %s1452_s19 }
  0x11   : > { %v1737_v2 = vld [vmem:[%s1909_s22 + $0xc] sm:$0xff]   ;;  %439 = vrot.lane.b32.xlu2 %v1745_v0, %s1857_s23  ;;  %435 = vrot.lane.b32.xlu1 %v1741_v1, %s1857_s23  ;;  %v1743_v4 = vld [vmem:[%s1909_s22 + $0x24] sm:$0xff]  }
  0x12   : > { %431 = vrot.lane.b32.xlu0 %v1737_v2, %s1857_s23  ;;  %v1739_v5 = vld [vmem:[%s1909_s22 + $0x14] sm:$0xff]   ;;  %v1753_v6 = vld [vmem:[%s1909_s22 + $0x4c] sm:$0xff]   ;;  %v1751_v7 = vld [vmem:[%s1909_s22 + $0x44] sm:$0xff]  }
  0x13   : > { %v1749_v8 = vld [vmem:[%s1909_s22 + $0x3c] sm:$0xff]   ;;  %v1759_v9 = vld [vmem:[%s1909_s22 + $0x64] sm:$0xff]   ;;  %v1755_v11 = vld [vmem:[%s1909_s22 + $0x54] sm:$0xff]  }
  0x14   : > { %v1757_v10 = vld [vmem:[%s1909_s22 + $0x5c] sm:$0xff]   ;;  %v1763_v13 = vld [vmem:[%s1909_s22 + $0x74] sm:$0xff]   ;;  %v1761_v14 = vld [vmem:[%s1909_s22 + $0x6c] sm:$0xff]  }
  0x15   : > { %v1765_v12 = vld [vmem:[%s1909_s22 + $0x7c] sm:$0xff]   ;;  %v1771_v15 = vld [vmem:[%s1909_s22 + $0x94] sm:$0xff]   ;;  %v1769_v16 = vld [vmem:[%s1909_s22 + $0x8c] sm:$0xff]  }
  0x16   : > { %v1767_v17 = vld [vmem:[%s1909_s22 + $0x84] sm:$0xff]   ;;  %v1777_v18 = vld [vmem:[%s1909_s22 + $0xac] sm:$0xff]   ;;  %v1773_v20 = vld [vmem:[%s1909_s22 + $0x9c] sm:$0xff]  }
  0x17   : > { %v1775_v19 = vld [vmem:[%s1909_s22 + $0xa4] sm:$0xff]   ;;  %v1800_v22 = vld [vmem:[%s1909_s22 + $0xbc] sm:$0xff]   ;;  %v1778_v23 = vld [vmem:[%s1909_s22 + $0xb4] sm:$0xff]  }
  0x18   : > { %v1801_v21 = vld [vmem:[%s1909_s22 + $0xc4] sm:$0xff]   ;;  %v1962_v26 = vld [vmem:[%s1909_s22 + $0x18] sm:$0xff]   ;;  %v1975_v29 = vld [vmem:[%s1909_s22 + $0x30] sm:$0xff]  }
  0x19   : > { %441 = vrot.lane.b32.xlu2 %v1747_v3, %s1857_s23  ;;  %437 = vrot.lane.b32.xlu1 %v1743_v4, %s1857_s23  ;;  %v1604_v24 = vld [vmem:[%s1909_s22 + $0x28] sm:$0xff]   ;;  %v1603_v25 = vld [vmem:[%s1909_s22 + $0x20] sm:$0xff]  }
  0x1a   : > { %433 = vrot.lane.b32.xlu0 %v1739_v5, %s1857_s23  ;;  %v1969_v27 = vld [vmem:[%s1909_s22 + $0x40] sm:$0xff]   ;;  %v1972_v28 = vld [vmem:[%s1909_s22 + $0x38] sm:$0xff]   ;;  %v1985_v31 = vld [vmem:[%s1909_s22 + $0x50] sm:$0xff]  }
  0x1b   : > { %v1610_v30 = vld [vmem:[%s1909_s22 + $0x58] sm:$0xff]   ;;  %v1988_v32 = vld [vmem:[%s1909_s22 + $0x48] sm:$0xff]   ;;  %v1613_v33 = vld [vmem:[%s1909_s22 + $0x70] sm:$0xff]  }
  0x1c   : > { %v1997_v34 = vld [vmem:[%s1909_s22 + $0x68] sm:$0xff]   ;;  %v2000_v35 = vld [vmem:[%s1909_s22 + $0x60] sm:$0xff]   ;;  %v2015_v41 = vld [vmem:[%s1909_s22 + $0x78] sm:$0xff]  }
  0x1d   : > { %v1616_v38 = vld [vmem:[%s1909_s22 + $0x88] sm:$0xff]   ;;  %v2012_v39 = vld [vmem:[%s1909_s22 + $0x80] sm:$0xff]   ;;  %v2027_v45 = vld [vmem:[%s1909_s22 + $0x98] sm:$0xff]  }
  0x1e   : > { %v1619_v44 = vld [vmem:[%s1909_s22 + $0xa0] sm:$0xff]   ;;  %v2030_v46 = vld [vmem:[%s1909_s22 + $0x90] sm:$0xff]   ;;  %v2040_v48 = vld [vmem:[%s1909_s22 + $0xb8] sm:$0xff]  }
  0x1f   : > { %v2043_v49 = vld [vmem:[%s1909_s22 + $0xb0] sm:$0xff]   ;;  %v2046_v50 = vld [vmem:[%s1909_s22 + $0xa8] sm:$0xff]   ;;  %v1623_v57 = vld [vmem:[%s1909_s22 + $0xc0] sm:$0xff]  }
  0x20   : > { %v1497_v55 = vld [vmem:[%s1909_s22 + $0xd0] sm:$0xff]  ;;  %v1624_v56 = vld [vmem:[%s1909_s22 + $0xc8] sm:$0xff]   ;;  %v860_v1 = vld [vmem:[%s2565_s2] sm:$0xff] }
  0x21   : > { %447 = vrot.lane.b32.xlu2 %v1753_v6, %s1857_s23  ;;  %445 = vrot.lane.b32.xlu1 %v1751_v7, %s1857_s23  ;;  %v862_v0 = vld [vmem:[%s2565_s2 + $0x10] sm:$0xff]  ;;  %v863_v7 = vld [vmem:[%s2565_s2 + $0x18] sm:$0xff] }
  0x22   : > { %443 = vrot.lane.b32.xlu0 %v1749_v8, %s1857_s23  ;;  %v662_v6 = vld [vmem:[%s2564_s1 + $0x10] sm:$0x3]  ;;  %v864_v8 = vld [vmem:[%s2565_s2 + $0x20] sm:$0xff] }
  0x29   : > { %453 = vrot.lane.b32.xlu2 %v1759_v9, %s1857_s23  ;;  %451 = vrot.lane.b32.xlu1 %v1757_v10, %s1857_s23  ;;  %v672_v9 = vunpack.c.l.b16 %v662_v6  ;;  %v865_v10 = vld [vmem:[%s2565_s2 + $0x28] sm:$0xff]  ;;  %v880_v6 = vld [vmem:[%s2565_s2 + $0xa0] sm:$0xff] }
  0x2a   : > { %449 = vrot.lane.b32.xlu0 %v1755_v11, %s1857_s23 }
  0x2b   : > { %v675_v11 = vpack.c.b16 %v672_v9, %v672_v9  ;;  %v881_v9 = vld [vmem:[%s2565_s2 + $0xa8] sm:$0xff] }
  0x31   : > { %459 = vrot.lane.b32.xlu2 %v1765_v12, %s1857_s23  ;;  %457 = vrot.lane.b32.xlu1 %v1763_v13, %s1857_s23  ;;  %v729_v12 = vsel %vm727_vm1, %v675_v11, 0 }
  0x32   : > { %455 = vrot.lane.b32.xlu0 %v1761_v14, %s1857_s23  ;;  %736 = vmatpush.bf16.msra.mxu0 %v729_v12 }
  0x33   : > { %1789 = vmatpush.bf16.msra.mxu1 %v729_v12  ;;  %1790 = vmatpush.bf16.msra.mxu2 %v729_v12 }
  0x34   : > { %1791 = vmatpush.bf16.msra.mxu3 %v729_v12 }
  0x39   : > { %465 = vrot.lane.b32.xlu2 %v1771_v15, %s1857_s23  ;;  %463 = vrot.lane.b32.xlu1 %v1769_v16, %s1857_s23 }
  0x3a   : > { %461 = vrot.lane.b32.xlu0 %v1767_v17, %s1857_s23 }
  0x41   : > { %471 = vrot.lane.b32.xlu2 %v1777_v18, %s1857_s23  ;;  %469 = vrot.lane.b32.xlu1 %v1775_v19, %s1857_s23  ;;  %v1499_v19 = vld [vmem:[%s2564_s1 + $0x8] sm:$0xff] }
  0x42   : > { %467 = vrot.lane.b32.xlu0 %v1773_v20, %s1857_s23  ;;  %v866_v20 = vld [vmem:[%s2565_s2 + $0x30] sm:$0xff]  ;;  %737 = vmatpush.bf16.msra.mxu0 %v1499_v19 }
  0x43   : > { %1792 = vmatpush.bf16.msra.mxu1 %v1499_v19  ;;  %1793 = vmatpush.bf16.msra.mxu2 %v1499_v19 }
  0x44   : > { %1794 = vmatpush.bf16.msra.mxu3 %v1499_v19  ;;  %v1600_v19 = vld [vmem:[%s1909_s22 + $0x8] sm:$0xff]  }
  0x49   : > { %477 = vrot.lane.b32.xlu2 %v1801_v21, %s1857_s23  ;;  %475 = vrot.lane.b32.xlu1 %v1800_v22, %s1857_s23  ;;  %v867_v21 = vld [vmem:[%s2565_s2 + $0x38] sm:$0xff]  ;;  %v868_v22 = vld [vmem:[%s2565_s2 + $0x40] sm:$0xff] }
  0x4a   : > { %473 = vrot.lane.b32.xlu0 %v1778_v23, %s1857_s23  ;;  %v1498_v23 = vld [vmem:[%s2564_s1] sm:$0xff]  ;;  %s221_s23 = scalar_lea.vmem %s2566_s3, %s1452_s19 }
  0x4b   : > { %738 = vmatpush.bf16.msra.mxu0 %v1498_v23  ;;  %1795 = vmatpush.bf16.msra.mxu1 %v1498_v23 }
  0x4c   : > { %1796 = vmatpush.bf16.msra.mxu2 %v1498_v23  ;;  %1797 = vmatpush.bf16.msra.mxu3 %v1498_v23 }
  0x51   : > { %492 = vrot.lane.b32.xlu2 %v1604_v24, %s1858_s24  ;;  %490 = vrot.lane.b32.xlu1 %v1603_v25, %s1858_s24 }
  0x52   : > { %488 = vrot.lane.b32.xlu0 %v1962_v26, %s1858_s24 }
  0x59   : > { %498 = vrot.lane.b32.xlu2 %v1969_v27, %s1858_s24  ;;  %496 = vrot.lane.b32.xlu1 %v1972_v28, %s1858_s24 }
  0x5a   : > { %494 = vrot.lane.b32.xlu0 %v1975_v29, %s1858_s24 }
  0x61   : > { %504 = vrot.lane.b32.xlu2 %v1610_v30, %s1858_s24  ;;  %502 = vrot.lane.b32.xlu1 %v1985_v31, %s1858_s24 }
  0x62   : > { %500 = vrot.lane.b32.xlu0 %v1988_v32, %s1858_s24 }
  0x69   : > { %510 = vrot.lane.b32.xlu2 %v1613_v33, %s1858_s24  ;;  %508 = vrot.lane.b32.xlu1 %v1997_v34, %s1858_s24 }
  0x6a   : > { %506 = vrot.lane.b32.xlu0 %v2000_v35, %s1858_s24 }
  0x6b   : > { %v440_v36 = vpop.permute.xlu2 %439 }
  0x6c   : > { %v2008_v37 = vsel %vm536_vm0, %v1603_v25, %v440_v36  ;;  %v870_v36 = vld [vmem:[%s2565_s2 + $0x50] sm:$0xff] }
  0x71   : > { %516 = vrot.lane.b32.xlu2 %v1616_v38, %s1858_s24  ;;  %514 = vrot.lane.b32.xlu1 %v2012_v39, %s1858_s24 }
  0x72   : > { %512 = vrot.lane.b32.xlu0 %v2015_v41, %s1858_s24 }
  0x73   : > { %v442_v42 = vpop.permute.xlu2 %441 }
  0x74   : > { %v2023_v43 = vsel %vm536_vm0, %v1604_v24, %v442_v42 }
  0x79   : > { %522 = vrot.lane.b32.xlu2 %v1619_v44, %s1858_s24  ;;  %520 = vrot.lane.b32.xlu1 %v2027_v45, %s1858_s24 }
  0x7a   : > { %518 = vrot.lane.b32.xlu0 %v2030_v46, %s1858_s24 }
  0x7b   : > { %v2037_v47 = vpop.permute.xlu2 %447 }
  0x81   : > { %528 = vrot.lane.b32.xlu2 %v2040_v48, %s1858_s24  ;;  %526 = vrot.lane.b32.xlu1 %v2043_v49, %s1858_s24 }
  0x82   : > { %524 = vrot.lane.b32.xlu0 %v2046_v50, %s1858_s24 }
  0x83   : > { %v454_v51 = vpop.permute.xlu2 %453  ;;  %v2054_v52 = vpop.permute.xlu1 %435 }
  0x84   : > { %v2057_v53 = vsel %vm536_vm0, %v1610_v30, %v454_v51  ;;  %v2059_v54 = vpop.permute.xlu0 %431  ;;  %v874_v51 = vld [vmem:[%s2565_s2 + $0x70] sm:$0xff] }
  0x89   : > { %534 = vrot.lane.b32.xlu2 %v1497_v55, %s1858_s24  ;;  %532 = vrot.lane.b32.xlu1 %v1624_v56, %s1858_s24 }
  0x8a   : > { %530 = vrot.lane.b32.xlu0 %v1623_v57, %s1858_s24  ;;  %v875_v57 = vld [vmem:[%s2565_s2 + $0x78] sm:$0xff] }
  0x8b   : > { %v460_v58 = vpop.permute.xlu2 %459  ;;  %v438_v59 = vpop.permute.xlu1 %437 }
  0x8c   : > { %v2068_v60 = vsel %vm536_vm0, %v1613_v33, %v460_v58  ;;  %v2072_v61 = vsel %vm536_vm0, %v1962_v26, %v438_v59  ;;  %v2074_v62 = vpop.permute.xlu0 %433  ;;  %v869_v33 = vld [vmem:[%s2565_s2 + $0x48] sm:$0xff]  ;;  %v876_v58 = vld [vmem:[%s2565_s2 + $0x80] sm:$0xff] }
  0x8d   : > { %v877_v59 = vld [vmem:[%s2565_s2 + $0x88] sm:$0xff] }
  0x91   : > { %915 = vperm.xlu1 %1831, %v861_v63   ;;  %920 = vperm.xlu2 %1832, %v862_v0  }
  0x92   : > { %910 = vperm.xlu0 %1830, %v860_v1   ;;  %v878_v1 = vld [vmem:[%s2565_s2 + $0x90] sm:$0xff] }
  0x93   : > { %v466_v2 = vpop.permute.xlu2 %465  ;;  %v2085_v3 = vpop.permute.xlu1 %445 }
  0x94   : > { %v2088_v4 = vsel %vm536_vm0, %v1616_v38, %v466_v2  ;;  %v2090_v5 = vpop.permute.xlu0 %443  ;;  %v879_v2 = vld [vmem:[%s2565_s2 + $0x98] sm:$0xff] }
  0x99   : > { %925 = vperm.xlu1 %1831, %v863_v7   ;;  %930 = vperm.xlu2 %1832, %v864_v8   ;;  %v1496_v7 = vld [vmem:[%s1909_s22] sm:$0xff] }
  0x9a   : > { %935 = vperm.xlu0 %1830, %v865_v10   ;;  %v882_v10 = vld [vmem:[%s2565_s2 + $0xb0] sm:$0xff] }
  0x9b   : > { %v472_v13 = vpop.permute.xlu2 %471  ;;  %v452_v14 = vpop.permute.xlu1 %451 }
  0x9c   : > { %v2105_v15 = vsel %vm536_vm0, %v1619_v44, %v472_v13  ;;  %v2109_v16 = vsel %vm536_vm0, %v1985_v31, %v452_v14  ;;  %v450_v17 = vpop.permute.xlu0 %449  ;;  %v872_v44 = vld [vmem:[%s2565_s2 + $0x60] sm:$0xff]  ;;  %v885_v14 = vld [vmem:[%s2565_s2 + $0xc8] sm:$0xff] }
  0x9d   : > { %v2113_v18 = vsel %vm536_vm0, %v1988_v32, %v450_v17  ;;  %v884_v13 = vld [vmem:[%s2565_s2 + $0xc0] sm:$0xff]  ;;  %v886_v17 = vld [vmem:[%s2565_s2 + $0xd0] sm:$0xff] }
  0xa1   : > { %940 = vperm.xlu1 %1831, %v866_v20   ;;  %945 = vperm.xlu2 %1832, %v867_v21   ;;  %v542_v21 = vsel %vm536_vm0, %v1600_v19, %v2074_v62  ;;  %v888_v62 = vld [vmem:[%s2565_s2 + $0xe0] sm:$0xff] }
  0xa2   : > { %950 = vperm.xlu0 %1830, %v868_v22   ;;  %v557_v22 = vsel %vm536_vm0, %v1975_v29, %v2090_v5  ;;  %v889_v29 = vld [vmem:[%s2565_s2 + $0xe8] sm:$0xff] }
  0xa3   : > { %v478_v24 = vpop.permute.xlu2 %477  ;;  %v458_v25 = vpop.permute.xlu1 %457 }
  0xa4   : > { %v2132_v26 = vsel %vm536_vm0, %v2040_v48, %v478_v24  ;;  %v2136_v30 = vsel %vm536_vm0, %v1997_v34, %v458_v25  ;;  %v456_v31 = vpop.permute.xlu0 %455  ;;  %v871_v34 = vld [vmem:[%s2565_s2 + $0x58] sm:$0xff]  ;;  %v873_v48 = vld [vmem:[%s2565_s2 + $0x68] sm:$0xff] }
  0xa5   : > { %v2140_v32 = vsel %vm536_vm0, %v2000_v35, %v456_v31  ;;  %v887_v31 = vld [vmem:[%s2565_s2 + $0xd8] sm:$0xff] }
  0xa9   : > { %955 = vperm.xlu1 %1831, %v869_v33   ;;  %960 = vperm.xlu2 %1832, %v870_v36  }
  0xaa   : > { %965 = vperm.xlu0 %1830, %v871_v34   ;;  %v890_v34 = vld [vmem:[%s2565_s2 + $0xf0] sm:$0xff] }
  0xab   : > { %v464_v38 = vpop.permute.xlu1 %463  ;;  %v493_v33 = vpop.permute.xlu2 %492 }
  0xac   : > { %v2153_v35 = vsel %vm536_vm0, %v2012_v39, %v464_v38  ;;  %v462_v40 = vpop.permute.xlu0 %461  ;;  %v891_v38 = vld [vmem:[%s2565_s2 + $0xf8] sm:$0xff] }
  0xad   : > { %v2157_v42 = vsel %vm536_vm0, %v2015_v41, %v462_v40  ;;  %v892_v40 = vld [vmem:[%s2565_s2 + $0x100] sm:$0xff] }
  0xb1   : > { %970 = vperm.xlu1 %1831, %v872_v44   ;;  %975 = vperm.xlu2 %1832, %v873_v48   ;;  %v1601_v44 = vld [vmem:[%s1909_s22 + $0x10] sm:$0xff]  }
  0xb2   : > { %980 = vperm.xlu0 %1830, %v874_v51   ;;  %v545_v51 = vsel %vm536_vm0, %v1601_v44, %v2054_v52  ;;  %v893_v52 = vld [vmem:[%s2565_s2 + $0x108] sm:$0xff] }
  0xb3   : > { %v470_v39 = vpop.permute.xlu1 %469  ;;  %v2256_v48 = vpop.permute.xlu2 %498 }
  0xb4   : > { %v2170_v41 = vsel %vm536_vm0, %v2027_v45, %v470_v39  ;;  %v468_v55 = vpop.permute.xlu0 %467  ;;  %v560_v39 = vsel %vm536_vm0, %v1972_v28, %v2085_v3  ;;  %v894_v28 = vld [vmem:[%s2565_s2 + $0x110] sm:$0xff]  ;;  %v895_v3 = vld [vmem:[%s2565_s2 + $0x118] sm:$0xff] }
  0xb5   : > { %v2174_v56 = vsel %vm536_vm0, %v2030_v46, %v468_v55 }
  0xb9   : > { %985 = vperm.xlu1 %1831, %v875_v57   ;;  %990 = vperm.xlu2 %1832, %v876_v58   ;;  %v615_v58 = vsel %vm609_vm3, %v545_v51, %v493_v33 }
  0xba   : > { %995 = vperm.xlu0 %1830, %v877_v59  }
  0xbb   : > { %v476_v45 = vpop.permute.xlu1 %475 }
  0xbc   : > { %v2187_v46 = vsel %vm536_vm0, %v2043_v49, %v476_v45  ;;  %v474_v63 = vpop.permute.xlu0 %473  ;;  %v539_v49 = vsel %vm536_vm0, %v1496_v7, %v2059_v54  ;;  %v883_v54 = vld [vmem:[%s2565_s2 + $0xb8] sm:$0xff]  ;;  %v898_v7 = vld [vmem:[%s2565_s2 + $0x130] sm:$0xff] }
  0xbd   : > { %v2191_v0 = vsel %vm536_vm0, %v2046_v50, %v474_v63 }
  0xc1   : > { %1000 = vperm.xlu1 %1831, %v878_v1   ;;  %1005 = vperm.xlu2 %1832, %v879_v2   ;;  %v896_v1 = vld [vmem:[%s2565_s2 + $0x120] sm:$0xff]  ;;  %v897_v2 = vld [vmem:[%s2565_s2 + $0x128] sm:$0xff] }
  0xc2   : > { %1010 = vperm.xlu0 %1830, %v880_v6  }
  0xc3   : > { %v491_v11 = vpop.permute.xlu1 %490 }
  0xc4   : > { %v489_v50 = vpop.permute.xlu0 %488  ;;  %v613_v24 = vsel %vm609_vm3, %v542_v21, %v491_v11 }
  0xc5   : > { %v611_v8 = vsel %vm609_vm3, %v539_v49, %v489_v50  ;;  %v563_v49 = vsel %vm536_vm0, %v1969_v27, %v2037_v47  ;;  %v899_v27 = vld [vmem:[%s2565_s2 + $0x138] sm:$0xff]  ;;  %v900_v47 = vld [vmem:[%s2565_s2 + $0x140] sm:$0xff] }
  0xc6   : > { %1470 = vmatmul.msk.bf16.vlgmr.msra.gmra.mxu0 %vm678_vm2, %v611_v8 }
  0xc9   : > { %1015 = vperm.xlu1 %1831, %v881_v9   ;;  %1020 = vperm.xlu2 %1832, %v882_v10  }
  0xca   : > { %1025 = vperm.xlu0 %1830, %v883_v54  }
  0xcb   : > { %v2226_v20 = vpop.permute.xlu1 %496 }
  0xcc   : > { %v495_v12 = vpop.permute.xlu0 %494  ;;  %v619_v19 = vsel %vm609_vm3, %v2008_v37, %v2226_v20  ;;  %v906_v37 = vld [vmem:[%s2565_s2 + $0x170] sm:$0xff]  ;;  %v621_v20 = vsel %vm609_vm3, %v2023_v43, %v2256_v48 }
  0xcd   : > { %v617_v9 = vsel %vm609_vm3, %v2072_v61, %v495_v12  ;;  %v901_v61 = vld [vmem:[%s2565_s2 + $0x148] sm:$0xff]  ;;  %v903_v12 = vld [vmem:[%s2565_s2 + $0x158] sm:$0xff] }
  0xd1   : > { %1030 = vperm.xlu1 %1831, %v884_v13   ;;  %1035 = vperm.xlu2 %1832, %v885_v14   ;;  %v904_v14 = vld [vmem:[%s2565_s2 + $0x160] sm:$0xff] }
  0xd2   : > { %1040 = vperm.xlu0 %1830, %v886_v17  }
  0xd3   : > { %v503_v5 = vpop.permute.xlu1 %502 }
  0xd4   : > { %v501_v23 = vpop.permute.xlu0 %500  ;;  %v625_v59 = vsel %vm609_vm3, %v560_v39, %v503_v5 }
  0xd5   : > { %v623_v25 = vsel %vm609_vm3, %v557_v22, %v501_v23 }
  0xd6   : > { %1471 = vmatmul.msk.bf16.gmra.mxu0 %vm678_vm2, %v613_v24  ;;  %1476 = vmatmul.msk.bf16.vlgmr.msra.gmra.mxu1 %vm678_vm2, %v623_v25  ;;  %v905_v24 = vld [vmem:[%s2565_s2 + $0x168] sm:$0xff] }
  0xd9   : > { %1045 = vperm.xlu1 %1831, %v887_v31   ;;  %1050 = vperm.xlu2 %1832, %v888_v62  }
  0xda   : > { %1055 = vperm.xlu0 %1830, %v889_v29  }
  0xdb   : > { %v2263_v57 = vpop.permute.xlu1 %508 }
  0xdc   : > { %v507_v36 = vpop.permute.xlu0 %506  ;;  %v631_v25 = vsel %vm609_vm3, %v2109_v16, %v2263_v57 }
  0xdd   : > { %v629_v21 = vsel %vm609_vm3, %v2113_v18, %v507_v36  ;;  %v907_v18 = vld [vmem:[%s2565_s2 + $0x178] sm:$0xff] }
  0xe1   : > { %1060 = vperm.xlu1 %1831, %v890_v34   ;;  %1065 = vperm.xlu2 %1832, %v891_v38  }
  0xe2   : > { %1070 = vperm.xlu0 %1830, %v892_v40  }
  0xe3   : > { %v515_v6 = vpop.permute.xlu1 %514 }
  0xe4   : > { %v513_v55 = vpop.permute.xlu0 %512  ;;  %v637_v54 = vsel %vm609_vm3, %v2136_v30, %v515_v6  ;;  %v902_v30 = vld [vmem:[%s2565_s2 + $0x150] sm:$0xff] }
  0xe5   : > { %v635_v45 = vsel %vm609_vm3, %v2140_v32, %v513_v55  ;;  %v505_v32 = vpop.permute.xlu2 %504 }
  0xe6   : > { %1472 = vmatmul.msk.bf16.gmra.mxu0 %vm678_vm2, %v615_v58  ;;  %1477 = vmatmul.msk.bf16.gmra.mxu1 %vm678_vm2, %v625_v59  ;;  %v627_v10 = vsel %vm609_vm3, %v563_v49, %v505_v32 }
  0xe7   : > { %1482 = vmatmul.msk.bf16.vlgmr.msra.gmra.mxu2 %vm678_vm2, %v635_v45 }
  0xe9   : > { %1075 = vperm.xlu1 %1831, %v893_v52   ;;  %1080 = vperm.xlu2 %1832, %v894_v28  }
  0xea   : > { %1085 = vperm.xlu0 %1830, %v895_v3  }
  0xec   : > { %v519_v63 = vpop.permute.xlu0 %518 }
  0xed   : > { %v511_v8 = vpop.permute.xlu2 %510  ;;  %v641_v31 = vsel %vm609_vm3, %v2157_v42, %v519_v63 }
  0xee   : > { %v633_v43 = vsel %vm609_vm3, %v2057_v53, %v511_v8 }
  0xf1   : > { %1090 = vperm.xlu1 %1831, %v896_v1   ;;  %1095 = vperm.xlu2 %1832, %v897_v2  }
  0xf2   : > { %1100 = vperm.xlu0 %1830, %v898_v7  }
  0xf4   : > { %v525_v50 = vpop.permute.xlu0 %524 }
  0xf5   : > { %v647_v11 = vsel %vm609_vm3, %v2174_v56, %v525_v50  ;;  %v521_v56 = vpop.permute.xlu1 %520  ;;  %v517_v13 = vpop.permute.xlu2 %516 }
  0xf6   : > { %1473 = vmatmul.msk.bf16.gmra.mxu0 %vm678_vm2, %v617_v9  ;;  %1478 = vmatmul.msk.bf16.gmra.mxu1 %vm678_vm2, %v627_v10  ;;  %v639_v22 = vsel %vm609_vm3, %v2068_v60, %v517_v13  ;;  %v643_v16 = vsel %vm609_vm3, %v2153_v35, %v521_v56 }
  0xf7   : > { %1483 = vmatmul.msk.bf16.gmra.mxu2 %vm678_vm2, %v637_v54  ;;  %1488 = vmatmul.msk.bf16.vlgmr.msra.gmra.mxu3 %vm678_vm2, %v647_v11 }
  0xf9   : > { %1105 = vperm.xlu1 %1831, %v899_v27   ;;  %1110 = vperm.xlu2 %1832, %v900_v47  }
  0xfa   : > { %1115 = vperm.xlu0 %1830, %v901_v61  }
  0xfc   : > { %v531_v33 = vpop.permute.xlu0 %530 }
  0xfd   : > { %v527_v17 = vpop.permute.xlu1 %526  ;;  %v523_v60 = vpop.permute.xlu2 %522  ;;  %v653_v29 = vsel %vm609_vm3, %v2191_v0, %v531_v33 }
  0xfe   : > { %v649_v23 = vsel %vm609_vm3, %v2170_v41, %v527_v17  ;;  %v645_v42 = vsel %vm609_vm3, %v2088_v4, %v523_v60 }
 0x101   : > { %1120 = vperm.xlu1 %1831, %v902_v30   ;;  %1125 = vperm.xlu2 %1832, %v903_v12  }
 0x102   : > { %1130 = vperm.xlu0 %1830, %v904_v14  }
 0x104   : > { %v911_v0 = vpop.permute.xlu0 %910 }
 0x105   : > { %v529_v41 = vpop.permute.xlu2 %528 }
 0x106   : > { %1474 = vmatmul.msk.bf16.gmra.mxu0 %vm678_vm2, %v619_v19  ;;  %1479 = vmatmul.msk.bf16.gmra.mxu1 %vm678_vm2, %v629_v21  ;;  %v651_v62 = vsel %vm609_vm3, %v2105_v15, %v529_v41  ;;  %v533_v15 = vpop.permute.xlu1 %532 }
 0x107   : > { %1484 = vmatmul.msk.bf16.gmra.mxu2 %vm678_vm2, %v639_v22  ;;  %1489 = vmatmul.msk.bf16.gmra.mxu3 %vm678_vm2, %v649_v23  ;;  %v655_v5 = vsel %vm609_vm3, %v2187_v46, %v533_v15 }
 0x109   : > { %1135 = vperm.xlu1 %1831, %v905_v24   ;;  %1140 = vperm.xlu2 %1832, %v906_v37  }
 0x10a   : > { %1145 = vperm.xlu0 %1830, %v907_v18  }
 0x10c   : > { %v936_v48 = vpop.permute.xlu0 %935 }
 0x10d   : > { %v535_v53 = vpop.permute.xlu2 %534 }
 0x10e   : > { %v916_v36 = vpop.permute.xlu1 %915  ;;  %v657_v38 = vsel %vm609_vm3, %v2132_v26, %v535_v53 }
 0x114   : > { %v951_v57 = vpop.permute.xlu0 %950 }
 0x115   : > { %v921_v34 = vpop.permute.xlu2 %920 }
 0x116   : > { %1475 = vmatmul.msk.bf16.gmra.mxu0 %vm678_vm2, %v621_v20  ;;  %1480 = vmatmul.msk.bf16.gmra.mxu1 %vm678_vm2, %v631_v25  ;;  %v926_v44 = vpop.permute.xlu1 %925 }
 0x117   : > { %1485 = vmatmul.msk.bf16.gmra.mxu2 %vm678_vm2, %v641_v31  ;;  %1490 = vmatmul.msk.bf16.gmra.mxu3 %vm678_vm2, %v651_v62 }
 0x11c   : > { %v2386_v3 = vpop.permute.xlu0 %965 }
 0x11d   : > { %v931_v4 = vpop.permute.xlu2 %930 }
 0x11e   : > { %v941_v39 = vpop.permute.xlu1 %940 }
 0x124   : > { %v2396_v7 = vpop.permute.xlu0 %980 }
 0x125   : > { %v946_v55 = vpop.permute.xlu2 %945 }
 0x126   : > { %1481 = vmatmul.msk.bf16.gmra.mxu1 %vm678_vm2, %v633_v43  ;;  %v2380_v45 = vpop.permute.xlu1 %955 }
 0x127   : > { %1486 = vmatmul.msk.bf16.gmra.mxu2 %vm678_vm2, %v643_v16  ;;  %1491 = vmatmul.msk.bf16.gmra.mxu3 %vm678_vm2, %v653_v29 }
 0x12c   : > { %v2406_v11 = vpop.permute.xlu0 %995 }
 0x12d   : > { %v2384_v26 = vpop.permute.xlu2 %960 }
 0x12e   : > { %v2392_v2 = vpop.permute.xlu1 %970 }
 0x134   : > { %v2424_v21 = vpop.permute.xlu0 %1010 }
 0x135   : > { %v2394_v6 = vpop.permute.xlu2 %975 }
 0x136   : > { %v2402_v9 = vpop.permute.xlu1 %985 }
 0x137   : > { %1487 = vmatmul.msk.bf16.gmra.mxu2 %vm678_vm2, %v645_v42  ;;  %1492 = vmatmul.msk.bf16.gmra.mxu3 %vm678_vm2, %v655_v5 }
 0x13d   : > { %v2404_v10 = vpop.permute.xlu2 %990 }
 0x13e   : > { %v2414_v56 = vpop.permute.xlu1 %1000 }
 0x143   : > { %v740_v35 = vpop.f32.mrf.mxu0 }
 0x144   : > { %v1148_v22 = vmul.f32 %v911_v0, %v740_v35  ;;  %v2436_v0 = vpop.permute.xlu0 %1025 }
 0x145   : > { %v2422_v19 = vpop.permute.xlu2 %1005 }
 0x146   : > { %v1243_v18 = vmul.f32 %v1148_v22, %v740_v35  ;;  %v2432_v42 = vpop.permute.xlu1 %1015 }
 0x147   : > { %1493 = vmatmul.msk.bf16.gmra.mxu3 %vm678_vm2, %v657_v38 }
 0x14b   : > { %v742_v40 = vpop.f32.mrf.mxu0 }
 0x14c   : > { %v1149_v17 = vmul.f32 %v916_v36, %v742_v40 }
 0x14e   : > { %v1244_v24 = vmul.f32 %v1149_v17, %v742_v40  ;;  %v1196_v60 = vadd.f32 %v1149_v17, %v1148_v22 }
 0x150   : > { %v1291_v43 = vadd.f32 %v1244_v24, %v1243_v18 }
 0x153   : > { %v745_v51 = vpop.f32.mrf.mxu0  ;;  %v2376_v46 = vpop.f32.mrf.mxu1 }
 0x154   : > { %v1150_v23 = vmul.f32 %v921_v34, %v745_v51  ;;  %v2434_v34 = vpop.permute.xlu2 %1020 }
 0x156   : > { %v1245_v41 = vmul.f32 %v1150_v23, %v745_v51  ;;  %v1197_v16 = vadd.f32 %v1196_v60, %v1150_v23 }
 0x158   : > { %v1292_v5 = vadd.f32 %v1291_v43, %v1245_v41  ;;  %v2446_v43 = vpop.permute.xlu1 %1030 }
 0x15b   : > { %v747_v58 = vpop.f32.mrf.mxu0  ;;  %v2378_v59 = vpop.f32.mrf.mxu1 }
 0x15c   : > { %v1151_v37 = vmul.f32 %v926_v44, %v747_v58 }
 0x15e   : > { %v1246_v29 = vmul.f32 %v1151_v37, %v747_v58  ;;  %v1198_v53 = vadd.f32 %v1197_v16, %v1151_v37 }
 0x160   : > { %v1293_v38 = vadd.f32 %v1292_v5, %v1246_v29  ;;  %v2448_v29 = vpop.permute.xlu2 %1035 }
 0x163   : > { %v750_v52 = vpop.f32.mrf.mxu0  ;;  %v2382_v28 = vpop.f32.mrf.mxu1 }
 0x164   : > { %v1152_v20 = vmul.f32 %v931_v4, %v750_v52 }
 0x166   : > { %v1247_v36 = vmul.f32 %v1152_v20, %v750_v52  ;;  %v1199_v40 = vadd.f32 %v1198_v53, %v1152_v20 }
 0x168   : > { %v1294_v51 = vadd.f32 %v1293_v38, %v1247_v36 }
 0x16a   : > { %v2388_v32 = vpop.f32.mrf.mxu2 }
 0x16b   : > { %v752_v63 = vpop.f32.mrf.mxu0  ;;  %v2390_v1 = vpop.f32.mrf.mxu1 }
 0x16c   : > { %v1153_v15 = vmul.f32 %v936_v48, %v752_v63 }
 0x16e   : > { %v1248_v44 = vmul.f32 %v1153_v15, %v752_v63  ;;  %v1200_v17 = vadd.f32 %v1199_v40, %v1153_v15  ;;  %v2450_v15 = vpop.permute.xlu0 %1040 }
 0x172   : > { %v2398_v49 = vpop.f32.mrf.mxu2 }
 0x173   : > { %v755_v50 = vpop.f32.mrf.mxu0  ;;  %v2400_v8 = vpop.f32.mrf.mxu1 }
 0x174   : > { %v1154_v35 = vmul.f32 %v941_v39, %v755_v50  ;;  %v1295_v39 = vadd.f32 %v1294_v51, %v1248_v44  ;;  %v1161_v44 = vmul.f32 %v2394_v6, %v2378_v59 }
 0x176   : > { %v1249_v22 = vmul.f32 %v1154_v35, %v755_v50  ;;  %v1201_v52 = vadd.f32 %v1200_v17, %v1154_v35 }
 0x178   : > { %v1296_v41 = vadd.f32 %v1295_v39, %v1249_v22 }
 0x17a   : > { %v2408_v54 = vpop.f32.mrf.mxu2  ;;  %v2410_v27 = vpop.f32.mrf.mxu3 }
 0x17b   : > { %v757_v47 = vpop.f32.mrf.mxu0  ;;  %v2412_v61 = vpop.f32.mrf.mxu1 }
 0x17c   : > { %v1155_v4 = vmul.f32 %v946_v55, %v757_v47 }
 0x17e   : > { %v1250_v18 = vmul.f32 %v1155_v4, %v757_v47  ;;  %v1202_v20 = vadd.f32 %v1201_v52, %v1155_v4  ;;  %v2464_v52 = vpop.permute.xlu1 %1045 }
 0x182   : > { %v2416_v30 = vpop.f32.mrf.mxu2  ;;  %v2418_v12 = vpop.f32.mrf.mxu3 }
 0x183   : > { %v760_v13 = vpop.f32.mrf.mxu0  ;;  %v2420_v14 = vpop.f32.mrf.mxu1 }
 0x184   : > { %v1156_v23 = vmul.f32 %v951_v57, %v760_v13  ;;  %v1297_v57 = vadd.f32 %v1296_v41, %v1250_v18  ;;  %v2471_v41 = vpop.permute.xlu2 %1050 }
 0x186   : > { %v1251_v63 = vmul.f32 %v1156_v23, %v760_v13  ;;  %v1203_v50 = vadd.f32 %v1202_v20, %v1156_v23  ;;  %v1162_v23 = vmul.f32 %v2396_v7, %v2382_v28  ;;  %v1164_v7 = vmul.f32 %v2404_v10, %v2400_v8 }
 0x188   : > { %v1298_v5 = vadd.f32 %v1297_v57, %v1251_v63  ;;  %v2478_v57 = vpop.permute.xlu0 %1055 }
 0x18a   : > { %v2426_v25 = vpop.f32.mrf.mxu2  ;;  %v2428_v31 = vpop.f32.mrf.mxu3 }
 0x18b   : > { %v762_v62 = vpop.f32.mrf.mxu0  ;;  %v2430_v33 = vpop.f32.mrf.mxu1 }
 0x18c   : > { %v1157_v60 = vmul.f32 %v2380_v45, %v762_v62 }
 0x18e   : > { %v1252_v16 = vmul.f32 %v1157_v60, %v762_v62  ;;  %v1204_v53 = vadd.f32 %v1203_v50, %v1157_v60  ;;  %v1165_v50 = vmul.f32 %v2406_v11, %v2412_v61 }
 0x190   : > { %v1299_v38 = vadd.f32 %v1298_v5, %v1252_v16  ;;  %v1260_v10 = vmul.f32 %v1165_v50, %v2412_v61 }
 0x192   : > { %v2438_v58 = vpop.f32.mrf.mxu2  ;;  %v2440_v48 = vpop.f32.mrf.mxu3 }
 0x193   : > { %v765_v24 = vpop.f32.mrf.mxu0  ;;  %v2442_v37 = vpop.f32.mrf.mxu1 }
 0x194   : > { %v1158_v55 = vmul.f32 %v2384_v26, %v765_v24  ;;  %v1160_v26 = vmul.f32 %v2392_v2, %v2376_v46  ;;  %v1256_v2 = vmul.f32 %v1161_v44, %v2378_v59 }
 0x196   : > { %v1253_v36 = vmul.f32 %v1158_v55, %v765_v24  ;;  %v1205_v40 = vadd.f32 %v1204_v53, %v1158_v55  ;;  %v1255_v22 = vmul.f32 %v1160_v26, %v2376_v46  ;;  %v1257_v46 = vmul.f32 %v1162_v23, %v2382_v28 }
 0x197   : > { %v1259_v53 = vmul.f32 %v1164_v7, %v2400_v8  ;;  %v1166_v28 = vmul.f32 %v2414_v56, %v2420_v14  ;;  %v1168_v8 = vmul.f32 %v2424_v21, %v2442_v37  ;;  %v1066_v56 = vpop.permute.xlu2 %1065 }
 0x198   : > { %v1300_v4 = vadd.f32 %v1299_v38, %v1253_v36 }
 0x199   : > { %v1261_v11 = vmul.f32 %v1166_v28, %v2420_v14 }
 0x19a   : > { %v2452_v47 = vpop.f32.mrf.mxu2  ;;  %v2454_v45 = vpop.f32.mrf.mxu3 }
 0x19b   : > { %v767_v35 = vpop.f32.mrf.mxu0  ;;  %v792_v13 = vpop.f32.mrf.mxu1 }
 0x19c   : > { %v1159_v62 = vmul.f32 %v2386_v3, %v767_v35  ;;  %v1163_v3 = vmul.f32 %v2402_v9, %v2390_v1 }
 0x19e   : > { %v1206_v51 = vadd.f32 %v1205_v40, %v1159_v62  ;;  %v1254_v17 = vmul.f32 %v1159_v62, %v767_v35  ;;  %v1258_v9 = vmul.f32 %v1163_v3, %v2390_v1  ;;  %v1061_v62 = vpop.permute.xlu1 %1060 }
 0x1a0   : > { %v1207_v24 = vadd.f32 %v1206_v51, %v1160_v26  ;;  %v1301_v39 = vadd.f32 %v1300_v4, %v1254_v17  ;;  %v1167_v26 = vmul.f32 %v2422_v19, %v2430_v33  ;;  %v1169_v17 = vmul.f32 %v2432_v42, %v792_v13 }
 0x1a2   : > { %v1208_v18 = vadd.f32 %v1207_v24, %v1161_v44  ;;  %v1302_v60 = vadd.f32 %v1301_v39, %v1255_v22  ;;  %v2469_v6 = vpop.f32.mrf.mxu2  ;;  %v2473_v20 = vpop.f32.mrf.mxu3  ;;  %v1262_v61 = vmul.f32 %v1167_v26, %v2430_v33  ;;  %v1263_v39 = vmul.f32 %v1168_v8, %v2442_v37 }
 0x1a3   : > { %v795_v59 = vpop.f32.mrf.mxu1  ;;  %v1172_v33 = vmul.f32 %v2446_v43, %v2388_v32  ;;  %v1173_v37 = vmul.f32 %v2448_v29, %v2398_v49 }
 0x1a4   : > { %v1209_v63 = vadd.f32 %v1208_v18, %v1162_v23  ;;  %v1303_v55 = vadd.f32 %v1302_v60, %v1256_v2  ;;  %v1071_v23 = vpop.permute.xlu0 %1070  ;;  %v1264_v18 = vmul.f32 %v1169_v17, %v792_v13 }
 0x1a5   : > { %v1267_v13 = vmul.f32 %v1172_v33, %v2388_v32 }
 0x1a6   : > { %v1210_v16 = vadd.f32 %v1209_v63, %v1163_v3  ;;  %v1304_v5 = vadd.f32 %v1303_v55, %v1257_v46  ;;  %v1170_v3 = vmul.f32 %v2434_v34, %v795_v59  ;;  %v1081_v34 = vpop.permute.xlu2 %1080 }
 0x1a8   : > { %v1211_v36 = vadd.f32 %v1210_v16, %v1164_v7  ;;  %v1305_v35 = vadd.f32 %v1304_v5, %v1258_v9  ;;  %v1265_v55 = vmul.f32 %v1170_v3, %v795_v59  ;;  %v1076_v9 = vpop.permute.xlu1 %1075  ;;  %v1268_v59 = vmul.f32 %v1173_v37, %v2398_v49 }
 0x1aa   : > { %v1306_v38 = vadd.f32 %v1305_v35, %v1259_v53  ;;  %v1212_v40 = vadd.f32 %v1211_v36, %v1165_v50  ;;  %v2489_v1 = vpop.f32.mrf.mxu2  ;;  %v2494_v51 = vpop.f32.mrf.mxu3  ;;  %v1175_v35 = vmul.f32 %v2464_v52, %v2416_v30 }
 0x1ab   : > { %v797_v24 = vpop.f32.mrf.mxu1 }
 0x1ac   : > { %v1213_v44 = vadd.f32 %v1212_v40, %v1166_v28  ;;  %v1307_v4 = vadd.f32 %v1306_v38, %v1260_v10  ;;  %v1171_v46 = vmul.f32 %v2436_v0, %v797_v24  ;;  %v1174_v0 = vmul.f32 %v2450_v15, %v2408_v54  ;;  %v1086_v36 = vpop.permute.xlu0 %1085 }
 0x1ad   : > { %v1176_v38 = vmul.f32 %v2471_v41, %v2426_v25  ;;  %v1270_v15 = vmul.f32 %v1175_v35, %v2416_v30 }
 0x1ae   : > { %v1214_v19 = vadd.f32 %v1213_v44, %v1167_v26  ;;  %v1308_v22 = vadd.f32 %v1307_v4, %v1261_v11  ;;  %v1266_v5 = vmul.f32 %v1171_v46, %v797_v24  ;;  %v1269_v26 = vmul.f32 %v1174_v0, %v2408_v54 }
 0x1af   : > { %v1271_v52 = vmul.f32 %v1176_v38, %v2426_v25  ;;  %v1179_v24 = vmul.f32 %v1066_v56, %v2469_v6 }
 0x1b0   : > { %v1215_v2 = vadd.f32 %v1214_v19, %v1168_v8  ;;  %v1309_v14 = vadd.f32 %v1308_v22, %v1262_v61  ;;  %v1177_v8 = vmul.f32 %v2478_v57, %v2438_v58  ;;  %v1091_v4 = vpop.permute.xlu1 %1090  ;;  %v1178_v61 = vmul.f32 %v1061_v62, %v2452_v47  ;;  %v1096_v19 = vpop.permute.xlu2 %1095 }
 0x1b1   : > { %v1274_v62 = vmul.f32 %v1179_v24, %v2469_v6 }
 0x1b2   : > { %v1216_v21 = vadd.f32 %v1215_v2, %v1169_v17  ;;  %v1310_v60 = vadd.f32 %v1309_v14, %v1263_v39  ;;  %v822_v7 = vpop.f32.mrf.mxu2  ;;  %v2505_v53 = vpop.f32.mrf.mxu3  ;;  %v1272_v41 = vmul.f32 %v1177_v8, %v2438_v58  ;;  %v1273_v57 = vmul.f32 %v1178_v61, %v2452_v47 }
 0x1b3   : > { %v1180_v14 = vmul.f32 %v1071_v23, %v2489_v1 }
 0x1b4   : > { %v1311_v42 = vadd.f32 %v1310_v60, %v1264_v18  ;;  %v1217_v63 = vadd.f32 %v1216_v21, %v1170_v3  ;;  %v1101_v2 = vpop.permute.xlu0 %1100  ;;  %v1181_v21 = vmul.f32 %v1076_v9, %v822_v7 }
 0x1b6   : > { %v1312_v50 = vadd.f32 %v1311_v42, %v1265_v55  ;;  %v1218_v16 = vadd.f32 %v1217_v63, %v1171_v46 }
 0x1b8   : > { %v1219_v28 = vadd.f32 %v1218_v16, %v1172_v33  ;;  %v1313_v43 = vadd.f32 %v1312_v50, %v1266_v5  ;;  %v1275_v33 = vmul.f32 %v1180_v14, %v2489_v1  ;;  %v1106_v63 = vpop.permute.xlu1 %1105  ;;  %v1111_v16 = vpop.permute.xlu2 %1110  ;;  %v1184_v5 = vmul.f32 %v1091_v4, %v2410_v27 }
 0x1ba   : > { %v1220_v29 = vadd.f32 %v1219_v28, %v1173_v37  ;;  %v1314_v10 = vadd.f32 %v1313_v43, %v1267_v13  ;;  %v825_v11 = vpop.f32.mrf.mxu2  ;;  %v2521_v22 = vpop.f32.mrf.mxu3  ;;  %v1276_v37 = vmul.f32 %v1181_v21, %v822_v7  ;;  %v1185_v28 = vmul.f32 %v1096_v19, %v2418_v12 }
 0x1bb   : > { %v1182_v56 = vmul.f32 %v1081_v34, %v825_v11  ;;  %v1279_v34 = vmul.f32 %v1184_v5, %v2410_v27 }
 0x1bc   : > { %v1221_v40 = vadd.f32 %v1220_v29, %v1174_v0  ;;  %v1315_v32 = vadd.f32 %v1314_v10, %v1268_v59  ;;  %v1116_v0 = vpop.permute.xlu0 %1115  ;;  %v1187_v10 = vmul.f32 %v1106_v63, %v2440_v48 }
 0x1bd   : > { %v1277_v9 = vmul.f32 %v1182_v56, %v825_v11  ;;  %v1188_v11 = vmul.f32 %v1111_v16, %v2454_v45  ;;  %v1189_v4 = vmul.f32 %v1116_v0, %v2473_v20 }
 0x1be   : > { %v1222_v44 = vadd.f32 %v1221_v40, %v1175_v35  ;;  %v1316_v49 = vadd.f32 %v1315_v32, %v1269_v26  ;;  %v1186_v35 = vmul.f32 %v1101_v2, %v2428_v31  ;;  %v1282_v27 = vmul.f32 %v1187_v10, %v2440_v48 }
 0x1c0   : > { %v1223_v17 = vadd.f32 %v1222_v44, %v1176_v38  ;;  %v1317_v54 = vadd.f32 %v1316_v49, %v1270_v15  ;;  %v1121_v40 = vpop.permute.xlu1 %1120  ;;  %v1281_v32 = vmul.f32 %v1186_v35, %v2428_v31  ;;  %v1126_v44 = vpop.permute.xlu2 %1125  ;;  %v1284_v31 = vmul.f32 %v1189_v4, %v2473_v20 }
 0x1c2   : > { %v1318_v30 = vadd.f32 %v1317_v54, %v1271_v52  ;;  %v1224_v39 = vadd.f32 %v1223_v17, %v1177_v8  ;;  %v827_v46 = vpop.f32.mrf.mxu2  ;;  %v852_v23 = vpop.f32.mrf.mxu3  ;;  %v1283_v17 = vmul.f32 %v1188_v11, %v2454_v45  ;;  %v1190_v54 = vmul.f32 %v1121_v40, %v2494_v51 }
 0x1c3   : > { %v1183_v47 = vmul.f32 %v1086_v36, %v827_v46  ;;  %v1280_v36 = vmul.f32 %v1185_v28, %v2418_v12 }
 0x1c4   : > { %v1225_v3 = vadd.f32 %v1224_v39, %v1178_v61  ;;  %v1319_v25 = vadd.f32 %v1318_v30, %v1272_v41  ;;  %v1131_v12 = vpop.permute.xlu0 %1130  ;;  %v1285_v2 = vmul.f32 %v1190_v54, %v2494_v51 }
 0x1c5   : > { %v1278_v59 = vmul.f32 %v1183_v47, %v827_v46  ;;  %v1192_v48 = vmul.f32 %v1131_v12, %v2521_v22 }
 0x1c6   : > { %v1226_v18 = vadd.f32 %v1225_v3, %v1179_v24  ;;  %v1320_v60 = vadd.f32 %v1319_v25, %v1273_v57  ;;  %v1191_v24 = vmul.f32 %v1126_v44, %v2505_v53 }
 0x1c7   : > { %v1287_v20 = vmul.f32 %v1192_v48, %v2521_v22 }
 0x1c8   : > { %v1227_v58 = vadd.f32 %v1226_v18, %v1180_v14  ;;  %v1321_v42 = vadd.f32 %v1320_v60, %v1274_v62  ;;  %v1136_v3 = vpop.permute.xlu1 %1135  ;;  %v1286_v45 = vmul.f32 %v1191_v24, %v2505_v53  ;;  %v1141_v18 = vpop.permute.xlu2 %1140 }
 0x1c9   : > { %v1193_v25 = vmul.f32 %v1136_v3, %v852_v23 }
 0x1ca   : > { %v1228_v55 = vadd.f32 %v1227_v58, %v1181_v21  ;;  %v1322_v50 = vadd.f32 %v1321_v42, %v1275_v33  ;;  %v855_v49 = vpop.f32.mrf.mxu3 }
 0x1cb   : > { %v1194_v58 = vmul.f32 %v1141_v18, %v855_v49 }
 0x1cc   : > { %v1323_v13 = vadd.f32 %v1322_v50, %v1276_v37  ;;  %v1229_v6 = vadd.f32 %v1228_v55, %v1182_v56  ;;  %v1146_v42 = vpop.permute.xlu0 %1145  ;;  %v1288_v56 = vmul.f32 %v1193_v25, %v852_v23 }
 0x1ce   : > { %v1324_v43 = vadd.f32 %v1323_v13, %v1277_v9  ;;  %v1230_v1 = vadd.f32 %v1229_v6, %v1183_v47  ;;  %v1289_v47 = vmul.f32 %v1194_v58, %v855_v49 }
 0x1d0   : > { %v1231_v7 = vadd.f32 %v1230_v1, %v1184_v5  ;;  %v1325_v29 = vadd.f32 %v1324_v43, %v1278_v59 }
 0x1d2   : > { %v1232_v26 = vadd.f32 %v1231_v7, %v1185_v28  ;;  %v1326_v38 = vadd.f32 %v1325_v29, %v1279_v34  ;;  %v857_v60 = vpop.f32.mrf.mxu3 }
 0x1d3   : > { %v1195_v55 = vmul.f32 %v1146_v42, %v857_v60 }
 0x1d4   : > { %v1233_v15 = vadd.f32 %v1232_v26, %v1186_v35  ;;  %v1327_v8 = vadd.f32 %v1326_v38, %v1280_v36 }
 0x1d5   : > { %v1290_v5 = vmul.f32 %v1195_v55, %v857_v60 }
 0x1d6   : > { %v1234_v52 = vadd.f32 %v1233_v15, %v1187_v10  ;;  %v1328_v61 = vadd.f32 %v1327_v8, %v1281_v32 }
 0x1d8   : > { %v1235_v19 = vadd.f32 %v1234_v52, %v1188_v11  ;;  %v1329_v41 = vadd.f32 %v1328_v61, %v1282_v27 }
 0x1da   : > { %v1330_v30 = vadd.f32 %v1329_v41, %v1283_v17  ;;  %v1236_v39 = vadd.f32 %v1235_v19, %v1189_v4 }
 0x1dc   : > { %v1237_v57 = vadd.f32 %v1236_v39, %v1190_v54  ;;  %v1331_v14 = vadd.f32 %v1330_v30, %v1284_v31 }
 0x1de   : > { %v1238_v62 = vadd.f32 %v1237_v57, %v1191_v24  ;;  %v1332_v21 = vadd.f32 %v1331_v14, %v1285_v2 }
 0x1e0   : > { %v1239_v46 = vadd.f32 %v1238_v62, %v1192_v48  ;;  %v1333_v33 = vadd.f32 %v1332_v21, %v1286_v45 }
 0x1e2   : > { %v1240_v51 = vadd.f32 %v1239_v46, %v1193_v25  ;;  %v1334_v63 = vadd.f32 %v1333_v33, %v1287_v20 }
 0x1e4   : > { %v1335_v37 = vadd.f32 %v1334_v63, %v1288_v56  ;;  %v1241_v50 = vadd.f32 %v1240_v51, %v1194_v58 }
 0x1e6   : > { %v1336_v53 = vadd.f32 %v1335_v37, %v1289_v47  ;;  %v1242_v16 = vadd.f32 %v1241_v50, %v1195_v55 }
 0x1e8   : > { %v1337_v22 = vadd.f32 %v1336_v53, %v1290_v5  ;;  %1342 = vst [vmem:[%s221_s23] sm:$0xff] %v1242_v16 }
 0x1ea   : > { %1343 = vst [vmem:[%s225_s26] sm:$0xff] %v1337_v22 }
 0x1eb PF: > { %s15_s17 = sadd.s32 1, %s1855_s17   ;;  %s2568_s15 = smov %s1851_s16 }
 0x1ec   : > { %p12_p5 = scmp.ge.s32.totalorder %s15_s17, 4   ;;  %s2569_s16 = smov %s2571_s18 }
 0x1ee   :  { %14 = sbr.rel (!%p12_p5) target bundleno = 2 (0x2), region = 82 }

// kernel: resnet_block_forward.5
= control target key start
LH: loop header
LB: loop body
LE: loop exit
PB: predicated region body
PF: predicated region fallthrough
CT: control target
= control target key end

     0   :  { %s1997_s0 = inlined_call_operand.vmem [shape: bf16[768,128], index: 0, kind: input, shape index: {}]   ;;  %s1998_s2 = inlined_call_operand.vmem [shape: f32[1,128], index: 2, kind: input, shape index: {}]   ;;  %s1999_s3 = inlined_call_operand.vmem [shape: f32[1,128], index: 3, kind: input, shape index: {}]   ;;  %s2000_s1 = inlined_call_operand.vmem [shape: f32[768,128], index: 1, kind: input, shape index: {}]   ;;  %s2001_s4 = inlined_call_operand.vmem [shape: f32[768,128], index: 4, kind: output, shape index: {}]  }
   0x1   :  { %v798_v0 = vld [vmem:[%s1997_s0] sm:$0xff]   ;;  %v989_v5 = vld [vmem:[%s1997_s0 + $0x8] sm:$0xff]   ;;  %v990_v10 = vld [vmem:[%s1997_s0 + $0x10] sm:$0xff]  }
   0x2   :  { %v1071_v1 = vld [vmem:[%s1998_s2] ss:$0 sm:$0xff]  ;;  %v799_v2 = vunpack.c.l.bf16 %v798_v0  ;;  %v800_v4 = vunpack.c.h.bf16 %v798_v0  ;;  %v803_v8 = vunpack.c.l.bf16 %v989_v5  ;;  %v804_v9 = vunpack.c.h.bf16 %v989_v5  ;;  %v410_v12 = vld [vmem:[%s2000_s1 + $0x8] sm:$0xff]  ;;  %v991_v15 = vld [vmem:[%s1997_s0 + $0x18] sm:$0xff]  }
   0x3   :  { %v1076_v3 = vld [vmem:[%s1999_s3] ss:$0 sm:$0xff]  ;;  %v807_v13 = vunpack.c.l.bf16 %v990_v10  ;;  %v808_v14 = vunpack.c.h.bf16 %v990_v10  ;;  %v411_v20 = vld [vmem:[%s2000_s1 + $0x10] sm:$0xff]  ;;  %v412_v21 = vld [vmem:[%s2000_s1 + $0x18] sm:$0xff]  ;;  %v811_v24 = vunpack.c.l.bf16 %v991_v15  ;;  %v812_v25 = vunpack.c.h.bf16 %v991_v15 }
   0x4   :  { %v213_v6 = vmul.f32 %v1071_v1, %v799_v2  ;;  %v214_v7 = vmul.f32 %v1071_v1, %v800_v4  ;;  %v409_v11 = vld [vmem:[%s2000_s1] sm:$0xff]  ;;  %v215_v18 = vmul.f32 %v1071_v1, %v803_v8  ;;  %v216_v19 = vmul.f32 %v1071_v1, %v804_v9  ;;  %v414_v31 = vld [vmem:[%s2000_s1 + $0x28] sm:$0xff]  ;;  %v415_v41 = vld [vmem:[%s2000_s1 + $0x30] sm:$0xff] }
   0x5   :  { %v217_v22 = vmul.f32 %v1071_v1, %v807_v13  ;;  %v218_v23 = vmul.f32 %v1071_v1, %v808_v14  ;;  %v413_v30 = vld [vmem:[%s2000_s1 + $0x20] sm:$0xff]  ;;  %v219_v34 = vmul.f32 %v1071_v1, %v811_v24  ;;  %v220_v35 = vmul.f32 %v1071_v1, %v812_v25  ;;  %v416_v42 = vld [vmem:[%s2000_s1 + $0x38] sm:$0xff]  ;;  %v993_v47 = vld [vmem:[%s1997_s0 + $0x28] sm:$0xff]  }
   0x6   :  { %v313_v16 = vadd.f32 %v1076_v3, %v213_v6  ;;  %v314_v17 = vadd.f32 %v1076_v3, %v214_v7  ;;  %v315_v28 = vadd.f32 %v1076_v3, %v215_v18  ;;  %v316_v29 = vadd.f32 %v1076_v3, %v216_v19  ;;  %v992_v36 = vld [vmem:[%s1997_s0 + $0x20] sm:$0xff]   ;;  %v994_v52 = vld [vmem:[%s1997_s0 + $0x30] sm:$0xff]   ;;  %v995_v61 = vld [vmem:[%s1997_s0 + $0x38] sm:$0xff]  }
   0x7   :  { %v317_v32 = vadd.f32 %v1076_v3, %v217_v22  ;;  %v318_v33 = vadd.f32 %v1076_v3, %v218_v23  ;;  %v319_v45 = vadd.f32 %v1076_v3, %v219_v34  ;;  %v320_v46 = vadd.f32 %v1076_v3, %v220_v35  ;;  %v417_v0 = vld [vmem:[%s2000_s1 + $0x40] sm:$0xff]  ;;  %v418_v2 = vld [vmem:[%s2000_s1 + $0x48] sm:$0xff]  ;;  %v419_v10 = vld [vmem:[%s2000_s1 + $0x50] sm:$0xff] }
   0x8   :  { %v505_v26 = vadd.f32 %v409_v11, %v313_v16  ;;  %v506_v27 = vadd.f32 %v410_v12, %v314_v17  ;;  %v507_v39 = vadd.f32 %v411_v20, %v315_v28  ;;  %v508_v40 = vadd.f32 %v412_v21, %v316_v29  ;;  %v420_v11 = vld [vmem:[%s2000_s1 + $0x58] sm:$0xff]  ;;  %v421_v20 = vld [vmem:[%s2000_s1 + $0x60] sm:$0xff]  ;;  %v422_v21 = vld [vmem:[%s2000_s1 + $0x68] sm:$0xff] }
   0x9   :  { %v509_v43 = vadd.f32 %v413_v30, %v317_v32  ;;  %v510_v44 = vadd.f32 %v414_v31, %v318_v33  ;;  %v815_v50 = vunpack.c.l.bf16 %v992_v36  ;;  %v816_v51 = vunpack.c.h.bf16 %v992_v36  ;;  %v423_v31 = vld [vmem:[%s2000_s1 + $0x70] sm:$0xff]  ;;  %v424_v32 = vld [vmem:[%s2000_s1 + $0x78] sm:$0xff] }
   0xa   :  { %v601_v37 = vmax.f32 %v505_v26, 0.0  ;;  %v602_v38 = vmax.f32 %v506_v27, 0.0  ;;  %v603_v48 = vmax.f32 %v507_v39, 0.0  ;;  %v604_v49 = vmax.f32 %v508_v40, 0.0  ;;  %v996_v26 = vld [vmem:[%s1997_s0 + $0x40] sm:$0xff]  }
   0xb   :  { %v605_v53 = vmax.f32 %v509_v43, 0.0  ;;  %v606_v54 = vmax.f32 %v510_v44, 0.0  ;;  %v511_v55 = vadd.f32 %v415_v41, %v319_v45  ;;  %v512_v56 = vadd.f32 %v416_v42, %v320_v46  ;;  %v998_v42 = vld [vmem:[%s1997_s0 + $0x50] sm:$0xff]  }
   0xc   :  { %697 = vst [vmem:[%s2001_s4] sm:$0xff] %v601_v37  ;;  %v221_v57 = vmul.f32 %v1071_v1, %v815_v50  ;;  %v222_v58 = vmul.f32 %v1071_v1, %v816_v51  ;;  %v819_v59 = vunpack.c.l.bf16 %v993_v47  ;;  %v820_v60 = vunpack.c.h.bf16 %v993_v47  ;;  %v997_v37 = vld [vmem:[%s1997_s0 + $0x48] sm:$0xff]   ;;  %v999_v51 = vld [vmem:[%s1997_s0 + $0x58] sm:$0xff]  }
   0xd   :  { %698 = vst [vmem:[%s2001_s4 + $0x8] sm:$0xff] %v602_v38  ;;  %v607_v62 = vmax.f32 %v511_v55, 0.0  ;;  %v608_v63 = vmax.f32 %v512_v56, 0.0  ;;  %v823_v4 = vunpack.c.l.bf16 %v994_v52  ;;  %v824_v5 = vunpack.c.h.bf16 %v994_v52  ;;  %v426_v55 = vld [vmem:[%s2000_s1 + $0x88] sm:$0xff] }
   0xe   :  { %699 = vst [vmem:[%s2001_s4 + $0x10] sm:$0xff] %v603_v48  ;;  %v321_v6 = vadd.f32 %v1076_v3, %v221_v57  ;;  %v322_v7 = vadd.f32 %v1076_v3, %v222_v58  ;;  %v223_v8 = vmul.f32 %v1071_v1, %v819_v59  ;;  %v224_v9 = vmul.f32 %v1071_v1, %v820_v60 }
   0xf   :  { %700 = vst [vmem:[%s2001_s4 + $0x18] sm:$0xff] %v604_v49  ;;  %v225_v12 = vmul.f32 %v1071_v1, %v823_v4  ;;  %v226_v13 = vmul.f32 %v1071_v1, %v824_v5  ;;  %v827_v14 = vunpack.c.l.bf16 %v995_v61  ;;  %v828_v15 = vunpack.c.h.bf16 %v995_v61 }
  0x10   :  { %701 = vst [vmem:[%s2001_s4 + $0x20] sm:$0xff] %v605_v53  ;;  %v513_v16 = vadd.f32 %v417_v0, %v321_v6  ;;  %v514_v17 = vadd.f32 %v418_v2, %v322_v7  ;;  %v323_v18 = vadd.f32 %v1076_v3, %v223_v8  ;;  %v324_v19 = vadd.f32 %v1076_v3, %v224_v9 }
  0x11   :  { %702 = vst [vmem:[%s2001_s4 + $0x28] sm:$0xff] %v606_v54  ;;  %v325_v22 = vadd.f32 %v1076_v3, %v225_v12  ;;  %v326_v23 = vadd.f32 %v1076_v3, %v226_v13  ;;  %v227_v24 = vmul.f32 %v1071_v1, %v827_v14  ;;  %v228_v25 = vmul.f32 %v1071_v1, %v828_v15  ;;  %v425_v54 = vld [vmem:[%s2000_s1 + $0x80] sm:$0xff] }
  0x12   :  { %703 = vst [vmem:[%s2001_s4 + $0x30] sm:$0xff] %v607_v62  ;;  %v609_v27 = vmax.f32 %v513_v16, 0.0  ;;  %v610_v28 = vmax.f32 %v514_v17, 0.0  ;;  %v515_v29 = vadd.f32 %v419_v10, %v323_v18  ;;  %v516_v30 = vadd.f32 %v420_v11, %v324_v19  ;;  %v427_v62 = vld [vmem:[%s2000_s1 + $0x90] sm:$0xff]  ;;  %v429_v10 = vld [vmem:[%s2000_s1 + $0xa0] sm:$0xff]  ;;  %v430_v11 = vld [vmem:[%s2000_s1 + $0xa8] sm:$0xff] }
  0x13   :  { %704 = vst [vmem:[%s2001_s4 + $0x38] sm:$0xff] %v608_v63  ;;  %v517_v33 = vadd.f32 %v421_v20, %v325_v22  ;;  %v518_v34 = vadd.f32 %v422_v21, %v326_v23  ;;  %v327_v35 = vadd.f32 %v1076_v3, %v227_v24  ;;  %v328_v36 = vadd.f32 %v1076_v3, %v228_v25  ;;  %v428_v63 = vld [vmem:[%s2000_s1 + $0x98] sm:$0xff]  ;;  %v1000_v16 = vld [vmem:[%s1997_s0 + $0x60] sm:$0xff]   ;;  %v431_v21 = vld [vmem:[%s2000_s1 + $0xb0] sm:$0xff] }
  0x14   :  { %705 = vst [vmem:[%s2001_s4 + $0x40] sm:$0xff] %v609_v27  ;;  %v611_v38 = vmax.f32 %v515_v29, 0.0  ;;  %v612_v39 = vmax.f32 %v516_v30, 0.0  ;;  %v831_v40 = vunpack.c.l.bf16 %v996_v26  ;;  %v832_v41 = vunpack.c.h.bf16 %v996_v26  ;;  %v432_v22 = vld [vmem:[%s2000_s1 + $0xb8] sm:$0xff]  ;;  %v1001_v27 = vld [vmem:[%s1997_s0 + $0x68] sm:$0xff]  }
  0x15   :  { %706 = vst [vmem:[%s2001_s4 + $0x48] sm:$0xff] %v610_v28  ;;  %v613_v43 = vmax.f32 %v517_v33, 0.0  ;;  %v614_v44 = vmax.f32 %v518_v34, 0.0  ;;  %v519_v45 = vadd.f32 %v423_v31, %v327_v35  ;;  %v520_v46 = vadd.f32 %v424_v32, %v328_v36  ;;  %v1002_v32 = vld [vmem:[%s1997_s0 + $0x70] sm:$0xff]  }
  0x16   :  { %707 = vst [vmem:[%s2001_s4 + $0x50] sm:$0xff] %v611_v38  ;;  %v229_v47 = vmul.f32 %v1071_v1, %v831_v40  ;;  %v230_v48 = vmul.f32 %v1071_v1, %v832_v41  ;;  %v835_v49 = vunpack.c.l.bf16 %v997_v37  ;;  %v836_v50 = vunpack.c.h.bf16 %v997_v37  ;;  %v1003_v41 = vld [vmem:[%s1997_s0 + $0x78] sm:$0xff]  }
  0x17   :  { %708 = vst [vmem:[%s2001_s4 + $0x58] sm:$0xff] %v612_v39  ;;  %v615_v52 = vmax.f32 %v519_v45, 0.0  ;;  %v616_v53 = vmax.f32 %v520_v46, 0.0  ;;  %v839_v56 = vunpack.c.l.bf16 %v998_v42  ;;  %v840_v57 = vunpack.c.h.bf16 %v998_v42  ;;  %v434_v45 = vld [vmem:[%s2000_s1 + $0xc8] sm:$0xff] }
  0x18   :  { %709 = vst [vmem:[%s2001_s4 + $0x60] sm:$0xff] %v613_v43  ;;  %v329_v58 = vadd.f32 %v1076_v3, %v229_v47  ;;  %v330_v59 = vadd.f32 %v1076_v3, %v230_v48  ;;  %v231_v60 = vmul.f32 %v1071_v1, %v835_v49  ;;  %v232_v61 = vmul.f32 %v1071_v1, %v836_v50 }
  0x19   :  { %710 = vst [vmem:[%s2001_s4 + $0x68] sm:$0xff] %v614_v44  ;;  %v233_v0 = vmul.f32 %v1071_v1, %v839_v56  ;;  %v234_v2 = vmul.f32 %v1071_v1, %v840_v57  ;;  %v843_v4 = vunpack.c.l.bf16 %v999_v51  ;;  %v844_v5 = vunpack.c.h.bf16 %v999_v51  ;;  %v433_v44 = vld [vmem:[%s2000_s1 + $0xc0] sm:$0xff] }
  0x1a   :  { %711 = vst [vmem:[%s2001_s4 + $0x70] sm:$0xff] %v615_v52  ;;  %v521_v6 = vadd.f32 %v425_v54, %v329_v58  ;;  %v522_v7 = vadd.f32 %v426_v55, %v330_v59  ;;  %v331_v8 = vadd.f32 %v1076_v3, %v231_v60  ;;  %v332_v9 = vadd.f32 %v1076_v3, %v232_v61  ;;  %v435_v52 = vld [vmem:[%s2000_s1 + $0xd0] sm:$0xff] }
  0x1b   :  { %712 = vst [vmem:[%s2001_s4 + $0x78] sm:$0xff] %v616_v53  ;;  %v333_v12 = vadd.f32 %v1076_v3, %v233_v0  ;;  %v334_v13 = vadd.f32 %v1076_v3, %v234_v2  ;;  %v235_v14 = vmul.f32 %v1071_v1, %v843_v4  ;;  %v236_v15 = vmul.f32 %v1071_v1, %v844_v5  ;;  %v436_v53 = vld [vmem:[%s2000_s1 + $0xd8] sm:$0xff] }
  0x1c   :  { %v617_v17 = vmax.f32 %v521_v6, 0.0  ;;  %v618_v18 = vmax.f32 %v522_v7, 0.0  ;;  %v523_v19 = vadd.f32 %v427_v62, %v331_v8  ;;  %v524_v20 = vadd.f32 %v428_v63, %v332_v9  ;;  %v437_v62 = vld [vmem:[%s2000_s1 + $0xe0] sm:$0xff]  ;;  %v438_v63 = vld [vmem:[%s2000_s1 + $0xe8] sm:$0xff] }
  0x1d   :  { %v525_v23 = vadd.f32 %v429_v10, %v333_v12  ;;  %v526_v24 = vadd.f32 %v430_v11, %v334_v13  ;;  %v335_v25 = vadd.f32 %v1076_v3, %v235_v14  ;;  %v336_v26 = vadd.f32 %v1076_v3, %v236_v15  ;;  %v1004_v6 = vld [vmem:[%s1997_s0 + $0x80] sm:$0xff]   ;;  %v439_v11 = vld [vmem:[%s2000_s1 + $0xf0] sm:$0xff]  ;;  %v440_v12 = vld [vmem:[%s2000_s1 + $0xf8] sm:$0xff] }
  0x1e   :  { %713 = vst [vmem:[%s2001_s4 + $0x80] sm:$0xff] %v617_v17  ;;  %v619_v28 = vmax.f32 %v523_v19, 0.0  ;;  %v620_v29 = vmax.f32 %v524_v20, 0.0  ;;  %v847_v30 = vunpack.c.l.bf16 %v1000_v16  ;;  %v848_v31 = vunpack.c.h.bf16 %v1000_v16  ;;  %v1005_v17 = vld [vmem:[%s1997_s0 + $0x88] sm:$0xff]  }
  0x1f   :  { %714 = vst [vmem:[%s2001_s4 + $0x88] sm:$0xff] %v618_v18  ;;  %v621_v33 = vmax.f32 %v525_v23, 0.0  ;;  %v622_v34 = vmax.f32 %v526_v24, 0.0  ;;  %v527_v35 = vadd.f32 %v431_v21, %v335_v25  ;;  %v528_v36 = vadd.f32 %v432_v22, %v336_v26  ;;  %v1006_v22 = vld [vmem:[%s1997_s0 + $0x90] sm:$0xff]  }
  0x20   :  { %715 = vst [vmem:[%s2001_s4 + $0x90] sm:$0xff] %v619_v28  ;;  %v237_v37 = vmul.f32 %v1071_v1, %v847_v30  ;;  %v238_v38 = vmul.f32 %v1071_v1, %v848_v31  ;;  %v851_v39 = vunpack.c.l.bf16 %v1001_v27  ;;  %v852_v40 = vunpack.c.h.bf16 %v1001_v27  ;;  %v1007_v31 = vld [vmem:[%s1997_s0 + $0x98] sm:$0xff]  }
  0x21   :  { %716 = vst [vmem:[%s2001_s4 + $0x98] sm:$0xff] %v620_v29  ;;  %v623_v42 = vmax.f32 %v527_v35, 0.0  ;;  %v624_v43 = vmax.f32 %v528_v36, 0.0  ;;  %v855_v46 = vunpack.c.l.bf16 %v1002_v32  ;;  %v856_v47 = vunpack.c.h.bf16 %v1002_v32  ;;  %v442_v35 = vld [vmem:[%s2000_s1 + $0x108] sm:$0xff] }
  0x22   :  { %717 = vst [vmem:[%s2001_s4 + $0xa0] sm:$0xff] %v621_v33  ;;  %v337_v48 = vadd.f32 %v1076_v3, %v237_v37  ;;  %v338_v49 = vadd.f32 %v1076_v3, %v238_v38  ;;  %v239_v50 = vmul.f32 %v1071_v1, %v851_v39  ;;  %v240_v51 = vmul.f32 %v1071_v1, %v852_v40 }
  0x23   :  { %718 = vst [vmem:[%s2001_s4 + $0xa8] sm:$0xff] %v622_v34  ;;  %v241_v54 = vmul.f32 %v1071_v1, %v855_v46  ;;  %v242_v55 = vmul.f32 %v1071_v1, %v856_v47  ;;  %v859_v56 = vunpack.c.l.bf16 %v1003_v41  ;;  %v860_v57 = vunpack.c.h.bf16 %v1003_v41  ;;  %v441_v34 = vld [vmem:[%s2000_s1 + $0x100] sm:$0xff] }
  0x24   :  { %719 = vst [vmem:[%s2001_s4 + $0xb0] sm:$0xff] %v623_v42  ;;  %v529_v58 = vadd.f32 %v433_v44, %v337_v48  ;;  %v530_v59 = vadd.f32 %v434_v45, %v338_v49  ;;  %v339_v60 = vadd.f32 %v1076_v3, %v239_v50  ;;  %v340_v61 = vadd.f32 %v1076_v3, %v240_v51  ;;  %v443_v42 = vld [vmem:[%s2000_s1 + $0x110] sm:$0xff] }
  0x25   :  { %720 = vst [vmem:[%s2001_s4 + $0xb8] sm:$0xff] %v624_v43  ;;  %v341_v0 = vadd.f32 %v1076_v3, %v241_v54  ;;  %v342_v2 = vadd.f32 %v1076_v3, %v242_v55  ;;  %v243_v4 = vmul.f32 %v1071_v1, %v859_v56  ;;  %v244_v5 = vmul.f32 %v1071_v1, %v860_v57  ;;  %v444_v43 = vld [vmem:[%s2000_s1 + $0x118] sm:$0xff] }
  0x26   :  { %v625_v7 = vmax.f32 %v529_v58, 0.0  ;;  %v626_v8 = vmax.f32 %v530_v59, 0.0  ;;  %v531_v9 = vadd.f32 %v435_v52, %v339_v60  ;;  %v532_v10 = vadd.f32 %v436_v53, %v340_v61  ;;  %v445_v52 = vld [vmem:[%s2000_s1 + $0x120] sm:$0xff]  ;;  %v446_v53 = vld [vmem:[%s2000_s1 + $0x128] sm:$0xff] }
  0x27   :  { %v533_v13 = vadd.f32 %v437_v62, %v341_v0  ;;  %v534_v14 = vadd.f32 %v438_v63, %v342_v2  ;;  %v343_v15 = vadd.f32 %v1076_v3, %v243_v4  ;;  %v344_v16 = vadd.f32 %v1076_v3, %v244_v5  ;;  %v1008_v58 = vld [vmem:[%s1997_s0 + $0xa0] sm:$0xff]   ;;  %v447_v63 = vld [vmem:[%s2000_s1 + $0x130] sm:$0xff]  ;;  %v448_v0 = vld [vmem:[%s2000_s1 + $0x138] sm:$0xff] }
  0x28   :  { %721 = vst [vmem:[%s2001_s4 + $0xc0] sm:$0xff] %v625_v7  ;;  %v627_v18 = vmax.f32 %v531_v9, 0.0  ;;  %v628_v19 = vmax.f32 %v532_v10, 0.0  ;;  %v863_v20 = vunpack.c.l.bf16 %v1004_v6  ;;  %v864_v21 = vunpack.c.h.bf16 %v1004_v6  ;;  %v1009_v7 = vld [vmem:[%s1997_s0 + $0xa8] sm:$0xff]  }
  0x29   :  { %722 = vst [vmem:[%s2001_s4 + $0xc8] sm:$0xff] %v626_v8  ;;  %v629_v23 = vmax.f32 %v533_v13, 0.0  ;;  %v630_v24 = vmax.f32 %v534_v14, 0.0  ;;  %v535_v25 = vadd.f32 %v439_v11, %v343_v15  ;;  %v536_v26 = vadd.f32 %v440_v12, %v344_v16  ;;  %v1010_v12 = vld [vmem:[%s1997_s0 + $0xb0] sm:$0xff]  }
  0x2a   :  { %723 = vst [vmem:[%s2001_s4 + $0xd0] sm:$0xff] %v627_v18  ;;  %v245_v27 = vmul.f32 %v1071_v1, %v863_v20  ;;  %v246_v28 = vmul.f32 %v1071_v1, %v864_v21  ;;  %v867_v29 = vunpack.c.l.bf16 %v1005_v17  ;;  %v868_v30 = vunpack.c.h.bf16 %v1005_v17  ;;  %v1011_v21 = vld [vmem:[%s1997_s0 + $0xb8] sm:$0xff]  }
  0x2b   :  { %724 = vst [vmem:[%s2001_s4 + $0xd8] sm:$0xff] %v628_v19  ;;  %v631_v32 = vmax.f32 %v535_v25, 0.0  ;;  %v632_v33 = vmax.f32 %v536_v26, 0.0  ;;  %v871_v36 = vunpack.c.l.bf16 %v1006_v22  ;;  %v872_v37 = vunpack.c.h.bf16 %v1006_v22  ;;  %v450_v25 = vld [vmem:[%s2000_s1 + $0x148] sm:$0xff] }
  0x2c   :  { %725 = vst [vmem:[%s2001_s4 + $0xe0] sm:$0xff] %v629_v23  ;;  %v345_v38 = vadd.f32 %v1076_v3, %v245_v27  ;;  %v346_v39 = vadd.f32 %v1076_v3, %v246_v28  ;;  %v247_v40 = vmul.f32 %v1071_v1, %v867_v29  ;;  %v248_v41 = vmul.f32 %v1071_v1, %v868_v30 }
  0x2d   :  { %726 = vst [vmem:[%s2001_s4 + $0xe8] sm:$0xff] %v630_v24  ;;  %v249_v44 = vmul.f32 %v1071_v1, %v871_v36  ;;  %v250_v45 = vmul.f32 %v1071_v1, %v872_v37  ;;  %v875_v46 = vunpack.c.l.bf16 %v1007_v31  ;;  %v876_v47 = vunpack.c.h.bf16 %v1007_v31  ;;  %v449_v24 = vld [vmem:[%s2000_s1 + $0x140] sm:$0xff] }
  0x2e   :  { %727 = vst [vmem:[%s2001_s4 + $0xf0] sm:$0xff] %v631_v32  ;;  %v537_v48 = vadd.f32 %v441_v34, %v345_v38  ;;  %v538_v49 = vadd.f32 %v442_v35, %v346_v39  ;;  %v347_v50 = vadd.f32 %v1076_v3, %v247_v40  ;;  %v348_v51 = vadd.f32 %v1076_v3, %v248_v41  ;;  %v451_v32 = vld [vmem:[%s2000_s1 + $0x150] sm:$0xff] }
  0x2f   :  { %728 = vst [vmem:[%s2001_s4 + $0xf8] sm:$0xff] %v632_v33  ;;  %v349_v54 = vadd.f32 %v1076_v3, %v249_v44  ;;  %v350_v55 = vadd.f32 %v1076_v3, %v250_v45  ;;  %v251_v56 = vmul.f32 %v1071_v1, %v875_v46  ;;  %v252_v57 = vmul.f32 %v1071_v1, %v876_v47  ;;  %v452_v33 = vld [vmem:[%s2000_s1 + $0x158] sm:$0xff] }
  0x30   :  { %v633_v59 = vmax.f32 %v537_v48, 0.0  ;;  %v634_v60 = vmax.f32 %v538_v49, 0.0  ;;  %v539_v61 = vadd.f32 %v443_v42, %v347_v50  ;;  %v540_v62 = vadd.f32 %v444_v43, %v348_v51  ;;  %v453_v42 = vld [vmem:[%s2000_s1 + $0x160] sm:$0xff]  ;;  %v454_v43 = vld [vmem:[%s2000_s1 + $0x168] sm:$0xff] }
  0x31   :  { %v541_v2 = vadd.f32 %v445_v52, %v349_v54  ;;  %v542_v4 = vadd.f32 %v446_v53, %v350_v55  ;;  %v351_v5 = vadd.f32 %v1076_v3, %v251_v56  ;;  %v352_v6 = vadd.f32 %v1076_v3, %v252_v57  ;;  %v1012_v48 = vld [vmem:[%s1997_s0 + $0xc0] sm:$0xff]   ;;  %v455_v53 = vld [vmem:[%s2000_s1 + $0x170] sm:$0xff]  ;;  %v456_v54 = vld [vmem:[%s2000_s1 + $0x178] sm:$0xff] }
  0x32   :  { %729 = vst [vmem:[%s2001_s4 + $0x100] sm:$0xff] %v633_v59  ;;  %v635_v8 = vmax.f32 %v539_v61, 0.0  ;;  %v636_v9 = vmax.f32 %v540_v62, 0.0  ;;  %v879_v10 = vunpack.c.l.bf16 %v1008_v58  ;;  %v880_v11 = vunpack.c.h.bf16 %v1008_v58  ;;  %v1013_v59 = vld [vmem:[%s1997_s0 + $0xc8] sm:$0xff]  }
  0x33   :  { %730 = vst [vmem:[%s2001_s4 + $0x108] sm:$0xff] %v634_v60  ;;  %v637_v13 = vmax.f32 %v541_v2, 0.0  ;;  %v638_v14 = vmax.f32 %v542_v4, 0.0  ;;  %v543_v15 = vadd.f32 %v447_v63, %v351_v5  ;;  %v544_v16 = vadd.f32 %v448_v0, %v352_v6  ;;  %v1014_v0 = vld [vmem:[%s1997_s0 + $0xd0] sm:$0xff]  }
  0x34   :  { %731 = vst [vmem:[%s2001_s4 + $0x110] sm:$0xff] %v635_v8  ;;  %v253_v17 = vmul.f32 %v1071_v1, %v879_v10  ;;  %v254_v18 = vmul.f32 %v1071_v1, %v880_v11  ;;  %v883_v19 = vunpack.c.l.bf16 %v1009_v7  ;;  %v884_v20 = vunpack.c.h.bf16 %v1009_v7  ;;  %v1015_v11 = vld [vmem:[%s1997_s0 + $0xd8] sm:$0xff]  }
  0x35   :  { %732 = vst [vmem:[%s2001_s4 + $0x118] sm:$0xff] %v636_v9  ;;  %v639_v22 = vmax.f32 %v543_v15, 0.0  ;;  %v640_v23 = vmax.f32 %v544_v16, 0.0  ;;  %v887_v26 = vunpack.c.l.bf16 %v1010_v12  ;;  %v888_v27 = vunpack.c.h.bf16 %v1010_v12  ;;  %v458_v15 = vld [vmem:[%s2000_s1 + $0x188] sm:$0xff] }
  0x36   :  { %733 = vst [vmem:[%s2001_s4 + $0x120] sm:$0xff] %v637_v13  ;;  %v353_v28 = vadd.f32 %v1076_v3, %v253_v17  ;;  %v354_v29 = vadd.f32 %v1076_v3, %v254_v18  ;;  %v255_v30 = vmul.f32 %v1071_v1, %v883_v19  ;;  %v256_v31 = vmul.f32 %v1071_v1, %v884_v20 }
  0x37   :  { %734 = vst [vmem:[%s2001_s4 + $0x128] sm:$0xff] %v638_v14  ;;  %v257_v34 = vmul.f32 %v1071_v1, %v887_v26  ;;  %v258_v35 = vmul.f32 %v1071_v1, %v888_v27  ;;  %v891_v36 = vunpack.c.l.bf16 %v1011_v21  ;;  %v892_v37 = vunpack.c.h.bf16 %v1011_v21  ;;  %v457_v14 = vld [vmem:[%s2000_s1 + $0x180] sm:$0xff] }
  0x38   :  { %735 = vst [vmem:[%s2001_s4 + $0x130] sm:$0xff] %v639_v22  ;;  %v545_v38 = vadd.f32 %v449_v24, %v353_v28  ;;  %v546_v39 = vadd.f32 %v450_v25, %v354_v29  ;;  %v355_v40 = vadd.f32 %v1076_v3, %v255_v30  ;;  %v356_v41 = vadd.f32 %v1076_v3, %v256_v31  ;;  %v459_v22 = vld [vmem:[%s2000_s1 + $0x190] sm:$0xff] }
  0x39   :  { %736 = vst [vmem:[%s2001_s4 + $0x138] sm:$0xff] %v640_v23  ;;  %v357_v44 = vadd.f32 %v1076_v3, %v257_v34  ;;  %v358_v45 = vadd.f32 %v1076_v3, %v258_v35  ;;  %v259_v46 = vmul.f32 %v1071_v1, %v891_v36  ;;  %v260_v47 = vmul.f32 %v1071_v1, %v892_v37  ;;  %v460_v23 = vld [vmem:[%s2000_s1 + $0x198] sm:$0xff] }
  0x3a   :  { %v641_v49 = vmax.f32 %v545_v38, 0.0  ;;  %v642_v50 = vmax.f32 %v546_v39, 0.0  ;;  %v547_v51 = vadd.f32 %v451_v32, %v355_v40  ;;  %v548_v52 = vadd.f32 %v452_v33, %v356_v41  ;;  %v461_v32 = vld [vmem:[%s2000_s1 + $0x1a0] sm:$0xff]  ;;  %v462_v33 = vld [vmem:[%s2000_s1 + $0x1a8] sm:$0xff] }
  0x3b   :  { %v549_v55 = vadd.f32 %v453_v42, %v357_v44  ;;  %v550_v56 = vadd.f32 %v454_v43, %v358_v45  ;;  %v359_v57 = vadd.f32 %v1076_v3, %v259_v46  ;;  %v360_v58 = vadd.f32 %v1076_v3, %v260_v47  ;;  %v1016_v38 = vld [vmem:[%s1997_s0 + $0xe0] sm:$0xff]   ;;  %v463_v43 = vld [vmem:[%s2000_s1 + $0x1b0] sm:$0xff]  ;;  %v464_v44 = vld [vmem:[%s2000_s1 + $0x1b8] sm:$0xff] }
  0x3c   :  { %737 = vst [vmem:[%s2001_s4 + $0x140] sm:$0xff] %v641_v49  ;;  %v643_v60 = vmax.f32 %v547_v51, 0.0  ;;  %v644_v61 = vmax.f32 %v548_v52, 0.0  ;;  %v895_v62 = vunpack.c.l.bf16 %v1012_v48  ;;  %v896_v63 = vunpack.c.h.bf16 %v1012_v48  ;;  %v1017_v49 = vld [vmem:[%s1997_s0 + $0xe8] sm:$0xff]  }
  0x3d   :  { %738 = vst [vmem:[%s2001_s4 + $0x148] sm:$0xff] %v642_v50  ;;  %v645_v2 = vmax.f32 %v549_v55, 0.0  ;;  %v646_v4 = vmax.f32 %v550_v56, 0.0  ;;  %v551_v5 = vadd.f32 %v455_v53, %v359_v57  ;;  %v552_v6 = vadd.f32 %v456_v54, %v360_v58  ;;  %v1018_v54 = vld [vmem:[%s1997_s0 + $0xf0] sm:$0xff]  }
  0x3e   :  { %739 = vst [vmem:[%s2001_s4 + $0x150] sm:$0xff] %v643_v60  ;;  %v261_v7 = vmul.f32 %v1071_v1, %v895_v62  ;;  %v262_v8 = vmul.f32 %v1071_v1, %v896_v63  ;;  %v899_v9 = vunpack.c.l.bf16 %v1013_v59  ;;  %v900_v10 = vunpack.c.h.bf16 %v1013_v59  ;;  %v1019_v63 = vld [vmem:[%s1997_s0 + $0xf8] sm:$0xff]  }
  0x3f   :  { %740 = vst [vmem:[%s2001_s4 + $0x158] sm:$0xff] %v644_v61  ;;  %v647_v12 = vmax.f32 %v551_v5, 0.0  ;;  %v648_v13 = vmax.f32 %v552_v6, 0.0  ;;  %v903_v16 = vunpack.c.l.bf16 %v1014_v0  ;;  %v904_v17 = vunpack.c.h.bf16 %v1014_v0  ;;  %v466_v5 = vld [vmem:[%s2000_s1 + $0x1c8] sm:$0xff] }
  0x40   :  { %741 = vst [vmem:[%s2001_s4 + $0x160] sm:$0xff] %v645_v2  ;;  %v361_v18 = vadd.f32 %v1076_v3, %v261_v7  ;;  %v362_v19 = vadd.f32 %v1076_v3, %v262_v8  ;;  %v263_v20 = vmul.f32 %v1071_v1, %v899_v9  ;;  %v264_v21 = vmul.f32 %v1071_v1, %v900_v10 }
  0x41   :  { %742 = vst [vmem:[%s2001_s4 + $0x168] sm:$0xff] %v646_v4  ;;  %v265_v24 = vmul.f32 %v1071_v1, %v903_v16  ;;  %v266_v25 = vmul.f32 %v1071_v1, %v904_v17  ;;  %v907_v26 = vunpack.c.l.bf16 %v1015_v11  ;;  %v908_v27 = vunpack.c.h.bf16 %v1015_v11  ;;  %v465_v4 = vld [vmem:[%s2000_s1 + $0x1c0] sm:$0xff] }
  0x42   :  { %743 = vst [vmem:[%s2001_s4 + $0x170] sm:$0xff] %v647_v12  ;;  %v553_v28 = vadd.f32 %v457_v14, %v361_v18  ;;  %v554_v29 = vadd.f32 %v458_v15, %v362_v19  ;;  %v363_v30 = vadd.f32 %v1076_v3, %v263_v20  ;;  %v364_v31 = vadd.f32 %v1076_v3, %v264_v21  ;;  %v467_v12 = vld [vmem:[%s2000_s1 + $0x1d0] sm:$0xff] }
  0x43   :  { %744 = vst [vmem:[%s2001_s4 + $0x178] sm:$0xff] %v648_v13  ;;  %v365_v34 = vadd.f32 %v1076_v3, %v265_v24  ;;  %v366_v35 = vadd.f32 %v1076_v3, %v266_v25  ;;  %v267_v36 = vmul.f32 %v1071_v1, %v907_v26  ;;  %v268_v37 = vmul.f32 %v1071_v1, %v908_v27  ;;  %v468_v13 = vld [vmem:[%s2000_s1 + $0x1d8] sm:$0xff] }
  0x44   :  { %v649_v39 = vmax.f32 %v553_v28, 0.0  ;;  %v650_v40 = vmax.f32 %v554_v29, 0.0  ;;  %v555_v41 = vadd.f32 %v459_v22, %v363_v30  ;;  %v556_v42 = vadd.f32 %v460_v23, %v364_v31  ;;  %v469_v22 = vld [vmem:[%s2000_s1 + $0x1e0] sm:$0xff]  ;;  %v470_v23 = vld [vmem:[%s2000_s1 + $0x1e8] sm:$0xff] }
  0x45   :  { %v557_v45 = vadd.f32 %v461_v32, %v365_v34  ;;  %v558_v46 = vadd.f32 %v462_v33, %v366_v35  ;;  %v367_v47 = vadd.f32 %v1076_v3, %v267_v36  ;;  %v368_v48 = vadd.f32 %v1076_v3, %v268_v37  ;;  %v1020_v28 = vld [vmem:[%s1997_s0 + $0x100] sm:$0xff]   ;;  %v471_v33 = vld [vmem:[%s2000_s1 + $0x1f0] sm:$0xff]  ;;  %v472_v34 = vld [vmem:[%s2000_s1 + $0x1f8] sm:$0xff] }
  0x46   :  { %745 = vst [vmem:[%s2001_s4 + $0x180] sm:$0xff] %v649_v39  ;;  %v651_v50 = vmax.f32 %v555_v41, 0.0  ;;  %v652_v51 = vmax.f32 %v556_v42, 0.0  ;;  %v911_v52 = vunpack.c.l.bf16 %v1016_v38  ;;  %v912_v53 = vunpack.c.h.bf16 %v1016_v38  ;;  %v1021_v39 = vld [vmem:[%s1997_s0 + $0x108] sm:$0xff]  }
  0x47   :  { %746 = vst [vmem:[%s2001_s4 + $0x188] sm:$0xff] %v650_v40  ;;  %v653_v55 = vmax.f32 %v557_v45, 0.0  ;;  %v654_v56 = vmax.f32 %v558_v46, 0.0  ;;  %v559_v57 = vadd.f32 %v463_v43, %v367_v47  ;;  %v560_v58 = vadd.f32 %v464_v44, %v368_v48  ;;  %v1022_v44 = vld [vmem:[%s1997_s0 + $0x110] sm:$0xff]  }
  0x48   :  { %747 = vst [vmem:[%s2001_s4 + $0x190] sm:$0xff] %v651_v50  ;;  %v269_v59 = vmul.f32 %v1071_v1, %v911_v52  ;;  %v270_v60 = vmul.f32 %v1071_v1, %v912_v53  ;;  %v915_v61 = vunpack.c.l.bf16 %v1017_v49  ;;  %v916_v62 = vunpack.c.h.bf16 %v1017_v49  ;;  %v1023_v53 = vld [vmem:[%s1997_s0 + $0x118] sm:$0xff]  }
  0x49   :  { %748 = vst [vmem:[%s2001_s4 + $0x198] sm:$0xff] %v652_v51  ;;  %v655_v0 = vmax.f32 %v559_v57, 0.0  ;;  %v656_v2 = vmax.f32 %v560_v58, 0.0  ;;  %v919_v6 = vunpack.c.l.bf16 %v1018_v54  ;;  %v920_v7 = vunpack.c.h.bf16 %v1018_v54  ;;  %v474_v57 = vld [vmem:[%s2000_s1 + $0x208] sm:$0xff] }
  0x4a   :  { %749 = vst [vmem:[%s2001_s4 + $0x1a0] sm:$0xff] %v653_v55  ;;  %v369_v8 = vadd.f32 %v1076_v3, %v269_v59  ;;  %v370_v9 = vadd.f32 %v1076_v3, %v270_v60  ;;  %v271_v10 = vmul.f32 %v1071_v1, %v915_v61  ;;  %v272_v11 = vmul.f32 %v1071_v1, %v916_v62 }
  0x4b   :  { %750 = vst [vmem:[%s2001_s4 + $0x1a8] sm:$0xff] %v654_v56  ;;  %v273_v14 = vmul.f32 %v1071_v1, %v919_v6  ;;  %v274_v15 = vmul.f32 %v1071_v1, %v920_v7  ;;  %v923_v16 = vunpack.c.l.bf16 %v1019_v63  ;;  %v924_v17 = vunpack.c.h.bf16 %v1019_v63  ;;  %v473_v56 = vld [vmem:[%s2000_s1 + $0x200] sm:$0xff] }
  0x4c   :  { %751 = vst [vmem:[%s2001_s4 + $0x1b0] sm:$0xff] %v655_v0  ;;  %v561_v18 = vadd.f32 %v465_v4, %v369_v8  ;;  %v562_v19 = vadd.f32 %v466_v5, %v370_v9  ;;  %v371_v20 = vadd.f32 %v1076_v3, %v271_v10  ;;  %v372_v21 = vadd.f32 %v1076_v3, %v272_v11  ;;  %v475_v0 = vld [vmem:[%s2000_s1 + $0x210] sm:$0xff] }
  0x4d   :  { %752 = vst [vmem:[%s2001_s4 + $0x1b8] sm:$0xff] %v656_v2  ;;  %v373_v24 = vadd.f32 %v1076_v3, %v273_v14  ;;  %v374_v25 = vadd.f32 %v1076_v3, %v274_v15  ;;  %v275_v26 = vmul.f32 %v1071_v1, %v923_v16  ;;  %v276_v27 = vmul.f32 %v1071_v1, %v924_v17  ;;  %v476_v2 = vld [vmem:[%s2000_s1 + $0x218] sm:$0xff]  ;;  %v1728_v15 = vld [vmem:[%s1998_s2] ss:$0 sm:$0xff] }
  0x4e   :  { %v657_v29 = vmax.f32 %v561_v18, 0.0  ;;  %v658_v30 = vmax.f32 %v562_v19, 0.0  ;;  %v563_v31 = vadd.f32 %v467_v12, %v371_v20  ;;  %v564_v32 = vadd.f32 %v468_v13, %v372_v21  ;;  %v477_v12 = vld [vmem:[%s2000_s1 + $0x220] sm:$0xff] }
  0x4f   :  { %v565_v35 = vadd.f32 %v469_v22, %v373_v24  ;;  %v566_v36 = vadd.f32 %v470_v23, %v374_v25  ;;  %v375_v37 = vadd.f32 %v1076_v3, %v275_v26  ;;  %v376_v38 = vadd.f32 %v1076_v3, %v276_v27  ;;  %v1024_v18 = vld [vmem:[%s1997_s0 + $0x120] sm:$0xff]   ;;  %v480_v23 = vld [vmem:[%s2000_s1 + $0x238] sm:$0xff] }
  0x50   :  { %753 = vst [vmem:[%s2001_s4 + $0x1c0] sm:$0xff] %v657_v29  ;;  %v659_v40 = vmax.f32 %v563_v31, 0.0  ;;  %v660_v41 = vmax.f32 %v564_v32, 0.0  ;;  %v927_v42 = vunpack.c.l.bf16 %v1020_v28  ;;  %v928_v43 = vunpack.c.h.bf16 %v1020_v28  ;;  %v1744_v26 = vld [vmem:[%s1999_s3] ss:$0 sm:$0xff]  ;;  %v1025_v29 = vld [vmem:[%s1997_s0 + $0x128] sm:$0xff]  }
  0x51   :  { %754 = vst [vmem:[%s2001_s4 + $0x1c8] sm:$0xff] %v658_v30  ;;  %v661_v45 = vmax.f32 %v565_v35, 0.0  ;;  %v662_v46 = vmax.f32 %v566_v36, 0.0  ;;  %v567_v47 = vadd.f32 %v471_v33, %v375_v37  ;;  %v568_v48 = vadd.f32 %v472_v34, %v376_v38  ;;  %v1026_v34 = vld [vmem:[%s1997_s0 + $0x130] sm:$0xff]  }
  0x52   :  { %755 = vst [vmem:[%s2001_s4 + $0x1d0] sm:$0xff] %v659_v40  ;;  %v277_v49 = vmul.f32 %v1071_v1, %v927_v42  ;;  %v278_v50 = vmul.f32 %v1071_v1, %v928_v43  ;;  %v931_v51 = vunpack.c.l.bf16 %v1021_v39  ;;  %v932_v52 = vunpack.c.h.bf16 %v1021_v39  ;;  %v1027_v43 = vld [vmem:[%s1997_s0 + $0x138] sm:$0xff]  }
  0x53   :  { %756 = vst [vmem:[%s2001_s4 + $0x1d8] sm:$0xff] %v660_v41  ;;  %v663_v54 = vmax.f32 %v567_v47, 0.0  ;;  %v664_v55 = vmax.f32 %v568_v48, 0.0  ;;  %v935_v58 = vunpack.c.l.bf16 %v1022_v44  ;;  %v936_v59 = vunpack.c.h.bf16 %v1022_v44  ;;  %v482_v47 = vld [vmem:[%s2000_s1 + $0x248] sm:$0xff] }
  0x54   :  { %757 = vst [vmem:[%s2001_s4 + $0x1e0] sm:$0xff] %v661_v45  ;;  %v377_v60 = vadd.f32 %v1076_v3, %v277_v49  ;;  %v378_v61 = vadd.f32 %v1076_v3, %v278_v50  ;;  %v279_v62 = vmul.f32 %v1071_v1, %v931_v51  ;;  %v280_v63 = vmul.f32 %v1071_v1, %v932_v52 }
  0x55   :  { %758 = vst [vmem:[%s2001_s4 + $0x1e8] sm:$0xff] %v662_v46  ;;  %v281_v4 = vmul.f32 %v1071_v1, %v935_v58  ;;  %v282_v5 = vmul.f32 %v1071_v1, %v936_v59  ;;  %v939_v6 = vunpack.c.l.bf16 %v1023_v53  ;;  %v940_v7 = vunpack.c.h.bf16 %v1023_v53  ;;  %v478_v1 = vld [vmem:[%s2000_s1 + $0x228] sm:$0xff]  ;;  %v481_v46 = vld [vmem:[%s2000_s1 + $0x240] sm:$0xff] }
  0x56   :  { %759 = vst [vmem:[%s2001_s4 + $0x1f0] sm:$0xff] %v663_v54  ;;  %v569_v8 = vadd.f32 %v473_v56, %v377_v60  ;;  %v570_v9 = vadd.f32 %v474_v57, %v378_v61  ;;  %v379_v10 = vadd.f32 %v1076_v3, %v279_v62  ;;  %v380_v11 = vadd.f32 %v1076_v3, %v280_v63  ;;  %v483_v54 = vld [vmem:[%s2000_s1 + $0x250] sm:$0xff] }
  0x57   :  { %760 = vst [vmem:[%s2001_s4 + $0x1f8] sm:$0xff] %v664_v55  ;;  %v381_v13 = vadd.f32 %v1076_v3, %v281_v4  ;;  %v382_v14 = vadd.f32 %v1076_v3, %v282_v5  ;;  %v283_v16 = vmul.f32 %v1728_v15, %v939_v6  ;;  %v284_v17 = vmul.f32 %v1728_v15, %v940_v7  ;;  %v479_v3 = vld [vmem:[%s2000_s1 + $0x230] sm:$0xff]  ;;  %v484_v55 = vld [vmem:[%s2000_s1 + $0x258] sm:$0xff] }
  0x58   :  { %v665_v19 = vmax.f32 %v569_v8, 0.0  ;;  %v666_v20 = vmax.f32 %v570_v9, 0.0  ;;  %v571_v21 = vadd.f32 %v475_v0, %v379_v10  ;;  %v572_v22 = vadd.f32 %v476_v2, %v380_v11  ;;  %v485_v0 = vld [vmem:[%s2000_s1 + $0x260] sm:$0xff]  ;;  %v486_v2 = vld [vmem:[%s2000_s1 + $0x268] sm:$0xff] }
  0x59   :  { %v573_v24 = vadd.f32 %v477_v12, %v381_v13  ;;  %v574_v25 = vadd.f32 %v478_v1, %v382_v14  ;;  %v383_v27 = vadd.f32 %v1744_v26, %v283_v16  ;;  %v384_v28 = vadd.f32 %v1744_v26, %v284_v17  ;;  %v1028_v8 = vld [vmem:[%s1997_s0 + $0x140] sm:$0xff]   ;;  %v487_v1 = vld [vmem:[%s2000_s1 + $0x270] sm:$0xff]  ;;  %v488_v13 = vld [vmem:[%s2000_s1 + $0x278] sm:$0xff] }
  0x5a   :  { %761 = vst [vmem:[%s2001_s4 + $0x200] sm:$0xff] %v665_v19  ;;  %v667_v30 = vmax.f32 %v571_v21, 0.0  ;;  %v668_v31 = vmax.f32 %v572_v22, 0.0  ;;  %v943_v32 = vunpack.c.l.bf16 %v1024_v18  ;;  %v944_v33 = vunpack.c.h.bf16 %v1024_v18  ;;  %v1029_v19 = vld [vmem:[%s1997_s0 + $0x148] sm:$0xff]  }
  0x5b   :  { %762 = vst [vmem:[%s2001_s4 + $0x208] sm:$0xff] %v666_v20  ;;  %v669_v35 = vmax.f32 %v573_v24, 0.0  ;;  %v670_v36 = vmax.f32 %v574_v25, 0.0  ;;  %v575_v37 = vadd.f32 %v479_v3, %v383_v27  ;;  %v576_v38 = vadd.f32 %v480_v23, %v384_v28  ;;  %v1030_v23 = vld [vmem:[%s1997_s0 + $0x150] sm:$0xff]  }
  0x5c   :  { %763 = vst [vmem:[%s2001_s4 + $0x210] sm:$0xff] %v667_v30  ;;  %v285_v39 = vmul.f32 %v1728_v15, %v943_v32  ;;  %v286_v40 = vmul.f32 %v1728_v15, %v944_v33  ;;  %v947_v41 = vunpack.c.l.bf16 %v1025_v29  ;;  %v948_v42 = vunpack.c.h.bf16 %v1025_v29  ;;  %v1031_v33 = vld [vmem:[%s1997_s0 + $0x158] sm:$0xff]  }
  0x5d   :  { %764 = vst [vmem:[%s2001_s4 + $0x218] sm:$0xff] %v668_v31  ;;  %v671_v44 = vmax.f32 %v575_v37, 0.0  ;;  %v672_v45 = vmax.f32 %v576_v38, 0.0  ;;  %v951_v48 = vunpack.c.l.bf16 %v1026_v34  ;;  %v952_v49 = vunpack.c.h.bf16 %v1026_v34  ;;  %v490_v37 = vld [vmem:[%s2000_s1 + $0x288] sm:$0xff] }
  0x5e   :  { %765 = vst [vmem:[%s2001_s4 + $0x220] sm:$0xff] %v669_v35  ;;  %v385_v50 = vadd.f32 %v1744_v26, %v285_v39  ;;  %v386_v51 = vadd.f32 %v1744_v26, %v286_v40  ;;  %v287_v52 = vmul.f32 %v1728_v15, %v947_v41  ;;  %v288_v53 = vmul.f32 %v1728_v15, %v948_v42 }
  0x5f   :  { %766 = vst [vmem:[%s2001_s4 + $0x228] sm:$0xff] %v670_v36  ;;  %v289_v56 = vmul.f32 %v1728_v15, %v951_v48  ;;  %v290_v57 = vmul.f32 %v1728_v15, %v952_v49  ;;  %v955_v58 = vunpack.c.l.bf16 %v1027_v43  ;;  %v956_v59 = vunpack.c.h.bf16 %v1027_v43  ;;  %v489_v36 = vld [vmem:[%s2000_s1 + $0x280] sm:$0xff] }
  0x60   :  { %767 = vst [vmem:[%s2001_s4 + $0x230] sm:$0xff] %v671_v44  ;;  %v577_v60 = vadd.f32 %v481_v46, %v385_v50  ;;  %v578_v61 = vadd.f32 %v482_v47, %v386_v51  ;;  %v387_v62 = vadd.f32 %v1744_v26, %v287_v52  ;;  %v388_v63 = vadd.f32 %v1744_v26, %v288_v53  ;;  %v491_v44 = vld [vmem:[%s2000_s1 + $0x290] sm:$0xff] }
  0x61   :  { %768 = vst [vmem:[%s2001_s4 + $0x238] sm:$0xff] %v672_v45  ;;  %v389_v4 = vadd.f32 %v1744_v26, %v289_v56  ;;  %v390_v5 = vadd.f32 %v1744_v26, %v290_v57  ;;  %v291_v6 = vmul.f32 %v1728_v15, %v955_v58  ;;  %v292_v7 = vmul.f32 %v1728_v15, %v956_v59  ;;  %v492_v45 = vld [vmem:[%s2000_s1 + $0x298] sm:$0xff] }
  0x62   :  { %v673_v9 = vmax.f32 %v577_v60, 0.0  ;;  %v674_v10 = vmax.f32 %v578_v61, 0.0  ;;  %v579_v11 = vadd.f32 %v483_v54, %v387_v62  ;;  %v580_v12 = vadd.f32 %v484_v55, %v388_v63  ;;  %v493_v54 = vld [vmem:[%s2000_s1 + $0x2a0] sm:$0xff]  ;;  %v494_v55 = vld [vmem:[%s2000_s1 + $0x2a8] sm:$0xff] }
  0x63   :  { %v581_v14 = vadd.f32 %v485_v0, %v389_v4  ;;  %v582_v16 = vadd.f32 %v486_v2, %v390_v5  ;;  %v391_v17 = vadd.f32 %v1744_v26, %v291_v6  ;;  %v392_v18 = vadd.f32 %v1744_v26, %v292_v7  ;;  %v1032_v60 = vld [vmem:[%s1997_s0 + $0x160] sm:$0xff]   ;;  %v495_v2 = vld [vmem:[%s2000_s1 + $0x2b0] sm:$0xff]  ;;  %v496_v4 = vld [vmem:[%s2000_s1 + $0x2b8] sm:$0xff] }
  0x64   :  { %769 = vst [vmem:[%s2001_s4 + $0x240] sm:$0xff] %v673_v9  ;;  %v675_v20 = vmax.f32 %v579_v11, 0.0  ;;  %v676_v21 = vmax.f32 %v580_v12, 0.0  ;;  %v959_v22 = vunpack.c.l.bf16 %v1028_v8  ;;  %v960_v3 = vunpack.c.h.bf16 %v1028_v8  ;;  %v1033_v9 = vld [vmem:[%s1997_s0 + $0x168] sm:$0xff]  }
  0x65   :  { %770 = vst [vmem:[%s2001_s4 + $0x248] sm:$0xff] %v674_v10  ;;  %v677_v24 = vmax.f32 %v581_v14, 0.0  ;;  %v678_v25 = vmax.f32 %v582_v16, 0.0  ;;  %v583_v27 = vadd.f32 %v487_v1, %v391_v17  ;;  %v584_v28 = vadd.f32 %v488_v13, %v392_v18  ;;  %v1034_v13 = vld [vmem:[%s1997_s0 + $0x170] sm:$0xff]  }
  0x66   :  { %771 = vst [vmem:[%s2001_s4 + $0x250] sm:$0xff] %v675_v20  ;;  %v293_v29 = vmul.f32 %v1728_v15, %v959_v22  ;;  %v294_v30 = vmul.f32 %v1728_v15, %v960_v3  ;;  %v963_v31 = vunpack.c.l.bf16 %v1029_v19  ;;  %v964_v32 = vunpack.c.h.bf16 %v1029_v19  ;;  %v1035_v3 = vld [vmem:[%s1997_s0 + $0x178] sm:$0xff]  }
  0x67   :  { %772 = vst [vmem:[%s2001_s4 + $0x258] sm:$0xff] %v676_v21  ;;  %v679_v34 = vmax.f32 %v583_v27, 0.0  ;;  %v680_v35 = vmax.f32 %v584_v28, 0.0  ;;  %v967_v38 = vunpack.c.l.bf16 %v1030_v23  ;;  %v968_v39 = vunpack.c.h.bf16 %v1030_v23  ;;  %v498_v27 = vld [vmem:[%s2000_s1 + $0x2c8] sm:$0xff] }
  0x68   :  { %773 = vst [vmem:[%s2001_s4 + $0x260] sm:$0xff] %v677_v24  ;;  %v393_v40 = vadd.f32 %v1744_v26, %v293_v29  ;;  %v394_v41 = vadd.f32 %v1744_v26, %v294_v30  ;;  %v295_v42 = vmul.f32 %v1728_v15, %v963_v31  ;;  %v296_v43 = vmul.f32 %v1728_v15, %v964_v32 }
  0x69   :  { %774 = vst [vmem:[%s2001_s4 + $0x268] sm:$0xff] %v678_v25  ;;  %v297_v46 = vmul.f32 %v1728_v15, %v967_v38  ;;  %v298_v47 = vmul.f32 %v1728_v15, %v968_v39  ;;  %v971_v48 = vunpack.c.l.bf16 %v1031_v33  ;;  %v972_v49 = vunpack.c.h.bf16 %v1031_v33  ;;  %v497_v25 = vld [vmem:[%s2000_s1 + $0x2c0] sm:$0xff] }
  0x6a   :  { %775 = vst [vmem:[%s2001_s4 + $0x270] sm:$0xff] %v679_v34  ;;  %v585_v50 = vadd.f32 %v489_v36, %v393_v40  ;;  %v586_v51 = vadd.f32 %v490_v37, %v394_v41  ;;  %v395_v52 = vadd.f32 %v1744_v26, %v295_v42  ;;  %v396_v53 = vadd.f32 %v1744_v26, %v296_v43  ;;  %v499_v34 = vld [vmem:[%s2000_s1 + $0x2d0] sm:$0xff] }
  0x6b   :  { %776 = vst [vmem:[%s2001_s4 + $0x278] sm:$0xff] %v680_v35  ;;  %v397_v56 = vadd.f32 %v1744_v26, %v297_v46  ;;  %v398_v57 = vadd.f32 %v1744_v26, %v298_v47  ;;  %v299_v58 = vmul.f32 %v1728_v15, %v971_v48  ;;  %v300_v59 = vmul.f32 %v1728_v15, %v972_v49  ;;  %v500_v35 = vld [vmem:[%s2000_s1 + $0x2d8] sm:$0xff] }
  0x6c   :  { %v681_v61 = vmax.f32 %v585_v50, 0.0  ;;  %v682_v62 = vmax.f32 %v586_v51, 0.0  ;;  %v587_v63 = vadd.f32 %v491_v44, %v395_v52  ;;  %v588_v0 = vadd.f32 %v492_v45, %v396_v53  ;;  %v501_v44 = vld [vmem:[%s2000_s1 + $0x2e0] sm:$0xff]  ;;  %v502_v45 = vld [vmem:[%s2000_s1 + $0x2e8] sm:$0xff] }
  0x6d   :  { %v589_v5 = vadd.f32 %v493_v54, %v397_v56  ;;  %v590_v6 = vadd.f32 %v494_v55, %v398_v57  ;;  %v399_v7 = vadd.f32 %v1744_v26, %v299_v58  ;;  %v400_v8 = vadd.f32 %v1744_v26, %v300_v59  ;;  %v503_v54 = vld [vmem:[%s2000_s1 + $0x2f0] sm:$0xff]  ;;  %v504_v55 = vld [vmem:[%s2000_s1 + $0x2f8] sm:$0xff] }
  0x6e   :  { %777 = vst [vmem:[%s2001_s4 + $0x280] sm:$0xff] %v681_v61  ;;  %v683_v10 = vmax.f32 %v587_v63, 0.0  ;;  %v684_v11 = vmax.f32 %v588_v0, 0.0  ;;  %v975_v12 = vunpack.c.l.bf16 %v1032_v60  ;;  %v976_v1 = vunpack.c.h.bf16 %v1032_v60 }
  0x6f   :  { %778 = vst [vmem:[%s2001_s4 + $0x288] sm:$0xff] %v682_v62  ;;  %v685_v14 = vmax.f32 %v589_v5, 0.0  ;;  %v686_v16 = vmax.f32 %v590_v6, 0.0  ;;  %v591_v17 = vadd.f32 %v495_v2, %v399_v7  ;;  %v592_v18 = vadd.f32 %v496_v4, %v400_v8 }
  0x70   :  { %779 = vst [vmem:[%s2001_s4 + $0x290] sm:$0xff] %v683_v10  ;;  %v301_v19 = vmul.f32 %v1728_v15, %v975_v12  ;;  %v302_v20 = vmul.f32 %v1728_v15, %v976_v1  ;;  %v979_v21 = vunpack.c.l.bf16 %v1033_v9  ;;  %v980_v22 = vunpack.c.h.bf16 %v1033_v9 }
  0x71   :  { %780 = vst [vmem:[%s2001_s4 + $0x298] sm:$0xff] %v684_v11  ;;  %v687_v23 = vmax.f32 %v591_v17, 0.0  ;;  %v688_v24 = vmax.f32 %v592_v18, 0.0  ;;  %v983_v28 = vunpack.c.l.bf16 %v1034_v13  ;;  %v984_v29 = vunpack.c.h.bf16 %v1034_v13 }
  0x72   :  { %781 = vst [vmem:[%s2001_s4 + $0x2a0] sm:$0xff] %v685_v14  ;;  %v401_v30 = vadd.f32 %v1744_v26, %v301_v19  ;;  %v402_v31 = vadd.f32 %v1744_v26, %v302_v20  ;;  %v303_v32 = vmul.f32 %v1728_v15, %v979_v21  ;;  %v304_v33 = vmul.f32 %v1728_v15, %v980_v22 }
  0x73   :  { %782 = vst [vmem:[%s2001_s4 + $0x2a8] sm:$0xff] %v686_v16  ;;  %v305_v36 = vmul.f32 %v1728_v15, %v983_v28  ;;  %v306_v37 = vmul.f32 %v1728_v15, %v984_v29  ;;  %v987_v38 = vunpack.c.l.bf16 %v1035_v3  ;;  %v988_v39 = vunpack.c.h.bf16 %v1035_v3 }
  0x74   :  { %783 = vst [vmem:[%s2001_s4 + $0x2b0] sm:$0xff] %v687_v23  ;;  %v593_v40 = vadd.f32 %v497_v25, %v401_v30  ;;  %v594_v41 = vadd.f32 %v498_v27, %v402_v31  ;;  %v403_v42 = vadd.f32 %v1744_v26, %v303_v32  ;;  %v404_v43 = vadd.f32 %v1744_v26, %v304_v33 }
  0x75   :  { %784 = vst [vmem:[%s2001_s4 + $0x2b8] sm:$0xff] %v688_v24  ;;  %v405_v46 = vadd.f32 %v1744_v26, %v305_v36  ;;  %v406_v47 = vadd.f32 %v1744_v26, %v306_v37  ;;  %v307_v48 = vmul.f32 %v1728_v15, %v987_v38  ;;  %v308_v49 = vmul.f32 %v1728_v15, %v988_v39 }
  0x76   :  { %v689_v50 = vmax.f32 %v593_v40, 0.0  ;;  %v690_v51 = vmax.f32 %v594_v41, 0.0  ;;  %v595_v52 = vadd.f32 %v499_v34, %v403_v42  ;;  %v596_v53 = vadd.f32 %v500_v35, %v404_v43 }
  0x77   :  { %v597_v56 = vadd.f32 %v501_v44, %v405_v46  ;;  %v598_v57 = vadd.f32 %v502_v45, %v406_v47  ;;  %v407_v58 = vadd.f32 %v1744_v26, %v307_v48  ;;  %v408_v59 = vadd.f32 %v1744_v26, %v308_v49 }
  0x78   :  { %785 = vst [vmem:[%s2001_s4 + $0x2c0] sm:$0xff] %v689_v50  ;;  %v691_v15 = vmax.f32 %v595_v52, 0.0  ;;  %v692_v60 = vmax.f32 %v596_v53, 0.0 }
  0x79   :  { %786 = vst [vmem:[%s2001_s4 + $0x2c8] sm:$0xff] %v690_v51  ;;  %v693_v61 = vmax.f32 %v597_v56, 0.0  ;;  %v694_v62 = vmax.f32 %v598_v57, 0.0  ;;  %v599_v63 = vadd.f32 %v503_v54, %v407_v58  ;;  %v600_v0 = vadd.f32 %v504_v55, %v408_v59 }
  0x7a   :  { %787 = vst [vmem:[%s2001_s4 + $0x2d0] sm:$0xff] %v691_v15 }
  0x7b   :  { %788 = vst [vmem:[%s2001_s4 + $0x2d8] sm:$0xff] %v692_v60  ;;  %v695_v26 = vmax.f32 %v599_v63, 0.0  ;;  %v696_v2 = vmax.f32 %v600_v0, 0.0 }
  0x7c   :  { %789 = vst [vmem:[%s2001_s4 + $0x2e0] sm:$0xff] %v693_v61 }
  0x7d   :  { %790 = vst [vmem:[%s2001_s4 + $0x2e8] sm:$0xff] %v694_v62 }
  0x7e   :  { %791 = vst [vmem:[%s2001_s4 + $0x2f0] sm:$0xff] %v695_v26 }
  0x7f   :  { %792 = vst [vmem:[%s2001_s4 + $0x2f8] sm:$0xff] %v696_v2 }

// kernel: resnet_block_forward.4
= control target key start
LH: loop header
LB: loop body
LE: loop exit
PB: predicated region body
PF: predicated region fallthrough
CT: control target
= control target key end

     0   :  { %s7536_s27 = smov 0   ;;  %s7538_s28 = smov 0   ;;  %s11199_s0 = inlined_call_operand.vmem [shape: bf16[2,432,12], index: 0, kind: input, shape index: {}]   ;;  %s11200_s1 = inlined_call_operand.vmem [shape: bf16[36,128], index: 1, kind: input, shape index: {}]   ;;  %s11201_s2 = inlined_call_operand.vmem [shape: f32[1,128], index: 2, kind: input, shape index: {}]   ;;  %s11202_s3 = inlined_call_operand.vmem [shape: f32[1,128], index: 3, kind: input, shape index: {}]   ;;  %s11203_s4 = inlined_call_operand.vmem [shape: bf16[1152,128], index: 4, kind: input, shape index: {}]   ;;  %s11204_s5 = inlined_call_operand.vmem [shape: f32[384,1], index: 5, kind: input, shape index: {}]   ;;  %s11205_s6 = inlined_call_operand.vmem [shape: bf16[2,384,128], index: 6, kind: output, shape index: {0}]   ;;  %s11206_s7 = inlined_call_operand.vmem [shape: f32[16,128], index: 7, kind: output, shape index: {1}]   ;;  %s11207_s8 = inlined_call_operand.vmem [shape: f32[16,128], index: 8, kind: output, shape index: {2}]  }
   0x1   :  { %s7540_s29 = smov 0  }
   0x2 LB: > { %s31_s30 = sadd.s32 1, %s7482_s28  ;;  %p6154_p0 = scmp.ge.s32.totalorder %s7486_s29, 1  ;;  %s7486_s29 = sphi %s7540_s29, %s19_s29   ;;  %s7482_s28 = sphi %s7538_s28, %s12039_s28   ;;  %s7478_s27 = sphi %s7536_s27, %s12038_s27  }
   0x3   : > { %p33_p1 = scmp.ge.s32.totalorder %s31_s30, 2  ;;  %p285_p2 = scmp.lt.s32.totalorder %s7486_s29, 3 }
   0x5   : > { %s12041_s30 = smov (%p33_p1, %s31_s30), 0  ;;  %p286_p3 = pnand %p6154_p0, %p285_p2 }
   0x7   : > { %289 = sbr.rel (%p286_p3) target bundleno = 1599 (0x63f), region = 44 }
   0xc   : > { %p330_p4 = scmp.lt.s32.totalorder %s7478_s27, 1  ;;  %s7488_s13 = smov 12   ;;  %v11208_v27 = vmov 0   ;;  %v787_v32 = vld [vmem:[%s11200_s1 + $0x10] sm:$0x3]  ;;  %vm852_vm0 = vcmask 1041408  }
   0xd   : > { %s7489_s14 = smov 24   ;;  %7432 = vset.pattern.permute.xlu2 %v11208_v27  ;;  %1477 = vst [vmem:[#allocation2] sm:$0xff] %v11208_v27  ;;  %7431 = vset.pattern.permute.xlu1 %v11208_v27  ;;  %v797_v35 = vunpack.c.l.b16 %v787_v32  ;;  %v6804_v39 = vld [vmem:[%s11200_s1 + $0x8] sm:$0xff]  ;;  %v6803_v42 = vld [vmem:[%s11200_s1] sm:$0xff]  ;;  %v1159_v54 = vld [vmem:[%s11204_s5 + $0xb0] sm:$0xff]  ;;  %vm661_vm1 = vcmask 97280  }
   0xe   : > { %s12043_s27 = smov (!%p330_p4, %s7478_s27), 1  ;;  %1478 = vst [vmem:[#allocation2 + $0x8] sm:$0xf] %v11208_v27  ;;  %7433 = vset.pattern.permute.xlu0 %v11208_v27  ;;  %v1158_v48 = vld [vmem:[%s11204_s5 + $0xa8] sm:$0xff]  ;;  %v1157_v49 = vld [vmem:[%s11204_s5 + $0xa0] sm:$0xff]  ;;  %v1160_v59 = vld [vmem:[%s11204_s5 + $0xb8] sm:$0xff] }
   0xf   : > { %s7402_s9 = smul.u32 216, %s12043_s27  ;;  %1479 = vst [vmem:[#allocation2 + $0xc] sm:$0xff] %v11208_v27  ;;  %v800_v36 = vpack.c.b16 %v797_v35, %v797_v35  ;;  %v1161_v58 = vld [vmem:[%s11204_s5 + $0xc0] sm:$0xff]  ;;  %vm734_vm2 = vcmask 195584   ;;  %vm803_vm3 = vcmask 293888   ;;  %v7856_v32 = vld [vmem:[%s11204_s5 + $0x8] sm:$0xff] }
  0x10   : > { %1480 = vst [vmem:[#allocation2 + $0x14] sm:$0xf] %v11208_v27  ;;  %vm2116_vm4 = vcmask 1043456   ;;  %vm2222_vm5 = vsmask.f32 3328  ;;  %vm2513_vm7 = vcmask 1043459  }
  0x11   : > { %s7560_s12 = scalar_lea.vmem %s11199_s0, %s7402_s9  ;;  %1482 = vst [vmem:[#allocation2 + $0x20] sm:$0xf] %v11208_v27  ;;  %v854_v37 = vsel %vm852_vm0, %v800_v36, 0  ;;  %vm8202_vm6 = vmand %vm2116_vm4, %vm2222_vm5  ;;  %vm2514_vm8 = vsmask.f32 7950  ;;  %s7403_s10 = smul.u32 192, %s12043_s27 }
  0x12   : > { %v7339_v0 = vld [vmem:[%s7560_s12 + $0x1c] sm:$0xff]   ;;  %v7337_v1 = vld [vmem:[%s7560_s12 + $0x14] sm:$0xff]   ;;  %v7335_v2 = vld [vmem:[%s7560_s12 + $0xc] sm:$0xff]   ;;  %1483 = vst [vmem:[#allocation2 + $0x24] sm:$0xff] %v11208_v27  ;;  %861 = vmatpush.bf16.msra.mxu0 %v854_v37  ;;  %7387 = vmatpush.bf16.msra.mxu3 %v854_v37  ;;  %vm2117_vm9 = vsmask.f32 7938 }
  0x13   : > { %560 = vrot.lane.b32.xlu2 %v7339_v0, %s7488_s13  ;;  %558 = vrot.lane.b32.xlu1 %v7337_v1, %s7488_s13  ;;  %v7569_v3 = vld [vmem:[%s7560_s12 + $0x28] sm:$0xff]   ;;  %v7572_v4 = vld [vmem:[%s7560_s12 + $0x20] sm:$0xff]   ;;  %1484 = vst [vmem:[#allocation2 + $0x2c] sm:$0xf] %v11208_v27  ;;  %vm8270_vm10 = vmand %vm2513_vm7, %vm2514_vm8  ;;  %vm2223_vm12 = vsmask.f32 7440  ;;  %s10749_s15 = scalar_lea.vmem %s11205_s6, %s7403_s10 }
  0x14   : > { %556 = vrot.lane.b32.xlu0 %v7335_v2, %s7488_s13  ;;  %v7575_v5 = vld [vmem:[%s7560_s12 + $0x18] sm:$0xff]   ;;  %v7343_v6 = vld [vmem:[%s7560_s12 + $0x2c] sm:$0xff]   ;;  %v7341_v8 = vld [vmem:[%s7560_s12 + $0x24] sm:$0xff]   ;;  %1485 = vst [vmem:[#allocation2 + $0x30] sm:$0xff] %v11208_v27  ;;  %vm1633_vm13 = vsmask.f32 256 }
  0x15   : > { %v7585_v7 = vld [vmem:[%s7560_s12 + $0x30] sm:$0xff]   ;;  %v7594_v10 = vld [vmem:[%s7560_s12 + $0x40] sm:$0xff]   ;;  %v7597_v11 = vld [vmem:[%s7560_s12 + $0x38] sm:$0xff]   ;;  %1486 = vst [vmem:[#allocation2 + $0x38] sm:$0xf] %v11208_v27  ;;  %s6157_s16 = sshll.u32 %s12043_s27, 3 }
  0x16   : > { %v7345_v9 = vld [vmem:[%s7560_s12 + $0x34] sm:$0xff]   ;;  %v7349_v12 = vld [vmem:[%s7560_s12 + $0x44] sm:$0xff]   ;;  %v7347_v14 = vld [vmem:[%s7560_s12 + $0x3c] sm:$0xff]   ;;  %1487 = vst [vmem:[#allocation2 + $0x3c] sm:$0xff] %v11208_v27  ;;  %862 = vmatpush.bf16.msra.mxu0 %v6804_v39  ;;  %7388 = vmatpush.bf16.msra.mxu3 %v6804_v39  ;;  %vm1634_vm14 = vsmask.f32 4368  ;;  %s346_s19 = scalar_lea.vmem %s11206_s7, %s6157_s16  ;;  %s350_s22 = scalar_lea.vmem %s11207_s8, %s6157_s16 }
  0x17   : > { %v7606_v13 = vld [vmem:[%s7560_s12 + $0x48] sm:$0xff]   ;;  %v7185_v16 = vld [vmem:[%s7560_s12 + $0x58] sm:$0xff]   ;;  %v7184_v17 = vld [vmem:[%s7560_s12 + $0x50] sm:$0xff]   ;;  %1488 = vst [vmem:[#allocation2 + $0x44] sm:$0xf] %v11208_v27 }
  0x18   : > { %v7351_v15 = vld [vmem:[%s7560_s12 + $0x4c] sm:$0xff]   ;;  %v7355_v18 = vld [vmem:[%s7560_s12 + $0x5c] sm:$0xff]   ;;  %v7353_v20 = vld [vmem:[%s7560_s12 + $0x54] sm:$0xff]   ;;  %1489 = vst [vmem:[#allocation2 + $0x48] sm:$0xff] %v11208_v27 }
  0x19   : > { %v7186_v19 = vld [vmem:[%s7560_s12 + $0x60] sm:$0xff]   ;;  %v7627_v22 = vld [vmem:[%s7560_s12 + $0x70] sm:$0xff]   ;;  %v7630_v23 = vld [vmem:[%s7560_s12 + $0x68] sm:$0xff]   ;;  %1490 = vst [vmem:[#allocation2 + $0x50] sm:$0xf] %v11208_v27 }
  0x1a   : > { %v7357_v21 = vld [vmem:[%s7560_s12 + $0x64] sm:$0xff]   ;;  %v7361_v24 = vld [vmem:[%s7560_s12 + $0x74] sm:$0xff]   ;;  %v7359_v26 = vld [vmem:[%s7560_s12 + $0x6c] sm:$0xff]   ;;  %1491 = vst [vmem:[#allocation2 + $0x54] sm:$0xff] %v11208_v27  ;;  %863 = vmatpush.bf16.msra.mxu0 %v6803_v42  ;;  %7389 = vmatpush.bf16.msra.mxu3 %v6803_v42 }
  0x1b   : > { %617 = vrot.lane.b32.xlu2 %v7569_v3, %s7489_s14  ;;  %615 = vrot.lane.b32.xlu1 %v7572_v4, %s7489_s14  ;;  %v7639_v25 = vld [vmem:[%s7560_s12 + $0x78] sm:$0xff]   ;;  %v7653_v29 = vld [vmem:[%s7560_s12 + $0x88] sm:$0xff]   ;;  %1492 = vst [vmem:[#allocation2 + $0x5c] sm:$0xf] %v11208_v27  ;;  %vm8275_vm11 = vmand %vm2116_vm4, %vm2117_vm9 }
  0x1c   : > { %613 = vrot.lane.b32.xlu0 %v7575_v5, %s7489_s14  ;;  %v7363_v28 = vld [vmem:[%s7560_s12 + $0x7c] sm:$0xff]   ;;  %v7367_v31 = vld [vmem:[%s7560_s12 + $0x8c] sm:$0xff]   ;;  %v7365_v34 = vld [vmem:[%s7560_s12 + $0x84] sm:$0xff]   ;;  %1493 = vst [vmem:[#allocation2 + $0x60] sm:$0xff] %v11208_v27 }
  0x1d   : > { %v7657_v30 = vld [vmem:[%s7560_s12 + $0x80] sm:$0xff]   ;;  %v7675_v33 = vld [vmem:[%s7560_s12 + $0x90] sm:$0xff]   ;;  %1494 = vst [vmem:[#allocation2 + $0x68] sm:$0xf] %v11208_v27  ;;  %v7699_v41 = vld [vmem:[%s7560_s12 + $0x98] sm:$0xff]  }
  0x1e   : > { %v7369_v38 = vld [vmem:[%s7560_s12 + $0x94] sm:$0xff]   ;;  %v7695_v40 = vld [vmem:[%s7560_s12 + $0xa0] sm:$0xff]   ;;  %1495 = vst [vmem:[#allocation2 + $0x6c] sm:$0xff] %v11208_v27  ;;  %v7720_v45 = vld [vmem:[%s7560_s12 + $0xa8] sm:$0xff]  }
  0x1f   : > { %1496 = vst [vmem:[#allocation2 + $0x74] sm:$0xf] %v11208_v27  ;;  %v7373_v44 = vld [vmem:[%s7560_s12 + $0xa4] sm:$0xff]   ;;  %v7371_v46 = vld [vmem:[%s7560_s12 + $0x9c] sm:$0xff]   ;;  %v7746_v50 = vld [vmem:[%s7560_s12 + $0xb0] sm:$0xff]  }
  0x20   : > { %1497 = vst [vmem:[#allocation2 + $0x78] sm:$0xff] %v11208_v27  ;;  %v7375_v52 = vld [vmem:[%s7560_s12 + $0xac] sm:$0xff]   ;;  %v7197_v53 = vld [vmem:[%s7560_s12 + $0xb8] sm:$0xff]   ;;  %v6801_v61 = vld [vmem:[%s7560_s12] sm:$0xff] }
  0x21   : > { %1498 = vst [vmem:[#allocation2 + $0x80] sm:$0xf] %v11208_v27  ;;  %v7376_v60 = vld [vmem:[%s7560_s12 + $0xb4] sm:$0xff]   ;;  %v1165_v39 = vld [vmem:[%s11204_s5 + $0xe0] sm:$0xff]  ;;  %vm8306_vm15 = vmor %vm2222_vm5, %vm2223_vm12 }
  0x22   : > { %1499 = vst [vmem:[#allocation2 + $0x84] sm:$0xff] %v11208_v27  ;;  %v7176_v42 = vld [vmem:[%s7560_s12 + $0x10] sm:$0xff]   ;;  %vm8318_vm0 = vmor %vm1633_vm13, %vm1634_vm14 }
  0x23   : > { %564 = vrot.lane.b32.xlu2 %v7343_v6, %s7488_s13  ;;  %619 = vrot.lane.b32.xlu1 %v7585_v7, %s7489_s14  ;;  %1500 = vst [vmem:[#allocation2 + $0x8c] sm:$0xf] %v11208_v27  ;;  %v7801_v6 = vld [vmem:[%s11204_s5] sm:$0xff] }
  0x24   : > { %562 = vrot.lane.b32.xlu0 %v7341_v8, %s7488_s13  ;;  %1501 = vst [vmem:[#allocation2 + $0x90] sm:$0xff] %v11208_v27  ;;  %v7198_v8 = vld [vmem:[%s7560_s12 + $0xc0] sm:$0xff]  }
  0x25   : > { %1502 = vst [vmem:[#allocation2 + $0x98] sm:$0xf] %v11208_v27 }
  0x26   : > { %1503 = vst [vmem:[#allocation2 + $0x9c] sm:$0xff] %v11208_v27 }
  0x27   : > { %1504 = vst [vmem:[#allocation2 + $0xa4] sm:$0xf] %v11208_v27 }
  0x28   : > { %1505 = vst [vmem:[#allocation2 + $0xa8] sm:$0xff] %v11208_v27 }
  0x29   : > { %1506 = vst [vmem:[#allocation2 + $0xb0] sm:$0xf] %v11208_v27 }
  0x2a   : > { %1507 = vst [vmem:[#allocation2 + $0xb4] sm:$0xff] %v11208_v27 }
  0x2b   : > { %623 = vrot.lane.b32.xlu2 %v7594_v10, %s7489_s14  ;;  %566 = vrot.lane.b32.xlu1 %v7345_v9, %s7488_s13  ;;  %1508 = vst [vmem:[#allocation2 + $0xbc] sm:$0xf] %v11208_v27  ;;  %v1162_v9 = vld [vmem:[%s11204_s5 + $0xc8] sm:$0xff] }
  0x2c   : > { %621 = vrot.lane.b32.xlu0 %v7597_v11, %s7489_s14  ;;  %1509 = vst [vmem:[#allocation2 + $0xc0] sm:$0xff] %v11208_v27 }
  0x2d   : > { %1510 = vst [vmem:[#allocation2 + $0xc8] sm:$0xf] %v11208_v27 }
  0x2e   : > { %1511 = vst [vmem:[#allocation2 + $0xcc] sm:$0xff] %v11208_v27 }
  0x2f   : > { %1512 = vst [vmem:[#allocation2 + $0xd4] sm:$0xf] %v11208_v27 }
  0x30   : > { %1513 = vst [vmem:[#allocation2 + $0xd8] sm:$0xff] %v11208_v27 }
  0x31   : > { %1514 = vst [vmem:[#allocation2 + $0xe0] sm:$0xf] %v11208_v27 }
  0x32   : > { %1515 = vst [vmem:[#allocation2 + $0xe4] sm:$0xff] %v11208_v27 }
  0x33   : > { %570 = vrot.lane.b32.xlu2 %v7349_v12, %s7488_s13  ;;  %625 = vrot.lane.b32.xlu1 %v7606_v13, %s7489_s14  ;;  %1516 = vst [vmem:[#allocation2 + $0xec] sm:$0xf] %v11208_v27 }
  0x34   : > { %568 = vrot.lane.b32.xlu0 %v7347_v14, %s7488_s13  ;;  %1517 = vst [vmem:[#allocation2 + $0xf0] sm:$0xff] %v11208_v27 }
  0x35   : > { %1518 = vst [vmem:[#allocation2 + $0xf8] sm:$0xf] %v11208_v27 }
  0x36   : > { %1519 = vst [vmem:[#allocation2 + $0xfc] sm:$0xff] %v11208_v27 }
  0x37   : > { %1520 = vst [vmem:[#allocation2 + $0x104] sm:$0xf] %v11208_v27 }
  0x38   : > { %1521 = vst [vmem:[#allocation2 + $0x108] sm:$0xff] %v11208_v27 }
  0x39   : > { %1522 = vst [vmem:[#allocation2 + $0x110] sm:$0xf] %v11208_v27 }
  0x3a   : > { %1523 = vst [vmem:[#allocation2 + $0x114] sm:$0xff] %v11208_v27 }
  0x3b   : > { %629 = vrot.lane.b32.xlu2 %v7185_v16, %s7489_s14  ;;  %572 = vrot.lane.b32.xlu1 %v7351_v15, %s7488_s13  ;;  %1524 = vst [vmem:[#allocation2 + $0x11c] sm:$0xf] %v11208_v27  ;;  %v7400_v16 = vld [vmem:[%s7560_s12 + $0xbc] sm:$0xff]  }
  0x3c   : > { %627 = vrot.lane.b32.xlu0 %v7184_v17, %s7489_s14  ;;  %1525 = vst [vmem:[#allocation2 + $0x120] sm:$0xff] %v11208_v27  ;;  %v1163_v17 = vld [vmem:[%s11204_s5 + $0xd0] sm:$0xff] }
  0x3d   : > { %1526 = vst [vmem:[#allocation2 + $0x128] sm:$0xf] %v11208_v27 }
  0x3e   : > { %1527 = vst [vmem:[#allocation2 + $0x12c] sm:$0xff] %v11208_v27 }
  0x3f   : > { %1528 = vst [vmem:[#allocation2 + $0x134] sm:$0xf] %v11208_v27 }
  0x40   : > { %1529 = vst [vmem:[#allocation2 + $0x138] sm:$0xff] %v11208_v27 }
  0x41   : > { %1530 = vst [vmem:[#allocation2 + $0x140] sm:$0xf] %v11208_v27 }
  0x42   : > { %1531 = vst [vmem:[#allocation2 + $0x144] sm:$0xff] %v11208_v27 }
  0x43   : > { %576 = vrot.lane.b32.xlu2 %v7355_v18, %s7488_s13  ;;  %631 = vrot.lane.b32.xlu1 %v7186_v19, %s7489_s14  ;;  %1532 = vst [vmem:[#allocation2 + $0x14c] sm:$0xf] %v11208_v27  ;;  %v7175_v18 = vld [vmem:[%s7560_s12 + $0x8] sm:$0xff]  }
  0x44   : > { %574 = vrot.lane.b32.xlu0 %v7353_v20, %s7488_s13  ;;  %1533 = vst [vmem:[#allocation2 + $0x150] sm:$0xff] %v11208_v27  ;;  %v7199_v19 = vld [vmem:[%s7560_s12 + $0xc8] sm:$0xff]  }
  0x45   : > { %1534 = vst [vmem:[#allocation2 + $0x158] sm:$0xf] %v11208_v27 }
  0x46   : > { %1535 = vst [vmem:[#allocation2 + $0x15c] sm:$0xff] %v11208_v27 }
  0x47   : > { %1536 = vst [vmem:[#allocation2 + $0x164] sm:$0xf] %v11208_v27 }
  0x48   : > { %1537 = vst [vmem:[#allocation2 + $0x168] sm:$0xff] %v11208_v27 }
  0x49   : > { %1538 = vst [vmem:[#allocation2 + $0x170] sm:$0xf] %v11208_v27 }
  0x4a   : > { %1539 = vst [vmem:[#allocation2 + $0x174] sm:$0xff] %v11208_v27 }
  0x4b   : > { %635 = vrot.lane.b32.xlu2 %v7627_v22, %s7489_s14  ;;  %578 = vrot.lane.b32.xlu1 %v7357_v21, %s7488_s13  ;;  %1540 = vst [vmem:[#allocation2 + $0x17c] sm:$0xf] %v11208_v27 }
  0x4c   : > { %633 = vrot.lane.b32.xlu0 %v7630_v23, %s7489_s14  ;;  %1541 = vst [vmem:[#allocation2 + $0x180] sm:$0xff] %v11208_v27 }
  0x4d   : > { %1542 = vst [vmem:[#allocation2 + $0x188] sm:$0xf] %v11208_v27 }
  0x4e   : > { %1543 = vst [vmem:[#allocation2 + $0x18c] sm:$0xff] %v11208_v27 }
  0x4f   : > { %1544 = vst [vmem:[#allocation2 + $0x194] sm:$0xf] %v11208_v27 }
  0x50   : > { %1545 = vst [vmem:[#allocation2 + $0x198] sm:$0xff] %v11208_v27 }
  0x51   : > { %1546 = vst [vmem:[#allocation2 + $0x1a0] sm:$0xf] %v11208_v27 }
  0x52   : > { %1547 = vst [vmem:[#allocation2 + $0x1a4] sm:$0xff] %v11208_v27 }
  0x53   : > { %582 = vrot.lane.b32.xlu2 %v7361_v24, %s7488_s13  ;;  %637 = vrot.lane.b32.xlu1 %v7639_v25, %s7489_s14  ;;  %1548 = vst [vmem:[#allocation2 + $0x1ac] sm:$0xf] %v11208_v27 }
  0x54   : > { %580 = vrot.lane.b32.xlu0 %v7359_v26, %s7488_s13  ;;  %1549 = vst [vmem:[#allocation2 + $0x1b0] sm:$0xff] %v11208_v27 }
  0x55   : > { %1550 = vst [vmem:[#allocation2 + $0x1b8] sm:$0xf] %v11208_v27 }
  0x56   : > { %1551 = vst [vmem:[#allocation2 + $0x1bc] sm:$0xff] %v11208_v27 }
  0x57   : > { %1552 = vst [vmem:[#allocation2 + $0x1c4] sm:$0xf] %v11208_v27 }
  0x58   : > { %1553 = vst [vmem:[#allocation2 + $0x1c8] sm:$0xff] %v11208_v27 }
  0x59   : > { %1554 = vst [vmem:[#allocation2 + $0x1d0] sm:$0xf] %v11208_v27 }
  0x5a   : > { %1555 = vst [vmem:[#allocation2 + $0x1d4] sm:$0xff] %v11208_v27 }
  0x5b   : > { %641 = vrot.lane.b32.xlu2 %v7653_v29, %s7489_s14  ;;  %584 = vrot.lane.b32.xlu1 %v7363_v28, %s7488_s13  ;;  %1556 = vst [vmem:[#allocation2 + $0x1dc] sm:$0xf] %v11208_v27 }
  0x5c   : > { %639 = vrot.lane.b32.xlu0 %v7657_v30, %s7489_s14  ;;  %1557 = vst [vmem:[#allocation2 + $0x1e0] sm:$0xff] %v11208_v27 }
  0x5d   : > { %1558 = vst [vmem:[#allocation2 + $0x1e8] sm:$0xf] %v11208_v27 }
  0x5e   : > { %1559 = vst [vmem:[#allocation2 + $0x1ec] sm:$0xff] %v11208_v27 }
  0x5f   : > { %1560 = vst [vmem:[#allocation2 + $0x1f4] sm:$0xf] %v11208_v27 }
  0x60   : > { %1561 = vst [vmem:[#allocation2 + $0x1f8] sm:$0xff] %v11208_v27 }
  0x61   : > { %1562 = vst [vmem:[#allocation2 + $0x200] sm:$0xf] %v11208_v27 }
  0x62   : > { %1563 = vst [vmem:[#allocation2 + $0x204] sm:$0xff] %v11208_v27 }
  0x63   : > { %588 = vrot.lane.b32.xlu2 %v7367_v31, %s7488_s13  ;;  %643 = vrot.lane.b32.xlu1 %v7675_v33, %s7489_s14  ;;  %v7851_v31 = vld [vmem:[%s11204_s5 + $0x10] sm:$0xff]  ;;  %1564 = vst [vmem:[#allocation2 + $0x20c] sm:$0xf] %v11208_v27 }
  0x64   : > { %586 = vrot.lane.b32.xlu0 %v7365_v34, %s7488_s13  ;;  %v1164_v34 = vld [vmem:[%s11204_s5 + $0xd8] sm:$0xff]  ;;  %1565 = vst [vmem:[#allocation2 + $0x210] sm:$0xff] %v11208_v27 }
  0x65   : > { %1566 = vst [vmem:[#allocation2 + $0x218] sm:$0xf] %v11208_v27 }
  0x66   : > { %1567 = vst [vmem:[#allocation2 + $0x21c] sm:$0xff] %v11208_v27 }
  0x67   : > { %1568 = vst [vmem:[#allocation2 + $0x224] sm:$0xf] %v11208_v27 }
  0x68   : > { %1569 = vst [vmem:[#allocation2 + $0x228] sm:$0xff] %v11208_v27 }
  0x69   : > { %1570 = vst [vmem:[#allocation2 + $0x230] sm:$0xf] %v11208_v27 }
  0x6a   : > { %1571 = vst [vmem:[#allocation2 + $0x234] sm:$0xff] %v11208_v27 }
  0x6b   : > { %647 = vrot.lane.b32.xlu2 %v7695_v40, %s7489_s14  ;;  %590 = vrot.lane.b32.xlu1 %v7369_v38, %s7488_s13  ;;  %v7880_v38 = vld [vmem:[%s11204_s5 + $0x18] sm:$0xff]  ;;  %1572 = vst [vmem:[#allocation2 + $0x23c] sm:$0xf] %v11208_v27 }
  0x6c   : > { %645 = vrot.lane.b32.xlu0 %v7699_v41, %s7489_s14  ;;  %1573 = vst [vmem:[#allocation2 + $0x240] sm:$0xff] %v11208_v27 }
  0x6d   : > { %v7713_v43 = vpop.permute.xlu2 %560  ;;  %1574 = vst [vmem:[#allocation2 + $0x248] sm:$0xf] %v11208_v27 }
  0x6e   : > { %1575 = vst [vmem:[#allocation2 + $0x24c] sm:$0xff] %v11208_v27 }
  0x6f   : > { %1576 = vst [vmem:[#allocation2 + $0x254] sm:$0xf] %v11208_v27 }
  0x70   : > { %1577 = vst [vmem:[#allocation2 + $0x258] sm:$0xff] %v11208_v27 }
  0x71   : > { %1578 = vst [vmem:[#allocation2 + $0x260] sm:$0xf] %v11208_v27 }
  0x72   : > { %1579 = vst [vmem:[#allocation2 + $0x264] sm:$0xff] %v11208_v27 }
  0x73   : > { %594 = vrot.lane.b32.xlu2 %v7373_v44, %s7488_s13  ;;  %649 = vrot.lane.b32.xlu1 %v7720_v45, %s7489_s14  ;;  %v7890_v44 = vld [vmem:[%s11204_s5 + $0x20] sm:$0xff]  ;;  %1580 = vst [vmem:[#allocation2 + $0x26c] sm:$0xf] %v11208_v27 }
  0x74   : > { %592 = vrot.lane.b32.xlu0 %v7371_v46, %s7488_s13  ;;  %v670_v46 = vsel %vm661_vm1, %v7176_v42, %v7713_v43  ;;  %v1167_v43 = vld [vmem:[%s11204_s5 + $0xf0] sm:$0xff]  ;;  %1581 = vst [vmem:[#allocation2 + $0x270] sm:$0xff] %v11208_v27 }
  0x75   : > { %v7732_v47 = vpop.permute.xlu2 %617  ;;  %1582 = vst [vmem:[#allocation2 + $0x278] sm:$0xf] %v11208_v27 }
  0x76   : > { %1583 = vst [vmem:[#allocation2 + $0x27c] sm:$0xff] %v11208_v27 }
  0x77   : > { %1584 = vst [vmem:[#allocation2 + $0x284] sm:$0xf] %v11208_v27 }
  0x7b   : > { %1292 = vperm.xlu2 %7432, %v1158_v48   ;;  %1287 = vperm.xlu1 %7431, %v1157_v49  }
  0x7c   : > { %651 = vrot.lane.b32.xlu0 %v7746_v50, %s7489_s14 }
  0x7d   : > { %v7754_v51 = vpop.permute.xlu2 %564 }
  0x83   : > { %653 = vrot.lane.b32.xlu2 %v7197_v53, %s7489_s14  ;;  %596 = vrot.lane.b32.xlu1 %v7375_v52, %s7488_s13  ;;  %v740_v53 = vsel %vm734_vm2, %v670_v46, %v7732_v47 }
  0x84   : > { %1297 = vperm.xlu0 %7433, %v1159_v54   ;;  %v1166_v54 = vld [vmem:[%s11204_s5 + $0xe8] sm:$0xff] }
  0x85   : > { %v7771_v55 = vpop.permute.xlu2 %623  ;;  %v559_v56 = vpop.permute.xlu1 %558 }
  0x86   : > { %v557_v57 = vpop.permute.xlu0 %556  ;;  %v667_v20 = vsel %vm661_vm1, %v7175_v18, %v559_v56  ;;  %v7922_v56 = vld [vmem:[%s11204_s5 + $0x28] sm:$0xff] }
  0x87   : > { %v664_v0 = vsel %vm661_vm1, %v6801_v61, %v557_v57  ;;  %v1169_v61 = vld [vmem:[%s11204_s5 + $0x100] sm:$0xff]  ;;  %v7995_v18 = vld [vmem:[%s11204_s5 + $0x48] sm:$0xff] }
  0x8b   : > { %1307 = vperm.xlu2 %7432, %v1161_v58   ;;  %1302 = vperm.xlu1 %7431, %v1160_v59   ;;  %v1168_v59 = vld [vmem:[%s11204_s5 + $0xf8] sm:$0xff] }
  0x8c   : > { %598 = vrot.lane.b32.xlu0 %v7376_v60, %s7488_s13  ;;  %v7944_v60 = vld [vmem:[%s11204_s5 + $0x30] sm:$0xff] }
  0x8d   : > { %v7790_v62 = vpop.permute.xlu2 %570  ;;  %v616_v63 = vpop.permute.xlu1 %615 }
  0x8e   : > { %v614_v1 = vpop.permute.xlu0 %613  ;;  %v738_v28 = vsel %vm734_vm2, %v667_v20, %v616_v63  ;;  %v8003_v20 = vld [vmem:[%s11204_s5 + $0x50] sm:$0xff] }
  0x8f   : > { %v736_v2 = vsel %vm734_vm2, %v664_v0, %v614_v1 }
  0x90   : > { %6175 = vmatmul.msk.bf16.vlgmr.msra.gmra.mxu0 %vm803_vm3, %v736_v2 }
  0x93   : > { %1187 = vperm.xlu2 %7432, %v7801_v6   ;;  %655 = vrot.lane.b32.xlu1 %v7198_v8, %s7489_s14  ;;  %v7973_v8 = vld [vmem:[%s11204_s5 + $0x40] sm:$0xff] }
  0x94   : > { %1312 = vperm.xlu0 %7433, %v1162_v9   ;;  %v7978_v9 = vld [vmem:[%s11204_s5 + $0x38] sm:$0xff] }
  0x95   : > { %v7814_v12 = vpop.permute.xlu2 %629  ;;  %v7816_v14 = vpop.permute.xlu1 %619 }
  0x96   : > { %v7819_v15 = vpop.permute.xlu0 %562 }
  0x97   : > { %v673_v63 = vsel %vm661_vm1, %v7575_v5, %v7819_v15 }
  0x98   : > { %v742_v2 = vsel %vm734_vm2, %v673_v63, %v7816_v14  ;;  %v1170_v14 = vld [vmem:[%s11204_s5 + $0x108] sm:$0xff]  ;;  %v1175_v63 = vld [vmem:[%s11204_s5 + $0x130] sm:$0xff] }
  0x9b   : > { %600 = vrot.lane.b32.xlu2 %v7400_v16, %s7488_s13  ;;  %1317 = vperm.xlu1 %7431, %v1163_v17  }
  0x9c   : > { %657 = vrot.lane.b32.xlu0 %v7199_v19, %s7489_s14  ;;  %v1171_v19 = vld [vmem:[%s11204_s5 + $0x110] sm:$0xff] }
  0x9d   : > { %v7837_v21 = vpop.permute.xlu2 %576  ;;  %v7839_v24 = vpop.permute.xlu1 %566 }
  0x9e   : > { %v7842_v26 = vpop.permute.xlu0 %621 }
  0xa0   : > { %6176 = vmatmul.msk.bf16.gmra.mxu0 %vm803_vm3, %v738_v28  ;;  %v676_v28 = vsel %vm661_vm1, %v7572_v4, %v7754_v51 }
  0xa3   : > { %1197 = vperm.xlu2 %7432, %v7851_v31   ;;  %1192 = vperm.xlu1 %7431, %v7856_v32  }
  0xa4   : > { %1322 = vperm.xlu0 %7433, %v1164_v34  }
  0xa5   : > { %v7868_v35 = vpop.permute.xlu2 %635  ;;  %v7870_v36 = vpop.permute.xlu1 %625 }
  0xa6   : > { %v7873_v37 = vpop.permute.xlu0 %568 }
  0xa7   : > { %v682_v34 = vsel %vm661_vm1, %v7585_v7, %v7873_v37  ;;  %v1172_v37 = vld [vmem:[%s11204_s5 + $0x118] sm:$0xff] }
  0xa8   : > { %v8022_v51 = vsel %vm734_vm2, %v682_v34, %v7870_v36 }
  0xab   : > { %1202 = vperm.xlu2 %7432, %v7880_v38   ;;  %1327 = vperm.xlu1 %7431, %v1165_v39  }
  0xac   : > { %1207 = vperm.xlu0 %7433, %v7890_v44  }
  0xad   : > { %v7900_v48 = vpop.permute.xlu2 %582  ;;  %v7902_v49 = vpop.permute.xlu1 %572 }
  0xae   : > { %v7905_v52 = vpop.permute.xlu0 %627  ;;  %v703_v39 = vsel %vm661_vm1, %v7630_v23, %v7900_v48  ;;  %v1173_v23 = vld [vmem:[%s11204_s5 + $0x120] sm:$0xff] }
  0xb0   : > { %6177 = vmatmul.msk.bf16.gmra.mxu0 %vm803_vm3, %v740_v53  ;;  %v744_v53 = vsel %vm734_vm2, %v676_v28, %v7842_v26  ;;  %v8036_v26 = vld [vmem:[%s11204_s5 + $0x58] sm:$0xff] }
  0xb3   : > { %1337 = vperm.xlu2 %7432, %v1167_v43   ;;  %1332 = vperm.xlu1 %7431, %v1166_v54   ;;  %v6890_v54 = vld [vmem:[%s11203_s4 + $0x38] sm:$0xff] }
  0xb4   : > { %1212 = vperm.xlu0 %7433, %v7922_v56   ;;  %4271 = vmatpush.bf16.msra.mxu1 %v6890_v54 }
  0xb5   : > { %v7929_v47 = vpop.permute.xlu2 %641  ;;  %v7931_v57 = vpop.permute.xlu1 %631  ;;  %7390 = vmatpush.bf16.msra.mxu2 %v6890_v54  ;;  %v8121_v54 = vld [vmem:[%s11204_s5 + $0x80] sm:$0xff] }
  0xb6   : > { %v7934_v58 = vpop.permute.xlu0 %574 }
  0xbb   : > { %1342 = vperm.xlu2 %7432, %v1168_v59   ;;  %1217 = vperm.xlu1 %7431, %v7944_v60   ;;  %v1174_v59 = vld [vmem:[%s11204_s5 + $0x128] sm:$0xff] }
  0xbc   : > { %1347 = vperm.xlu0 %7433, %v1169_v61   ;;  %v8050_v61 = vld [vmem:[%s11204_s5 + $0x60] sm:$0xff] }
  0xbd   : > { %v7958_v0 = vpop.permute.xlu2 %588  ;;  %v7960_v1 = vpop.permute.xlu1 %578 }
  0xbe   : > { %v7965_v5 = vpop.permute.xlu0 %633 }
  0xc0   : > { %6178 = vmatmul.msk.bf16.gmra.mxu0 %vm803_vm3, %v742_v2  ;;  %v679_v2 = vsel %vm661_vm1, %v7569_v3, %v7839_v24 }
  0xc3   : > { %1227 = vperm.xlu2 %7432, %v7973_v8   ;;  %1222 = vperm.xlu1 %7431, %v7978_v9  }
  0xc4   : > { %1352 = vperm.xlu0 %7433, %v1170_v14  }
  0xc5   : > { %v7986_v15 = vpop.permute.xlu2 %647  ;;  %v7988_v16 = vpop.permute.xlu1 %637 }
  0xc6   : > { %v7990_v17 = vpop.permute.xlu0 %580 }
  0xcb   : > { %1232 = vperm.xlu2 %7432, %v7995_v18   ;;  %1357 = vperm.xlu1 %7431, %v1171_v19   ;;  %v685_v19 = vsel %vm661_vm1, %v7597_v11, %v7790_v62  ;;  %v8091_v62 = vld [vmem:[%s11204_s5 + $0x68] sm:$0xff] }
  0xcc   : > { %1237 = vperm.xlu0 %7433, %v8003_v20   ;;  %v8079_v11 = vsel %vm734_vm2, %v685_v19, %v7905_v52  ;;  %v6888_v52 = vld [vmem:[%s11203_s4 + $0x28] sm:$0xff] }
  0xcd   : > { %v8016_v42 = vpop.permute.xlu2 %594  ;;  %v585_v46 = vpop.permute.xlu1 %584 }
  0xce   : > { %v640_v4 = vpop.permute.xlu0 %639  ;;  %v706_v14 = vsel %vm661_vm1, %v7627_v22, %v585_v46  ;;  %v6889_v22 = vld [vmem:[%s11203_s4 + $0x30] sm:$0xff] }
  0xcf   : > { %v762_v7 = vsel %vm734_vm2, %v703_v39, %v640_v4  ;;  %v746_v39 = vsel %vm734_vm2, %v679_v2, %v7771_v55  ;;  %v764_v3 = vsel %vm734_vm2, %v706_v14, %v7929_v47  ;;  %v8086_v55 = vld [vmem:[%s11204_s5 + $0x70] sm:$0xff]  ;;  %v1176_v47 = vld [vmem:[%s11204_s5 + $0x138] sm:$0xff]  ;;  %4272 = vmatpush.bf16.msra.mxu1 %v6889_v22  ;;  %7391 = vmatpush.bf16.msra.mxu2 %v6889_v22 }
  0xd0   : > { %6179 = vmatmul.msk.bf16.gmra.mxu0 %vm803_vm3, %v744_v53  ;;  %6188 = vmatmul.msk.bf16.vlgmr.msra.gmra.mxu3 %vm803_vm3, %v762_v7  ;;  %v6887_v7 = vld [vmem:[%s11203_s4 + $0x20] sm:$0xff] }
  0xd3   : > { %1367 = vperm.xlu2 %7432, %v1173_v23   ;;  %1362 = vperm.xlu1 %7431, %v1172_v37   ;;  %v8113_v23 = vld [vmem:[%s11204_s5 + $0x78] sm:$0xff]  ;;  %v1177_v37 = vld [vmem:[%s11204_s5 + $0x140] sm:$0xff] }
  0xd4   : > { %1242 = vperm.xlu0 %7433, %v8036_v26   ;;  %4273 = vmatpush.bf16.msra.mxu1 %v6888_v52 }
  0xd5   : > { %v8039_v36 = vpop.permute.xlu2 %1292  ;;  %v644_v48 = vpop.permute.xlu1 %643  ;;  %7392 = vmatpush.bf16.msra.mxu2 %v6888_v52 }
  0xd6   : > { %11310 = vst [vmem:[#allocation3_spill] sm:$0xff] %v8039_v36  ;;  %v587_v43 = vpop.permute.xlu0 %586 }
  0xd8   : > { %4274 = vmatpush.bf16.msra.mxu1 %v6887_v7 }
  0xd9   : > { %7393 = vmatpush.bf16.msra.mxu2 %v6887_v7  ;;  %v6883_v7 = vld [vmem:[%s11203_s4] sm:$0xff] }
  0xdb   : > { %1372 = vperm.xlu2 %7432, %v1174_v59   ;;  %1247 = vperm.xlu1 %7431, %v8050_v61   ;;  %v6886_v59 = vld [vmem:[%s11203_s4 + $0x18] sm:$0xff] }
  0xdc   : > { %1377 = vperm.xlu0 %7433, %v1175_v63   ;;  %v709_v63 = vsel %vm661_vm1, %v7639_v25, %v587_v43  ;;  %4275 = vmatpush.bf16.msra.mxu1 %v6886_v59  ;;  %v1179_v25 = vld [vmem:[%s11204_s5 + $0x150] sm:$0xff]  ;;  %v8152_v43 = vld [vmem:[%s11204_s5 + $0x88] sm:$0xff] }
  0xdd   : > { %v8064_v28 = vpop.permute.xlu2 %653  ;;  %v8066_v34 = vpop.permute.xlu1 %590  ;;  %v766_v19 = vsel %vm734_vm2, %v709_v63, %v644_v48  ;;  %7394 = vmatpush.bf16.msra.mxu2 %v6886_v59  ;;  %v1178_v48 = vld [vmem:[%s11204_s5 + $0x148] sm:$0xff]  ;;  %v8173_v59 = vld [vmem:[%s11204_s5 + $0x90] sm:$0xff]  ;;  %v1181_v63 = vld [vmem:[%s11204_s5 + $0x160] sm:$0xff] }
  0xde   : > { %v8072_v24 = vpop.permute.xlu0 %645 }
  0xe0   : > { %6180 = vmatmul.msk.bf16.gmra.mxu0 %vm803_vm3, %v746_v39  ;;  %6189 = vmatmul.msk.bf16.gmra.mxu3 %vm803_vm3, %v764_v3  ;;  %v6885_v3 = vld [vmem:[%s11203_s4 + $0x10] sm:$0xff] }
  0xe1   : > { %4276 = vmatpush.bf16.msra.mxu1 %v6885_v3  ;;  %7395 = vmatpush.bf16.msra.mxu2 %v6885_v3  ;;  %v6806_v3 = vld [vmem:[#allocation2 + $0x8] sm:$0xf0] }
  0xe3   : > { %1257 = vperm.xlu2 %7432, %v8086_v55   ;;  %1252 = vperm.xlu1 %7431, %v8091_v62  }
  0xe4   : > { %1382 = vperm.xlu0 %7433, %v1176_v47  }
  0xe5   : > { %v8101_v46 = vpop.permute.xlu2 %1307  ;;  %v8103_v53 = vpop.permute.xlu1 %649 }
  0xe6   : > { %11311 = vst [vmem:[#allocation4_spill] sm:$0xff] %v8101_v46  ;;  %v8105_v4 = vpop.permute.xlu0 %592 }
  0xeb   : > { %1262 = vperm.xlu2 %7432, %v8113_v23   ;;  %1387 = vperm.xlu1 %7431, %v1177_v37   ;;  %v1180_v37 = vld [vmem:[%s11204_s5 + $0x158] sm:$0xff] }
  0xec   : > { %1267 = vperm.xlu0 %7433, %v8121_v54  }
  0xed   : > { %v8130_v2 = vpop.permute.xlu2 %1187  ;;  %v8132_v14 = vpop.permute.xlu1 %1287 }
  0xee   : > { %v8135_v39 = vpop.permute.xlu0 %651 }
  0xf0   : > { %6181 = vmatmul.msk.bf16.gmra.mxu0 %vm803_vm3, %v8022_v51  ;;  %6190 = vmatmul.msk.bf16.gmra.mxu3 %vm803_vm3, %v766_v19  ;;  %v6884_v51 = vld [vmem:[%s11203_s4 + $0x8] sm:$0xff]  ;;  %v6201_v19 = vld [vmem:[#allocation2] sm:$0xf] }
  0xf1   : > { %4277 = vmatpush.bf16.msra.mxu1 %v6884_v51  ;;  %7396 = vmatpush.bf16.msra.mxu2 %v6884_v51 }
  0xf3   : > { %1397 = vperm.xlu2 %7432, %v1179_v25   ;;  %1392 = vperm.xlu1 %7431, %v1178_v48   ;;  %v712_v25 = vsel %vm661_vm1, %v7657_v30, %v7958_v0  ;;  %v6202_v48 = vor.u32 %v6806_v3, %v6201_v19  ;;  %v8197_v30 = vld [vmem:[%s11204_s5 + $0x98] sm:$0xff]  ;;  %v6802_v0 = vld [vmem:[%s7560_s12 + $0xd0] sm:$0xff]  ;;  %v1182_v19 = vld [vmem:[%s11204_s5 + $0x168] sm:$0xff] }
  0xf4   : > { %1272 = vperm.xlu0 %7433, %v8152_v43   ;;  %v768_v46 = vsel %vm734_vm2, %v712_v25, %v8072_v24  ;;  %v11314_v24 = vmov 0  ;;  %v1184_v3 = vld [vmem:[%s11204_s5 + $0x178] sm:$0xff]  ;;  %v688_v25 = vsel %vm661_vm1, %v7594_v10, %v7902_v49 }
  0xf5   : > { %v8158_v22 = vpop.permute.xlu2 %600  ;;  %v8160_v47 = vpop.permute.xlu1 %596  ;;  %4278 = vmatpush.bf16.msra.mxu1 %v6883_v7  ;;  %7397 = vmatpush.bf16.msra.mxu2 %v6883_v7  ;;  %v7401_v7 = vld [vmem:[%s7560_s12 + $0xc4] sm:$0xff]   ;;  %v11315_v24 = vsel %vm8202_vm6, 4294967295, %v11314_v24  ;;  %v752_v10 = vsel %vm734_vm2, %v688_v25, %v7814_v12 }
  0xf6   : > { %v8162_v52 = vpop.permute.xlu0 %1297  ;;  %11316 = vst [vmem:[#allocation7_spill] sm:$0xff] %v11315_v24 }
  0xf7   : > { %11312 = vst [vmem:[#allocation5_spill] sm:$0xff] %v8162_v52 }
  0xf8   : > { %4279 = vmatmul.bf16.vlgmr.msra.gmra.mxu1 %v6202_v48  ;;  %v715_v48 = vsel %vm661_vm1, %v7653_v29, %v8066_v34 }
  0xf9   : > { %v770_v29 = vsel %vm734_vm2, %v715_v48, %v7986_v15 }
  0xfb   : > { %1402 = vperm.xlu2 %7432, %v1180_v37   ;;  %1277 = vperm.xlu1 %7431, %v8173_v59  }
  0xfc   : > { %1407 = vperm.xlu0 %7433, %v1181_v63   ;;  %v1183_v63 = vld [vmem:[%s11204_s5 + $0x170] sm:$0xff] }
  0xfd   : > { %v8182_v51 = vpop.permute.xlu2 %1197  ;;  %v8184_v27 = vpop.permute.xlu1 %1302 }
  0xfe   : > { %11313 = vst [vmem:[#allocation6_spill] sm:$0xff] %v8184_v27  ;;  %v8188_v52 = vpop.permute.xlu0 %598 }
 0x100   : > { %6182 = vmatmul.msk.bf16.gmra.mxu0 %vm803_vm3, %v8079_v11  ;;  %6191 = vmatmul.msk.bf16.gmra.mxu3 %vm803_vm3, %v768_v46 }
 0x103   : > { %602 = vrot.lane.b32.xlu2 %v7401_v7, %s7488_s13  ;;  %1282 = vperm.xlu1 %7431, %v8197_v30   ;;  %v8233_v7 = vld [vmem:[%s11201_s2] ss:$0 sm:$0xff] }
 0x104   : > { %659 = vrot.lane.b32.xlu0 %v6802_v0, %s7489_s14  ;;  %v8238_v0 = vld [vmem:[%s11202_s3] ss:$0 sm:$0xff] }
 0x105   : > { %v8209_v11 = vpop.permute.xlu2 %1202  ;;  %v8213_v37 = vpop.permute.xlu1 %655 }
 0x106   : > { %v8211_v46 = vpop.permute.xlu0 %1312 }
 0x107   : > { %11317 = vst [vmem:[#allocation8_spill] sm:$0xff] %v8211_v46 }
 0x10b   : > { %1417 = vperm.xlu2 %7432, %v1183_v63   ;;  %1412 = vperm.xlu1 %7431, %v1182_v19  }
 0x10c   : > { %1422 = vperm.xlu0 %7433, %v1184_v3  }
 0x10d   : > { %v865_v24 = vpop.f32.mrf.mxu0  ;;  %v8240_v46 = vpop.permute.xlu2 %1337 }
 0x10e   : > { %v989_v49 = vmul.f32 %v8233_v7, %v865_v24  ;;  %v8247_v34 = vpop.permute.xlu0 %657  ;;  %v8252_v19 = vpop.permute.xlu1 %1317 }
 0x110   : > { %v1041_v63 = vadd.f32 %v8238_v0, %v989_v49  ;;  %6183 = vmatmul.msk.bf16.gmra.mxu0 %vm803_vm3, %v752_v10  ;;  %6192 = vmatmul.msk.bf16.gmra.mxu3 %vm803_vm3, %v770_v29 }
 0x112   : > { %v1089_v3 = vmax.f32 %v1041_v63, 0.0  ;;  %v2516_v63 = vld [vmem:[#allocation2 + $0x20] sm:$0x8] }
 0x113   : > { %5583 = vperm.xlu2 %7432, %v7856_v32   ;;  %5578 = vperm.xlu1 %7431, %v7801_v6   ;;  %v718_v32 = vsel %vm661_vm1, %v7675_v33, %v8105_v4 }
 0x114   : > { %v1425_v12 = vmul.f32 %v8130_v2, %v1089_v3  ;;  %5588 = vperm.xlu0 %7433, %v7851_v31   ;;  %v691_v31 = vsel %vm661_vm1, %v7606_v13, %v7934_v58 }
 0x115   : > { %v867_v15 = vpop.f32.mrf.mxu0  ;;  %v8258_v24 = vpop.permute.xlu2 %1342  ;;  %v754_v36 = vsel %vm734_vm2, %v691_v31, %v7931_v57 }
 0x116   : > { %v1585_v25 = vpack.c.bf16 %v1425_v12, %v1425_v12  ;;  %v990_v48 = vmul.f32 %v8233_v7, %v867_v15  ;;  %v8261_v10 = vpop.permute.xlu0 %1322  ;;  %v1193_v13 = vpop.permute.xlu1 %1192 }
 0x118   : > { %v1637_v29 = vshrl.u32 %v1585_v25, 16  ;;  %v1640_v49 = vshll.u32 %v1585_v25, 16  ;;  %2174 = vst [vmem:[#allocation2 + $0x28] sm:$0xf] %v1585_v25  ;;  %v1042_v6 = vadd.f32 %v8238_v0, %v990_v48  ;;  %v2119_v48 = vld [vmem:[#allocation2 + $0x24] sm:$0xf] }
 0x11a   : > { %v1639_v3 = vrot.slane %v1637_v29, 7  ;;  %v2225_v12 = vrot.slane %v1640_v49, 5  ;;  %v2226_v15 = vrot.slane %v1637_v29, 4  ;;  %v1090_v27 = vmax.f32 %v1042_v6, 0.0 }
 0x11b   : > { %5598 = vperm.xlu2 %7432, %v7890_v44   ;;  %5593 = vperm.xlu1 %7431, %v7880_v38   ;;  %v724_v29 = vsel %vm661_vm1, %v7695_v40, %v8160_v47  ;;  %v772_v38 = vsel %vm734_vm2, %v718_v32, %v8103_v53  ;;  %v6914_v53 = vld [vmem:[%s11203_s4 + $0xf8] sm:$0xff] }
 0x11c   : > { %v1642_v33 = vor.u32 %v1640_v49, %v1639_v3  ;;  %v2517_v58 = vsel %vm8270_vm10, %v2225_v12, %v2516_v63  ;;  %v1426_v4 = vmul.f32 %v1193_v13, %v1090_v27  ;;  %5603 = vperm.xlu0 %7433, %v7922_v56   ;;  %v2227_v49 = vor.u32 %v2226_v15, %v2225_v12 }
 0x11d   : > { %2518 = vst [vmem:[#allocation2 + $0x20] sm:$0x8] %v2517_v58  ;;  %v870_v6 = vpop.f32.mrf.mxu0  ;;  %v8296_v40 = vpop.permute.xlu2 %1227  ;;  %v8312_v32 = vsel %vm734_vm2, %v724_v29, %v8064_v28  ;;  %4658 = vmatpush.bf16.msrb.mxu0 %v6914_v53 }
 0x11e   : > { %v2120_v44 = vsel %vm8275_vm11, %v1642_v33, %v2119_v48  ;;  %v1586_v27 = vpack.c.bf16 %v1426_v4, %v1426_v4  ;;  %v991_v56 = vmul.f32 %v8233_v7, %v870_v6  ;;  %v8294_v2 = vpop.permute.xlu0 %1207  ;;  %v2228_v12 = vrot.slane %v2227_v49, 4  ;;  %v6913_v4 = vld [vmem:[%s11203_s4 + $0xf0] sm:$0xff] }
 0x11f   : > { %2121 = vst [vmem:[#allocation2 + $0x24] sm:$0xf] %v2120_v44  ;;  %v1643_v33 = vrot.slane %v1639_v3, 4 }
 0x120   : > { %v1645_v47 = vshrl.u32 %v1586_v27, 16  ;;  %v1648_v63 = vshll.u32 %v1586_v27, 16  ;;  %2175 = vst [vmem:[#allocation2 + $0x34] sm:$0xf] %v1586_v27  ;;  %v1043_v57 = vadd.f32 %v8238_v0, %v991_v56  ;;  %6184 = vmatmul.msk.bf16.gmra.mxu0 %vm803_vm3, %v754_v36  ;;  %6193 = vmatmul.msk.bf16.gmra.mxu3 %vm803_vm3, %v772_v38 }
 0x121   : > { %4659 = vmatpush.bf16.msrb.mxu0 %v6913_v4 }
 0x122   : > { %v8314_v15 = vrot.slane %v1645_v47, 7  ;;  %v2229_v36 = vrot.slane %v1648_v63, 5  ;;  %v1091_v25 = vmax.f32 %v1043_v57, 0.0  ;;  %v2231_v13 = vrot.slane %v1645_v47, 4  ;;  %v6912_v47 = vld [vmem:[%s11203_s4 + $0xe8] sm:$0xff] }
 0x123   : > { %5613 = vperm.xlu2 %7432, %v7978_v9   ;;  %5608 = vperm.xlu1 %7431, %v7944_v60   ;;  %v11326_v9 = vmov 0  }
 0x124   : > { %v1650_v28 = vor.u32 %v1648_v63, %v8314_v15  ;;  %v2230_v58 = vsel %vm8306_vm15, %v2228_v12, %v2229_v36  ;;  %5618 = vperm.xlu0 %7433, %v7973_v8   ;;  %v1427_v29 = vmul.f32 %v8182_v51, %v1091_v25  ;;  %v2870_v38 = vunpack.c.l.b16 %v11326_v9  ;;  %v7436_v63 = vld [vmem:[%s7560_s12 + $0x50] sm:$0xff]  }
 0x125   : > { %2519 = vst [vmem:[#allocation2 + $0x2c] sm:$0xf] %v2230_v58  ;;  %v872_v6 = vpop.f32.mrf.mxu0  ;;  %v2232_v8 = vor.u32 %v2231_v13, %v2229_v36  ;;  %v694_v57 = vsel %vm661_vm1, %v7436_v63, %v7837_v21  ;;  %v8348_v25 = vpop.permute.xlu2 %1232  ;;  %v721_v13 = vsel %vm661_vm1, %v7699_v41, %v8016_v42  ;;  %4660 = vmatpush.bf16.msrb.mxu0 %v6912_v47  ;;  %v1652_v41 = vrot.slane %v8314_v15, 4 }
 0x126   : > { %v1651_v60 = vsel %vm8318_vm0, %v1643_v33, %v1650_v28  ;;  %v992_v3 = vmul.f32 %v8233_v7, %v872_v6  ;;  %v8336_v44 = vpop.permute.xlu0 %1212  ;;  %v8338_v49 = vld [vmem:[#allocation2 + $0x24] sm:$0xff]  ;;  %v1587_v27 = vpack.c.bf16 %v1427_v29, %v1427_v29  ;;  %v756_v6 = vsel %vm734_vm2, %v694_v57, %v7965_v5 }
 0x127   : > { %2122 = vst [vmem:[#allocation2 + $0x30] sm:$0xf] %v1651_v60  ;;  %v2873_v56 = vunpack.c.l.b16 %v8338_v49  ;;  %v2233_v28 = vrot.slane %v2232_v8, 4  ;;  %v727_v5 = vsel %vm661_vm1, %v7720_v45, %v8188_v52  ;;  %v6910_v45 = vld [vmem:[%s11203_s4 + $0xd8] sm:$0xff] }
 0x128   : > { %v1044_v51 = vadd.f32 %v8238_v0, %v992_v3  ;;  %v1654_v53 = vshrl.u32 %v1587_v27, 16  ;;  %v1657_v12 = vshll.u32 %v1587_v27, 16  ;;  %2176 = vst [vmem:[#allocation2 + $0x40] sm:$0xf] %v1587_v27  ;;  %v8387_v52 = vsel %vm734_vm2, %v727_v5, %v8213_v37 }
 0x129   : > { %v3011_v36 = vpack.c.b16 %v2873_v56, %v2870_v38  ;;  %v8364_v38 = vpop.permute.xlu1 %1327 }
 0x12a   : > { %v1092_v33 = vmax.f32 %v1044_v51, 0.0  ;;  %v1656_v58 = vrot.slane %v1654_v53, 7  ;;  %v2234_v4 = vrot.slane %v1657_v12, 5  ;;  %v2236_v29 = vrot.slane %v1654_v53, 4 }
 0x12b   : > { %4284 = vmatmul.bf16.gmra.mxu1 %v3011_v36  ;;  %5628 = vperm.xlu2 %7432, %v8003_v20   ;;  %v774_v20 = vsel %vm734_vm2, %v721_v13, %v8135_v39 }
 0x12c   : > { %v1428_v21 = vmul.f32 %v8209_v11, %v1092_v33  ;;  %5623 = vperm.xlu1 %7431, %v7995_v18   ;;  %5633 = vperm.xlu0 %7433, %v8036_v26   ;;  %v1659_v42 = vor.u32 %v1657_v12, %v1656_v58  ;;  %v2235_v9 = vsel %vm8306_vm15, %v2233_v28, %v2234_v4  ;;  %v6911_v18 = vld [vmem:[%s11203_s4 + $0xe0] sm:$0xff]  ;;  %v8394_v13 = vld [vmem:[#allocation2 + $0x2c] sm:$0xf]  ;;  %v1661_v33 = vrot.slane %v1656_v58, 4 }
 0x12d   : > { %v875_v60 = vpop.f32.mrf.mxu0  ;;  %v2237_v26 = vor.u32 %v2236_v29, %v2234_v4  ;;  %2520 = vst [vmem:[#allocation2 + $0x38] sm:$0xf] %v2235_v9  ;;  %4661 = vmatpush.bf16.msrb.mxu0 %v6911_v18  ;;  %v8391_v36 = vpop.permute.xlu2 %1367 }
 0x12e   : > { %v1588_v11 = vpack.c.bf16 %v1428_v21, %v1428_v21  ;;  %v993_v15 = vmul.f32 %v8233_v7, %v875_v60  ;;  %v8375_v3 = vpop.permute.xlu0 %1347  ;;  %v1660_v8 = vsel %vm8318_vm0, %v1652_v41, %v1659_v42  ;;  %v8402_v21 = vld [vmem:[#allocation2 + $0x30] sm:$0xff] }
 0x12f   : > { %2123 = vst [vmem:[#allocation2 + $0x3c] sm:$0xf] %v1660_v8  ;;  %v2238_v47 = vrot.slane %v2237_v26, 4  ;;  %v2876_v5 = vunpack.c.l.b16 %v8402_v21 }
 0x130   : > { %v1663_v39 = vshrl.u32 %v1588_v11, 16  ;;  %v1666_v27 = vshll.u32 %v1588_v11, 16  ;;  %v1045_v51 = vadd.f32 %v8238_v0, %v993_v15  ;;  %6185 = vmatmul.msk.bf16.gmra.mxu0 %vm803_vm3, %v756_v6  ;;  %6194 = vmatmul.msk.bf16.gmra.mxu3 %vm803_vm3, %v774_v20  ;;  %2177 = vst [vmem:[#allocation2 + $0x4c] sm:$0xf] %v1588_v11 }
 0x131   : > { %4662 = vmatpush.bf16.msrb.mxu0 %v6910_v45  ;;  %v8416_v9 = vpop.permute.xlu1 %1332 }
 0x132   : > { %v8389_v63 = vrot.slane %v1663_v39, 7  ;;  %v2239_v57 = vrot.slane %v1666_v27, 5  ;;  %v1093_v53 = vmax.f32 %v1045_v51, 0.0  ;;  %v2241_v12 = vrot.slane %v1663_v39, 4  ;;  %v6908_v39 = vld [vmem:[%s11203_s4 + $0xc8] sm:$0xff] }
 0x133   : > { %5643 = vperm.xlu2 %7432, %v8091_v62   ;;  %v6909_v62 = vld [vmem:[%s11203_s4 + $0xd0] sm:$0xff] }
 0x134   : > { %v1668_v28 = vor.u32 %v1666_v27, %v8389_v63  ;;  %v2240_v37 = vsel %vm8306_vm15, %v2238_v47, %v2239_v57  ;;  %5638 = vperm.xlu1 %7431, %v8050_v61   ;;  %5648 = vperm.xlu0 %7433, %v8086_v55   ;;  %v1429_v4 = vmul.f32 %v8294_v2, %v1093_v53  ;;  %v8407_v58 = vld [vmem:[#allocation2 + $0x38] sm:$0xf]  ;;  %v2875_v55 = vunpack.c.l.b16 %v8394_v13  ;;  %v5560_v13 = vld [vmem:[%s11204_s5 + $0x100] sm:$0xff] }
 0x135   : > { %2521 = vst [vmem:[#allocation2 + $0x44] sm:$0xf] %v2240_v37  ;;  %v877_v29 = vpop.f32.mrf.mxu0  ;;  %v2878_v2 = vunpack.c.l.b16 %v8407_v58  ;;  %v2242_v42 = vor.u32 %v2241_v12, %v2239_v57  ;;  %4663 = vmatpush.bf16.msrb.mxu0 %v6909_v62  ;;  %v7437_v27 = vld [vmem:[%s7560_s12 + $0x58] sm:$0xff]  }
 0x136   : > { %v1669_v6 = vsel %vm8318_vm0, %v1661_v33, %v1668_v28  ;;  %v994_v41 = vmul.f32 %v8233_v7, %v877_v29  ;;  %v8412_v61 = vpop.permute.xlu0 %1352  ;;  %v1589_v60 = vpack.c.bf16 %v1429_v4, %v1429_v4  ;;  %v8418_v20 = vld [vmem:[#allocation2 + $0x3c] sm:$0xff]  ;;  %v697_v51 = vsel %vm661_vm1, %v7437_v27, %v7960_v1  ;;  %v8445_v29 = vpop.permute.xlu2 %1372 }
 0x137   : > { %2124 = vst [vmem:[#allocation2 + $0x48] sm:$0xf] %v1669_v6  ;;  %v2879_v26 = vunpack.c.l.b16 %v8418_v20  ;;  %v8427_v11 = vpack.c.b16 %v2878_v2, %v2875_v55  ;;  %v2243_v57 = vrot.slane %v2242_v42, 4  ;;  %v1670_v1 = vrot.slane %v8389_v63, 4  ;;  %v6907_v42 = vld [vmem:[%s11203_s4 + $0xc0] sm:$0xff] }
 0x138   : > { %v1046_v18 = vadd.f32 %v8238_v0, %v994_v41  ;;  %v1672_v15 = vshrl.u32 %v1589_v60, 16  ;;  %v1675_v8 = vshll.u32 %v1589_v60, 16  ;;  %2178 = vst [vmem:[#allocation2 + $0x58] sm:$0xf] %v1589_v60 }
 0x139   : > { %v3014_v47 = vpack.c.b16 %v2879_v26, %v2876_v5  ;;  %4664 = vmatpush.bf16.msrb.mxu0 %v6908_v39 }
 0x13a   : > { %v1094_v45 = vmax.f32 %v1046_v18, 0.0  ;;  %v1674_v53 = vrot.slane %v1672_v15, 7  ;;  %v2244_v12 = vrot.slane %v1675_v8, 5  ;;  %v2246_v33 = vrot.slane %v1672_v15, 4 }
 0x13b   : > { %5658 = vperm.xlu2 %7432, %v8121_v54   ;;  %4289 = vmatmul.bf16.gmra.mxu1 %v3014_v47  ;;  %v758_v54 = vsel %vm734_vm2, %v697_v51, %v7868_v35  ;;  %v5548_v51 = vld [vmem:[%s11204_s5 + $0xa0] sm:$0xff] }
 0x13c   : > { %v1430_v28 = vmul.f32 %v8336_v44, %v1094_v45  ;;  %5653 = vperm.xlu1 %7431, %v8113_v23   ;;  %v1677_v37 = vor.u32 %v1675_v8, %v1674_v53  ;;  %v2245_v4 = vsel %vm8306_vm15, %v2243_v57, %v2244_v12  ;;  %5663 = vperm.xlu0 %7433, %v8152_v43   ;;  %v1679_v47 = vrot.slane %v1674_v53, 4 }
 0x13d   : > { %v880_v62 = vpop.f32.mrf.mxu0  ;;  %v730_v44 = vsel %vm661_vm1, %v7746_v50, %v8158_v22  ;;  %v2247_v6 = vor.u32 %v2246_v33, %v2244_v12  ;;  %2522 = vst [vmem:[#allocation2 + $0x50] sm:$0xf] %v2245_v4  ;;  %v1218_v50 = vpop.permute.xlu1 %1217  ;;  %4665 = vmatpush.bf16.msrb.mxu0 %v6907_v42 }
 0x13e   : > { %v1590_v23 = vpack.c.bf16 %v1430_v28, %v1430_v28  ;;  %v995_v63 = vmul.f32 %v8233_v7, %v880_v62  ;;  %v8454_v41 = vpop.permute.xlu0 %1237  ;;  %v1678_v43 = vsel %vm8318_vm0, %v1670_v1, %v1677_v37  ;;  %v8467_v22 = vsel %vm734_vm2, %v730_v44, %v8247_v34  ;;  %v8476_v33 = vld [vmem:[#allocation2 + $0x48] sm:$0xff]  ;;  %v8483_v4 = vpop.permute.xlu2 %1257 }
 0x13f   : > { %2125 = vst [vmem:[#allocation2 + $0x54] sm:$0xf] %v1678_v43  ;;  %v2248_v15 = vrot.slane %v2247_v6, 4  ;;  %v5550_v6 = vld [vmem:[%s11204_s5 + $0xb0] sm:$0xff] }
 0x140   : > { %v1681_v35 = vshrl.u32 %v1590_v23, 16  ;;  %v1684_v60 = vshll.u32 %v1590_v23, 16  ;;  %v1047_v18 = vadd.f32 %v8238_v0, %v995_v63  ;;  %6186 = vmatmul.msk.bf16.gmra.mxu0 %vm803_vm3, %v758_v54  ;;  %6195 = vmatmul.msk.bf16.gmra.mxu3 %vm803_vm3, %v8312_v32  ;;  %2179 = vst [vmem:[#allocation2 + $0x64] sm:$0xf] %v1590_v23  ;;  %v11214_v54 = vunpack.c.l.b16 %v8476_v33  ;;  %v7438_v23 = vld [vmem:[%s7560_s12 + $0x60] sm:$0xff]  }
 0x141   : > { %v700_v63 = vsel %vm661_vm1, %v7438_v23, %v7990_v17 }
 0x142   : > { %v1683_v8 = vrot.slane %v1681_v35, 7  ;;  %v2249_v39 = vrot.slane %v1684_v60, 5  ;;  %v1095_v27 = vmax.f32 %v1047_v18, 0.0  ;;  %v2251_v45 = vrot.slane %v1681_v35, 4  ;;  %v5549_v35 = vld [vmem:[%s11204_s5 + $0xa8] sm:$0xff] }
 0x143   : > { %5673 = vperm.xlu2 %7432, %v8197_v30  }
 0x144   : > { %v1686_v32 = vor.u32 %v1684_v60, %v1683_v8  ;;  %v2250_v57 = vsel %vm8306_vm15, %v2248_v15, %v2249_v39  ;;  %5668 = vperm.xlu1 %7431, %v8173_v59   ;;  %v1431_v34 = vmul.f32 %v1218_v50, %v1095_v27  ;;  %5678 = vperm.xlu0 %7433, %v5548_v51   ;;  %v5551_v50 = vld [vmem:[%s11204_s5 + $0xb8] sm:$0xff] }
 0x145   : > { %2523 = vst [vmem:[#allocation2 + $0x5c] sm:$0xf] %v2250_v57  ;;  %v882_v12 = vpop.f32.mrf.mxu0  ;;  %v2252_v53 = vor.u32 %v2251_v45, %v2249_v39  ;;  %v1223_v39 = vpop.permute.xlu1 %1222  ;;  %v6906_v45 = vld [vmem:[%s11203_s4 + $0xb8] sm:$0xff]  ;;  %v1688_v57 = vrot.slane %v1683_v8, 4 }
 0x146   : > { %v1687_v28 = vsel %vm8318_vm0, %v1679_v47, %v1686_v32  ;;  %v996_v1 = vmul.f32 %v8233_v7, %v882_v12  ;;  %v8481_v30 = vpop.permute.xlu0 %1242  ;;  %v1591_v37 = vpack.c.bf16 %v1431_v34, %v1431_v34  ;;  %v8485_v59 = vld [vmem:[#allocation2 + $0x54] sm:$0xff]  ;;  %v760_v32 = vsel %vm734_vm2, %v700_v63, %v7988_v16  ;;  %4529 = vmatpush.bf16.msrb.mxu3 %v6906_v45  ;;  %v5553_v63 = vld [vmem:[%s11204_s5 + $0xc8] sm:$0xff] }
 0x147   : > { %2126 = vst [vmem:[#allocation2 + $0x60] sm:$0xf] %v1687_v28  ;;  %v11213_v44 = vunpack.c.l.b16 %v8485_v59  ;;  %v2253_v15 = vrot.slane %v2252_v53, 4 }
 0x148   : > { %v1048_v62 = vadd.f32 %v8238_v0, %v996_v1  ;;  %v1690_v42 = vshrl.u32 %v1591_v37, 16  ;;  %v1693_v43 = vshll.u32 %v1591_v37, 16  ;;  %2180 = vst [vmem:[#allocation2 + $0x70] sm:$0xf] %v1591_v37 }
 0x149   : > { %v3017_v18 = vpack.c.b16 %v11213_v44, %v11214_v54 }
 0x14a   : > { %v1096_v60 = vmax.f32 %v1048_v62, 0.0  ;;  %v1692_v17 = vrot.slane %v1690_v42, 7  ;;  %v2254_v27 = vrot.slane %v1693_v43, 5  ;;  %v2256_v51 = vrot.slane %v1690_v42, 4  ;;  %v6905_v42 = vld [vmem:[%s11203_s4 + $0xb0] sm:$0xff] }
 0x14b   : > { %5688 = vperm.xlu2 %7432, %v5550_v6   ;;  %4294 = vmatmul.bf16.gmra.mxu1 %v3017_v18 }
 0x14c   : > { %v1432_v47 = vmul.f32 %v1223_v39, %v1096_v60  ;;  %5683 = vperm.xlu1 %7431, %v5549_v35   ;;  %v1695_v34 = vor.u32 %v1693_v43, %v1692_v17  ;;  %v2255_v12 = vsel %vm8306_vm15, %v2253_v15, %v2254_v27  ;;  %v2257_v28 = vor.u32 %v2256_v51, %v2254_v27  ;;  %v8528_v35 = vpop.permute.xlu2 %1262  ;;  %v5552_v60 = vld [vmem:[%s11204_s5 + $0xc0] sm:$0xff]  ;;  %v5554_v39 = vld [vmem:[%s11204_s5 + $0xd0] sm:$0xff]  ;;  %v6904_v51 = vld [vmem:[%s11203_s4 + $0xa8] sm:$0xff] }
 0x14d   : > { %5693 = vperm.xlu0 %7433, %v5551_v50   ;;  %v885_v1 = vpop.f32.mrf.mxu0  ;;  %2524 = vst [vmem:[#allocation2 + $0x68] sm:$0xf] %v2255_v12  ;;  %4530 = vmatpush.bf16.msrb.mxu3 %v6905_v42  ;;  %v1697_v45 = vrot.slane %v1692_v17, 4  ;;  %v5556_v42 = vld [vmem:[%s11204_s5 + $0xe0] sm:$0xff] }
 0x14e   : > { %v1592_v53 = vpack.c.bf16 %v1432_v47, %v1432_v47  ;;  %v997_v37 = vmul.f32 %v8233_v7, %v885_v1  ;;  %v8514_v62 = vpop.permute.xlu0 %1377  ;;  %v1696_v6 = vsel %vm8318_vm0, %v1688_v57, %v1695_v34  ;;  %v2258_v43 = vrot.slane %v2257_v28, 4  ;;  %v8546_v28 = vld [vmem:[#allocation2 + $0x60] sm:$0xff] }
 0x14f   : > { %2127 = vst [vmem:[#allocation2 + $0x6c] sm:$0xf] %v1696_v6 }
 0x150   : > { %v1699_v16 = vshrl.u32 %v1592_v53, 16  ;;  %v1702_v8 = vshll.u32 %v1592_v53, 16  ;;  %v1049_v23 = vadd.f32 %v8238_v0, %v997_v37  ;;  %6187 = vmatmul.msk.bf16.gmra.mxu0 %vm803_vm3, %v760_v32  ;;  %6196 = vmatmul.msk.bf16.gmra.mxu3 %vm803_vm3, %v8387_v52  ;;  %2181 = vst [vmem:[#allocation2 + $0x7c] sm:$0xf] %v1592_v53 }
 0x151   : > { %4531 = vmatpush.bf16.msrb.mxu3 %v6904_v51 }
 0x152   : > { %v8533_v18 = vrot.slane %v1699_v16, 7  ;;  %v2259_v50 = vrot.slane %v1702_v8, 5  ;;  %v2261_v52 = vrot.slane %v1699_v16, 4  ;;  %v1097_v15 = vmax.f32 %v1049_v23, 0.0 }
 0x153   : > { %v930_v27 = vpop.f32.mrf.mxu3  ;;  %5703 = vperm.xlu2 %7432, %v5553_v63   ;;  %v11212_v23 = vunpack.c.l.b16 %v8546_v28 }
 0x154   : > { %v1704_v47 = vor.u32 %v1702_v8, %v8533_v18  ;;  %v2260_v32 = vsel %vm8306_vm15, %v2258_v43, %v2259_v50  ;;  %5698 = vperm.xlu1 %7431, %v5552_v60   ;;  %v1433_v57 = vmul.f32 %v8296_v40, %v1097_v15  ;;  %v1015_v34 = vmul.f32 %v8233_v7, %v930_v27  ;;  %v5555_v43 = vld [vmem:[%s11204_s5 + $0xd8] sm:$0xff]  ;;  %v2575_v60 = vld [vmem:[#allocation2 + $0x20] sm:$0xf] }
 0x155   : > { %2525 = vst [vmem:[#allocation2 + $0x74] sm:$0xf] %v2260_v32  ;;  %5708 = vperm.xlu0 %7433, %v5554_v39   ;;  %v887_v12 = vpop.f32.mrf.mxu0  ;;  %v2262_v53 = vor.u32 %v2261_v52, %v2259_v50  ;;  %v6903_v39 = vld [vmem:[%s11203_s4 + $0xa0] sm:$0xff] }
 0x156   : > { %v1705_v1 = vsel %vm8318_vm0, %v1697_v45, %v1704_v47  ;;  %v998_v17 = vmul.f32 %v8233_v7, %v887_v12  ;;  %v8551_v37 = vpop.permute.xlu0 %1382  ;;  %v1593_v6 = vpack.c.bf16 %v1433_v57, %v1433_v57  ;;  %v1067_v16 = vadd.f32 %v8238_v0, %v1015_v34  ;;  %v8554_v40 = vld [vmem:[#allocation2 + $0x6c] sm:$0xff]  ;;  %v8577_v12 = vpop.permute.xlu2 %1397  ;;  %4532 = vmatpush.bf16.msrb.mxu3 %v6903_v39 }
 0x157   : > { %2128 = vst [vmem:[#allocation2 + $0x78] sm:$0xf] %v1705_v1  ;;  %v11210_v63 = vunpack.c.l.b16 %v8554_v40  ;;  %v2263_v27 = vrot.slane %v2262_v53, 4  ;;  %v5557_v47 = vld [vmem:[%s11204_s5 + $0xe8] sm:$0xff]  ;;  %v3167_v53 = vpack.c.b16 %v2876_v5, %v2873_v56  ;;  %v6902_v56 = vld [vmem:[%s11203_s4 + $0x98] sm:$0xff]  ;;  %v5558_v39 = vld [vmem:[%s11204_s5 + $0xf0] sm:$0xff] }
 0x158   : > { %v1050_v8 = vadd.f32 %v8238_v0, %v998_v17  ;;  %v1708_v50 = vshrl.u32 %v1593_v6, 16  ;;  %v1711_v52 = vshll.u32 %v1593_v6, 16  ;;  %2182 = vst [vmem:[#allocation2 + $0x88] sm:$0xf] %v1593_v6  ;;  %v1115_v15 = vmax.f32 %v1067_v16, 0.0 }
 0x159   : > { %v3020_v45 = vpack.c.b16 %v11210_v63, %v11212_v23 }
 0x15a   : > { %v1098_v51 = vmax.f32 %v1050_v8, 0.0  ;;  %v8575_v32 = vrot.slane %v1708_v50, 7  ;;  %v2264_v57 = vrot.slane %v1711_v52, 5  ;;  %v2266_v34 = vrot.slane %v1708_v50, 4  ;;  %4533 = vmatpush.bf16.msrb.mxu3 %v6902_v56 }
 0x15b   : > { %v1451_v1 = vmul.f32 %v8252_v19, %v1115_v15  ;;  %v932_v17 = vpop.f32.mrf.mxu3  ;;  %5718 = vperm.xlu2 %7432, %v5556_v42   ;;  %4299 = vmatmul.bf16.gmra.mxu1 %v3020_v45  ;;  %v2872_v8 = vunpack.c.l.b16 %v2575_v60  ;;  %v1706_v50 = vrot.slane %v8533_v18, 4  ;;  %v8597_v60 = vld [vmem:[#allocation2 + $0x44] sm:$0xf]  ;;  %v5559_v15 = vld [vmem:[%s11204_s5 + $0xf8] sm:$0xff] }
 0x15c   : > { %v1434_v6 = vmul.f32 %v8348_v25, %v1098_v51  ;;  %v1016_v16 = vmul.f32 %v8233_v7, %v932_v17  ;;  %5713 = vperm.xlu1 %7431, %v5555_v43   ;;  %v1713_v63 = vor.u32 %v1711_v52, %v8575_v32  ;;  %v2265_v19 = vsel %vm8306_vm15, %v2263_v27, %v2264_v57 }
 0x15d   : > { %v2267_v42 = vor.u32 %v2266_v34, %v2264_v57  ;;  %5723 = vperm.xlu0 %7433, %v5557_v47   ;;  %v890_v49 = vpop.f32.mrf.mxu0  ;;  %2526 = vst [vmem:[#allocation2 + $0x80] sm:$0xf] %v2265_v19  ;;  %v1611_v25 = vpack.c.bf16 %v1451_v1, %v1451_v1  ;;  %v8609_v27 = vpack.c.b16 %v2875_v55, %v2872_v8  ;;  %v11211_v17 = vunpack.c.l.b16 %v8597_v60 }
 0x15e   : > { %v1594_v21 = vpack.c.bf16 %v1434_v6, %v1434_v6  ;;  %v1068_v5 = vadd.f32 %v8238_v0, %v1016_v16  ;;  %v999_v43 = vmul.f32 %v8233_v7, %v890_v49  ;;  %v8595_v18 = vpop.permute.xlu0 %1267  ;;  %11327 = vst [vmem:[#allocation9_spill] sm:$0xff] %v8597_v60  ;;  %v1714_v52 = vsel %vm8318_vm0, %v1706_v50, %v1713_v63  ;;  %v8617_v55 = vld [vmem:[#allocation2 + $0x78] sm:$0xff]  ;;  %v8620_v6 = vpop.permute.xlu1 %1357 }
 0x15f   : > { %2129 = vst [vmem:[#allocation2 + $0x84] sm:$0xf] %v1714_v52  ;;  %v1870_v51 = vshrl.u32 %v1611_v25, 16  ;;  %v1873_v45 = vshll.u32 %v1611_v25, 16  ;;  %v2268_v63 = vrot.slane %v2267_v42, 4 }
 0x160   : > { %v1717_v47 = vshrl.u32 %v1594_v21, 16  ;;  %v1720_v57 = vshll.u32 %v1594_v21, 16  ;;  %6197 = vmatmul.msk.bf16.gmra.mxu3 %vm803_vm3, %v8467_v22  ;;  %4666 = vmatmul.bf16.vlgmr.msrb.gmra.mxu0 %v3167_v53  ;;  %2200 = vst [vmem:[#allocation2 + $0x160] sm:$0xf] %v1611_v25  ;;  %v1116_v34 = vmax.f32 %v1068_v5, 0.0  ;;  %v1051_v1 = vadd.f32 %v8238_v0, %v999_v43 }
 0x161   : > { %v8622_v16 = vrot.slane %v1870_v51, 7  ;;  %v8624_v8 = vrot.slane %v1873_v45, 5  ;;  %v2356_v22 = vrot.slane %v1870_v51, 4  ;;  %2183 = vst [vmem:[#allocation2 + $0x94] sm:$0xf] %v1594_v21  ;;  %v1715_v25 = vrot.slane %v8575_v32, 4  ;;  %v8637_v51 = vpop.permute.xlu2 %1402 }
 0x162   : > { %v8626_v53 = vrot.slane %v1717_v47, 7  ;;  %v2269_v50 = vrot.slane %v1720_v57, 5  ;;  %v2271_v19 = vrot.slane %v1717_v47, 4  ;;  %v1452_v42 = vmul.f32 %v8261_v10, %v1116_v34 }
 0x163   : > { %v1099_v49 = vmax.f32 %v1051_v1, 0.0  ;;  %v935_v56 = vpop.f32.mrf.mxu3  ;;  %5733 = vperm.xlu2 %7432, %v5559_v15   ;;  %v8631_v5 = vor.u32 %v1873_v45, %v8622_v16  ;;  %v2357_v43 = vor.u32 %v2356_v22, %v8624_v8  ;;  %v11216_v15 = vunpack.c.l.b16 %v8617_v55 }
 0x164   : > { %v1722_v52 = vor.u32 %v1720_v57, %v8626_v53  ;;  %5728 = vperm.xlu1 %7431, %v5558_v39   ;;  %v2270_v21 = vsel %vm8306_vm15, %v2268_v63, %v2269_v50  ;;  %v1612_v47 = vpack.c.bf16 %v1452_v42, %v1452_v42  ;;  %v8644_v32 = vpack.c.b16 %v11211_v17, %v2878_v2 }
 0x165   : > { %5738 = vperm.xlu0 %7433, %v5560_v13   ;;  %v892_v10 = vpop.f32.mrf.mxu0  ;;  %v2272_v39 = vor.u32 %v2271_v19, %v2269_v50  ;;  %2527 = vst [vmem:[#allocation2 + $0x8c] sm:$0xf] %v2270_v21  ;;  %v1435_v57 = vmul.f32 %v8454_v41, %v1099_v49  ;;  %v1017_v63 = vmul.f32 %v8233_v7, %v935_v56  ;;  %v2358_v1 = vrot.slane %v2357_v43, 4  ;;  %v5562_v19 = vld [vmem:[%s11204_s5 + $0x110] sm:$0xff]  ;;  %v5561_v21 = vld [vmem:[%s11204_s5 + $0x108] sm:$0xff] }
 0x166   : > { %v1723_v45 = vsel %vm8318_vm0, %v1715_v25, %v1722_v52  ;;  %v8650_v34 = vpop.permute.xlu0 %1272  ;;  %v1879_v13 = vshrl.u32 %v1612_v47, 16  ;;  %v1882_v22 = vshll.u32 %v1612_v47, 16  ;;  %v1000_v58 = vmul.f32 %v8233_v7, %v892_v10  ;;  %v8653_v42 = vld [vmem:[#allocation2 + $0x84] sm:$0xff]  ;;  %2201 = vst [vmem:[#allocation2 + $0x16c] sm:$0xf] %v1612_v47  ;;  %v6901_v49 = vld [vmem:[%s11203_s4 + $0x90] sm:$0xff] }
 0x167   : > { %2130 = vst [vmem:[#allocation2 + $0x90] sm:$0xf] %v1723_v45  ;;  %v1877_v2 = vrot.slane %v8622_v16, 4  ;;  %v1595_v25 = vpack.c.bf16 %v1435_v57, %v1435_v57  ;;  %v1069_v50 = vadd.f32 %v8238_v0, %v1017_v63  ;;  %v11215_v41 = vunpack.c.l.b16 %v8653_v42  ;;  %v5563_v47 = vld [vmem:[%s11204_s5 + $0x118] sm:$0xff]  ;;  %4534 = vmatpush.bf16.msrb.mxu3 %v6901_v49 }
 0x168   : > { %v8664_v56 = vrot.slane %v1879_v13, 7  ;;  %v2359_v43 = vrot.slane %v1882_v22, 5  ;;  %v2361_v52 = vrot.slane %v1879_v13, 4  ;;  %v1052_v16 = vadd.f32 %v8238_v0, %v1000_v58  ;;  %v6900_v13 = vld [vmem:[%s11203_s4 + $0x88] sm:$0xff] }
 0x169   : > { %v1726_v10 = vshrl.u32 %v1595_v25, 16  ;;  %v1729_v45 = vshll.u32 %v1595_v25, 16  ;;  %2184 = vst [vmem:[#allocation2 + $0xa0] sm:$0xf] %v1595_v25  ;;  %v1117_v57 = vmax.f32 %v1069_v50, 0.0  ;;  %v3023_v63 = vpack.c.b16 %v11215_v41, %v11216_v15  ;;  %v8683_v25 = vpop.permute.xlu1 %1362 }
 0x16a   : > { %v2273_v58 = vrot.slane %v2272_v39, 4  ;;  %v1884_v17 = vor.u32 %v1882_v22, %v8664_v56  ;;  %v2360_v23 = vsel %vm8306_vm15, %v2358_v1, %v2359_v43  ;;  %v2362_v44 = vor.u32 %v2361_v52, %v2359_v43 }
 0x16b   : > { %v937_v54 = vpop.f32.mrf.mxu3  ;;  %5748 = vperm.xlu2 %7432, %v5562_v19   ;;  %2545 = vst [vmem:[#allocation2 + $0x164] sm:$0xf] %v2360_v23  ;;  %v8685_v50 = vrot.slane %v1726_v10, 7  ;;  %v2274_v41 = vrot.slane %v1729_v45, 5  ;;  %v2276_v49 = vrot.slane %v1726_v10, 4  ;;  %v1453_v15 = vmul.f32 %v8364_v38, %v1117_v57  ;;  %4304 = vmatmul.bf16.gmra.mxu1 %v3023_v63  ;;  %v7439_v10 = vld [vmem:[%s7560_s12 + $0xb8] sm:$0xff]  }
 0x16c   : > { %5743 = vperm.xlu1 %7431, %v5561_v21   ;;  %v1885_v39 = vsel %vm8318_vm0, %v1877_v2, %v1884_v17  ;;  %v1100_v22 = vmax.f32 %v1052_v16, 0.0  ;;  %v1018_v1 = vmul.f32 %v8233_v7, %v937_v54  ;;  %v11328_v23 = vunpack.c.l.b16 %v8476_v33  ;;  %4535 = vmatpush.bf16.msrb.mxu3 %v6900_v13  ;;  %v603_v54 = vpop.permute.xlu2 %602 }
 0x16d   : > { %5753 = vperm.xlu0 %7433, %v5563_v47   ;;  %v895_v43 = vpop.f32.mrf.mxu0  ;;  %v1724_v52 = vrot.slane %v8626_v53, 4  ;;  %2148 = vst [vmem:[#allocation2 + $0x168] sm:$0xf] %v1885_v39  ;;  %v1731_v38 = vor.u32 %v1729_v45, %v8685_v50  ;;  %v2275_v21 = vsel %vm8306_vm15, %v2273_v58, %v2274_v41  ;;  %v2277_v17 = vor.u32 %v2276_v49, %v2274_v41  ;;  %v6899_v53 = vld [vmem:[%s11203_s4 + $0x80] sm:$0xff] }
 0x16e   : > { %v3170_v19 = vpack.c.b16 %v11328_v23, %v2879_v26  ;;  %v8699_v2 = vpop.permute.xlu0 %1407  ;;  %2528 = vst [vmem:[#allocation2 + $0x98] sm:$0xf] %v2275_v21  ;;  %v1613_v16 = vpack.c.bf16 %v1453_v15, %v1453_v15  ;;  %v1436_v20 = vmul.f32 %v8481_v30, %v1100_v22  ;;  %v1070_v26 = vadd.f32 %v8238_v0, %v1018_v1  ;;  %v5565_v30 = vld [vmem:[%s11204_s5 + $0x128] sm:$0xff]  ;;  %v5564_v15 = vld [vmem:[%s11204_s5 + $0x120] sm:$0xff]  ;;  %v5566_v22 = vld [vmem:[%s11204_s5 + $0x130] sm:$0xff] }
 0x16f   : > { %v1001_v33 = vmul.f32 %v8233_v7, %v895_v43  ;;  %v2363_v47 = vrot.slane %v2362_v44, 4  ;;  %v1732_v41 = vsel %vm8318_vm0, %v1724_v52, %v1731_v38  ;;  %v8711_v45 = vsel %vm661_vm1, %v7439_v10, %v603_v54 }
 0x170   : > { %4671 = vmatmul.bf16.gmra.mxu0 %v3170_v19  ;;  %v11329_v57 = vunpack.c.l.b16 %v8485_v59  ;;  %v11330_v44 = vunpack.c.l.b16 %v8546_v28  ;;  %2131 = vst [vmem:[#allocation2 + $0x9c] sm:$0xf] %v1732_v41  ;;  %v1888_v13 = vshrl.u32 %v1613_v16, 16  ;;  %v1891_v58 = vshll.u32 %v1613_v16, 16  ;;  %v8731_v28 = vld [vmem:[#allocation2 + $0x90] sm:$0xff]  ;;  %4536 = vmatpush.bf16.msrb.mxu3 %v6899_v53 }
 0x171   : > { %v1596_v49 = vpack.c.bf16 %v1436_v20, %v1436_v20  ;;  %v1118_v39 = vmax.f32 %v1070_v26, 0.0  ;;  %v1886_v1 = vrot.slane %v8664_v56, 4  ;;  %v1733_v43 = vrot.slane %v8685_v50, 4  ;;  %2202 = vst [vmem:[#allocation2 + $0x178] sm:$0xf] %v1613_v16 }
 0x172   : > { %v8723_v63 = vpack.c.b16 %v11330_v44, %v11329_v57  ;;  %v2278_v23 = vrot.slane %v2277_v17, 4  ;;  %v1053_v59 = vadd.f32 %v8238_v0, %v1001_v33  ;;  %v8733_v19 = vrot.slane %v1888_v13, 7  ;;  %v8737_v17 = vld [vmem:[#allocation2 + $0x8] sm:$0xf]  ;;  %v8739_v0 = vld [vmem:[#allocation2 + $0x10] sm:$0xf0] }
 0x173   : > { %v2364_v52 = vrot.slane %v1891_v58, 5  ;;  %v2366_v38 = vrot.slane %v1888_v13, 4  ;;  %v1735_v21 = vshrl.u32 %v1596_v49, 16  ;;  %2185 = vst [vmem:[#allocation2 + $0xac] sm:$0xf] %v1596_v49  ;;  %v940_v54 = vpop.f32.mrf.mxu3  ;;  %5763 = vperm.xlu2 %7432, %v5565_v30   ;;  %v1738_v20 = vshll.u32 %v1596_v49, 16  ;;  %v1248_v30 = vpop.permute.xlu1 %1247 }
 0x174   : > { %v1454_v56 = vmul.f32 %v8416_v9, %v1118_v39  ;;  %v1101_v26 = vmax.f32 %v1053_v59, 0.0  ;;  %v1019_v50 = vmul.f32 %v8233_v7, %v940_v54  ;;  %5758 = vperm.xlu1 %7431, %v5564_v15   ;;  %v1893_v16 = vor.u32 %v1891_v58, %v8733_v19 }
 0x175   : > { %v2365_v33 = vsel %vm8306_vm15, %v2363_v47, %v2364_v52  ;;  %v2367_v53 = vor.u32 %v2366_v38, %v2364_v52  ;;  %5768 = vperm.xlu0 %7433, %v5566_v22   ;;  %v897_v41 = vpop.f32.mrf.mxu0  ;;  %v2900_v10 = vunpack.c.l.b16 %v8731_v28  ;;  %v8745_v9 = vrot.slane %v1735_v21, 7  ;;  %v8752_v47 = vld [vmem:[%s11202_s3] ss:$0 sm:$0xff] }
 0x176   : > { %2546 = vst [vmem:[#allocation2 + $0x170] sm:$0xf] %v2365_v33  ;;  %v2279_v7 = vrot.slane %v1738_v20, 5  ;;  %v2281_v15 = vrot.slane %v1735_v21, 4  ;;  %v1614_v57 = vpack.c.bf16 %v1454_v56, %v1454_v56  ;;  %v1894_v44 = vsel %vm8318_vm0, %v1886_v1, %v1893_v16  ;;  %v660_v49 = vpop.permute.xlu0 %659  ;;  %v5568_v38 = vld [vmem:[%s11204_s5 + $0x140] sm:$0xff] }
 0x177   : > { %v1437_v13 = vmul.f32 %v1248_v30, %v1101_v26  ;;  %v1071_v58 = vadd.f32 %v8752_v47, %v1019_v50  ;;  %v6210_v39 = vor.u32 %v8739_v0, %v8737_v17  ;;  %2149 = vst [vmem:[#allocation2 + $0x174] sm:$0xf] %v1894_v44  ;;  %v2368_v22 = vrot.slane %v2367_v53, 4  ;;  %v5567_v50 = vld [vmem:[%s11204_s5 + $0x138] sm:$0xff]  ;;  %v5569_v30 = vld [vmem:[%s11204_s5 + $0x148] sm:$0xff] }
 0x178   : > { %v1740_v59 = vor.u32 %v1738_v20, %v8745_v9  ;;  %v2280_v52 = vsel %vm8306_vm15, %v2278_v23, %v2279_v7  ;;  %v2282_v1 = vor.u32 %v2281_v15, %v2279_v7  ;;  %v1897_v21 = vshrl.u32 %v1614_v57, 16  ;;  %2203 = vst [vmem:[#allocation2 + $0x184] sm:$0xf] %v1614_v57  ;;  %v8772_v23 = vld [vmem:[%s11201_s2] ss:$0 sm:$0xff] }
 0x179   : > { %2529 = vst [vmem:[#allocation2 + $0xa4] sm:$0xf] %v2280_v52  ;;  %v1900_v54 = vshll.u32 %v1614_v57, 16  ;;  %v1597_v56 = vpack.c.bf16 %v1437_v13, %v1437_v13  ;;  %v1119_v26 = vmax.f32 %v1071_v58, 0.0  ;;  %v1895_v16 = vrot.slane %v8733_v19, 4 }
 0x17a   : > { %v1741_v20 = vsel %vm8318_vm0, %v1733_v43, %v1740_v59  ;;  %v1002_v33 = vmul.f32 %v8772_v23, %v897_v41  ;;  %v782_v53 = vsel %vm734_vm2, %v8711_v45, %v660_v49  ;;  %v8780_v19 = vrot.slane %v1897_v21, 7 }
 0x17b   : > { %2132 = vst [vmem:[#allocation2 + $0xa8] sm:$0xf] %v1741_v20  ;;  %v2369_v7 = vrot.slane %v1900_v54, 5  ;;  %v2371_v43 = vrot.slane %v1897_v21, 4  ;;  %v1744_v15 = vshrl.u32 %v1597_v56, 16  ;;  %6198 = vmatmul.msk.bf16.gmra.mxu3 %vm803_vm3, %v782_v53  ;;  %v942_v57 = vpop.f32.mrf.mxu3  ;;  %5778 = vperm.xlu2 %7432, %v5568_v38   ;;  %v1747_v44 = vshll.u32 %v1597_v56, 16 }
 0x17c   : > { %2186 = vst [vmem:[#allocation2 + $0xb8] sm:$0xf] %v1597_v56  ;;  %v1455_v41 = vmul.f32 %v8240_v46, %v1119_v26  ;;  %v1054_v45 = vadd.f32 %v8752_v47, %v1002_v33  ;;  %v1020_v13 = vmul.f32 %v8772_v23, %v942_v57  ;;  %5773 = vperm.xlu1 %7431, %v5567_v50   ;;  %v2283_v58 = vrot.slane %v2282_v1, 4  ;;  %v8795_v33 = vld [vmem:[#allocation2 + $0x9c] sm:$0xff] }
 0x17d   : > { %v1902_v49 = vor.u32 %v1900_v54, %v8780_v19  ;;  %v2370_v59 = vsel %vm8306_vm15, %v2368_v22, %v2369_v7  ;;  %v2372_v52 = vor.u32 %v2371_v43, %v2369_v7  ;;  %5783 = vperm.xlu0 %7433, %v5569_v30   ;;  %v900_v21 = vpop.f32.mrf.mxu0  ;;  %v8789_v38 = vrot.slane %v1744_v15, 7  ;;  %v1253_v22 = vpop.permute.xlu1 %1252 }
 0x17e   : > { %2547 = vst [vmem:[#allocation2 + $0x17c] sm:$0xf] %v2370_v59  ;;  %v2284_v56 = vrot.slane %v1747_v44, 5  ;;  %v2286_v20 = vrot.slane %v1744_v15, 4  ;;  %v1615_v46 = vpack.c.bf16 %v1455_v41, %v1455_v41  ;;  %v1742_v26 = vrot.slane %v8745_v9, 4  ;;  %v5571_v9 = vld [vmem:[%s11204_s5 + $0x158] sm:$0xff] }
 0x17f   : > { %v1903_v50 = vsel %vm8318_vm0, %v1895_v16, %v1902_v49  ;;  %v1102_v1 = vmax.f32 %v1054_v45, 0.0  ;;  %v1072_v54 = vadd.f32 %v8752_v47, %v1020_v13  ;;  %v2373_v53 = vrot.slane %v2372_v52, 4  ;;  %v5570_v45 = vld [vmem:[%s11204_s5 + $0x150] sm:$0xff]  ;;  %v5572_v49 = vld [vmem:[%s11204_s5 + $0x160] sm:$0xff] }
 0x180   : > { %2150 = vst [vmem:[#allocation2 + $0x180] sm:$0xf] %v1903_v50  ;;  %v1749_v30 = vor.u32 %v1747_v44, %v8789_v38  ;;  %v2285_v7 = vsel %vm8306_vm15, %v2283_v58, %v2284_v56  ;;  %v2287_v43 = vor.u32 %v2286_v20, %v2284_v56  ;;  %4676 = vmatmul.bf16.gmra.mxu0 %v8723_v63  ;;  %v1906_v16 = vshrl.u32 %v1615_v46, 16 }
 0x181   : > { %2530 = vst [vmem:[#allocation2 + $0xb0] sm:$0xf] %v2285_v7  ;;  %v1909_v15 = vshll.u32 %v1615_v46, 16  ;;  %v1438_v57 = vmul.f32 %v1253_v22, %v1102_v1  ;;  %v1120_v41 = vmax.f32 %v1072_v54, 0.0  ;;  %v1904_v44 = vrot.slane %v8780_v19, 4 }
 0x182   : > { %v1750_v13 = vsel %vm8318_vm0, %v1742_v26, %v1749_v30  ;;  %v1751_v63 = vrot.slane %v8789_v38, 4  ;;  %2204 = vst [vmem:[#allocation2 + $0x190] sm:$0xf] %v1615_v46  ;;  %v2903_v58 = vunpack.c.l.b16 %v8795_v33  ;;  %v8815_v59 = vrot.slane %v1906_v16, 7 }
 0x183   : > { %2133 = vst [vmem:[#allocation2 + $0xb4] sm:$0xf] %v1750_v13  ;;  %v2374_v52 = vrot.slane %v1909_v15, 5  ;;  %v2376_v56 = vrot.slane %v1906_v16, 4  ;;  %v1598_v20 = vpack.c.bf16 %v1438_v57, %v1438_v57  ;;  %v945_v50 = vpop.f32.mrf.mxu3  ;;  %5793 = vperm.xlu2 %7432, %v5571_v9   ;;  %v1456_v19 = vmul.f32 %v8258_v24, %v1120_v41 }
 0x184   : > { %v3026_v38 = vpack.c.b16 %v2903_v58, %v2900_v10  ;;  %v1003_v46 = vmul.f32 %v8772_v23, %v900_v21  ;;  %v1021_v26 = vmul.f32 %v8772_v23, %v945_v50  ;;  %5788 = vperm.xlu1 %7431, %v5570_v45   ;;  %v2288_v1 = vrot.slane %v2287_v43, 4 }
 0x185   : > { %v1911_v54 = vor.u32 %v1909_v15, %v8815_v59  ;;  %v2375_v22 = vsel %vm8306_vm15, %v2373_v53, %v2374_v52  ;;  %v2377_v30 = vor.u32 %v2376_v56, %v2374_v52  ;;  %2187 = vst [vmem:[#allocation2 + $0xc4] sm:$0xf] %v1598_v20  ;;  %5798 = vperm.xlu0 %7433, %v5572_v49   ;;  %v902_v24 = vpop.f32.mrf.mxu0  ;;  %v1753_v7 = vshrl.u32 %v1598_v20, 16  ;;  %v5574_v53 = vld [vmem:[%s11204_s5 + $0x170] sm:$0xff] }
 0x186   : > { %2548 = vst [vmem:[#allocation2 + $0x188] sm:$0xf] %v2375_v22  ;;  %v1756_v9 = vshll.u32 %v1598_v20, 16  ;;  %v1616_v16 = vpack.c.bf16 %v1456_v19, %v1456_v19  ;;  %4309 = vmatmul.bf16.gmra.mxu1 %v3026_v38  ;;  %v1055_v21 = vadd.f32 %v8752_v47, %v1003_v46  ;;  %v1073_v15 = vadd.f32 %v8752_v47, %v1021_v26  ;;  %v5573_v19 = vld [vmem:[%s11204_s5 + $0x168] sm:$0xff]  ;;  %v5575_v22 = vld [vmem:[%s11204_s5 + $0x178] sm:$0xff] }
 0x187   : > { %v1912_v57 = vsel %vm8318_vm0, %v1904_v44, %v1911_v54  ;;  %v2378_v43 = vrot.slane %v2377_v30, 4  ;;  %v1004_v41 = vmul.f32 %v8772_v23, %v902_v24  ;;  %v8835_v45 = vrot.slane %v1753_v7, 7  ;;  %v8848_v30 = vld [vmem:[#allocation2 + $0x50] sm:$0xf] }
 0x188   : > { %2151 = vst [vmem:[#allocation2 + $0x18c] sm:$0xf] %v1912_v57  ;;  %v2289_v13 = vrot.slane %v1756_v9, 5  ;;  %v2291_v49 = vrot.slane %v1753_v7, 4  ;;  %v1915_v52 = vshrl.u32 %v1616_v16, 16  ;;  %v1918_v56 = vshll.u32 %v1616_v16, 16 }
 0x189   : > { %2205 = vst [vmem:[#allocation2 + $0x19c] sm:$0xf] %v1616_v16  ;;  %v1103_v20 = vmax.f32 %v1055_v21, 0.0  ;;  %v1121_v50 = vmax.f32 %v1073_v15, 0.0  ;;  %v1056_v44 = vadd.f32 %v8752_v47, %v1004_v41  ;;  %v1913_v38 = vrot.slane %v8815_v59, 4 }
 0x18a   : > { %v1758_v46 = vor.u32 %v1756_v9, %v8835_v45  ;;  %v2290_v26 = vsel %vm8306_vm15, %v2288_v1, %v2289_v13  ;;  %v2292_v54 = vor.u32 %v2291_v49, %v2289_v13  ;;  %11331 = vst [vmem:[#allocation10_spill] sm:$0xff] %v8848_v30  ;;  %v8850_v24 = vrot.slane %v1915_v52, 7  ;;  %v8863_v49 = vld [vmem:[#allocation2 + $0x5c] sm:$0xf] }
 0x18b   : > { %2531 = vst [vmem:[#allocation2 + $0xbc] sm:$0xf] %v2290_v26  ;;  %v2379_v7 = vrot.slane %v1918_v56, 5  ;;  %v2381_v16 = vrot.slane %v1915_v52, 4  ;;  %v1439_v21 = vmul.f32 %v8483_v4, %v1103_v20  ;;  %4537 = vmatmul.bf16.vlgmr.msrb.gmra.mxu3 %v6210_v39  ;;  %v947_v59 = vpop.f32.mrf.mxu3  ;;  %5808 = vperm.xlu2 %7432, %v5574_v53   ;;  %v1457_v9 = vmul.f32 %v8375_v3, %v1121_v50 }
 0x18c   : > { %v1759_v1 = vsel %vm8318_vm0, %v1751_v63, %v1758_v46  ;;  %v1104_v57 = vmax.f32 %v1056_v44, 0.0  ;;  %5803 = vperm.xlu1 %7431, %v5573_v19   ;;  %v11332_v15 = vunpack.c.l.b16 %v8554_v40  ;;  %v11333_v41 = vunpack.c.l.b16 %v8617_v55  ;;  %11334 = vst [vmem:[#allocation11_spill] sm:$0xff] %v8863_v49 }
 0x18d   : > { %2134 = vst [vmem:[#allocation2 + $0xc0] sm:$0xf] %v1759_v1  ;;  %v1920_v4 = vor.u32 %v1918_v56, %v8850_v24  ;;  %v2380_v17 = vsel %vm8306_vm15, %v2378_v43, %v2379_v7  ;;  %v2382_v0 = vor.u32 %v2381_v16, %v2379_v7  ;;  %5813 = vperm.xlu0 %7433, %v5575_v22   ;;  %v8868_v39 = vpop.f32.mrf.mxu0  ;;  %v11218_v3 = vunpack.c.l.b16 %v8848_v30  ;;  %v8876_v43 = vld [vmem:[#allocation2 + $0xb4] sm:$0xff] }
 0x18e   : > { %v3176_v13 = vpack.c.b16 %v11333_v41, %v11332_v15  ;;  %2549 = vst [vmem:[#allocation2 + $0x194] sm:$0xf] %v2380_v17  ;;  %v1599_v63 = vpack.c.bf16 %v1439_v21, %v1439_v21  ;;  %v1617_v40 = vpack.c.bf16 %v1457_v9, %v1457_v9  ;;  %v1440_v55 = vmul.f32 %v8528_v35, %v1104_v57 }
 0x18f   : > { %v1022_v53 = vmul.f32 %v8772_v23, %v947_v59  ;;  %v1760_v52 = vrot.slane %v8835_v45, 4  ;;  %v2293_v20 = vrot.slane %v2292_v54, 4  ;;  %v1921_v56 = vsel %vm8318_vm0, %v1913_v38, %v1920_v4  ;;  %v8881_v54 = vld [vmem:[#allocation2 + $0xa8] sm:$0xff] }
 0x190   : > { %v11217_v50 = vunpack.c.l.b16 %v8863_v49  ;;  %2152 = vst [vmem:[#allocation2 + $0x198] sm:$0xf] %v1921_v56  ;;  %v1762_v44 = vshrl.u32 %v1599_v63, 16  ;;  %v1765_v19 = vshll.u32 %v1599_v63, 16  ;;  %v1924_v46 = vshrl.u32 %v1617_v40, 16  ;;  %4681 = vmatmul.bf16.gmra.mxu0 %v3176_v13 }
 0x191   : > { %v1927_v26 = vshll.u32 %v1617_v40, 16  ;;  %v1922_v35 = vrot.slane %v8850_v24, 4  ;;  %v2383_v22 = vrot.slane %v2382_v0, 4  ;;  %2188 = vst [vmem:[#allocation2 + $0xd0] sm:$0xf] %v1599_v63  ;;  %v1600_v7 = vpack.c.bf16 %v1440_v55, %v1440_v55  ;;  %v8888_v0 = vpop.f32.mrf.mxu1  ;;  %v8890_v63 = vpop.permute.xlu1 %1387 }
 0x192   : > { %v1074_v45 = vadd.f32 %v8752_v47, %v1022_v53  ;;  %v1764_v38 = vrot.slane %v1762_v44, 7  ;;  %v2294_v16 = vrot.slane %v1765_v19, 5  ;;  %v2296_v21 = vrot.slane %v1762_v44, 4  ;;  %2206 = vst [vmem:[#allocation2 + $0x1a8] sm:$0xf] %v1617_v40 }
 0x193   : > { %v8883_v59 = vrot.slane %v1924_v46, 7  ;;  %v2384_v1 = vrot.slane %v1927_v26, 5  ;;  %v1771_v9 = vshrl.u32 %v1600_v7, 16  ;;  %v1774_v57 = vshll.u32 %v1600_v7, 16  ;;  %2189 = vst [vmem:[#allocation2 + $0xdc] sm:$0xf] %v1600_v7  ;;  %v950_v24 = vpop.f32.mrf.mxu3 }
 0x194   : > { %v2909_v15 = vunpack.c.l.b16 %v8876_v43  ;;  %v1767_v41 = vor.u32 %v1765_v19, %v1764_v38  ;;  %v2295_v13 = vsel %vm8306_vm15, %v2293_v20, %v2294_v16  ;;  %v2297_v4 = vor.u32 %v2296_v21, %v2294_v16  ;;  %11335 = vst [vmem:[#allocation12_spill] sm:$0xff] %v8888_v0  ;;  %v8902_v44 = vld [vmem:[#allocation2 + $0x68] sm:$0xf] }
 0x195   : > { %v2386_v17 = vrot.slane %v1924_v46, 4  ;;  %2532 = vst [vmem:[#allocation2 + $0xc8] sm:$0xf] %v2295_v13  ;;  %v1929_v40 = vor.u32 %v1927_v26, %v8883_v59  ;;  %v2385_v55 = vsel %vm8306_vm15, %v2383_v22, %v2384_v1  ;;  %v2906_v53 = vunpack.c.l.b16 %v8881_v54  ;;  %v907_v56 = vpop.f32.mrf.mxu0 }
 0x196   : > { %v8900_v20 = vpack.c.b16 %v11217_v50, %v11218_v3  ;;  %11336 = vst [vmem:[#allocation13_spill] sm:$0xff] %v8902_v44  ;;  %v1768_v19 = vsel %vm8318_vm0, %v1760_v52, %v1767_v41  ;;  %v2298_v46 = vrot.slane %v2297_v4, 4  ;;  %v8906_v26 = vrot.slane %v1771_v9, 7 }
 0x197   : > { %2550 = vst [vmem:[#allocation2 + $0x1a0] sm:$0xf] %v2385_v55  ;;  %v2299_v7 = vrot.slane %v1774_v57, 5  ;;  %v1769_v22 = vrot.slane %v1764_v38, 4  ;;  %v1930_v54 = vsel %vm8318_vm0, %v1922_v35, %v1929_v40  ;;  %v2301_v16 = vrot.slane %v1771_v9, 4  ;;  %v8931_v40 = vld [vmem:[#allocation2 + $0xc0] sm:$0xff] }
 0x198   : > { %2135 = vst [vmem:[#allocation2 + $0xcc] sm:$0xf] %v1768_v19  ;;  %v1122_v21 = vmax.f32 %v1074_v45, 0.0  ;;  %v2387_v13 = vor.u32 %v2386_v17, %v2384_v1  ;;  %v1776_v50 = vor.u32 %v1774_v57, %v8906_v26  ;;  %v3029_v52 = vpack.c.b16 %v2909_v15, %v2906_v53 }
 0x199   : > { %2153 = vst [vmem:[#allocation2 + $0x1a4] sm:$0xf] %v1930_v54  ;;  %v2300_v3 = vsel %vm8306_vm15, %v2298_v46, %v2299_v7  ;;  %v1005_v38 = vmul.f32 %v8772_v23, %v8868_v39  ;;  %v1023_v35 = vmul.f32 %v8772_v23, %v950_v24  ;;  %v2302_v9 = vor.u32 %v2301_v16, %v2299_v7 }
 0x19a   : > { %2533 = vst [vmem:[#allocation2 + $0xd4] sm:$0xf] %v2300_v3  ;;  %v1458_v41 = vmul.f32 %v8412_v61, %v1122_v21  ;;  %v1777_v1 = vsel %vm8318_vm0, %v1769_v22, %v1776_v50  ;;  %4314 = vmatmul.bf16.gmra.mxu1 %v3029_v52  ;;  %v1006_v57 = vmul.f32 %v8772_v23, %v907_v56  ;;  %v11337_v4 = vunpack.c.l.b16 %v8653_v42  ;;  %v8942_v52 = vpop.permute.xlu1 %1392 }
 0x19b   : > { %v1931_v61 = vrot.slane %v8883_v59, 4  ;;  %2136 = vst [vmem:[#allocation2 + $0xd8] sm:$0xf] %v1777_v1  ;;  %v1057_v24 = vadd.f32 %v8752_v47, %v1005_v38  ;;  %v1075_v17 = vadd.f32 %v8752_v47, %v1023_v35  ;;  %4542 = vmatmul.bf16.gmra.mxu3 %v8609_v27  ;;  %v952_v50 = vpop.f32.mrf.mxu3  ;;  %v2388_v55 = vrot.slane %v2387_v13, 4  ;;  %v8940_v13 = vpop.f32.mrf.mxu1 }
 0x19c   : > { %v3179_v3 = vpack.c.b16 %v2900_v10, %v11337_v4  ;;  %v1618_v39 = vpack.c.bf16 %v1458_v41, %v1458_v41  ;;  %v1778_v56 = vrot.slane %v8906_v26, 4  ;;  %v1058_v42 = vadd.f32 %v8752_v47, %v1006_v57  ;;  %11338 = vst [vmem:[#allocation14_spill] sm:$0xff] %v8940_v13 }
 0x19d   : > { %v1024_v28 = vmul.f32 %v8772_v23, %v952_v50  ;;  %v1105_v19 = vmax.f32 %v1057_v24, 0.0  ;;  %v1123_v46 = vmax.f32 %v1075_v17, 0.0  ;;  %v910_v7 = vpop.f32.mrf.mxu0  ;;  %v2303_v22 = vrot.slane %v2302_v9, 4 }
 0x19e   : > { %v1933_v10 = vshrl.u32 %v1618_v39, 16  ;;  %v1936_v59 = vshll.u32 %v1618_v39, 16  ;;  %2207 = vst [vmem:[#allocation2 + $0x1b4] sm:$0xf] %v1618_v39  ;;  %v1106_v54 = vmax.f32 %v1058_v42, 0.0  ;;  %v2912_v21 = vunpack.c.l.b16 %v8931_v40 }
 0x19f   : > { %v1076_v27 = vadd.f32 %v8752_v47, %v1024_v28  ;;  %v8937_v16 = vld [vmem:[#allocation2 + $0xcc] sm:$0xff]  ;;  %v1441_v1 = vmul.f32 %v8595_v18, %v1105_v19  ;;  %v1459_v57 = vmul.f32 %v8620_v6, %v1123_v46  ;;  %v8951_v39 = vpack.c.b16 %v2906_v53, %v2903_v58 }
 0x1a0   : > { %v8944_v41 = vrot.slane %v1933_v10, 7  ;;  %v2389_v38 = vrot.slane %v1936_v59, 5  ;;  %v2391_v35 = vrot.slane %v1933_v10, 4  ;;  %v1442_v9 = vmul.f32 %v8650_v34, %v1106_v54  ;;  %4686 = vmatmul.bf16.gmra.mxu0 %v3179_v3 }
 0x1a1   : > { %v1124_v4 = vmax.f32 %v1076_v27, 0.0  ;;  %v11219_v42 = vunpack.c.l.b16 %v8937_v16  ;;  %v1601_v18 = vpack.c.bf16 %v1441_v1, %v1441_v1  ;;  %v1619_v28 = vpack.c.bf16 %v1459_v57, %v1459_v57 }
 0x1a2   : > { %v1938_v24 = vor.u32 %v1936_v59, %v8944_v41  ;;  %v2390_v17 = vsel %vm8306_vm15, %v2388_v55, %v2389_v38  ;;  %v2392_v50 = vor.u32 %v2391_v35, %v2389_v38  ;;  %v1602_v6 = vpack.c.bf16 %v1442_v9, %v1442_v9 }
 0x1a3   : > { %2551 = vst [vmem:[#allocation2 + $0x1ac] sm:$0xf] %v2390_v17  ;;  %v1460_v34 = vmul.f32 %v8683_v25, %v1124_v4  ;;  %v1940_v33 = vrot.slane %v8944_v41, 4  ;;  %v1007_v53 = vmul.f32 %v8772_v23, %v910_v7  ;;  %v955_v10 = vpop.f32.mrf.mxu3  ;;  %v1780_v55 = vshrl.u32 %v1601_v18, 16 }
 0x1a4   : > { %v1939_v3 = vsel %vm8318_vm0, %v1931_v61, %v1938_v24  ;;  %v2393_v58 = vrot.slane %v2392_v50, 4  ;;  %v1783_v59 = vshll.u32 %v1601_v18, 16  ;;  %v1942_v19 = vshrl.u32 %v1619_v28, 16  ;;  %2190 = vst [vmem:[#allocation2 + $0xe8] sm:$0xf] %v1601_v18 }
 0x1a5   : > { %2154 = vst [vmem:[#allocation2 + $0x1b0] sm:$0xf] %v1939_v3  ;;  %v1945_v46 = vshll.u32 %v1619_v28, 16  ;;  %v1789_v54 = vshrl.u32 %v1602_v6, 16  ;;  %v1792_v27 = vshll.u32 %v1602_v6, 16  ;;  %v1620_v38 = vpack.c.bf16 %v1460_v34, %v1460_v34  ;;  %v912_v61 = vpop.f32.mrf.mxu0 }
 0x1a6   : > { %v3032_v25 = vpack.c.b16 %v11219_v42, %v2912_v21  ;;  %v1782_v41 = vrot.slane %v1780_v55, 7  ;;  %v2304_v35 = vrot.slane %v1783_v59, 5  ;;  %v2306_v1 = vrot.slane %v1780_v55, 4  ;;  %2208 = vst [vmem:[#allocation2 + $0x1c0] sm:$0xf] %v1619_v28  ;;  %v1278_v42 = vpop.permute.xlu1 %1277 }
 0x1a7   : > { %v1944_v7 = vrot.slane %v1942_v19, 7  ;;  %v2394_v57 = vrot.slane %v1945_v46, 5  ;;  %v2396_v9 = vrot.slane %v1942_v19, 4  ;;  %v8966_v4 = vrot.slane %v1789_v54, 7  ;;  %2191 = vst [vmem:[#allocation2 + $0xf4] sm:$0xf] %v1602_v6 }
 0x1a8   : > { %v1059_v24 = vadd.f32 %v8752_v47, %v1007_v53  ;;  %v1785_v17 = vor.u32 %v1783_v59, %v1782_v41  ;;  %v2305_v50 = vsel %vm8306_vm15, %v2303_v22, %v2304_v35  ;;  %v2307_v18 = vor.u32 %v2306_v1, %v2304_v35  ;;  %2209 = vst [vmem:[#allocation2 + $0x1cc] sm:$0xf] %v1620_v38  ;;  %v8971_v3 = vpop.f32.mrf.mxu1 }
 0x1a9   : > { %v2309_v34 = vrot.slane %v1792_v27, 5  ;;  %11339 = vst [vmem:[#allocation15_spill] sm:$0xff] %v8971_v3  ;;  %v1787_v55 = vrot.slane %v1782_v41, 4  ;;  %v1947_v28 = vor.u32 %v1945_v46, %v1944_v7  ;;  %v2395_v19 = vsel %vm8306_vm15, %v2393_v58, %v2394_v57 }
 0x1aa   : > { %2534 = vst [vmem:[#allocation2 + $0xe0] sm:$0xf] %v2305_v50  ;;  %v2397_v45 = vor.u32 %v2396_v9, %v2394_v57  ;;  %v1786_v6 = vsel %vm8318_vm0, %v1778_v56, %v1785_v17  ;;  %v2308_v53 = vrot.slane %v2307_v18, 4  ;;  %v1949_v22 = vrot.slane %v1944_v7, 4  ;;  %4319 = vmatmul.bf16.gmra.mxu1 %v3032_v25  ;;  %v8987_v25 = vld [vmem:[#allocation2 + $0x74] sm:$0xf] }
 0x1ab   : > { %2552 = vst [vmem:[#allocation2 + $0x1b8] sm:$0xf] %v2395_v19  ;;  %v1794_v59 = vor.u32 %v1792_v27, %v8966_v4  ;;  %v1948_v41 = vsel %vm8318_vm0, %v1940_v33, %v1947_v28  ;;  %v2311_v35 = vrot.slane %v1789_v54, 4  ;;  %v1951_v1 = vshrl.u32 %v1620_v38, 16  ;;  %4547 = vmatmul.bf16.gmra.mxu3 %v8644_v32  ;;  %v957_v58 = vpop.f32.mrf.mxu3 }
 0x1ac   : > { %2137 = vst [vmem:[#allocation2 + $0xe4] sm:$0xf] %v1786_v6  ;;  %v2398_v46 = vrot.slane %v2397_v45, 4  ;;  %v2310_v56 = vsel %vm8306_vm15, %v2308_v53, %v2309_v34  ;;  %v1954_v7 = vshll.u32 %v1620_v38, 16  ;;  %v1107_v27 = vmax.f32 %v1059_v24, 0.0 }
 0x1ad   : > { %2155 = vst [vmem:[#allocation2 + $0x1bc] sm:$0xf] %v1948_v41  ;;  %v1795_v26 = vsel %vm8318_vm0, %v1787_v55, %v1794_v59  ;;  %v2312_v57 = vor.u32 %v2311_v35, %v2309_v34  ;;  %v8989_v33 = vrot.slane %v1951_v1, 7  ;;  %v2401_v45 = vrot.slane %v1951_v1, 4  ;;  %v915_v32 = vpop.f32.mrf.mxu0  ;;  %v9013_v41 = vld [vmem:[#allocation2 + $0xd8] sm:$0xff] }
 0x1ae   : > { %11340 = vst [vmem:[#allocation16_spill] sm:$0xff] %v8987_v25  ;;  %v1025_v54 = vmul.f32 %v8772_v23, %v955_v10  ;;  %v2399_v9 = vrot.slane %v1954_v7, 5  ;;  %v1443_v17 = vmul.f32 %v1278_v42, %v1107_v27  ;;  %v1008_v50 = vmul.f32 %v8772_v23, %v912_v61 }
 0x1af   : > { %2138 = vst [vmem:[#allocation2 + $0xf0] sm:$0xf] %v1795_v26  ;;  %v1026_v18 = vmul.f32 %v8772_v23, %v957_v58  ;;  %v1956_v38 = vor.u32 %v1954_v7, %v8989_v33  ;;  %v9000_v34 = vpack.c.b16 %v2912_v21, %v2909_v15  ;;  %v11220_v10 = vunpack.c.l.b16 %v8987_v25 }
 0x1b0   : > { %2535 = vst [vmem:[#allocation2 + $0xec] sm:$0xf] %v2310_v56  ;;  %v1077_v24 = vadd.f32 %v8752_v47, %v1025_v54  ;;  %v1796_v55 = vrot.slane %v8966_v4, 4  ;;  %v2400_v42 = vsel %vm8306_vm15, %v2398_v46, %v2399_v9  ;;  %v1603_v61 = vpack.c.bf16 %v1443_v17, %v1443_v17  ;;  %v9007_v19 = vpop.f32.mrf.mxu1  ;;  %4691 = vmatmul.bf16.gmra.mxu0 %v8951_v39  ;;  %v1283_v46 = vpop.permute.xlu1 %1282 }
 0x1b1   : > { %v1060_v28 = vadd.f32 %v8752_v47, %v1008_v50  ;;  %11341 = vst [vmem:[#allocation17_spill] sm:$0xff] %v9007_v19  ;;  %v2313_v6 = vrot.slane %v2312_v57, 4  ;;  %v1957_v43 = vsel %vm8318_vm0, %v1949_v22, %v1956_v38  ;;  %v1078_v40 = vadd.f32 %v8752_v47, %v1026_v18 }
 0x1b2   : > { %2553 = vst [vmem:[#allocation2 + $0x1c4] sm:$0xf] %v2400_v42  ;;  %v1125_v15 = vmax.f32 %v1077_v24, 0.0  ;;  %v2402_v21 = vor.u32 %v2401_v45, %v2399_v9  ;;  %v1798_v4 = vshrl.u32 %v1603_v61, 16  ;;  %v1801_v53 = vshll.u32 %v1603_v61, 16 }
 0x1b3   : > { %2156 = vst [vmem:[#allocation2 + $0x1c8] sm:$0xf] %v1957_v43  ;;  %v1108_v59 = vmax.f32 %v1060_v28, 0.0  ;;  %v1958_v35 = vrot.slane %v8989_v33, 4  ;;  %v1126_v1 = vmax.f32 %v1078_v40, 0.0  ;;  %v9017_v58 = vld [vmem:[#allocation2 + $0xe4] sm:$0xff]  ;;  %v1009_v22 = vmul.f32 %v8772_v23, %v915_v32  ;;  %v9020_v26 = vpop.f32.mrf.mxu3 }
 0x1b4   : > { %2192 = vst [vmem:[#allocation2 + $0x100] sm:$0xf] %v1603_v61  ;;  %v1461_v39 = vmul.f32 %v8391_v36, %v1125_v15  ;;  %v9022_v56 = vrot.slane %v1798_v4, 7  ;;  %v2314_v7 = vrot.slane %v1801_v53, 5  ;;  %v2316_v27 = vrot.slane %v1798_v4, 4  ;;  %v6922_v32 = vld [vmem:[%s11203_s4 + $0x138] sm:$0xff] }
 0x1b5   : > { %v1444_v57 = vmul.f32 %v1283_v46, %v1108_v59  ;;  %v1462_v54 = vmul.f32 %v8445_v29, %v1126_v1  ;;  %v2918_v33 = vunpack.c.l.b16 %v9013_v41  ;;  %v11227_v9 = vunpack.c.l.b16 %v9017_v58  ;;  %v9027_v36 = vpop.f32.mrf.mxu0  ;;  %4787 = vmatpush.bf16.msrb.mxu1 %v6922_v32 }
 0x1b6   : > { %v1621_v45 = vpack.c.bf16 %v1461_v39, %v1461_v39  ;;  %v2403_v17 = vrot.slane %v2402_v21, 4  ;;  %v1803_v50 = vor.u32 %v1801_v53, %v9022_v56  ;;  %v2315_v18 = vsel %vm8306_vm15, %v2313_v6, %v2314_v7 }
 0x1b7   : > { %v2317_v38 = vor.u32 %v2316_v27, %v2314_v7  ;;  %2536 = vst [vmem:[#allocation2 + $0xf8] sm:$0xf] %v2315_v18  ;;  %v1604_v42 = vpack.c.bf16 %v1444_v57, %v1444_v57  ;;  %v1622_v61 = vpack.c.bf16 %v1462_v54, %v1462_v54  ;;  %v1805_v43 = vrot.slane %v9022_v56, 4 }
 0x1b8   : > { %v1960_v24 = vshrl.u32 %v1621_v45, 16  ;;  %v1963_v29 = vshll.u32 %v1621_v45, 16  ;;  %v1804_v28 = vsel %vm8318_vm0, %v1796_v55, %v1803_v50  ;;  %2210 = vst [vmem:[#allocation2 + $0x1d8] sm:$0xf] %v1621_v45  ;;  %v3035_v15 = vpack.c.b16 %v11227_v9, %v2918_v33  ;;  %v9043_v59 = vpop.f32.mrf.mxu1  ;;  %v6921_v45 = vld [vmem:[%s11203_s4 + $0x130] sm:$0xff] }
 0x1b9   : > { %v1061_v6 = vadd.f32 %v8752_v47, %v1009_v22  ;;  %2139 = vst [vmem:[#allocation2 + $0xfc] sm:$0xf] %v1804_v28  ;;  %v1807_v53 = vshrl.u32 %v1604_v42, 16  ;;  %v2318_v46 = vrot.slane %v2317_v38, 4  ;;  %v1810_v39 = vshll.u32 %v1604_v42, 16  ;;  %4788 = vmatpush.bf16.msrb.mxu1 %v6921_v45 }
 0x1ba   : > { %v1962_v40 = vrot.slane %v1960_v24, 7  ;;  %v2404_v21 = vrot.slane %v1963_v29, 5  ;;  %v2406_v4 = vrot.slane %v1960_v24, 4  ;;  %11342 = vst [vmem:[#allocation18_spill] sm:$0xff] %v9043_v59  ;;  %v1969_v55 = vshrl.u32 %v1622_v61, 16  ;;  %4324 = vmatmul.bf16.gmra.mxu1 %v3035_v15  ;;  %v6894_v59 = vld [vmem:[%s11203_s4 + $0x58] sm:$0xff] }
 0x1bb   : > { %2193 = vst [vmem:[#allocation2 + $0x10c] sm:$0xf] %v1604_v42  ;;  %v1972_v1 = vshll.u32 %v1622_v61, 16  ;;  %v1109_v22 = vmax.f32 %v1061_v6, 0.0  ;;  %4552 = vmatmul.bf16.gmra.mxu3 %v8900_v20  ;;  %v962_v57 = vpop.f32.mrf.mxu3  ;;  %v9051_v54 = vrot.slane %v1807_v53, 7  ;;  %v2319_v32 = vrot.slane %v1810_v39, 5 }
 0x1bc   : > { %v1965_v56 = vor.u32 %v1963_v29, %v1962_v40  ;;  %v2405_v7 = vsel %vm8306_vm15, %v2403_v17, %v2404_v21  ;;  %v2407_v27 = vor.u32 %v2406_v4, %v2404_v21  ;;  %2211 = vst [vmem:[#allocation2 + $0x1e4] sm:$0xf] %v1622_v61  ;;  %v2321_v50 = vrot.slane %v1807_v53, 4  ;;  %v6920_v20 = vld [vmem:[%s11203_s4 + $0x128] sm:$0xff] }
 0x1bd   : > { %2554 = vst [vmem:[#allocation2 + $0x1d0] sm:$0xf] %v2405_v7  ;;  %v9053_v18 = vrot.slane %v1969_v55, 7  ;;  %v1967_v38 = vrot.slane %v1962_v40, 4  ;;  %v2409_v29 = vrot.slane %v1972_v1, 5  ;;  %v920_v42 = vpop.f32.mrf.mxu0  ;;  %v1812_v61 = vor.u32 %v1810_v39, %v9051_v54  ;;  %4789 = vmatpush.bf16.msrb.mxu1 %v6920_v20 }
 0x1be   : > { %v1966_v17 = vsel %vm8318_vm0, %v1958_v35, %v1965_v56  ;;  %v2408_v24 = vrot.slane %v2407_v27, 4  ;;  %v2320_v28 = vsel %vm8306_vm15, %v2318_v46, %v2319_v32  ;;  %v2322_v15 = vor.u32 %v2321_v50, %v2319_v32 }
 0x1bf   : > { %2157 = vst [vmem:[#allocation2 + $0x1d4] sm:$0xf] %v1966_v17  ;;  %v2411_v6 = vrot.slane %v1969_v55, 4  ;;  %v1974_v35 = vor.u32 %v1972_v1, %v9053_v18  ;;  %v11343_v21 = vunpack.c.l.b16 %v8902_v44  ;;  %v1813_v53 = vsel %vm8318_vm0, %v1805_v43, %v1812_v61  ;;  %v9078_v1 = vld [vmem:[#allocation2 + $0xf0] sm:$0xff] }
 0x1c0   : > { %2537 = vst [vmem:[#allocation2 + $0x104] sm:$0xf] %v2320_v28  ;;  %v2410_v40 = vsel %vm8306_vm15, %v2408_v24, %v2409_v29  ;;  %v1814_v39 = vrot.slane %v9051_v54, 4  ;;  %v1445_v46 = vmul.f32 %v8132_v14, %v1109_v22  ;;  %v1027_v55 = vmul.f32 %v8772_v23, %v9020_v26  ;;  %v9080_v56 = vld [vmem:[#allocation2 + $0xfc] sm:$0xff]  ;;  %4696 = vmatmul.bf16.gmra.mxu0 %v9000_v34  ;;  %v9089_v22 = vpop.f32.mrf.mxu1 }
 0x1c1   : > { %v9070_v4 = vpack.c.b16 %v11220_v10, %v11343_v21  ;;  %2555 = vst [vmem:[#allocation2 + $0x1dc] sm:$0xf] %v2410_v40  ;;  %v1975_v7 = vsel %vm8318_vm0, %v1967_v38, %v1974_v35  ;;  %v1976_v43 = vrot.slane %v9053_v18, 4  ;;  %v1010_v27 = vmul.f32 %v8772_v23, %v9027_v36 }
 0x1c2   : > { %2140 = vst [vmem:[#allocation2 + $0x108] sm:$0xf] %v1813_v53  ;;  %v1028_v14 = vmul.f32 %v8772_v23, %v962_v57  ;;  %v2323_v26 = vrot.slane %v2322_v15, 4  ;;  %v2412_v45 = vor.u32 %v2411_v6, %v2409_v29  ;;  %v1605_v54 = vpack.c.bf16 %v1445_v46, %v1445_v46  ;;  %v6919_v57 = vld [vmem:[%s11203_s4 + $0x120] sm:$0xff] }
 0x1c3   : > { %11344 = vst [vmem:[#allocation19_spill] sm:$0xff] %v9089_v22  ;;  %v1079_v34 = vadd.f32 %v8752_v47, %v1027_v55  ;;  %v1062_v32 = vadd.f32 %v8752_v47, %v1010_v27  ;;  %v11226_v17 = vunpack.c.l.b16 %v9078_v1  ;;  %v11221_v38 = vunpack.c.l.b16 %v9080_v56  ;;  %v965_v36 = vpop.f32.mrf.mxu3  ;;  %4790 = vmatpush.bf16.msrb.mxu1 %v6919_v57 }
 0x1c4   : > { %2158 = vst [vmem:[#allocation2 + $0x1e0] sm:$0xf] %v1975_v7  ;;  %v1080_v50 = vadd.f32 %v8752_v47, %v1028_v14  ;;  %v1816_v24 = vshrl.u32 %v1605_v54, 16  ;;  %v1819_v20 = vshll.u32 %v1605_v54, 16  ;;  %v1011_v61 = vmul.f32 %v8772_v23, %v920_v42  ;;  %v11345_v7 = vld [vmem:[#allocation3_spill] sm:$0xff] }
 0x1c5   : > { %2194 = vst [vmem:[#allocation2 + $0x118] sm:$0xf] %v1605_v54  ;;  %v1127_v29 = vmax.f32 %v1079_v34, 0.0  ;;  %v1110_v28 = vmax.f32 %v1062_v32, 0.0  ;;  %v3038_v6 = vpack.c.b16 %v11221_v38, %v11226_v17  ;;  %v1029_v35 = vmul.f32 %v8772_v23, %v965_v36  ;;  %v922_v40 = vpop.f32.mrf.mxu0  ;;  %v9881_v44 = vld [vmem:[#allocation2 + $0x1d0] sm:$0xf] }
 0x1c6   : > { %v1128_v15 = vmax.f32 %v1080_v50, 0.0  ;;  %v9105_v21 = vrot.slane %v1816_v24, 7  ;;  %v2324_v53 = vrot.slane %v1819_v20, 5  ;;  %v2326_v46 = vrot.slane %v1816_v24, 4 }
 0x1c7   : > { %v1463_v55 = vmul.f32 %v8514_v62, %v1127_v29  ;;  %v1446_v27 = vmul.f32 %v11345_v7, %v1110_v28  ;;  %v1063_v14 = vadd.f32 %v8752_v47, %v1011_v61  ;;  %v1081_v54 = vadd.f32 %v8752_v47, %v1029_v35 }
 0x1c8   : > { %v1464_v42 = vmul.f32 %v8551_v37, %v1128_v15  ;;  %v2413_v34 = vrot.slane %v2412_v45, 4  ;;  %v1821_v32 = vor.u32 %v1819_v20, %v9105_v21  ;;  %v2325_v50 = vsel %vm8306_vm15, %v2323_v26, %v2324_v53  ;;  %v9115_v29 = vpop.f32.mrf.mxu1  ;;  %v6918_v26 = vld [vmem:[%s11203_s4 + $0x118] sm:$0xff] }
 0x1c9   : > { %v2327_v36 = vor.u32 %v2326_v46, %v2324_v53  ;;  %2538 = vst [vmem:[#allocation2 + $0x110] sm:$0xf] %v2325_v50  ;;  %v1623_v57 = vpack.c.bf16 %v1463_v55, %v1463_v55  ;;  %v1606_v24 = vpack.c.bf16 %v1446_v27, %v1446_v27  ;;  %v1111_v62 = vmax.f32 %v1063_v14, 0.0  ;;  %4791 = vmatpush.bf16.msrb.mxu1 %v6918_v26 }
 0x1ca   : > { %v1624_v10 = vpack.c.bf16 %v1464_v42, %v1464_v42  ;;  %11346 = vst [vmem:[#allocation3_spill] sm:$0xff] %v9115_v29  ;;  %v1822_v37 = vsel %vm8318_vm0, %v1814_v39, %v1821_v32  ;;  %4329 = vmatmul.bf16.gmra.mxu1 %v3038_v6  ;;  %v1129_v47 = vmax.f32 %v1081_v54, 0.0  ;;  %v1012_v45 = vmul.f32 %v8772_v23, %v922_v40  ;;  %v11347_v6 = vld [vmem:[#allocation5_spill] sm:$0xff] }
 0x1cb   : > { %v2328_v61 = vrot.slane %v2327_v36, 4  ;;  %2141 = vst [vmem:[#allocation2 + $0x114] sm:$0xf] %v1822_v37  ;;  %v1978_v20 = vshrl.u32 %v1623_v57, 16  ;;  %v1981_v28 = vshll.u32 %v1623_v57, 16  ;;  %v1825_v15 = vshrl.u32 %v1606_v24, 16  ;;  %4557 = vmatmul.bf16.gmra.mxu3 %v9070_v4  ;;  %v9124_v53 = vpop.f32.mrf.mxu3 }
 0x1cc   : > { %v1828_v35 = vshll.u32 %v1606_v24, 16  ;;  %2212 = vst [vmem:[#allocation2 + $0x1f0] sm:$0xf] %v1623_v57  ;;  %v1987_v39 = vshrl.u32 %v1624_v10, 16  ;;  %v1990_v46 = vshll.u32 %v1624_v10, 16  ;;  %v1447_v55 = vmul.f32 %v11347_v6, %v1111_v62  ;;  %v6917_v37 = vld [vmem:[%s11203_s4 + $0x110] sm:$0xff] }
 0x1cd   : > { %v1465_v23 = vmul.f32 %v8890_v63, %v1129_v47  ;;  %v1980_v40 = vrot.slane %v1978_v20, 7  ;;  %v2414_v7 = vrot.slane %v1981_v28, 5  ;;  %v2416_v27 = vrot.slane %v1978_v20, 4  ;;  %2195 = vst [vmem:[#allocation2 + $0x124] sm:$0xf] %v1606_v24  ;;  %v9130_v14 = vpop.f32.mrf.mxu0  ;;  %4792 = vmatpush.bf16.msrb.mxu1 %v6917_v37 }
 0x1ce   : > { %v9128_v42 = vrot.slane %v1825_v15, 7  ;;  %v2329_v54 = vrot.slane %v1828_v35, 5  ;;  %v2331_v4 = vrot.slane %v1825_v15, 4  ;;  %v9132_v32 = vrot.slane %v1987_v39, 7  ;;  %2213 = vst [vmem:[#allocation2 + $0x1fc] sm:$0xf] %v1624_v10 }
 0x1cf   : > { %v2419_v50 = vrot.slane %v1990_v46, 5  ;;  %v1983_v36 = vor.u32 %v1981_v28, %v1980_v40  ;;  %v1985_v57 = vrot.slane %v1980_v40, 4  ;;  %v2415_v63 = vsel %vm8306_vm15, %v2413_v34, %v2414_v7  ;;  %v9162_v40 = vld [vmem:[%s11202_s3] ss:$0 sm:$0xff] }
 0x1d0   : > { %v2417_v62 = vor.u32 %v2416_v27, %v2414_v7  ;;  %v1823_v24 = vrot.slane %v9105_v21, 4  ;;  %2556 = vst [vmem:[#allocation2 + $0x1e8] sm:$0xf] %v2415_v63  ;;  %v1830_v47 = vor.u32 %v1828_v35, %v9128_v42  ;;  %v2330_v26 = vsel %vm8306_vm15, %v2328_v61, %v2329_v54  ;;  %v9148_v15 = vpop.f32.mrf.mxu1  ;;  %v6916_v21 = vld [vmem:[%s11203_s4 + $0x108] sm:$0xff] }
 0x1d1   : > { %v1984_v10 = vsel %vm8318_vm0, %v1976_v43, %v1983_v36  ;;  %v2332_v34 = vor.u32 %v2331_v4, %v2329_v54  ;;  %2539 = vst [vmem:[#allocation2 + $0x11c] sm:$0xf] %v2330_v26  ;;  %v1992_v28 = vor.u32 %v1990_v46, %v9132_v32  ;;  %v2421_v18 = vrot.slane %v1987_v39, 4  ;;  %v9165_v27 = vld [vmem:[#allocation2 + $0x24] sm:$0xff]  ;;  %4793 = vmatpush.bf16.msrb.mxu1 %v6916_v21  ;;  %v9173_v26 = vld [vmem:[%s11201_s2] ss:$0 sm:$0xff] }
 0x1d2   : > { %v2418_v20 = vrot.slane %v2417_v62, 4  ;;  %11348 = vst [vmem:[#allocation5_spill] sm:$0xff] %v9148_v15  ;;  %v1831_v61 = vsel %vm8318_vm0, %v1823_v24, %v1830_v47  ;;  %v1607_v35 = vpack.c.bf16 %v1447_v55, %v1447_v55  ;;  %v1625_v6 = vpack.c.bf16 %v1465_v23, %v1465_v23  ;;  %v11349_v21 = vld [vmem:[#allocation6_spill] sm:$0xff] }
 0x1d3   : > { %2159 = vst [vmem:[#allocation2 + $0x1ec] sm:$0xf] %v1984_v10  ;;  %v1993_v43 = vsel %vm8318_vm0, %v1985_v57, %v1992_v28  ;;  %v1064_v7 = vadd.f32 %v9162_v40, %v1012_v45  ;;  %v2422_v55 = vor.u32 %v2421_v18, %v2419_v50  ;;  %v2333_v36 = vrot.slane %v2332_v34, 4  ;;  %v970_v62 = vpop.f32.mrf.mxu3  ;;  %v9177_v10 = vld [vmem:[#allocation2 + $0x108] sm:$0xff]  ;;  %v6915_v18 = vld [vmem:[%s11203_s4 + $0x100] sm:$0xff] }
 0x1d4   : > { %2142 = vst [vmem:[#allocation2 + $0x120] sm:$0xf] %v1831_v61  ;;  %v2420_v46 = vsel %vm8306_vm15, %v2418_v20, %v2419_v50  ;;  %v1834_v54 = vshrl.u32 %v1607_v35, 16  ;;  %v1837_v4 = vshll.u32 %v1607_v35, 16  ;;  %v1996_v57 = vshrl.u32 %v1625_v6, 16 }
 0x1d5   : > { %2160 = vst [vmem:[#allocation2 + $0x1f8] sm:$0xf] %v1993_v43  ;;  %v1999_v63 = vshll.u32 %v1625_v6, 16  ;;  %v1112_v23 = vmax.f32 %v1064_v7, 0.0  ;;  %v927_v37 = vpop.f32.mrf.mxu0  ;;  %v1030_v50 = vmul.f32 %v9173_v26, %v9124_v53  ;;  %v2423_v20 = vrot.slane %v2422_v55, 4  ;;  %v9191_v7 = vld [vmem:[#allocation2 + $0x114] sm:$0xff]  ;;  %4794 = vmatpush.bf16.msrb.mxu1 %v6915_v18 }
 0x1d6   : > { %2557 = vst [vmem:[#allocation2 + $0x1f4] sm:$0xf] %v2420_v46  ;;  %v9168_v24 = vrot.slane %v1834_v54, 7  ;;  %v2334_v45 = vrot.slane %v1837_v4, 5  ;;  %v2336_v47 = vrot.slane %v1834_v54, 4  ;;  %v9179_v34 = vrot.slane %v1996_v57, 7 }
 0x1d7   : > { %2196 = vst [vmem:[#allocation2 + $0x130] sm:$0xf] %v1607_v35  ;;  %v9181_v28 = vrot.slane %v1999_v63, 5  ;;  %v1448_v61 = vmul.f32 %v11349_v21, %v1112_v23  ;;  %v1832_v35 = vrot.slane %v9128_v42, 4  ;;  %v9196_v55 = vld [vmem:[#allocation2 + $0x30] sm:$0xff]  ;;  %v1994_v23 = vrot.slane %v9132_v32, 4 }
 0x1d8   : > { %2214 = vst [vmem:[#allocation2 + $0x208] sm:$0xf] %v1625_v6  ;;  %v1839_v43 = vor.u32 %v1837_v4, %v9168_v24  ;;  %v2335_v53 = vsel %vm8306_vm15, %v2333_v36, %v2334_v45  ;;  %v2337_v46 = vor.u32 %v2336_v47, %v2334_v45  ;;  %v6898_v6 = vld [vmem:[%s11203_s4 + $0x78] sm:$0xff]  ;;  %v2001_v42 = vor.u32 %v1999_v63, %v9179_v34  ;;  %v9212_v18 = vpop.f32.mrf.mxu1 }
 0x1d9   : > { %2540 = vst [vmem:[#allocation2 + $0x128] sm:$0xf] %v2335_v53  ;;  %v2425_v4 = vsel %vm8306_vm15, %v2423_v20, %v9181_v28  ;;  %v1608_v45 = vpack.c.bf16 %v1448_v61, %v1448_v61  ;;  %v1082_v47 = vadd.f32 %v9162_v40, %v1030_v50  ;;  %v11223_v21 = vunpack.c.l.b16 %v9177_v10  ;;  %4400 = vmatpush.bf16.msrb.mxu2 %v6898_v6 }
 0x1da   : > { %v1840_v36 = vsel %vm8318_vm0, %v1832_v35, %v1839_v43  ;;  %2558 = vst [vmem:[#allocation2 + $0x200] sm:$0xf] %v2425_v4  ;;  %v1841_v32 = vrot.slane %v9168_v24, 4  ;;  %v2002_v63 = vsel %vm8318_vm0, %v1994_v23, %v2001_v42  ;;  %v2426_v53 = vrot.slane %v1996_v57, 4  ;;  %v9225_v23 = vld [vmem:[#allocation2 + $0x80] sm:$0xf] }
 0x1db   : > { %2143 = vst [vmem:[#allocation2 + $0x12c] sm:$0xf] %v1840_v36  ;;  %v11222_v20 = vunpack.c.l.b16 %v9191_v7  ;;  %v2338_v38 = vrot.slane %v2337_v46, 4  ;;  %v1843_v35 = vshrl.u32 %v1608_v45, 16  ;;  %v1846_v61 = vshll.u32 %v1608_v45, 16 }
 0x1dc   : > { %11350 = vst [vmem:[#allocation6_spill] sm:$0xff] %v9212_v18  ;;  %v1130_v43 = vmax.f32 %v1082_v47, 0.0  ;;  %v1013_v50 = vmul.f32 %v9173_v26, %v9130_v14  ;;  %v11351_v57 = vunpack.c.l.b16 %v8937_v16  ;;  %v1031_v46 = vmul.f32 %v9173_v26, %v970_v62  ;;  %v9236_v14 = vld [vmem:[#allocation2 + $0x8c] sm:$0xf]  ;;  %v972_v62 = vpop.f32.mrf.mxu3 }
 0x1dd   : > { %2161 = vst [vmem:[#allocation2 + $0x204] sm:$0xf] %v2002_v63  ;;  %v3041_v24 = vpack.c.b16 %v11222_v20, %v11223_v21  ;;  %v9227_v42 = vpop.f32.mrf.mxu0  ;;  %v9229_v4 = vrot.slane %v1843_v35, 7  ;;  %v2339_v36 = vrot.slane %v1846_v61, 5  ;;  %v2003_v63 = vrot.slane %v9179_v34, 4 }
 0x1de   : > { %2197 = vst [vmem:[#allocation2 + $0x13c] sm:$0xf] %v1608_v45  ;;  %v3188_v6 = vpack.c.b16 %v2918_v33, %v11351_v57  ;;  %v2341_v45 = vrot.slane %v1843_v35, 4  ;;  %v1466_v47 = vmul.f32 %v8942_v52, %v1130_v43  ;;  %v1065_v16 = vadd.f32 %v9162_v40, %v1013_v50 }
 0x1df   : > { %11352 = vst [vmem:[#allocation20_spill] sm:$0xff] %v9225_v23  ;;  %4334 = vmatmul.bf16.gmra.mxu1 %v3041_v24  ;;  %v1083_v41 = vadd.f32 %v9162_v40, %v1031_v46  ;;  %v1014_v33 = vmul.f32 %v9173_v26, %v927_v37  ;;  %v2427_v57 = vor.u32 %v2426_v53, %v9181_v28  ;;  %v11225_v34 = vunpack.c.l.b16 %v9225_v23 }
 0x1e0   : > { %11353 = vst [vmem:[#allocation21_spill] sm:$0xff] %v9227_v42  ;;  %4701 = vmatmul.bf16.gmra.mxu0 %v3188_v6  ;;  %v1848_v20 = vor.u32 %v1846_v61, %v9229_v4  ;;  %v2340_v52 = vsel %vm8306_vm15, %v2338_v38, %v2339_v36  ;;  %v1626_v35 = vpack.c.bf16 %v1466_v47, %v1466_v47  ;;  %v1113_v43 = vmax.f32 %v1065_v16, 0.0  ;;  %v11355_v38 = vld [vmem:[#allocation4_spill] sm:$0xff] }
 0x1e1   : > { %11354 = vst [vmem:[#allocation22_spill] sm:$0xff] %v9236_v14  ;;  %v1131_v24 = vmax.f32 %v1083_v41, 0.0  ;;  %v1066_v50 = vadd.f32 %v9162_v40, %v1014_v33  ;;  %v2342_v6 = vor.u32 %v2341_v45, %v2339_v36  ;;  %v11224_v46 = vunpack.c.l.b16 %v9236_v14 }
 0x1e2   : > { %2541 = vst [vmem:[#allocation2 + $0x134] sm:$0xf] %v2340_v52  ;;  %v1849_v37 = vsel %vm8318_vm0, %v1841_v32, %v1848_v20  ;;  %v1032_v28 = vmul.f32 %v9173_v26, %v972_v62  ;;  %v2005_v53 = vshrl.u32 %v1626_v35, 16  ;;  %v2008_v61 = vshll.u32 %v1626_v35, 16  ;;  %v9255_v62 = vpop.f32.mrf.mxu1 }
 0x1e3   : > { %2144 = vst [vmem:[#allocation2 + $0x138] sm:$0xf] %v1849_v37  ;;  %v1449_v21 = vmul.f32 %v11355_v38, %v1113_v43  ;;  %v1467_v52 = vmul.f32 %v8577_v12, %v1131_v24  ;;  %v2428_v47 = vrot.slane %v2427_v57, 4  ;;  %v1114_v16 = vmax.f32 %v1066_v50, 0.0 }
 0x1e4   : > { %2215 = vst [vmem:[#allocation2 + $0x214] sm:$0xf] %v1626_v35  ;;  %v3025_v32 = vpack.c.b16 %v11224_v46, %v11225_v34  ;;  %v1084_v20 = vadd.f32 %v9162_v40, %v1032_v28  ;;  %v2007_v36 = vrot.slane %v2005_v53, 7  ;;  %v2429_v45 = vrot.slane %v2008_v61, 5  ;;  %v11358_v35 = vld [vmem:[#allocation8_spill] sm:$0xff] }
 0x1e5   : > { %v2431_v41 = vrot.slane %v2005_v53, 4  ;;  %v1609_v33 = vpack.c.bf16 %v1449_v21, %v1449_v21  ;;  %11356 = vst [vmem:[#allocation4_spill] sm:$0xff] %v9255_v62  ;;  %v9257_v37 = vpop.f32.mrf.mxu0  ;;  %v1850_v12 = vrot.slane %v9229_v4, 4  ;;  %v1627_v57 = vpack.c.bf16 %v1467_v52, %v1467_v52 }
 0x1e6   : > { %11357 = vst [vmem:[#allocation23_spill] sm:$0xff] %v9257_v37  ;;  %v1450_v43 = vmul.f32 %v11358_v35, %v1114_v16  ;;  %4562 = vmatmul.bf16.gmra.mxu3 %v3025_v32  ;;  %v1132_v24 = vmax.f32 %v1084_v20, 0.0  ;;  %v2343_v50 = vrot.slane %v2342_v6, 4  ;;  %v2010_v38 = vor.u32 %v2008_v61, %v2007_v36  ;;  %v9266_v6 = vld [vmem:[#allocation2 + $0x120] sm:$0xff]  ;;  %v6897_v61 = vld [vmem:[%s11203_s4 + $0x70] sm:$0xff] }
 0x1e7   : > { %v2430_v28 = vsel %vm8306_vm15, %v2428_v47, %v2429_v45  ;;  %v2432_v46 = vor.u32 %v2431_v41, %v2429_v45  ;;  %2198 = vst [vmem:[#allocation2 + $0x148] sm:$0xf] %v1609_v33  ;;  %v1852_v21 = vshrl.u32 %v1609_v33, 16  ;;  %v1855_v53 = vshll.u32 %v1609_v33, 16  ;;  %v975_v33 = vpop.f32.mrf.mxu3  ;;  %4401 = vmatpush.bf16.msrb.mxu2 %v6897_v61 }
 0x1e8   : > { %2559 = vst [vmem:[#allocation2 + $0x20c] sm:$0xf] %v2430_v28  ;;  %v2014_v34 = vshrl.u32 %v1627_v57, 16  ;;  %v2017_v17 = vshll.u32 %v1627_v57, 16  ;;  %v2011_v4 = vsel %vm8318_vm0, %v2003_v63, %v2010_v38  ;;  %v1610_v16 = vpack.c.bf16 %v1450_v43, %v1450_v43 }
 0x1e9   : > { %v2433_v52 = vrot.slane %v2432_v46, 4  ;;  %2216 = vst [vmem:[#allocation2 + $0x220] sm:$0xf] %v1627_v57  ;;  %v1468_v32 = vmul.f32 %v8637_v51, %v1132_v24  ;;  %v1854_v47 = vrot.slane %v1852_v21, 7  ;;  %v2344_v20 = vrot.slane %v1855_v53, 5 }
 0x1ea   : > { %2162 = vst [vmem:[#allocation2 + $0x210] sm:$0xf] %v2011_v4  ;;  %v2346_v45 = vrot.slane %v1852_v21, 4  ;;  %v9271_v41 = vrot.slane %v2014_v34, 7  ;;  %v2434_v35 = vrot.slane %v2017_v17, 5  ;;  %v2436_v63 = vrot.slane %v2014_v34, 4 }
 0x1eb   : > { %v1861_v46 = vshrl.u32 %v1610_v16, 16  ;;  %v1864_v57 = vshll.u32 %v1610_v16, 16  ;;  %2199 = vst [vmem:[#allocation2 + $0x154] sm:$0xf] %v1610_v16  ;;  %v1857_v51 = vor.u32 %v1855_v53, %v1854_v47  ;;  %v2345_v43 = vsel %vm8306_vm15, %v2343_v50, %v2344_v20  ;;  %v9279_v34 = vld [vmem:[#allocation2 + $0x12c] sm:$0xff] }
 0x1ec   : > { %v2347_v24 = vor.u32 %v2346_v45, %v2344_v20  ;;  %v11231_v38 = vunpack.c.l.b16 %v9266_v6  ;;  %v2012_v28 = vrot.slane %v2007_v36, 4  ;;  %v1859_v4 = vrot.slane %v1854_v47, 4  ;;  %2542 = vst [vmem:[#allocation2 + $0x140] sm:$0xf] %v2345_v43  ;;  %v9287_v45 = vpop.f32.mrf.mxu1 }
 0x1ed   : > { %v2019_v21 = vor.u32 %v2017_v17, %v9271_v41  ;;  %v2435_v9 = vsel %vm8306_vm15, %v2433_v52, %v2434_v35  ;;  %v9281_v54 = vpop.f32.mrf.mxu0  ;;  %v1858_v53 = vsel %vm8318_vm0, %v1850_v12, %v1857_v51  ;;  %v1863_v50 = vrot.slane %v1861_v46, 7  ;;  %11360 = vst [vmem:[#allocation24_spill] sm:$0xff] %v9287_v45  ;;  %v9294_v51 = vld [vmem:[#allocation2 + $0x48] sm:$0xff] }
 0x1ee   : > { %11359 = vst [vmem:[#allocation8_spill] sm:$0xff] %v9281_v54  ;;  %v2348_v16 = vrot.slane %v2347_v24, 4  ;;  %v2349_v61 = vrot.slane %v1864_v57, 5  ;;  %v2437_v47 = vor.u32 %v2436_v63, %v2434_v35  ;;  %v2351_v17 = vrot.slane %v1861_v46, 4  ;;  %v9297_v63 = vld [vmem:[#allocation2 + $0xa4] sm:$0xf] }
 0x1ef   : > { %2560 = vst [vmem:[#allocation2 + $0x218] sm:$0xf] %v2435_v9  ;;  %v2020_v36 = vsel %vm8318_vm0, %v2012_v28, %v2019_v21  ;;  %v1628_v20 = vpack.c.bf16 %v1468_v32, %v1468_v32  ;;  %v1866_v52 = vor.u32 %v1864_v57, %v1863_v50  ;;  %v1868_v43 = vrot.slane %v1863_v50, 4  ;;  %v9292_v9 = vld [vmem:[#allocation2 + $0x98] sm:$0xf] }
 0x1f0   : > { %2145 = vst [vmem:[#allocation2 + $0x144] sm:$0xf] %v1858_v53  ;;  %v2350_v39 = vsel %vm8306_vm15, %v2348_v16, %v2349_v61  ;;  %v11230_v12 = vunpack.c.l.b16 %v9279_v34  ;;  %v11234_v24 = vunpack.c.h.b16 %v9294_v51  ;;  %v2352_v28 = vor.u32 %v2351_v17, %v2349_v61 }
 0x1f1   : > { %2163 = vst [vmem:[#allocation2 + $0x21c] sm:$0xf] %v2020_v36  ;;  %v2023_v35 = vshrl.u32 %v1628_v20, 16  ;;  %v2026_v32 = vshll.u32 %v1628_v20, 16  ;;  %v1867_v46 = vsel %vm8318_vm0, %v1859_v4, %v1866_v52  ;;  %v1876_v57 = vsel %vm8318_vm0, %v1868_v43, %v8631_v5 }
 0x1f2   : > { %11361 = vst [vmem:[#allocation25_spill] sm:$0xff] %v9292_v9  ;;  %v3044_v21 = vpack.c.b16 %v11230_v12, %v11231_v38  ;;  %v11363_v53 = vunpack.c.h.b16 %v9165_v27  ;;  %v2438_v50 = vrot.slane %v2437_v47, 4  ;;  %v2353_v61 = vrot.slane %v2352_v28, 4  ;;  %v977_v47 = vpop.f32.mrf.mxu3 }
 0x1f3   : > { %2543 = vst [vmem:[#allocation2 + $0x14c] sm:$0xf] %v2350_v39  ;;  %v11364_v39 = vunpack.c.h.b16 %v9196_v55  ;;  %v9312_v36 = vrot.slane %v2023_v35, 7  ;;  %v2439_v4 = vrot.slane %v2026_v32, 5  ;;  %v11365_v5 = vunpack.c.l.b16 %v9017_v58 }
 0x1f4   : > { %11362 = vst [vmem:[#allocation26_spill] sm:$0xff] %v9297_v63  ;;  %4339 = vmatmul.bf16.vlgmr.msra.gmra.mxu2 %v3044_v21  ;;  %v11366_v17 = vunpack.c.l.b16 %v9078_v1  ;;  %v1033_v52 = vmul.f32 %v9173_v26, %v975_v33  ;;  %v11229_v43 = vunpack.c.l.b16 %v9292_v9  ;;  %v2021_v28 = vrot.slane %v9271_v41, 4  ;;  %v9330_v21 = vld [vmem:[#allocation2 + $0x3c] sm:$0xff]  ;;  %v9877_v9 = vld [vmem:[#allocation2 + $0x210] sm:$0xff] }
 0x1f5   : > { %2217 = vst [vmem:[#allocation2 + $0x22c] sm:$0xf] %v1628_v20  ;;  %v3168_v16 = vpack.c.b16 %v11364_v39, %v11363_v53  ;;  %v11228_v53 = vunpack.c.l.b16 %v9297_v63  ;;  %v2440_v58 = vsel %vm8306_vm15, %v2438_v50, %v2439_v4  ;;  %v9328_v1 = vpop.f32.mrf.mxu0  ;;  %v11235_v33 = vunpack.c.h.b16 %v9330_v21  ;;  %v9333_v39 = vld [vmem:[#allocation2 + $0x60] sm:$0xff] }
 0x1f6   : > { %2146 = vst [vmem:[#allocation2 + $0x150] sm:$0xf] %v1867_v46  ;;  %v3191_v20 = vpack.c.b16 %v11366_v17, %v11365_v5  ;;  %v2355_v46 = vsel %vm8306_vm15, %v2353_v61, %v8624_v8  ;;  %v1085_v41 = vadd.f32 %v9162_v40, %v1033_v52  ;;  %v2441_v50 = vrot.slane %v2023_v35, 4  ;;  %v9344_v5 = vld [vmem:[#allocation2 + $0x54] sm:$0xff]  ;;  %v9354_v35 = vpop.f32.mrf.mxu1 }
 0x1f7   : > { %2147 = vst [vmem:[#allocation2 + $0x15c] sm:$0xf] %v1876_v57  ;;  %4795 = vmatmul.bf16.vlgmr.msrb.gmra.mxu1 %v3168_v16  ;;  %v2028_v57 = vor.u32 %v2026_v32, %v9312_v36  ;;  %v11232_v16 = vunpack.c.h.b16 %v9333_v39  ;;  %v3028_v8 = vpack.c.b16 %v11228_v53, %v11229_v43  ;;  %v1034_v61 = vmul.f32 %v9173_v26, %v977_v47  ;;  %v9352_v53 = vld [vmem:[#allocation2 + $0x144] sm:$0xff]  ;;  %v9366_v43 = vld [vmem:[#allocation2 + $0x6c] sm:$0xff] }
 0x1f8   : > { %11367 = vst [vmem:[#allocation27_spill] sm:$0xff] %v9328_v1  ;;  %4706 = vmatmul.bf16.gmra.mxu0 %v3191_v20  ;;  %v11233_v17 = vunpack.c.h.b16 %v9344_v5  ;;  %v1133_v20 = vmax.f32 %v1085_v41, 0.0  ;;  %v3171_v52 = vpack.c.b16 %v11234_v24, %v11235_v33  ;;  %v9363_v41 = vld [vmem:[#allocation2 + $0x138] sm:$0xff]  ;;  %v11372_v18 = vunpack.c.l.b16 %v9080_v56  ;;  %v1418_v1 = vpop.permute.xlu2 %1417 }
 0x1f9   : > { %2544 = vst [vmem:[#allocation2 + $0x158] sm:$0xf] %v2355_v46  ;;  %v2029_v32 = vsel %vm8318_vm0, %v2021_v28, %v2028_v57  ;;  %4567 = vmatmul.bf16.gmra.mxu3 %v3028_v8  ;;  %v1086_v46 = vadd.f32 %v9162_v40, %v1034_v61  ;;  %v2442_v57 = vor.u32 %v2441_v50, %v2439_v4  ;;  %v1413_v8 = vpop.permute.xlu1 %1412  ;;  %v11236_v50 = vunpack.c.l.b16 %v9363_v41  ;;  %v9376_v61 = vld [vmem:[#allocation2 + $0xbc] sm:$0xf] }
 0x1fa   : > { %2561 = vst [vmem:[#allocation2 + $0x224] sm:$0xf] %v2440_v58  ;;  %v1469_v47 = vmul.f32 %v8699_v2, %v1133_v20  ;;  %v9361_v28 = vpack.c.b16 %v11232_v16, %v11233_v17  ;;  %v9371_v20 = vld [vmem:[#allocation2 + $0x78] sm:$0xff]  ;;  %v11371_v16 = vunpack.c.l.b16 %v9352_v53  ;;  %vm2169_vm1 = vcmask 1040384  }
 0x1fb   : > { %2164 = vst [vmem:[#allocation2 + $0x228] sm:$0xf] %v2029_v32  ;;  %v1134_v58 = vmax.f32 %v1086_v46, 0.0  ;;  %v2443_v24 = vrot.slane %v2442_v57, 4  ;;  %v9387_v57 = vld [vmem:[#allocation2 + $0xb0] sm:$0xf]  ;;  %vm2170_vm2 = vmand %vm2169_vm1, %vm1633_vm13  ;;  %v11466_v13 = vunpack.c.h.b16 %v9363_v41 }
 0x1fc   : > { %11368 = vst [vmem:[#allocation28_spill] sm:$0xff] %v9354_v35  ;;  %v1629_v32 = vpack.c.bf16 %v1469_v47, %v1469_v47  ;;  %v2030_v47 = vrot.slane %v9312_v36, 4  ;;  %v3047_v45 = vpack.c.b16 %v11371_v16, %v11236_v50  ;;  %v11373_v36 = vunpack.c.l.b16 %v9177_v10 }
 0x1fd   : > { %v1470_v38 = vmul.f32 %v1413_v8, %v1134_v58  ;;  %v9369_v2 = vpop.f32.mrf.mxu0  ;;  %11370 = vst [vmem:[#allocation30_spill] sm:$0xff] %v9376_v61 }
 0x1fe   : > { %11369 = vst [vmem:[#allocation29_spill] sm:$0xff] %v9369_v2  ;;  %v2032_v17 = vshrl.u32 %v1629_v32, 16  ;;  %v2035_v4 = vshll.u32 %v1629_v32, 16  ;;  %v980_v46 = vpop.f32.mrf.mxu3  ;;  %v11237_v2 = vunpack.c.l.b16 %v9376_v61 }
 0x1ff   : > { %2218 = vst [vmem:[#allocation2 + $0x238] sm:$0xf] %v1629_v32  ;;  %v1630_v33 = vpack.c.bf16 %v1470_v38, %v1470_v38  ;;  %v1035_v58 = vmul.f32 %v9173_v26, %v980_v46  ;;  %v3194_v38 = vpack.c.b16 %v11373_v36, %v11372_v18 }
 0x200   : > { %v2034_v8 = vrot.slane %v2032_v17, 7  ;;  %v2444_v12 = vrot.slane %v2035_v4, 5  ;;  %v2446_v35 = vrot.slane %v2032_v17, 4  ;;  %11374 = vst [vmem:[#allocation31_spill] sm:$0xff] %v9387_v57 }
 0x201   : > { %v2041_v32 = vshrl.u32 %v1630_v33, 16  ;;  %v2044_v62 = vshll.u32 %v1630_v33, 16  ;;  %2219 = vst [vmem:[#allocation2 + $0x244] sm:$0xf] %v1630_v33  ;;  %v1087_v46 = vadd.f32 %v9162_v40, %v1035_v58 }
 0x202   : > { %v2037_v15 = vor.u32 %v2035_v4, %v2034_v8  ;;  %v2445_v17 = vsel %vm8306_vm15, %v2443_v24, %v2444_v12  ;;  %v2447_v29 = vor.u32 %v2446_v35, %v2444_v12  ;;  %v11238_v4 = vunpack.c.l.b16 %v9387_v57  ;;  %v6896_v12 = vld [vmem:[%s11203_s4 + $0x68] sm:$0xff] }
 0x203   : > { %2562 = vst [vmem:[#allocation2 + $0x230] sm:$0xf] %v2445_v17  ;;  %v2043_v16 = vrot.slane %v2041_v32, 7  ;;  %v2449_v50 = vrot.slane %v2044_v62, 5  ;;  %v2451_v33 = vrot.slane %v2041_v32, 4  ;;  %v9393_v22 = vpop.f32.mrf.mxu1  ;;  %v1135_v56 = vmax.f32 %v1087_v46, 0.0  ;;  %4402 = vmatpush.bf16.msrb.mxu2 %v6896_v12 }
 0x204   : > { %11375 = vst [vmem:[#allocation32_spill] sm:$0xff] %v9393_v22  ;;  %v2038_v18 = vsel %vm8318_vm0, %v2030_v47, %v2037_v15  ;;  %v2448_v36 = vrot.slane %v2447_v29, 4  ;;  %4344 = vmatmul.bf16.gmra.mxu2 %v3047_v45  ;;  %v11376_v24 = vunpack.c.h.b16 %v9366_v43  ;;  %v11377_v35 = vunpack.c.h.b16 %v9371_v20 }
 0x205   : > { %v2039_v32 = vrot.slane %v2034_v8, 4  ;;  %2165 = vst [vmem:[#allocation2 + $0x234] sm:$0xf] %v2038_v18  ;;  %v2046_v46 = vor.u32 %v2044_v62, %v2043_v16  ;;  %v1471_v17 = vmul.f32 %v1418_v1, %v1135_v56  ;;  %v9407_v15 = vpop.f32.mrf.mxu0  ;;  %v3031_v45 = vpack.c.b16 %v11237_v2, %v11238_v4 }
 0x206   : > { %v9405_v58 = vpack.c.b16 %v11377_v35, %v11376_v24  ;;  %11378 = vst [vmem:[#allocation33_spill] sm:$0xff] %v9407_v15  ;;  %v2450_v29 = vsel %vm8306_vm15, %v2448_v36, %v2449_v50  ;;  %v11379_v47 = vunpack.c.h.b16 %v9196_v55  ;;  %v11380_v8 = vunpack.c.h.b16 %v9330_v21 }
 0x207   : > { %4800 = vmatmul.bf16.gmra.mxu1 %v3171_v52  ;;  %v982_v52 = vpop.f32.mrf.mxu3  ;;  %v2047_v62 = vsel %vm8318_vm0, %v2039_v32, %v2046_v46  ;;  %v2452_v1 = vor.u32 %v2451_v33, %v2449_v50  ;;  %2563 = vst [vmem:[#allocation2 + $0x23c] sm:$0xf] %v2450_v29  ;;  %v1631_v56 = vpack.c.bf16 %v1471_v17, %v1471_v17  ;;  %v11381_v36 = vunpack.c.h.b16 %v9294_v51  ;;  %v9431_v33 = vld [vmem:[#allocation2 + $0x150] sm:$0xff]  ;;  %v9433_v46 = vld [vmem:[#allocation2 + $0x15c] sm:$0xff]  ;;  %v1423_v29 = vpop.permute.xlu0 %1422 }
 0x208   : > { %4711 = vmatmul.bf16.gmra.mxu0 %v3194_v38  ;;  %v9419_v18 = vpack.c.b16 %v11380_v8, %v11379_v47  ;;  %v1036_v38 = vmul.f32 %v9173_v26, %v982_v52  ;;  %2166 = vst [vmem:[#allocation2 + $0x240] sm:$0xf] %v2047_v62  ;;  %v11382_v12 = vunpack.c.h.b16 %v9344_v5  ;;  %v2048_v51 = vrot.slane %v2043_v16, 4  ;;  %v9439_v8 = vld [vmem:[#allocation2 + $0x90] sm:$0xff] }
 0x209   : > { %4572 = vmatmul.bf16.gmra.mxu3 %v3031_v45  ;;  %v2050_v55 = vshrl.u32 %v1631_v56, 16  ;;  %v2053_v21 = vshll.u32 %v1631_v56, 16  ;;  %2220 = vst [vmem:[#allocation2 + $0x250] sm:$0xf] %v1631_v56  ;;  %v2453_v47 = vrot.slane %v2452_v1, 4  ;;  %v11240_v62 = vunpack.c.l.b16 %v9431_v33 }
 0x20a   : > { %v9428_v24 = vpack.c.b16 %v11382_v12, %v11381_v36  ;;  %v1088_v35 = vadd.f32 %v9162_v40, %v1036_v38  ;;  %v11241_v40 = vunpack.c.h.b16 %v9439_v8  ;;  %v11239_v1 = vunpack.c.l.b16 %v9433_v46  ;;  %v9444_v38 = vld [vmem:[#allocation2 + $0xd4] sm:$0xf] }
 0x20b   : > { %v2052_v32 = vrot.slane %v2050_v55, 7  ;;  %v2454_v50 = vrot.slane %v2053_v21, 5  ;;  %v2456_v17 = vrot.slane %v2050_v55, 4  ;;  %v9437_v52 = vpop.f32.mrf.mxu1  ;;  %11384 = vst [vmem:[#allocation35_spill] sm:$0xff] %v9444_v38  ;;  %v9452_v55 = vld [vmem:[#allocation2 + $0x84] sm:$0xff]  ;;  %v11415_v15 = vunpack.c.l.b16 %v9431_v33 }
 0x20c   : > { %v1136_v26 = vmax.f32 %v1088_v35, 0.0  ;;  %11383 = vst [vmem:[#allocation34_spill] sm:$0xff] %v9437_v52 }
 0x20d   : > { %v2055_v45 = vor.u32 %v2053_v21, %v2052_v32  ;;  %v2455_v5 = vsel %vm8306_vm15, %v2453_v47, %v2454_v50  ;;  %v9448_v16 = vpop.f32.mrf.mxu0  ;;  %v11242_v21 = vunpack.c.h.b16 %v9452_v55  ;;  %v2457_v35 = vor.u32 %v2456_v17, %v2454_v50 }
 0x20e   : > { %2564 = vst [vmem:[#allocation2 + $0x248] sm:$0xf] %v2455_v5  ;;  %v1472_v56 = vmul.f32 %v1423_v29, %v1136_v26  ;;  %v9455_v5 = vld [vmem:[#allocation2 + $0xc8] sm:$0xf]  ;;  %v3050_v29 = vpack.c.b16 %v11239_v1, %v11240_v62  ;;  %v11388_v50 = vunpack.c.l.b16 %v9191_v7  ;;  %v11389_v17 = vunpack.c.l.b16 %v9266_v6 }
 0x20f   : > { %v9446_v36 = vpop.f32.mrf.mxu3  ;;  %11386 = vst [vmem:[#allocation37_spill] sm:$0xff] %v9448_v16  ;;  %v2056_v12 = vsel %vm8318_vm0, %v2048_v51, %v2055_v45  ;;  %v9466_v51 = vpack.c.b16 %v11241_v40, %v11242_v21  ;;  %v2057_v26 = vrot.slane %v2052_v32, 4  ;;  %v2171_v40 = vld [vmem:[#allocation2 + $0x264] sm:$0x1]  ;;  %v11390_v21 = vunpack.c.l.b16 %v9444_v38  ;;  %v2567_v32 = vld [vmem:[#allocation2 + $0x260] sm:$0xf] }
 0x210   : > { %11385 = vst [vmem:[#allocation36_spill] sm:$0xff] %v9446_v36  ;;  %v1632_v47 = vpack.c.bf16 %v1472_v56, %v1472_v56  ;;  %v3197_v45 = vpack.c.b16 %v11389_v17, %v11388_v50  ;;  %v11243_v56 = vunpack.c.l.b16 %v9455_v5  ;;  %v11393_v16 = vunpack.c.h.b16 %v9333_v39  ;;  %v9501_v39 = vld [vmem:[#allocation2 + $0x168] sm:$0xff] }
 0x211   : > { %2167 = vst [vmem:[#allocation2 + $0x24c] sm:$0xf] %v2056_v12  ;;  %v2458_v12 = vrot.slane %v2457_v35, 4 }
 0x212   : > { %11387 = vst [vmem:[#allocation38_spill] sm:$0xff] %v9455_v5  ;;  %v2059_v2 = vshrl.u32 %v1632_v47, 16  ;;  %v2062_v4 = vshll.u32 %v1632_v47, 16  ;;  %v3034_v52 = vpack.c.b16 %v11390_v21, %v11243_v56  ;;  %v11394_v21 = vunpack.c.h.b16 %v9366_v43  ;;  %v9503_v43 = vld [vmem:[#allocation2 + $0x174] sm:$0xff] }
 0x213   : > { %2221 = vst [vmem:[#allocation2 + $0x25c] sm:$0xf] %v1632_v47  ;;  %v11435_v37 = vunpack.c.l.b16 %v9503_v43  ;;  %v11476_v5 = vunpack.c.h.b16 %v9501_v39 }
 0x214   : > { %4349 = vmatmul.bf16.gmra.mxu2 %v3050_v29  ;;  %v2061_v1 = vrot.slane %v2059_v2, 7  ;;  %v2459_v62 = vrot.slane %v2062_v4, 5  ;;  %v2461_v47 = vrot.slane %v2059_v2, 4  ;;  %v6895_v2 = vld [vmem:[%s11203_s4 + $0x60] sm:$0xff] }
 0x215   : > { %4403 = vmatpush.bf16.msrb.mxu2 %v6895_v2  ;;  %v9516_v2 = vld [vmem:[#allocation2 + $0xe0] sm:$0xf] }
 0x216   : > { %v2064_v50 = vor.u32 %v2062_v4, %v2061_v1  ;;  %v2066_v17 = vrot.slane %v2061_v1, 4  ;;  %v2460_v35 = vsel %vm8306_vm15, %v2458_v12, %v2459_v62  ;;  %v9493_v4 = vpack.c.b16 %v11394_v21, %v11393_v16  ;;  %v9505_v16 = vld [vmem:[#allocation2 + $0xa8] sm:$0xff]  ;;  %11400 = vst [vmem:[#allocation44_spill] sm:$0xff] %v9516_v2 }
 0x217   : > { %4805 = vmatmul.bf16.gmra.mxu1 %v9361_v28  ;;  %v2462_v28 = vor.u32 %v2461_v47, %v2459_v62  ;;  %v9482_v29 = vpop.f32.mrf.mxu3  ;;  %2565 = vst [vmem:[#allocation2 + $0x254] sm:$0xf] %v2460_v35  ;;  %v9487_v22 = vpop.f32.mrf.mxu1  ;;  %v11245_v48 = vunpack.c.h.b16 %v9505_v16  ;;  %v7455_v35 = vld [vmem:[#allocation2 + $0x9c] sm:$0xff]  ;;  %v11403_v12 = vunpack.c.l.b16 %v9363_v41 }
 0x218   : > { %4716 = vmatmul.bf16.gmra.mxu0 %v3197_v45  ;;  %11391 = vst [vmem:[#allocation39_spill] sm:$0xff] %v9482_v29  ;;  %v2065_v31 = vsel %vm8318_vm0, %v2057_v26, %v2064_v50  ;;  %v2172_v62 = vsel %vm2170_vm2, %v2066_v17, %v2171_v40  ;;  %v9497_v45 = vpop.f32.mrf.mxu0  ;;  %v11246_v40 = vunpack.c.l.b16 %v9501_v39  ;;  %v9514_v17 = vld [vmem:[#allocation2 + $0xec] sm:$0xf] }
 0x219   : > { %11392 = vst [vmem:[#allocation40_spill] sm:$0xff] %v9487_v22  ;;  %v2463_v1 = vrot.slane %v2462_v28, 4  ;;  %4577 = vmatmul.bf16.gmra.mxu3 %v3034_v52  ;;  %v11244_v52 = vunpack.c.l.b16 %v9503_v43  ;;  %v2904_v28 = vunpack.c.h.b16 %v7455_v35  ;;  %v11247_v21 = vunpack.c.l.b16 %v9514_v17  ;;  %v9564_v22 = vld [vmem:[#allocation2 + $0xf8] sm:$0xf]  ;;  %4404 = vmatpush.bf16.msrb.mxu2 %v6894_v59 }
 0x21a   : > { %11395 = vst [vmem:[#allocation41_spill] sm:$0xff] %v9497_v45  ;;  %v11248_v35 = vunpack.c.l.b16 %v9516_v2 }
 0x21b   : > { %2168 = vst [vmem:[#allocation2 + $0x258] sm:$0xf] %v2065_v31  ;;  %v2568_v47 = vsel %vm8202_vm6, %v2463_v1, %v2567_v32  ;;  %v3053_v32 = vpack.c.b16 %v11244_v52, %v11246_v40  ;;  %v11402_v1 = vunpack.c.l.b16 %v9279_v34 }
 0x21c   : > { %2173 = vst [vmem:[#allocation2 + $0x264] sm:$0x1] %v2172_v62  ;;  %v3183_v62 = vpack.c.b16 %v11245_v48, %v2904_v28  ;;  %v3037_v56 = vpack.c.b16 %v11247_v21, %v11248_v35  ;;  %v11405_v48 = vunpack.c.h.b16 %v9371_v20 }
 0x21d   : > { %2569 = vst [vmem:[#allocation2 + $0x260] sm:$0xf] %v2568_v47  ;;  %v3200_v47 = vpack.c.b16 %v11403_v12, %v11402_v1  ;;  %v9547_v1 = vld [vmem:[#allocation2 + $0x180] sm:$0xff]  ;;  %v9549_v12 = vld [vmem:[#allocation2 + $0x18c] sm:$0xff] }
 0x21e   : > { %11399 = vst [vmem:[#allocation43_spill] sm:$0xff] %v9514_v17  ;;  %v11250_v35 = vunpack.c.l.b16 %v9547_v1  ;;  %v11249_v20 = vunpack.c.l.b16 %v9549_v12 }
 0x21f   : > { %v9510_v26 = vpop.f32.mrf.mxu3  ;;  %v9512_v50 = vpop.f32.mrf.mxu1  ;;  %11412 = vst [vmem:[#allocation52_spill] sm:$0xff] %v9564_v22 }
 0x220   : > { %11397 = vst [vmem:[#allocation7_spill] sm:$0xff] %v9510_v26  ;;  %v9523_v31 = vpop.f32.mrf.mxu0 }
 0x221   : > { %11398 = vst [vmem:[#allocation42_spill] sm:$0xff] %v9512_v50  ;;  %v9553_v50 = vld [vmem:[#allocation2 + $0xc0] sm:$0xff] }
 0x222   : > { %11401 = vst [vmem:[#allocation45_spill] sm:$0xff] %v9523_v31  ;;  %v11413_v31 = vunpack.c.h.b16 %v9553_v50 }
 0x224   : > { %4354 = vmatmul.bf16.gmra.mxu2 %v3053_v32  ;;  %v11406_v32 = vunpack.c.h.b16 %v9452_v55 }
 0x227   : > { %4810 = vmatmul.bf16.gmra.mxu1 %v9405_v58  ;;  %v9537_v52 = vpop.f32.mrf.mxu3  ;;  %v9543_v58 = vpack.c.b16 %v11406_v32, %v11405_v48  ;;  %v9545_v40 = vpop.f32.mrf.mxu1  ;;  %v9562_v32 = vld [vmem:[#allocation2 + $0x104] sm:$0xf] }
 0x228   : > { %4721 = vmatmul.bf16.gmra.mxu0 %v3200_v47  ;;  %11404 = vst [vmem:[#allocation46_spill] sm:$0xff] %v9537_v52  ;;  %v9551_v47 = vpop.f32.mrf.mxu0  ;;  %v11251_v21 = vunpack.c.l.b16 %v9562_v32  ;;  %v9600_v52 = vld [vmem:[#allocation2 + $0xd8] sm:$0xff] }
 0x229   : > { %11407 = vst [vmem:[#allocation47_spill] sm:$0xff] %v9545_v40  ;;  %4582 = vmatmul.bf16.gmra.mxu3 %v3037_v56  ;;  %v7457_v56 = vld [vmem:[#allocation2 + $0xb4] sm:$0xff] }
 0x22a   : > { %11408 = vst [vmem:[#allocation48_spill] sm:$0xff] %v9551_v47  ;;  %v2910_v40 = vunpack.c.h.b16 %v7457_v56  ;;  %v3056_v47 = vpack.c.b16 %v11249_v20, %v11250_v35  ;;  %v9596_v35 = vld [vmem:[#allocation2 + $0x198] sm:$0xff] }
 0x22b   : > { %11411 = vst [vmem:[#allocation51_spill] sm:$0xff] %v9562_v32  ;;  %v11425_v32 = vunpack.c.h.b16 %v9600_v52 }
 0x22c   : > { %v3186_v45 = vpack.c.b16 %v11413_v31, %v2910_v40 }
 0x22f   : > { %v9558_v55 = vpop.f32.mrf.mxu3  ;;  %v9560_v48 = vpop.f32.mrf.mxu1 }
 0x230   : > { %11409 = vst [vmem:[#allocation49_spill] sm:$0xff] %v9558_v55  ;;  %v11252_v55 = vunpack.c.l.b16 %v9564_v22 }
 0x231   : > { %11410 = vst [vmem:[#allocation50_spill] sm:$0xff] %v9560_v48  ;;  %v11414_v48 = vunpack.c.l.b16 %v9352_v53 }
 0x232   : > { %v3040_v31 = vpack.c.b16 %v11251_v21, %v11252_v55  ;;  %v11255_v55 = vunpack.c.l.b16 %v9596_v35 }
 0x233   : > { %v3203_v56 = vpack.c.b16 %v11415_v15, %v11414_v48 }
 0x234   : > { %4359 = vmatmul.bf16.gmra.mxu2 %v3056_v47  ;;  %v9586_v47 = vpop.f32.mrf.mxu0 }
 0x235   : > { %11416 = vst [vmem:[#allocation53_spill] sm:$0xff] %v9586_v47 }
 0x237   : > { %4815 = vmatmul.bf16.gmra.mxu1 %v9466_v51  ;;  %v11417_v51 = vunpack.c.h.b16 %v9439_v8  ;;  %v9592_v15 = vpop.f32.mrf.mxu1  ;;  %v9594_v48 = vpop.f32.mrf.mxu3 }
 0x238   : > { %4726 = vmatmul.bf16.gmra.mxu0 %v3203_v56  ;;  %11418 = vst [vmem:[#allocation54_spill] sm:$0xff] %v9592_v15  ;;  %v9598_v56 = vld [vmem:[#allocation2 + $0x1a4] sm:$0xff] }
 0x239   : > { %v9590_v20 = vpack.c.b16 %v2904_v28, %v11417_v51  ;;  %11419 = vst [vmem:[#allocation55_spill] sm:$0xff] %v9594_v48  ;;  %4587 = vmatmul.bf16.gmra.mxu3 %v3040_v31  ;;  %v11254_v59 = vunpack.c.l.b16 %v9598_v56  ;;  %v9607_v28 = vld [vmem:[#allocation2 + $0x11c] sm:$0xf]  ;;  %v7459_v51 = vld [vmem:[#allocation2 + $0xcc] sm:$0xff] }
 0x23a   : > { %11421 = vst [vmem:[#allocation57_spill] sm:$0xff] %v9607_v28  ;;  %v2916_v15 = vunpack.c.h.b16 %v7459_v51  ;;  %v9611_v31 = vld [vmem:[#allocation2 + $0x110] sm:$0xf]  ;;  %v11256_v54 = vunpack.c.l.b16 %v9607_v28  ;;  %v11426_v51 = vunpack.c.l.b16 %v9433_v46 }
 0x23b   : > { %11423 = vst [vmem:[#allocation59_spill] sm:$0xff] %v9611_v31  ;;  %v3059_v21 = vpack.c.b16 %v11254_v59, %v11255_v55  ;;  %v11257_v26 = vunpack.c.l.b16 %v9611_v31  ;;  %v6893_v55 = vld [vmem:[%s11203_s4 + $0x50] sm:$0xff] }
 0x23c   : > { %v9609_v47 = vpop.f32.mrf.mxu0  ;;  %4405 = vmatpush.bf16.msrb.mxu2 %v6893_v55  ;;  %v9650_v28 = vld [vmem:[#allocation2 + $0xf0] sm:$0xff]  ;;  %v7461_v55 = vld [vmem:[#allocation2 + $0xe4] sm:$0xff] }
 0x23d   : > { %11422 = vst [vmem:[#allocation58_spill] sm:$0xff] %v9609_v47  ;;  %v11427_v47 = vunpack.c.l.b16 %v9501_v39  ;;  %v3043_v59 = vpack.c.b16 %v11256_v54, %v11257_v26 }
 0x23f   : > { %v9605_v8 = vpop.f32.mrf.mxu1  ;;  %v9613_v48 = vpop.f32.mrf.mxu3  ;;  %v3206_v19 = vpack.c.b16 %v11427_v47, %v11426_v51  ;;  %v9640_v47 = vld [vmem:[#allocation2 + $0x1b0] sm:$0xff] }
 0x240   : > { %11420 = vst [vmem:[#allocation56_spill] sm:$0xff] %v9605_v8  ;;  %v3189_v8 = vpack.c.b16 %v11425_v32, %v2916_v15  ;;  %v11263_v54 = vunpack.c.l.b16 %v9640_v47 }
 0x241   : > { %11424 = vst [vmem:[#allocation60_spill] sm:$0xff] %v9613_v48 }
 0x244   : > { %4364 = vmatmul.bf16.gmra.mxu2 %v3059_v21  ;;  %v11428_v21 = vunpack.c.h.b16 %v9505_v16  ;;  %v9644_v51 = vpop.f32.mrf.mxu0  ;;  %v11262_v16 = vunpack.c.h.b16 %v9650_v28 }
 0x245   : > { %11430 = vst [vmem:[#allocation62_spill] sm:$0xff] %v9644_v51 }
 0x247   : > { %4820 = vmatmul.bf16.gmra.mxu1 %v3183_v62  ;;  %v9636_v62 = vpack.c.b16 %v2910_v40, %v11428_v21  ;;  %v9638_v32 = vpop.f32.mrf.mxu1  ;;  %v9646_v48 = vpop.f32.mrf.mxu3  ;;  %v9653_v40 = vld [vmem:[#allocation2 + $0x134] sm:$0xf]  ;;  %v9655_v21 = vld [vmem:[#allocation2 + $0x128] sm:$0xf] }
 0x248   : > { %4731 = vmatmul.bf16.gmra.mxu0 %v3206_v19  ;;  %11429 = vst [vmem:[#allocation61_spill] sm:$0xff] %v9638_v32  ;;  %v9642_v19 = vld [vmem:[#allocation2 + $0x1bc] sm:$0xff]  ;;  %v11264_v51 = vunpack.c.l.b16 %v9653_v40  ;;  %v11265_v29 = vunpack.c.l.b16 %v9655_v21 }
 0x249   : > { %4592 = vmatmul.bf16.gmra.mxu3 %v3043_v59  ;;  %11431 = vst [vmem:[#allocation63_spill] sm:$0xff] %v9646_v48  ;;  %v11261_v26 = vunpack.c.l.b16 %v9642_v19  ;;  %v2922_v59 = vunpack.c.h.b16 %v7461_v55  ;;  %v11436_v55 = vunpack.c.l.b16 %v9547_v1 }
 0x24a   : > { %11432 = vst [vmem:[#allocation64_spill] sm:$0xff] %v9653_v40 }
 0x24b   : > { %11433 = vst [vmem:[#allocation65_spill] sm:$0xff] %v9655_v21  ;;  %v3062_v32 = vpack.c.b16 %v11261_v26, %v11263_v54  ;;  %v3192_v31 = vpack.c.b16 %v11262_v16, %v2922_v59  ;;  %v3209_v3 = vpack.c.b16 %v11436_v55, %v11435_v37  ;;  %v3046_v26 = vpack.c.b16 %v11264_v51, %v11265_v29  ;;  %v9683_v16 = vld [vmem:[#allocation2 + $0x1c8] sm:$0xff]  ;;  %v9685_v37 = vld [vmem:[#allocation2 + $0x1d4] sm:$0xff] }
 0x24c   : > { %v9671_v42 = vpop.f32.mrf.mxu0  ;;  %v11270_v54 = vunpack.c.l.b16 %v9683_v16  ;;  %v6892_v21 = vld [vmem:[%s11203_s4 + $0x48] sm:$0xff] }
 0x24d   : > { %11437 = vst [vmem:[#allocation67_spill] sm:$0xff] %v9671_v42  ;;  %4406 = vmatpush.bf16.msrb.mxu2 %v6892_v21  ;;  %v11278_v21 = vunpack.c.h.b16 %v9266_v6 }
 0x24f   : > { %v9662_v48 = vpop.f32.mrf.mxu1  ;;  %v9673_v22 = vpop.f32.mrf.mxu3 }
 0x250   : > { %11434 = vst [vmem:[#allocation66_spill] sm:$0xff] %v9662_v48  ;;  %v11269_v48 = vunpack.c.h.b16 %v9177_v10 }
 0x251   : > { %11438 = vst [vmem:[#allocation68_spill] sm:$0xff] %v9673_v22 }
 0x254   : > { %4369 = vmatmul.bf16.gmra.mxu2 %v3062_v32  ;;  %v11439_v32 = vunpack.c.h.b16 %v9553_v50  ;;  %v9696_v50 = vld [vmem:[#allocation2 + $0x14c] sm:$0xf] }
 0x255   : > { %11443 = vst [vmem:[#allocation72_spill] sm:$0xff] %v9696_v50 }
 0x257   : > { %4825 = vmatmul.bf16.gmra.mxu1 %v3186_v45  ;;  %v9681_v45 = vpack.c.b16 %v2916_v15, %v11439_v32  ;;  %v9694_v51 = vpop.f32.mrf.mxu3  ;;  %v7462_v15 = vld [vmem:[#allocation2 + $0xfc] sm:$0xff] }
 0x258   : > { %4736 = vmatmul.bf16.gmra.mxu0 %v3209_v3  ;;  %v11268_v3 = vunpack.c.l.b16 %v9685_v37  ;;  %11442 = vst [vmem:[#allocation71_spill] sm:$0xff] %v9694_v51  ;;  %v9698_v32 = vld [vmem:[#allocation2 + $0x140] sm:$0xf]  ;;  %v11446_v51 = vunpack.c.l.b16 %v9596_v35 }
 0x259   : > { %4597 = vmatmul.bf16.gmra.mxu3 %v3046_v26  ;;  %v2928_v26 = vunpack.c.h.b16 %v7462_v15  ;;  %11444 = vst [vmem:[#allocation73_spill] sm:$0xff] %v9698_v32  ;;  %v11273_v15 = vunpack.c.l.b16 %v9698_v32 }
 0x25a   : > { %v3065_v29 = vpack.c.b16 %v11268_v3, %v11270_v54  ;;  %v9729_v54 = vld [vmem:[#allocation2 + $0x1e0] sm:$0xff] }
 0x25b   : > { %v3195_v22 = vpack.c.b16 %v11269_v48, %v2928_v26  ;;  %v11277_v32 = vunpack.c.l.b16 %v9729_v54 }
 0x25c   : > { %v9687_v55 = vpop.f32.mrf.mxu1 }
 0x25d   : > { %11440 = vst [vmem:[#allocation69_spill] sm:$0xff] %v9687_v55  ;;  %v9692_v42 = vpop.f32.mrf.mxu0  ;;  %v11272_v55 = vunpack.c.l.b16 %v9696_v50 }
 0x25e   : > { %11441 = vst [vmem:[#allocation70_spill] sm:$0xff] %v9692_v42  ;;  %v11445_v42 = vunpack.c.l.b16 %v9549_v12 }
 0x25f   : > { %v3049_v3 = vpack.c.b16 %v11272_v55, %v11273_v15  ;;  %v9743_v15 = vld [vmem:[#allocation2 + $0x164] sm:$0xf] }
 0x260   : > { %v3212_v40 = vpack.c.b16 %v11446_v51, %v11445_v42  ;;  %v11280_v17 = vunpack.c.l.b16 %v9743_v15 }
 0x264   : > { %4374 = vmatmul.bf16.gmra.mxu2 %v3065_v29  ;;  %v11447_v29 = vunpack.c.h.b16 %v9600_v52  ;;  %v9723_v48 = vpop.f32.mrf.mxu1  ;;  %v9736_v52 = vld [vmem:[#allocation2 + $0x158] sm:$0xf] }
 0x265   : > { %11448 = vst [vmem:[#allocation74_spill] sm:$0xff] %v9723_v48  ;;  %v9725_v42 = vpop.f32.mrf.mxu0 }
 0x266   : > { %11449 = vst [vmem:[#allocation75_spill] sm:$0xff] %v9725_v42  ;;  %v11279_v42 = vunpack.c.l.b16 %v9736_v52 }
 0x267   : > { %4830 = vmatmul.bf16.gmra.mxu1 %v3189_v8  ;;  %v9721_v8 = vpack.c.b16 %v2922_v59, %v11447_v29  ;;  %11451 = vst [vmem:[#allocation77_spill] sm:$0xff] %v9736_v52  ;;  %v2934_v59 = vunpack.c.h.b16 %v9191_v7  ;;  %v11455_v7 = vunpack.c.l.b16 %v9598_v56 }
 0x268   : > { %4741 = vmatmul.bf16.gmra.mxu0 %v3212_v40  ;;  %v9731_v40 = vld [vmem:[#allocation2 + $0x1ec] sm:$0xff] }
 0x269   : > { %4602 = vmatmul.bf16.gmra.mxu3 %v3049_v3  ;;  %v9727_v51 = vpop.f32.mrf.mxu3  ;;  %v11276_v55 = vunpack.c.l.b16 %v9731_v40  ;;  %v9754_v50 = vpack.c.b16 %v11278_v21, %v2934_v59 }
 0x26a   : > { %11450 = vst [vmem:[#allocation76_spill] sm:$0xff] %v9727_v51 }
 0x26b   : > { %v3068_v48 = vpack.c.b16 %v11276_v55, %v11277_v32  ;;  %v3052_v55 = vpack.c.b16 %v11280_v17, %v11279_v42  ;;  %v11457_v32 = vunpack.c.h.b16 %v9650_v28  ;;  %v9782_v42 = vld [vmem:[#allocation2 + $0x1f8] sm:$0xff] }
 0x26c   : > { %v9790_v17 = vld [vmem:[#allocation2 + $0x17c] sm:$0xf] }
 0x26d   : > { %v11470_v0 = vunpack.c.l.b16 %v9790_v17 }
 0x271   : > { %v9741_v3 = vpop.f32.mrf.mxu3 }
 0x272   : > { %11453 = vst [vmem:[#allocation79_spill] sm:$0xff] %v9741_v3  ;;  %v11456_v3 = vunpack.c.l.b16 %v9640_v47 }
 0x274   : > { %v9739_v29 = vpop.f32.mrf.mxu1  ;;  %4379 = vmatmul.bf16.gmra.mxu2 %v3068_v48 }
 0x275   : > { %11452 = vst [vmem:[#allocation78_spill] sm:$0xff] %v9739_v29  ;;  %v9750_v51 = vpop.f32.mrf.mxu0  ;;  %v3215_v29 = vpack.c.b16 %v11456_v3, %v11455_v7 }
 0x276   : > { %11454 = vst [vmem:[#allocation80_spill] sm:$0xff] %v9750_v51  ;;  %v9767_v51 = vpack.c.b16 %v2928_v26, %v11457_v32  ;;  %v9788_v32 = vld [vmem:[#allocation2 + $0x170] sm:$0xf]  ;;  %v2958_v26 = vunpack.c.h.b16 %v9503_v43  ;;  %v2979_v43 = vunpack.c.h.b16 %v9683_v16 }
 0x277   : > { %4835 = vmatmul.bf16.gmra.mxu1 %v3192_v31  ;;  %v9769_v21 = vpop.f32.mrf.mxu2  ;;  %v6891_v31 = vld [vmem:[%s11203_s4 + $0x40] sm:$0xff]  ;;  %v11479_v30 = vunpack.c.l.b16 %v9788_v32 }
 0x278   : > { %4746 = vmatmul.bf16.gmra.mxu0 %v3215_v29  ;;  %11458 = vst [vmem:[#allocation81_spill] sm:$0xff] %v9769_v21  ;;  %v9778_v29 = vld [vmem:[#allocation2 + $0x204] sm:$0xff]  ;;  %4407 = vmatpush.bf16.msrb.mxu2 %v6891_v31  ;;  %v11283_v21 = vunpack.c.l.b16 %v9782_v42  ;;  %v9865_v61 = vpack.c.b16 %v2958_v26, %v11476_v5 }
 0x279   : > { %4607 = vmatmul.bf16.gmra.mxu3 %v3052_v55  ;;  %v11282_v28 = vunpack.c.l.b16 %v9778_v29 }
 0x27b   : > { %v3071_v31 = vpack.c.b16 %v11282_v28, %v11283_v21  ;;  %v11468_v28 = vunpack.c.l.b16 %v9683_v16  ;;  %v2988_v16 = vunpack.c.h.b16 %v9731_v40 }
 0x27c   : > { %v9771_v48 = vpop.f32.mrf.mxu1  ;;  %v9780_v7 = vpop.f32.mrf.mxu3 }
 0x27d   : > { %11459 = vst [vmem:[#allocation82_spill] sm:$0xff] %v9771_v48  ;;  %v9776_v3 = vpop.f32.mrf.mxu0 }
 0x27e   : > { %11460 = vst [vmem:[#allocation83_spill] sm:$0xff] %v9776_v3  ;;  %v11284_v3 = vunpack.c.h.b16 %v9279_v34 }
 0x27f   : > { %11461 = vst [vmem:[#allocation84_spill] sm:$0xff] %v9780_v7  ;;  %v9786_v55 = vpop.f32.mrf.mxu2 }
 0x280   : > { %11462 = vst [vmem:[#allocation85_spill] sm:$0xff] %v9786_v55  ;;  %v9810_v36 = vpack.c.b16 %v11466_v13, %v11284_v3  ;;  %v2964_v3 = vunpack.c.h.b16 %v9549_v12 }
 0x284   : > { %v9794_v52 = vpop.f32.mrf.mxu1  ;;  %v9804_v48 = vpop.f32.mrf.mxu3  ;;  %4384 = vmatmul.bf16.gmra.mxu2 %v3071_v31  ;;  %v11471_v31 = vunpack.c.h.b16 %v9177_v10  ;;  %v2982_v10 = vunpack.c.h.b16 %v9685_v37 }
 0x285   : > { %11463 = vst [vmem:[#allocation86_spill] sm:$0xff] %v9794_v52  ;;  %v9802_v55 = vpop.f32.mrf.mxu0  ;;  %v11467_v52 = vunpack.c.l.b16 %v9642_v19 }
 0x286   : > { %11464 = vst [vmem:[#allocation87_spill] sm:$0xff] %v9802_v55  ;;  %v2961_v55 = vunpack.c.h.b16 %v9547_v1  ;;  %v9833_v1 = vld [vmem:[#allocation2 + $0x188] sm:$0xf]  ;;  %v9883_v5 = vpack.c.b16 %v2982_v10, %v2979_v43 }
 0x287   : > { %11465 = vst [vmem:[#allocation88_spill] sm:$0xff] %v9804_v48  ;;  %4840 = vmatmul.bf16.gmra.mxu1 %v3195_v22  ;;  %v3218_v21 = vpack.c.b16 %v11468_v28, %v11467_v52  ;;  %v11469_v48 = vunpack.c.l.b16 %v9788_v32  ;;  %v9825_v22 = vpack.c.b16 %v2934_v59, %v11471_v31  ;;  %v2967_v52 = vunpack.c.h.b16 %v9596_v35  ;;  %v9831_v7 = vpop.f32.mrf.mxu2  ;;  %v2637_v31 = vld [vmem:[#allocation2 + $0x194] sm:$0xf]  ;;  %v9857_v35 = vld [vmem:[#allocation2 + $0x1c4] sm:$0xf] }
 0x288   : > { %v2976_v28 = vunpack.c.h.b16 %v9642_v19  ;;  %11472 = vst [vmem:[#allocation89_spill] sm:$0xff] %v9831_v7  ;;  %v2985_v59 = vunpack.c.h.b16 %v9729_v54  ;;  %v9847_v7 = vld [vmem:[#allocation2 + $0x1a0] sm:$0xf]  ;;  %v9859_v19 = vpack.c.b16 %v2961_v55, %v2958_v26  ;;  %v2965_v23 = vunpack.c.l.b16 %v2637_v31 }
 0x289   : > { %4751 = vmatmul.bf16.gmra.mxu0 %v3218_v21  ;;  %v3055_v13 = vpack.c.b16 %v11470_v0, %v11469_v48  ;;  %v2970_v21 = vunpack.c.h.b16 %v9598_v56  ;;  %v2973_v0 = vunpack.c.h.b16 %v9640_v47  ;;  %v9844_v48 = vld [vmem:[#allocation2 + $0x21c] sm:$0xff]  ;;  %v2962_v56 = vunpack.c.l.b16 %v9833_v1 }
 0x28a   : > { %v9861_v38 = vpack.c.b16 %v2979_v43, %v2976_v28  ;;  %v9867_v1 = vpack.c.b16 %v2964_v3, %v2961_v55  ;;  %v9869_v57 = vpack.c.b16 %v2967_v52, %v2964_v3  ;;  %v9892_v49 = vpack.c.b16 %v2988_v16, %v2985_v59 }
 0x28b   : > { %4612 = vmatmul.bf16.gmra.mxu3 %v3055_v13  ;;  %v9853_v13 = vld [vmem:[#allocation2 + $0x1ac] sm:$0xf]  ;;  %v9875_v63 = vpack.c.b16 %v2976_v28, %v2973_v0  ;;  %v9890_v28 = vld [vmem:[#allocation2 + $0x1e8] sm:$0xf]  ;;  %v2991_v26 = vunpack.c.h.b16 %v9782_v42  ;;  %v11299_v55 = vunpack.c.l.b16 %v9877_v9  ;;  %v11478_v3 = vunpack.c.l.b16 %v9743_v15 }
 0x28c   : > { %v9839_v12 = vpop.f32.mrf.mxu1  ;;  %v9851_v2 = vpop.f32.mrf.mxu3  ;;  %v11483_v43 = vunpack.c.l.b16 %v9847_v7  ;;  %v11486_v15 = vunpack.c.h.b16 %v9352_v53 }
 0x28d   : > { %11473 = vst [vmem:[#allocation90_spill] sm:$0xff] %v9839_v12  ;;  %v9849_v47 = vpop.f32.mrf.mxu0  ;;  %v9855_v12 = vld [vmem:[#allocation2 + $0x1b8] sm:$0xf] }
 0x28e   : > { %11474 = vst [vmem:[#allocation91_spill] sm:$0xff] %v9849_v47  ;;  %v9871_v47 = vpack.c.b16 %v2985_v59, %v2982_v10  ;;  %v9899_v10 = vpack.c.b16 %v2973_v0, %v2970_v21  ;;  %v9907_v59 = vpack.c.b16 %v11479_v30, %v11478_v3  ;;  %v11485_v0 = vunpack.c.l.b16 %v9844_v48 }
 0x28f   : > { %11475 = vst [vmem:[#allocation92_spill] sm:$0xff] %v9851_v2  ;;  %v9873_v2 = vpack.c.b16 %v2970_v21, %v2967_v52  ;;  %v9888_v52 = vld [vmem:[#allocation2 + $0x1dc] sm:$0xf]  ;;  %v9894_v14 = vpop.f32.mrf.mxu2  ;;  %v9917_v21 = vpack.c.b16 %v11483_v43, %v2965_v23  ;;  %v11487_v30 = vunpack.c.h.b16 %v9431_v33 }
 0x290   : > { %11477 = vst [vmem:[#allocation93_spill] sm:$0xff] %v9894_v14  ;;  %v11481_v14 = vunpack.c.l.b16 %v9790_v17  ;;  %v3074_v25 = vpack.c.b16 %v11485_v0, %v11299_v55  ;;  %v11489_v17 = vunpack.c.l.b16 %v9855_v12  ;;  %v11494_v0 = vunpack.c.l.b16 %v9881_v44 }
 0x291   : > { %11480 = vst [vmem:[#allocation94_spill] sm:$0xff] %v9907_v59  ;;  %v9927_v32 = vpack.c.b16 %v11487_v30, %v11486_v15  ;;  %v11496_v59 = vunpack.c.l.b16 %v9888_v52  ;;  %v11497_v15 = vunpack.c.l.b16 %v9890_v28 }
 0x292   : > { %v9911_v60 = vpack.c.b16 %v2962_v56, %v11481_v14  ;;  %11484 = vst [vmem:[#allocation96_spill] sm:$0xff] %v9917_v21  ;;  %v11488_v14 = vunpack.c.l.b16 %v9853_v13  ;;  %v11493_v21 = vunpack.c.l.b16 %v9857_v35 }
 0x293   : > { %v9949_v30 = vpack.c.b16 %v11497_v15, %v11496_v59  ;;  %v9964_v59 = vld [vmem:[#allocation2 + $0x1f4] sm:$0xf] }
 0x294   : > { %11482 = vst [vmem:[#allocation95_spill] sm:$0xff] %v9911_v60  ;;  %v9913_v31 = vpop.f32.mrf.mxu1  ;;  %v9933_v3 = vpack.c.b16 %v11489_v17, %v11488_v14  ;;  %v9937_v43 = vpop.f32.mrf.mxu3  ;;  %v9943_v55 = vpack.c.b16 %v11494_v0, %v11493_v21  ;;  %4389 = vmatmul.bf16.gmra.mxu2 %v3074_v25  ;;  %v11499_v14 = vunpack.c.l.b16 %v9685_v37  ;;  %v11500_v17 = vunpack.c.l.b16 %v9729_v54  ;;  %v6938_v21 = vld [vmem:[%s11203_s4 + $0x1b8] sm:$0xff] }
 0x295   : > { %v9935_v60 = vpop.f32.mrf.mxu0  ;;  %11492 = vst [vmem:[#allocation99_spill] sm:$0xff] %v9937_v43  ;;  %v9962_v0 = vpack.c.b16 %v2991_v26, %v2988_v16  ;;  %v3058_v25 = vpack.c.b16 %v2965_v23, %v2962_v56  ;;  %v11501_v37 = vunpack.c.h.b16 %v9266_v6  ;;  %v11502_v54 = vunpack.c.h.b16 %v9279_v34  ;;  %5045 = vmatpush.bf16.msra.mxu3 %v6938_v21  ;;  %v9989_v56 = vld [vmem:[#allocation2 + $0x234] sm:$0xff] }
 0x296   : > { %11490 = vst [vmem:[#allocation97_spill] sm:$0xff] %v9933_v3  ;;  %v6930_v3 = vld [vmem:[%s11203_s4 + $0x178] sm:$0xff]  ;;  %v11301_v16 = vunpack.c.l.b16 %v9964_v59  ;;  %v11514_v43 = vunpack.c.h.b16 %v9501_v39 }
 0x297   : > { %11491 = vst [vmem:[#allocation98_spill] sm:$0xff] %v9935_v60  ;;  %4845 = vmatmul.bf16.gmra.mxu1 %v9754_v50  ;;  %v3221_v60 = vpack.c.b16 %v11500_v17, %v11499_v14  ;;  %4916 = vmatpush.bf16.msra.mxu2 %v6930_v3  ;;  %v9970_v50 = vpack.c.b16 %v11502_v54, %v11501_v37  ;;  %v9972_v15 = vpop.f32.mrf.mxu2  ;;  %v9974_v14 = vld [vmem:[#allocation2 + $0x200] sm:$0xf]  ;;  %v2994_v17 = vunpack.c.h.b16 %v9778_v29  ;;  %v6946_v21 = vld [vmem:[%s11203_s4 + $0x1f8] sm:$0xff]  ;;  %v9998_v37 = vld [vmem:[#allocation2 + $0x228] sm:$0xff]  ;;  %v11302_v54 = vunpack.c.l.b16 %v9989_v56 }
 0x298   : > { %11495 = vst [vmem:[#allocation100_spill] sm:$0xff] %v9943_v55  ;;  %5174 = vmatpush.bf16.msra.mxu0 %v6946_v21  ;;  %v11513_v55 = vunpack.c.l.b16 %v9782_v42  ;;  %v10042_v39 = vld [vmem:[#allocation2 + $0x218] sm:$0xf] }
 0x299   : > { %11498 = vst [vmem:[#allocation101_spill] sm:$0xff] %v9949_v30  ;;  %4756 = vmatmul.bf16.gmra.mxu0 %v3221_v60  ;;  %v11300_v60 = vunpack.c.l.b16 %v9974_v14 }
 0x29a   : > { %11503 = vst [vmem:[#allocation102_spill] sm:$0xff] %v9972_v15 }
 0x29b   : > { %4617 = vmatmul.bf16.gmra.mxu3 %v3058_v25  ;;  %v9985_v6 = vpack.c.b16 %v11300_v60, %v11301_v16  ;;  %v9996_v25 = vpack.c.b16 %v2994_v17, %v2991_v26  ;;  %v6954_v60 = vld [vmem:[%s11203_s4 + $0x238] sm:$0xff]  ;;  %v2952_v16 = vunpack.c.h.b16 %v9433_v46  ;;  %v11512_v46 = vunpack.c.l.b16 %v9731_v40 }
 0x29c   : > { %v9979_v23 = vpop.f32.mrf.mxu1  ;;  %v9991_v3 = vpop.f32.mrf.mxu3  ;;  %5303 = vmatpush.bf16.msra.mxu1 %v6954_v60  ;;  %v11518_v40 = vunpack.c.h.b16 %v9352_v53 }
 0x29d   : > { %11504 = vst [vmem:[#allocation103_spill] sm:$0xff] %v9979_v23  ;;  %v9987_v34 = vpop.f32.mrf.mxu0  ;;  %v3207_v60 = vpack.c.b16 %v11514_v43, %v2952_v16  ;;  %v10028_v23 = vld [vmem:[#allocation2 + $0x20c] sm:$0xf] }
 0x29e   : > { %11505 = vst [vmem:[#allocation104_spill] sm:$0xff] %v9985_v6  ;;  %v2997_v6 = vunpack.c.h.b16 %v9877_v9  ;;  %v11305_v43 = vunpack.c.l.b16 %v10028_v23 }
 0x29f   : > { %11506 = vst [vmem:[#allocation105_spill] sm:$0xff] %v9987_v34  ;;  %v10001_v15 = vpop.f32.mrf.mxu2  ;;  %v11303_v34 = vunpack.c.l.b16 %v9998_v37 }
 0x2a0   : > { %11507 = vst [vmem:[#allocation106_spill] sm:$0xff] %v9991_v3  ;;  %v3224_v3 = vpack.c.b16 %v11513_v55, %v11512_v46  ;;  %v3000_v55 = vunpack.c.h.b16 %v9844_v48  ;;  %v11523_v46 = vunpack.c.h.b16 %v9431_v33  ;;  %v11528_v33 = vunpack.c.l.b16 %v9877_v9 }
 0x2a1   : > { %11508 = vst [vmem:[#allocation107_spill] sm:$0xff] %v10001_v15  ;;  %v3077_v26 = vpack.c.b16 %v11302_v54, %v11303_v34  ;;  %v11515_v54 = vunpack.c.l.b16 %v9847_v7  ;;  %v11516_v34 = vunpack.c.l.b16 %v9853_v13  ;;  %v11304_v7 = vunpack.c.l.b16 %v10042_v39 }
 0x2a3   : > { %v10053_v53 = vpack.c.b16 %v11304_v7, %v11305_v43 }
 0x2a4   : > { %v10009_v30 = vpop.f32.mrf.mxu1  ;;  %v10017_v15 = vpop.f32.mrf.mxu3  ;;  %4394 = vmatmul.bf16.gmra.mxu2 %v3077_v26  ;;  %v3061_v26 = vpack.c.b16 %v11516_v34, %v11515_v54  ;;  %v10059_v34 = vpack.c.b16 %v3000_v55, %v2997_v6  ;;  %v6203_v54 = vld [vmem:[#allocation2 + $0xc] sm:$0xf0] }
 0x2a5   : > { %11509 = vst [vmem:[#allocation108_spill] sm:$0xff] %v10009_v30  ;;  %v10015_v21 = vpop.f32.mrf.mxu0  ;;  %v10026_v30 = vpack.c.b16 %v2997_v6, %v2994_v17  ;;  %v11527_v6 = vunpack.c.l.b16 %v9778_v29 }
 0x2a6   : > { %11510 = vst [vmem:[#allocation109_spill] sm:$0xff] %v10015_v21 }
 0x2a7   : > { %11511 = vst [vmem:[#allocation110_spill] sm:$0xff] %v10017_v15  ;;  %4850 = vmatmul.bf16.gmra.mxu1 %v9810_v36  ;;  %v11517_v36 = vunpack.c.h.b16 %v9363_v41  ;;  %v10040_v42 = vpop.f32.mrf.mxu2 }
 0x2a8   : > { %11519 = vst [vmem:[#allocation111_spill] sm:$0xff] %v10040_v42 }
 0x2a9   : > { %4761 = vmatmul.bf16.gmra.mxu0 %v3224_v3  ;;  %v10038_v21 = vpack.c.b16 %v11518_v40, %v11517_v36  ;;  %11520 = vst [vmem:[#allocation112_spill] sm:$0xff] %v10053_v53  ;;  %v6805_v3 = vld [vmem:[#allocation2 + $0x4] sm:$0xf]  ;;  %v3003_v40 = vunpack.c.h.b16 %v9998_v37 }
 0x2aa   : > { %v6206_v42 = vor.u32 %v6805_v3, %v6203_v54  ;;  %v11529_v3 = vunpack.c.l.b16 %v9855_v12  ;;  %v11530_v54 = vunpack.c.l.b16 %v9857_v35 }
 0x2ab   : > { %4622 = vmatmul.bf16.gmra.mxu3 %v3061_v26  ;;  %v10063_v26 = vpack.c.b16 %v2952_v16, %v11523_v46  ;;  %v3227_v16 = vpack.c.b16 %v11528_v33, %v11527_v6  ;;  %v10079_v46 = vpack.c.b16 %v3003_v40, %v3000_v55 }
 0x2ac   : > { %v10047_v17 = vpop.f32.mrf.mxu1  ;;  %v10057_v13 = vpop.f32.mrf.mxu3  ;;  %v3064_v53 = vpack.c.b16 %v11530_v54, %v11529_v3 }
 0x2ad   : > { %v10055_v41 = vpop.f32.mrf.mxu0  ;;  %11522 = vst [vmem:[#allocation114_spill] sm:$0xff] %v10057_v13 }
 0x2ae   : > { %11521 = vst [vmem:[#allocation113_spill] sm:$0xff] %v10055_v41 }
 0x2af   : > { %v10065_v36 = vpop.f32.mrf.mxu2 }
 0x2b0   : > { %11524 = vst [vmem:[#allocation115_spill] sm:$0xff] %v10065_v36  ;;  %v10081_v36 = vld [vmem:[#allocation2 + $0x224] sm:$0xf] }
 0x2b1   : > { %v11307_v9 = vunpack.c.l.b16 %v10081_v36 }
 0x2b4   : > { %v10068_v15 = vpop.f32.mrf.mxu1  ;;  %v10072_v43 = vpop.f32.mrf.mxu3  ;;  %4408 = vmatmul.bf16.vlgmr.msrb.gmra.mxu2 %v6206_v42  ;;  %v10089_v42 = vld [vmem:[#allocation2 + $0x230] sm:$0xf] }
 0x2b5   : > { %v10070_v7 = vpop.f32.mrf.mxu0  ;;  %11526 = vst [vmem:[#allocation117_spill] sm:$0xff] %v10072_v43  ;;  %v11306_v29 = vunpack.c.l.b16 %v10089_v42  ;;  %v6929_v43 = vld [vmem:[%s11203_s4 + $0x170] sm:$0xff] }
 0x2b6   : > { %11525 = vst [vmem:[#allocation116_spill] sm:$0xff] %v10070_v7  ;;  %4917 = vmatpush.bf16.msra.mxu2 %v6929_v43  ;;  %v6953_v43 = vld [vmem:[%s11203_s4 + $0x230] sm:$0xff] }
 0x2b7   : > { %4855 = vmatmul.bf16.gmra.mxu1 %v9927_v32  ;;  %v10087_v7 = vpop.f32.mrf.mxu2  ;;  %v3006_v32 = vunpack.c.h.b16 %v9989_v56  ;;  %v10100_v12 = vpack.c.b16 %v11306_v29, %v11307_v9  ;;  %v6944_v29 = vld [vmem:[%s11203_s4 + $0x1e8] sm:$0xff]  ;;  %v11537_v9 = vunpack.c.h.b16 %v9165_v27  ;;  %v6937_v27 = vld [vmem:[%s11203_s4 + $0x1b0] sm:$0xff] }
 0x2b8   : > { %11531 = vst [vmem:[#allocation118_spill] sm:$0xff] %v10087_v7  ;;  %v2666_v7 = vld [vmem:[#allocation2 + $0x240] sm:$0xff]  ;;  %5046 = vmatpush.bf16.msra.mxu3 %v6937_v27  ;;  %5304 = vmatpush.bf16.msra.mxu1 %v6953_v43  ;;  %v6940_v27 = vld [vmem:[%s11203_s4 + $0x1c8] sm:$0xff] }
 0x2b9   : > { %4766 = vmatmul.bf16.gmra.mxu0 %v3227_v16  ;;  %11532 = vst [vmem:[#allocation119_spill] sm:$0xff] %v10100_v12  ;;  %v10109_v33 = vpack.c.b16 %v3006_v32, %v3003_v40  ;;  %v7463_v16 = vld [vmem:[#allocation2] sm:$0xff] }
 0x2ba   : > { %v2871_v3 = vunpack.c.h.b16 %v7463_v16  ;;  %v11541_v16 = vunpack.c.l.b16 %v9998_v37  ;;  %v11543_v37 = vunpack.c.l.b16 %v9888_v52 }
 0x2bb   : > { %4627 = vmatmul.bf16.gmra.mxu3 %v3064_v53  ;;  %v6945_v53 = vld [vmem:[%s11203_s4 + $0x1f0] sm:$0xff] }
 0x2bc   : > { %v10094_v55 = vpop.f32.mrf.mxu1  ;;  %v10104_v6 = vpop.f32.mrf.mxu3  ;;  %5175 = vmatpush.bf16.msra.mxu0 %v6945_v53  ;;  %v3012_v12 = vpack.c.b16 %v11537_v9, %v2871_v3  ;;  %v11540_v53 = vunpack.c.l.b16 %v9844_v48  ;;  %v6943_v9 = vld [vmem:[%s11203_s4 + $0x1e0] sm:$0xff]  ;;  %v11542_v48 = vunpack.c.l.b16 %v9881_v44  ;;  %v6941_v44 = vld [vmem:[%s11203_s4 + $0x1d0] sm:$0xff] }
 0x2bd   : > { %v10102_v35 = vpop.f32.mrf.mxu0  ;;  %11534 = vst [vmem:[#allocation121_spill] sm:$0xff] %v10104_v6 }
 0x2be   : > { %11533 = vst [vmem:[#allocation120_spill] sm:$0xff] %v10102_v35  ;;  %v3159_v35 = vunpack.c.h.b16 %v2666_v7 }
 0x2bf   : > { %v10111_v54 = vpop.f32.mrf.mxu2 }
 0x2c0   : > { %11535 = vst [vmem:[#allocation122_spill] sm:$0xff] %v10111_v54  ;;  %5176 = vmatpush.bf16.msra.mxu0 %v6944_v29  ;;  %v3230_v54 = vpack.c.b16 %v11541_v16, %v11540_v53  ;;  %v10137_v29 = vpack.c.b16 %v3159_v35, %v3006_v32  ;;  %v6942_v53 = vld [vmem:[%s11203_s4 + $0x1d8] sm:$0xff] }
 0x2c4   : > { %v10113_v41 = vpop.f32.mrf.mxu1  ;;  %v10122_v40 = vpop.f32.mrf.mxu3  ;;  %4413 = vmatmul.bf16.gmra.mxu2 %v3012_v12  ;;  %5177 = vmatpush.bf16.msra.mxu0 %v6943_v9 }
 0x2c5   : > { %11536 = vst [vmem:[#allocation123_spill] sm:$0xff] %v10113_v41  ;;  %v10120_v6 = vpop.f32.mrf.mxu0 }
 0x2c6   : > { %11538 = vst [vmem:[#allocation124_spill] sm:$0xff] %v10120_v6 }
 0x2c7   : > { %11539 = vst [vmem:[#allocation125_spill] sm:$0xff] %v10122_v40  ;;  %4860 = vmatmul.bf16.gmra.mxu1 %v3207_v60  ;;  %v3067_v60 = vpack.c.b16 %v11543_v37, %v11542_v48  ;;  %v10143_v12 = vpop.f32.mrf.mxu2  ;;  %v11552_v37 = vunpack.c.l.b16 %v9989_v56 }
 0x2c8   : > { %11544 = vst [vmem:[#allocation126_spill] sm:$0xff] %v10143_v12  ;;  %5178 = vmatpush.bf16.msra.mxu0 %v6942_v53  ;;  %v11553_v53 = vunpack.c.l.b16 %v9890_v28  ;;  %v6213_v28 = vld [vmem:[#allocation2 + $0x24c] sm:$0xf] }
 0x2c9   : > { %4771 = vmatmul.bf16.gmra.mxu0 %v3230_v54  ;;  %v3158_v54 = vunpack.c.l.b16 %v2666_v7  ;;  %v6939_v7 = vld [vmem:[%s11203_s4 + $0x1c0] sm:$0xff]  ;;  %v6936_v12 = vld [vmem:[%s11203_s4 + $0x1a8] sm:$0xff] }
 0x2ca   : > { %5047 = vmatpush.bf16.msra.mxu3 %v6936_v12 }
 0x2cb   : > { %4632 = vmatmul.bf16.gmra.mxu3 %v3067_v60  ;;  %v3233_v60 = vpack.c.b16 %v3158_v54, %v11552_v37  ;;  %v6809_v37 = vld [vmem:[#allocation2 + $0x254] sm:$0xf0] }
 0x2cc   : > { %v10145_v3 = vpop.f32.mrf.mxu1  ;;  %v10152_v35 = vpop.f32.mrf.mxu3  ;;  %5179 = vmatpush.bf16.msra.mxu0 %v6941_v44  ;;  %v11554_v44 = vunpack.c.l.b16 %v9964_v59 }
 0x2cd   : > { %11545 = vst [vmem:[#allocation127_spill] sm:$0xff] %v10145_v3  ;;  %v10150_v32 = vpop.f32.mrf.mxu0 }
 0x2ce   : > { %11546 = vst [vmem:[#allocation128_spill] sm:$0xff] %v10150_v32  ;;  %v3070_v43 = vpack.c.b16 %v11554_v44, %v11553_v53  ;;  %v11563_v53 = vunpack.c.l.b16 %v9974_v14  ;;  %v11564_v44 = vunpack.c.l.b16 %v10028_v23 }
 0x2cf   : > { %11547 = vst [vmem:[#allocation129_spill] sm:$0xff] %v10152_v35  ;;  %v10157_v52 = vpop.f32.mrf.mxu2 }
 0x2d0   : > { %11548 = vst [vmem:[#allocation130_spill] sm:$0xff] %v10157_v52  ;;  %5180 = vmatpush.bf16.msra.mxu0 %v6940_v27 }
 0x2d4   : > { %v10162_v16 = vpop.f32.mrf.mxu1  ;;  %v10169_v48 = vpop.f32.mrf.mxu3  ;;  %4418 = vmatmul.bf16.gmra.mxu2 %v9419_v18  ;;  %5181 = vmatpush.bf16.msra.mxu0 %v6939_v7  ;;  %v6214_v7 = vor.u32 %v6809_v37, %v6213_v28  ;;  %v6227_v37 = vld [vmem:[#allocation2 + $0x54] sm:$0xf0] }
 0x2d5   : > { %11549 = vst [vmem:[#allocation131_spill] sm:$0xff] %v10162_v16  ;;  %v10167_v9 = vpop.f32.mrf.mxu0  ;;  %v6934_v28 = vld [vmem:[%s11203_s4 + $0x198] sm:$0xff]  ;;  %v6846_v16 = vld [vmem:[#allocation2 + $0x160] sm:$0xf0] }
 0x2d6   : > { %11550 = vst [vmem:[#allocation132_spill] sm:$0xff] %v10167_v9 }
 0x2d7   : > { %11551 = vst [vmem:[#allocation133_spill] sm:$0xff] %v10169_v48  ;;  %4865 = vmatmul.bf16.gmra.mxu1 %v9859_v19  ;;  %v10182_v52 = vpop.f32.mrf.mxu2 }
 0x2d8   : > { %11555 = vst [vmem:[#allocation134_spill] sm:$0xff] %v10182_v52 }
 0x2d9   : > { %4776 = vmatmul.bf16.gmra.mxu0 %v3233_v60 }
 0x2db   : > { %4637 = vmatmul.bf16.gmra.mxu3 %v3070_v43  ;;  %v3073_v43 = vpack.c.b16 %v11564_v44, %v11563_v53  ;;  %v6811_v53 = vld [vmem:[#allocation2 + $0x4c] sm:$0xf] }
 0x2dc   : > { %v10184_v18 = vpop.f32.mrf.mxu1  ;;  %v10188_v56 = vpop.f32.mrf.mxu3  ;;  %v6230_v12 = vor.u32 %v6811_v53, %v6227_v37 }
 0x2dd   : > { %11556 = vst [vmem:[#allocation135_spill] sm:$0xff] %v10184_v18  ;;  %v10186_v19 = vpop.f32.mrf.mxu0 }
 0x2de   : > { %11557 = vst [vmem:[#allocation136_spill] sm:$0xff] %v10186_v19 }
 0x2df   : > { %11558 = vst [vmem:[#allocation137_spill] sm:$0xff] %v10188_v56  ;;  %v10190_v54 = vpop.f32.mrf.mxu2 }
 0x2e0   : > { %11559 = vst [vmem:[#allocation138_spill] sm:$0xff] %v10190_v54 }
 0x2e4   : > { %v10192_v27 = vpop.f32.mrf.mxu1  ;;  %v10196_v59 = vpop.f32.mrf.mxu3  ;;  %4423 = vmatmul.bf16.gmra.mxu2 %v9428_v24 }
 0x2e5   : > { %11560 = vst [vmem:[#allocation139_spill] sm:$0xff] %v10192_v27  ;;  %v10194_v60 = vpop.f32.mrf.mxu0  ;;  %v6341_v27 = vld [vmem:[#allocation2 + $0x128] sm:$0xf] }
 0x2e6   : > { %11561 = vst [vmem:[#allocation140_spill] sm:$0xff] %v10194_v60 }
 0x2e7   : > { %11562 = vst [vmem:[#allocation141_spill] sm:$0xff] %v10196_v59  ;;  %4870 = vmatmul.bf16.gmra.mxu1 %v9869_v57  ;;  %v10204_v54 = vpop.f32.mrf.mxu2  ;;  %v6935_v57 = vld [vmem:[%s11203_s4 + $0x1a0] sm:$0xff] }
 0x2e8   : > { %11565 = vst [vmem:[#allocation142_spill] sm:$0xff] %v10204_v54  ;;  %5048 = vmatpush.bf16.msra.mxu3 %v6935_v57  ;;  %v6933_v57 = vld [vmem:[%s11203_s4 + $0x190] sm:$0xff]  ;;  %v11574_v54 = vunpack.c.l.b16 %v10081_v36 }
 0x2e9   : > { %4781 = vmatmul.bf16.gmra.mxu0 %v6214_v7 }
 0x2eb   : > { %4642 = vmatmul.bf16.gmra.mxu3 %v3073_v43  ;;  %v6928_v43 = vld [vmem:[%s11203_s4 + $0x168] sm:$0xff] }
 0x2ec   : > { %v10206_v52 = vpop.f32.mrf.mxu1  ;;  %v10213_v24 = vpop.f32.mrf.mxu3  ;;  %5049 = vmatpush.bf16.msra.mxu3 %v6934_v28  ;;  %4918 = vmatpush.bf16.msra.mxu2 %v6928_v43 }
 0x2ed   : > { %11566 = vst [vmem:[#allocation143_spill] sm:$0xff] %v10206_v52  ;;  %v10211_v60 = vpop.f32.mrf.mxu0 }
 0x2ee   : > { %11567 = vst [vmem:[#allocation144_spill] sm:$0xff] %v10211_v60 }
 0x2ef   : > { %11568 = vst [vmem:[#allocation145_spill] sm:$0xff] %v10213_v24  ;;  %v10218_v14 = vpop.f32.mrf.mxu2 }
 0x2f0   : > { %11569 = vst [vmem:[#allocation146_spill] sm:$0xff] %v10218_v14  ;;  %v11573_v14 = vunpack.c.l.b16 %v10042_v39  ;;  %5050 = vmatpush.bf16.msra.mxu3 %v6933_v57  ;;  %v6931_v39 = vld [vmem:[%s11203_s4 + $0x180] sm:$0xff] }
 0x2f4   : > { %v10220_v23 = vpop.f32.mrf.mxu1  ;;  %v10227_v44 = vpop.f32.mrf.mxu3  ;;  %4428 = vmatmul.bf16.gmra.mxu2 %v9493_v4 }
 0x2f5   : > { %11570 = vst [vmem:[#allocation147_spill] sm:$0xff] %v10220_v23  ;;  %v10225_v7 = vpop.f32.mrf.mxu0  ;;  %v6856_v23 = vld [vmem:[#allocation2 + $0x1b4] sm:$0xf] }
 0x2f6   : > { %11571 = vst [vmem:[#allocation148_spill] sm:$0xff] %v10225_v7  ;;  %v3076_v7 = vpack.c.b16 %v11574_v54, %v11573_v14  ;;  %v10257_v54 = vld [vmem:[#allocation2 + $0x23c] sm:$0xf]  ;;  %v6952_v14 = vld [vmem:[%s11203_s4 + $0x228] sm:$0xff] }
 0x2f7   : > { %11572 = vst [vmem:[#allocation149_spill] sm:$0xff] %v10227_v44  ;;  %4875 = vmatmul.bf16.gmra.mxu1 %v9899_v10  ;;  %v10241_v28 = vpop.f32.mrf.mxu2  ;;  %v6932_v10 = vld [vmem:[%s11203_s4 + $0x188] sm:$0xff]  ;;  %v11308_v43 = vunpack.c.l.b16 %v10257_v54 }
 0x2f8   : > { %11575 = vst [vmem:[#allocation150_spill] sm:$0xff] %v10241_v28  ;;  %5051 = vmatpush.bf16.msra.mxu3 %v6932_v10  ;;  %5305 = vmatpush.bf16.msra.mxu1 %v6952_v14  ;;  %v6814_v10 = vld [vmem:[#allocation2 + $0x64] sm:$0xf]  ;;  %v6347_v44 = vld [vmem:[#allocation2 + $0x144] sm:$0xf0] }
 0x2f9   : > { %5182 = vmatmul.bf16.vlgmr.msra.gmra.mxu0 %v6230_v12  ;;  %11580 = vst [vmem:[#allocation155_spill] sm:$0xff] %v10257_v54  ;;  %v6239_v12 = vld [vmem:[#allocation2 + $0x6c] sm:$0xf0] }
 0x2fb   : > { %4647 = vmatmul.bf16.gmra.mxu3 %v3076_v7 }
 0x2fc   : > { %v10243_v4 = vpop.f32.mrf.mxu1  ;;  %v10250_v53 = vpop.f32.mrf.mxu3  ;;  %5052 = vmatpush.bf16.msra.mxu3 %v6931_v39  ;;  %v6242_v39 = vor.u32 %v6814_v10, %v6239_v12 }
 0x2fd   : > { %11576 = vst [vmem:[#allocation151_spill] sm:$0xff] %v10243_v4  ;;  %v10248_v37 = vpop.f32.mrf.mxu0  ;;  %v6305_v4 = vld [vmem:[#allocation2 + $0xe0] sm:$0xf] }
 0x2fe   : > { %11577 = vst [vmem:[#allocation152_spill] sm:$0xff] %v10248_v37 }
 0x2ff   : > { %11578 = vst [vmem:[#allocation153_spill] sm:$0xff] %v10250_v53  ;;  %v10255_v36 = vpop.f32.mrf.mxu2  ;;  %v6311_v53 = vld [vmem:[#allocation2 + $0xfc] sm:$0xf0] }
 0x300   : > { %11579 = vst [vmem:[#allocation154_spill] sm:$0xff] %v10255_v36  ;;  %v11584_v36 = vunpack.c.l.b16 %v10089_v42  ;;  %v6817_v42 = vld [vmem:[#allocation2 + $0x7c] sm:$0xf] }
 0x302   : > { %v3079_v37 = vpack.c.b16 %v11308_v43, %v11584_v36  ;;  %v6812_v36 = vld [vmem:[#allocation2 + $0x50] sm:$0xf0] }
 0x304   : > { %v10262_v7 = vpop.f32.mrf.mxu1  ;;  %v10267_v28 = vpop.f32.mrf.mxu3  ;;  %4433 = vmatmul.bf16.gmra.mxu2 %v9543_v58 }
 0x305   : > { %11581 = vst [vmem:[#allocation156_spill] sm:$0xff] %v10262_v7 }
 0x306   : > { %v10265_v57 = vpop.f32.mrf.mxu0  ;;  %11583 = vst [vmem:[#allocation158_spill] sm:$0xff] %v10267_v28 }
 0x307   : > { %11582 = vst [vmem:[#allocation157_spill] sm:$0xff] %v10265_v57  ;;  %4880 = vmatmul.bf16.gmra.mxu1 %v9861_v38  ;;  %v10275_v60 = vpop.f32.mrf.mxu2  ;;  %v6251_v38 = vld [vmem:[#allocation2 + $0x84] sm:$0xf0] }
 0x308   : > { %11585 = vst [vmem:[#allocation159_spill] sm:$0xff] %v10275_v60 }
 0x309   : > { %5187 = vmatmul.bf16.gmra.mxu0 %v6242_v39  ;;  %v6225_v39 = vld [vmem:[#allocation2 + $0x48] sm:$0xf] }
 0x30a   : > { %v6226_v43 = vor.u32 %v6812_v36, %v6225_v39  ;;  %v6927_v36 = vld [vmem:[%s11203_s4 + $0x160] sm:$0xff] }
 0x30b   : > { %4652 = vmatmul.bf16.gmra.mxu3 %v3079_v37  ;;  %v6254_v37 = vor.u32 %v6817_v42, %v6251_v38  ;;  %v6815_v42 = vld [vmem:[#allocation2 + $0x68] sm:$0xf0]  ;;  %4919 = vmatpush.bf16.msra.mxu2 %v6927_v36  ;;  %v6818_v36 = vld [vmem:[#allocation2 + $0x80] sm:$0xf0] }
 0x30c   : > { %v10277_v14 = vpop.f32.mrf.mxu1 }
 0x30d   : > { %11586 = vst [vmem:[#allocation160_spill] sm:$0xff] %v10277_v14 }
 0x30e   : > { %v10279_v57 = vpop.f32.mrf.mxu0  ;;  %v10281_v19 = vpop.f32.mrf.mxu3 }
 0x30f   : > { %11587 = vst [vmem:[#allocation161_spill] sm:$0xff] %v10279_v57  ;;  %v10283_v28 = vpop.f32.mrf.mxu2 }
 0x310   : > { %11588 = vst [vmem:[#allocation162_spill] sm:$0xff] %v10281_v19 }
 0x311   : > { %11589 = vst [vmem:[#allocation163_spill] sm:$0xff] %v10283_v28 }
 0x314   : > { %v10285_v58 = vpop.f32.mrf.mxu1  ;;  %4438 = vmatmul.bf16.gmra.mxu2 %v9590_v20  ;;  %v6263_v20 = vld [vmem:[#allocation2 + $0x9c] sm:$0xf0] }
 0x315   : > { %11590 = vst [vmem:[#allocation164_spill] sm:$0xff] %v10285_v58  ;;  %v6357_v58 = vld [vmem:[#allocation2 + $0x150] sm:$0xf] }
 0x316   : > { %v10287_v12 = vpop.f32.mrf.mxu0  ;;  %v10289_v10 = vpop.f32.mrf.mxu3 }
 0x317   : > { %11591 = vst [vmem:[#allocation165_spill] sm:$0xff] %v10287_v12  ;;  %4885 = vmatmul.bf16.gmra.mxu1 %v9871_v47  ;;  %v10293_v60 = vpop.f32.mrf.mxu2  ;;  %v6820_v47 = vld [vmem:[#allocation2 + $0x94] sm:$0xf] }
 0x318   : > { %11592 = vst [vmem:[#allocation166_spill] sm:$0xff] %v10289_v10 }
 0x319   : > { %5192 = vmatmul.bf16.gmra.mxu0 %v6254_v37  ;;  %11593 = vst [vmem:[#allocation167_spill] sm:$0xff] %v10293_v60  ;;  %v6237_v37 = vld [vmem:[#allocation2 + $0x60] sm:$0xf] }
 0x31a   : > { %v6238_v39 = vor.u32 %v6815_v42, %v6237_v37  ;;  %v6823_v42 = vld [vmem:[#allocation2 + $0xac] sm:$0xf] }
 0x31b   : > { %5053 = vmatmul.bf16.vlgmr.msra.gmra.mxu3 %v6226_v43  ;;  %v6266_v43 = vor.u32 %v6820_v47, %v6263_v20  ;;  %v6275_v20 = vld [vmem:[#allocation2 + $0xb4] sm:$0xf0]  ;;  %v6951_v47 = vld [vmem:[%s11203_s4 + $0x220] sm:$0xff] }
 0x31c   : > { %v10295_v28 = vpop.f32.mrf.mxu1  ;;  %5306 = vmatpush.bf16.msra.mxu1 %v6951_v47  ;;  %v6821_v47 = vld [vmem:[#allocation2 + $0x98] sm:$0xf0] }
 0x31d   : > { %11594 = vst [vmem:[#allocation168_spill] sm:$0xff] %v10295_v28  ;;  %v6383_v28 = vld [vmem:[#allocation2 + $0x18c] sm:$0xf0] }
 0x31e   : > { %v10297_v57 = vpop.f32.mrf.mxu0  ;;  %v10299_v12 = vpop.f32.mrf.mxu3 }
 0x31f   : > { %11595 = vst [vmem:[#allocation169_spill] sm:$0xff] %v10297_v57  ;;  %v10301_v19 = vpop.f32.mrf.mxu2 }
 0x320   : > { %11596 = vst [vmem:[#allocation170_spill] sm:$0xff] %v10299_v12 }
 0x321   : > { %11597 = vst [vmem:[#allocation171_spill] sm:$0xff] %v10301_v19 }
 0x324   : > { %v10303_v10 = vpop.f32.mrf.mxu1  ;;  %4443 = vmatmul.bf16.gmra.mxu2 %v9636_v62 }
 0x325   : > { %11598 = vst [vmem:[#allocation172_spill] sm:$0xff] %v10303_v10 }
 0x326   : > { %v10305_v9 = vpop.f32.mrf.mxu0  ;;  %v10307_v38 = vpop.f32.mrf.mxu3 }
 0x327   : > { %11599 = vst [vmem:[#allocation173_spill] sm:$0xff] %v10305_v9  ;;  %4890 = vmatmul.bf16.gmra.mxu1 %v9962_v0  ;;  %v10314_v19 = vpop.f32.mrf.mxu2 }
 0x328   : > { %11600 = vst [vmem:[#allocation174_spill] sm:$0xff] %v10307_v38 }
 0x329   : > { %5197 = vmatmul.bf16.gmra.mxu0 %v6266_v43  ;;  %11601 = vst [vmem:[#allocation175_spill] sm:$0xff] %v10314_v19  ;;  %v6249_v19 = vld [vmem:[#allocation2 + $0x78] sm:$0xf] }
 0x32b   : > { %5058 = vmatmul.bf16.gmra.mxu3 %v6238_v39  ;;  %v6278_v39 = vor.u32 %v6823_v42, %v6275_v20  ;;  %v6261_v42 = vld [vmem:[#allocation2 + $0x90] sm:$0xf] }
 0x32c   : > { %v10316_v60 = vpop.f32.mrf.mxu1 }
 0x32d   : > { %11602 = vst [vmem:[#allocation176_spill] sm:$0xff] %v10316_v60 }
 0x32e   : > { %v10318_v9 = vpop.f32.mrf.mxu0  ;;  %v10320_v57 = vpop.f32.mrf.mxu3 }
 0x32f   : > { %11603 = vst [vmem:[#allocation177_spill] sm:$0xff] %v10318_v9  ;;  %v10322_v62 = vpop.f32.mrf.mxu2 }
 0x330   : > { %11604 = vst [vmem:[#allocation178_spill] sm:$0xff] %v10320_v57 }
 0x331   : > { %11605 = vst [vmem:[#allocation179_spill] sm:$0xff] %v10322_v62  ;;  %v6250_v62 = vor.u32 %v6818_v36, %v6249_v19  ;;  %v6262_v36 = vor.u32 %v6821_v47, %v6261_v42  ;;  %v6947_v42 = vld [vmem:[%s11203_s4 + $0x200] sm:$0xff] }
 0x334   : > { %v10324_v0 = vpop.f32.mrf.mxu1  ;;  %4448 = vmatmul.bf16.gmra.mxu2 %v9681_v45 }
 0x335   : > { %11606 = vst [vmem:[#allocation180_spill] sm:$0xff] %v10324_v0 }
 0x336   : > { %v10329_v43 = vpop.f32.mrf.mxu3  ;;  %v10333_v37 = vpop.f32.mrf.mxu0 }
 0x337   : > { %11607 = vst [vmem:[#allocation181_spill] sm:$0xff] %v10329_v43  ;;  %4895 = vmatmul.bf16.gmra.mxu1 %v10026_v30  ;;  %v10335_v9 = vpop.f32.mrf.mxu2  ;;  %v6287_v30 = vld [vmem:[#allocation2 + $0xcc] sm:$0xf0] }
 0x338   : > { %11608 = vst [vmem:[#allocation182_spill] sm:$0xff] %v10333_v37  ;;  %v6826_v37 = vld [vmem:[#allocation2 + $0xc4] sm:$0xf] }
 0x339   : > { %5202 = vmatmul.bf16.gmra.mxu0 %v6278_v39  ;;  %v6290_v19 = vor.u32 %v6826_v37, %v6287_v30  ;;  %v6948_v37 = vld [vmem:[%s11203_s4 + $0x208] sm:$0xff] }
 0x33b   : > { %5063 = vmatmul.bf16.gmra.mxu3 %v6250_v62  ;;  %v6950_v62 = vld [vmem:[%s11203_s4 + $0x218] sm:$0xff] }
 0x33c   : > { %v10337_v57 = vpop.f32.mrf.mxu1  ;;  %5307 = vmatpush.bf16.msra.mxu1 %v6950_v62 }
 0x33d   : > { %11609 = vst [vmem:[#allocation183_spill] sm:$0xff] %v10337_v57 }
 0x33e   : > { %v10339_v38 = vpop.f32.mrf.mxu3  ;;  %v10341_v43 = vpop.f32.mrf.mxu0 }
 0x33f   : > { %11610 = vst [vmem:[#allocation184_spill] sm:$0xff] %v10339_v38  ;;  %v10343_v12 = vpop.f32.mrf.mxu2  ;;  %v6273_v38 = vld [vmem:[#allocation2 + $0xa8] sm:$0xf] }
 0x340   : > { %11611 = vst [vmem:[#allocation185_spill] sm:$0xff] %v10341_v43 }
 0x344   : > { %v10345_v45 = vpop.f32.mrf.mxu1  ;;  %4453 = vmatmul.bf16.gmra.mxu2 %v9721_v8  ;;  %v6949_v8 = vld [vmem:[%s11203_s4 + $0x210] sm:$0xff] }
 0x345   : > { %11612 = vst [vmem:[#allocation186_spill] sm:$0xff] %v10345_v45  ;;  %5308 = vmatpush.bf16.msra.mxu1 %v6949_v8  ;;  %v6824_v8 = vld [vmem:[#allocation2 + $0xb0] sm:$0xf0] }
 0x346   : > { %v10347_v20 = vpop.f32.mrf.mxu3  ;;  %v10356_v43 = vpop.f32.mrf.mxu0 }
 0x347   : > { %11613 = vst [vmem:[#allocation187_spill] sm:$0xff] %v10347_v20  ;;  %4900 = vmatmul.bf16.gmra.mxu1 %v10079_v46  ;;  %v10354_v39 = vpop.f32.mrf.mxu2 }
 0x348   : > { %11614 = vst [vmem:[#allocation188_spill] sm:$0xff] %v10356_v43 }
 0x349   : > { %5207 = vmatmul.bf16.gmra.mxu0 %v6290_v19  ;;  %5309 = vmatpush.bf16.msra.mxu1 %v6948_v37  ;;  %v6299_v19 = vld [vmem:[#allocation2 + $0xe4] sm:$0xf0]  ;;  %v6926_v37 = vld [vmem:[%s11203_s4 + $0x158] sm:$0xff] }
 0x34a   : > { %4920 = vmatpush.bf16.msra.mxu2 %v6926_v37  ;;  %v6285_v37 = vld [vmem:[#allocation2 + $0xc0] sm:$0xf] }
 0x34b   : > { %5068 = vmatmul.bf16.gmra.mxu3 %v6262_v36  ;;  %v6829_v36 = vld [vmem:[#allocation2 + $0xdc] sm:$0xf] }
 0x34c   : > { %v10358_v20 = vpop.f32.mrf.mxu1 }
 0x34d   : > { %11615 = vst [vmem:[#allocation189_spill] sm:$0xff] %v10358_v20  ;;  %5310 = vmatpush.bf16.msra.mxu1 %v6947_v42  ;;  %v6808_v20 = vld [vmem:[#allocation2 + $0x250] sm:$0xf] }
 0x34e   : > { %v10363_v46 = vpop.f32.mrf.mxu3  ;;  %v10372_v62 = vpop.f32.mrf.mxu0 }
 0x34f   : > { %11616 = vst [vmem:[#allocation190_spill] sm:$0xff] %v10363_v46  ;;  %v10368_v30 = vpop.f32.mrf.mxu2  ;;  %v6302_v46 = vor.u32 %v6829_v36, %v6299_v19  ;;  %v6215_v19 = vld [vmem:[#allocation2 + $0x258] sm:$0xf0] }
 0x350   : > { %11618 = vst [vmem:[#allocation192_spill] sm:$0xff] %v10372_v62  ;;  %v6274_v62 = vor.u32 %v6824_v8, %v6273_v38  ;;  %v6218_v42 = vor.u32 %v6808_v20, %v6215_v19  ;;  %v6827_v8 = vld [vmem:[#allocation2 + $0xc8] sm:$0xf0]  ;;  %v6813_v19 = vld [vmem:[#allocation2 + $0x58] sm:$0xf0] }
 0x354   : > { %v10370_v47 = vpop.f32.mrf.mxu1  ;;  %4458 = vmatmul.bf16.gmra.mxu2 %v9767_v51 }
 0x355   : > { %11617 = vst [vmem:[#allocation191_spill] sm:$0xff] %v10370_v47 }
 0x356   : > { %v10377_v43 = vpop.f32.mrf.mxu3  ;;  %v10390_v51 = vpop.f32.mrf.mxu0 }
 0x357   : > { %11619 = vst [vmem:[#allocation193_spill] sm:$0xff] %v10377_v43  ;;  %4905 = vmatmul.bf16.gmra.mxu1 %v10137_v29  ;;  %v10384_v47 = vpop.f32.mrf.mxu2 }
 0x358   : > { %11622 = vst [vmem:[#allocation196_spill] sm:$0xff] %v10390_v51  ;;  %v6286_v51 = vor.u32 %v6827_v8, %v6285_v37  ;;  %v6297_v37 = vld [vmem:[#allocation2 + $0xd8] sm:$0xf] }
 0x359   : > { %5212 = vmatmul.bf16.gmra.mxu0 %v6302_v46  ;;  %v6832_v46 = vld [vmem:[#allocation2 + $0xf4] sm:$0xf] }
 0x35b   : > { %5073 = vmatmul.bf16.gmra.mxu3 %v6274_v62  ;;  %v6314_v62 = vor.u32 %v6832_v46, %v6311_v53  ;;  %v6233_v53 = vld [vmem:[#allocation2 + $0x50] sm:$0xf] }
 0x35c   : > { %v10386_v54 = vpop.f32.mrf.mxu1  ;;  %v6234_v46 = vor.u32 %v6813_v19, %v6233_v53  ;;  %v6816_v53 = vld [vmem:[#allocation2 + $0x70] sm:$0xf0] }
 0x35d   : > { %11620 = vst [vmem:[#allocation194_spill] sm:$0xff] %v10386_v54 }
 0x35e   : > { %v10388_v43 = vpop.f32.mrf.mxu3 }
 0x35f   : > { %11621 = vst [vmem:[#allocation195_spill] sm:$0xff] %v10388_v43  ;;  %v10392_v29 = vpop.f32.mrf.mxu2  ;;  %v10399_v43 = vpop.f32.mrf.mxu0 }
 0x360   : > { %11625 = vst [vmem:[#allocation199_spill] sm:$0xff] %v10399_v43  ;;  %v6835_v43 = vld [vmem:[#allocation2 + $0x10c] sm:$0xf] }
 0x364   : > { %v10394_v36 = vpop.f32.mrf.mxu1  ;;  %4463 = vmatmul.bf16.gmra.mxu2 %v9825_v22 }
 0x365   : > { %11623 = vst [vmem:[#allocation197_spill] sm:$0xff] %v10394_v36 }
 0x366   : > { %v10396_v38 = vpop.f32.mrf.mxu3 }
 0x367   : > { %11624 = vst [vmem:[#allocation198_spill] sm:$0xff] %v10396_v38  ;;  %4910 = vmatmul.bf16.gmra.mxu1 %v6218_v42  ;;  %v10401_v54 = vpop.f32.mrf.mxu2  ;;  %v10409_v38 = vpop.f32.mrf.mxu0  ;;  %v6323_v42 = vld [vmem:[#allocation2 + $0x114] sm:$0xf0] }
 0x368   : > { %11628 = vst [vmem:[#allocation202_spill] sm:$0xff] %v10409_v38 }
 0x369   : > { %5217 = vmatmul.bf16.gmra.mxu0 %v6314_v62  ;;  %v6830_v62 = vld [vmem:[#allocation2 + $0xe0] sm:$0xf0] }
 0x36b   : > { %5078 = vmatmul.bf16.gmra.mxu3 %v6286_v51  ;;  %v6326_v51 = vor.u32 %v6835_v43, %v6323_v42  ;;  %v6245_v43 = vld [vmem:[#allocation2 + $0x68] sm:$0xf]  ;;  %v6335_v42 = vld [vmem:[#allocation2 + $0x12c] sm:$0xf0] }
 0x36c   : > { %v10403_v36 = vpop.f32.mrf.mxu1 }
 0x36d   : > { %11626 = vst [vmem:[#allocation200_spill] sm:$0xff] %v10403_v36 }
 0x36e   : > { %v10405_v32 = vpop.f32.mrf.mxu3 }
 0x36f   : > { %11627 = vst [vmem:[#allocation201_spill] sm:$0xff] %v10405_v32  ;;  %v10407_v20 = vpop.f32.mrf.mxu2  ;;  %v6298_v32 = vor.u32 %v6830_v62, %v6297_v37  ;;  %v6925_v37 = vld [vmem:[%s11203_s4 + $0x150] sm:$0xff] }
 0x370   : > { %4921 = vmatpush.bf16.msra.mxu2 %v6925_v37  ;;  %v6321_v37 = vld [vmem:[#allocation2 + $0x108] sm:$0xf] }
 0x374   : > { %v10411_v22 = vpop.f32.mrf.mxu1  ;;  %4468 = vmatmul.bf16.gmra.mxu2 %v9970_v50 }
 0x375   : > { %11629 = vst [vmem:[#allocation203_spill] sm:$0xff] %v10411_v22  ;;  %v10420_v22 = vpop.f32.mrf.mxu0 }
 0x376   : > { %v10414_v8 = vpop.f32.mrf.mxu3  ;;  %11632 = vst [vmem:[#allocation206_spill] sm:$0xff] %v10420_v22  ;;  %v6309_v22 = vld [vmem:[#allocation2 + $0xf0] sm:$0xf] }
 0x377   : > { %5311 = vmatmul.bf16.vlgmr.msra.gmra.mxu1 %v6234_v46  ;;  %11630 = vst [vmem:[#allocation204_spill] sm:$0xff] %v10414_v8  ;;  %v10416_v36 = vpop.f32.mrf.mxu2  ;;  %v6246_v46 = vor.u32 %v6816_v53, %v6245_v43  ;;  %v6838_v8 = vld [vmem:[#allocation2 + $0x124] sm:$0xf] }
 0x379   : > { %5222 = vmatmul.bf16.gmra.mxu0 %v6326_v51  ;;  %v6833_v51 = vld [vmem:[#allocation2 + $0xf8] sm:$0xf0] }
 0x37b   : > { %5083 = vmatmul.bf16.gmra.mxu3 %v6298_v32  ;;  %v6338_v32 = vor.u32 %v6838_v8, %v6335_v42  ;;  %v6819_v8 = vld [vmem:[#allocation2 + $0x88] sm:$0xf0] }
 0x37c   : > { %v10418_v38 = vpop.f32.mrf.mxu1 }
 0x37d   : > { %11631 = vst [vmem:[#allocation205_spill] sm:$0xff] %v10418_v38  ;;  %v10428_v62 = vpop.f32.mrf.mxu0 }
 0x37e   : > { %v10422_v45 = vpop.f32.mrf.mxu3 }
 0x37f   : > { %11633 = vst [vmem:[#allocation207_spill] sm:$0xff] %v10422_v45  ;;  %v10424_v19 = vpop.f32.mrf.mxu2  ;;  %v6310_v45 = vor.u32 %v6833_v51, %v6309_v22  ;;  %v6841_v51 = vld [vmem:[#allocation2 + $0x13c] sm:$0xf] }
 0x384   : > { %v10426_v50 = vpop.f32.mrf.mxu1  ;;  %4473 = vmatmul.bf16.gmra.mxu2 %v10038_v21 }
 0x385   : > { %11634 = vst [vmem:[#allocation208_spill] sm:$0xff] %v10426_v50  ;;  %v10440_v43 = vpop.f32.mrf.mxu0 }
 0x386   : > { %v10436_v38 = vpop.f32.mrf.mxu3 }
 0x387   : > { %5316 = vmatmul.bf16.gmra.mxu1 %v6246_v46  ;;  %v10434_v50 = vpop.f32.mrf.mxu2  ;;  %11635 = vst [vmem:[#allocation209_spill] sm:$0xff] %v10436_v38  ;;  %v6257_v46 = vld [vmem:[#allocation2 + $0x80] sm:$0xf] }
 0x388   : > { %v6258_v22 = vor.u32 %v6819_v8, %v6257_v46  ;;  %v6822_v8 = vld [vmem:[#allocation2 + $0xa0] sm:$0xf0] }
 0x389   : > { %5227 = vmatmul.bf16.gmra.mxu0 %v6338_v32  ;;  %v6836_v32 = vld [vmem:[#allocation2 + $0x110] sm:$0xf0] }
 0x38a   : > { %v6322_v38 = vor.u32 %v6836_v32, %v6321_v37  ;;  %v6359_v32 = vld [vmem:[#allocation2 + $0x15c] sm:$0xf0] }
 0x38b   : > { %5088 = vmatmul.bf16.gmra.mxu3 %v6310_v45  ;;  %v6350_v45 = vor.u32 %v6841_v51, %v6347_v44  ;;  %v6333_v37 = vld [vmem:[#allocation2 + $0x120] sm:$0xf] }
 0x38c   : > { %v10438_v53 = vpop.f32.mrf.mxu1 }
 0x38d   : > { %11636 = vst [vmem:[#allocation210_spill] sm:$0xff] %v10438_v53  ;;  %v10451_v57 = vpop.f32.mrf.mxu0 }
 0x38e   : > { %v10446_v6 = vpop.f32.mrf.mxu3 }
 0x38f   : > { %v10442_v21 = vpop.f32.mrf.mxu2  ;;  %11638 = vst [vmem:[#allocation212_spill] sm:$0xff] %v10446_v6 }
 0x394   : > { %v10444_v42 = vpop.f32.mrf.mxu1  ;;  %4478 = vmatmul.bf16.gmra.mxu2 %v10063_v26  ;;  %v6269_v26 = vld [vmem:[#allocation2 + $0x98] sm:$0xf] }
 0x395   : > { %11637 = vst [vmem:[#allocation211_spill] sm:$0xff] %v10444_v42  ;;  %v10461_v44 = vpop.f32.mrf.mxu0  ;;  %v6270_v51 = vor.u32 %v6822_v8, %v6269_v26  ;;  %v6825_v8 = vld [vmem:[#allocation2 + $0xb8] sm:$0xf0] }
 0x396   : > { %v10455_v24 = vpop.f32.mrf.mxu3 }
 0x397   : > { %5321 = vmatmul.bf16.gmra.mxu1 %v6258_v22  ;;  %v10449_v53 = vpop.f32.mrf.mxu2  ;;  %11641 = vst [vmem:[#allocation215_spill] sm:$0xff] %v10455_v24  ;;  %v6844_v22 = vld [vmem:[#allocation2 + $0x154] sm:$0xf] }
 0x398   : > { %11639 = vst [vmem:[#allocation213_spill] sm:$0xff] %v10449_v53 }
 0x399   : > { %5232 = vmatmul.bf16.gmra.mxu0 %v6350_v45  ;;  %v6839_v45 = vld [vmem:[#allocation2 + $0x128] sm:$0xf0] }
 0x39a   : > { %v6334_v24 = vor.u32 %v6839_v45, %v6333_v37  ;;  %v6924_v45 = vld [vmem:[%s11203_s4 + $0x148] sm:$0xff]  ;;  %v6345_v37 = vld [vmem:[#allocation2 + $0x138] sm:$0xf] }
 0x39b   : > { %5093 = vmatmul.bf16.gmra.mxu3 %v6322_v38  ;;  %v6362_v38 = vor.u32 %v6844_v22, %v6359_v32  ;;  %v6371_v22 = vld [vmem:[#allocation2 + $0x174] sm:$0xf0]  ;;  %4922 = vmatpush.bf16.msra.mxu2 %v6924_v45 }
 0x39c   : > { %v10453_v42 = vpop.f32.mrf.mxu1 }
 0x39d   : > { %11640 = vst [vmem:[#allocation214_spill] sm:$0xff] %v10453_v42  ;;  %v10470_v59 = vpop.f32.mrf.mxu0 }
 0x39e   : > { %v10464_v42 = vpop.f32.mrf.mxu3 }
 0x39f   : > { %v10457_v6 = vpop.f32.mrf.mxu2 }
 0x3a0   : > { %11642 = vst [vmem:[#allocation216_spill] sm:$0xff] %v10457_v6 }
 0x3a4   : > { %v10459_v46 = vpop.f32.mrf.mxu1  ;;  %4483 = vmatmul.bf16.gmra.mxu2 %v9865_v61  ;;  %v6281_v61 = vld [vmem:[#allocation2 + $0xb0] sm:$0xf] }
 0x3a5   : > { %11643 = vst [vmem:[#allocation217_spill] sm:$0xff] %v10459_v46  ;;  %v6282_v56 = vor.u32 %v6825_v8, %v6281_v61 }
 0x3a6   : > { %v10474_v26 = vpop.f32.mrf.mxu3 }
 0x3a7   : > { %5326 = vmatmul.bf16.gmra.mxu1 %v6270_v51  ;;  %v10466_v0 = vpop.f32.mrf.mxu2  ;;  %v6847_v51 = vld [vmem:[#allocation2 + $0x16c] sm:$0xf] }
 0x3a8   : > { %11644 = vst [vmem:[#allocation218_spill] sm:$0xff] %v10466_v0 }
 0x3a9   : > { %5237 = vmatmul.bf16.gmra.mxu0 %v6362_v38  ;;  %v6842_v38 = vld [vmem:[#allocation2 + $0x140] sm:$0xf0] }
 0x3aa   : > { %v6346_v10 = vor.u32 %v6842_v38, %v6345_v37 }
 0x3ab   : > { %5098 = vmatmul.bf16.gmra.mxu3 %v6334_v24  ;;  %v6374_v24 = vor.u32 %v6847_v51, %v6371_v22  ;;  %v6293_v51 = vld [vmem:[#allocation2 + $0xc8] sm:$0xf]  ;;  %v6850_v22 = vld [vmem:[#allocation2 + $0x184] sm:$0xf] }
 0x3ac   : > { %v10468_v46 = vpop.f32.mrf.mxu1 }
 0x3ad   : > { %11645 = vst [vmem:[#allocation219_spill] sm:$0xff] %v10468_v46  ;;  %v10482_v46 = vpop.f32.mrf.mxu0 }
 0x3af   : > { %v10472_v60 = vpop.f32.mrf.mxu2 }
 0x3b0   : > { %11646 = vst [vmem:[#allocation220_spill] sm:$0xff] %v10472_v60 }
 0x3b4   : > { %v10476_v32 = vpop.f32.mrf.mxu1  ;;  %4488 = vmatmul.bf16.gmra.mxu2 %v9867_v1 }
 0x3b5   : > { %11647 = vst [vmem:[#allocation221_spill] sm:$0xff] %v10476_v32  ;;  %v10486_v32 = vpop.f32.mrf.mxu3  ;;  %v10492_v61 = vpop.f32.mrf.mxu0 }
 0x3b7   : > { %5331 = vmatmul.bf16.gmra.mxu1 %v6282_v56  ;;  %v10484_v48 = vpop.f32.mrf.mxu2  ;;  %v6828_v56 = vld [vmem:[#allocation2 + $0xd0] sm:$0xf0] }
 0x3b8   : > { %11648 = vst [vmem:[#allocation222_spill] sm:$0xff] %v10484_v48  ;;  %v6294_v35 = vor.u32 %v6828_v56, %v6293_v51  ;;  %v6831_v51 = vld [vmem:[#allocation2 + $0xe8] sm:$0xf0] }
 0x3b9   : > { %5242 = vmatmul.bf16.gmra.mxu0 %v6374_v24  ;;  %v6845_v24 = vld [vmem:[#allocation2 + $0x158] sm:$0xf0] }
 0x3ba   : > { %v6358_v37 = vor.u32 %v6845_v24, %v6357_v58 }
 0x3bb   : > { %5103 = vmatmul.bf16.gmra.mxu3 %v6346_v10  ;;  %v6386_v10 = vor.u32 %v6850_v22, %v6383_v28  ;;  %v6306_v28 = vor.u32 %v6831_v51, %v6305_v4  ;;  %v6369_v22 = vld [vmem:[#allocation2 + $0x168] sm:$0xf]  ;;  %v6834_v51 = vld [vmem:[#allocation2 + $0x100] sm:$0xf0] }
 0x3bc   : > { %v10488_v8 = vpop.f32.mrf.mxu1 }
 0x3bd   : > { %11649 = vst [vmem:[#allocation223_spill] sm:$0xff] %v10488_v8  ;;  %v10494_v38 = vpop.f32.mrf.mxu3  ;;  %v10501_v40 = vpop.f32.mrf.mxu0 }
 0x3bf   : > { %v10490_v1 = vpop.f32.mrf.mxu2 }
 0x3c0   : > { %11650 = vst [vmem:[#allocation224_spill] sm:$0xff] %v10490_v1  ;;  %v6407_v1 = vld [vmem:[#allocation2 + $0x1bc] sm:$0xf0] }
 0x3c4   : > { %4493 = vmatmul.bf16.gmra.mxu2 %v9873_v2  ;;  %v10497_v45 = vpop.f32.mrf.mxu1  ;;  %v6853_v2 = vld [vmem:[#allocation2 + $0x19c] sm:$0xf] }
 0x3c5   : > { %11651 = vst [vmem:[#allocation225_spill] sm:$0xff] %v10497_v45  ;;  %v10503_v14 = vpop.f32.mrf.mxu3  ;;  %v6848_v45 = vld [vmem:[#allocation2 + $0x170] sm:$0xf0] }
 0x3c6   : > { %v6370_v24 = vor.u32 %v6848_v45, %v6369_v22  ;;  %v6851_v45 = vld [vmem:[#allocation2 + $0x188] sm:$0xf0]  ;;  %v6410_v22 = vor.u32 %v6856_v23, %v6407_v1  ;;  %v6329_v23 = vld [vmem:[#allocation2 + $0x110] sm:$0xf] }
 0x3c7   : > { %5336 = vmatmul.bf16.gmra.mxu1 %v6294_v35  ;;  %v10499_v8 = vpop.f32.mrf.mxu2  ;;  %v6395_v35 = vld [vmem:[#allocation2 + $0x1a4] sm:$0xf0]  ;;  %v6859_v1 = vld [vmem:[#allocation2 + $0x1cc] sm:$0xf] }
 0x3c8   : > { %11652 = vst [vmem:[#allocation226_spill] sm:$0xff] %v10499_v8  ;;  %v6398_v58 = vor.u32 %v6853_v2, %v6395_v35  ;;  %v6317_v8 = vld [vmem:[#allocation2 + $0xf8] sm:$0xf]  ;;  %v6381_v35 = vld [vmem:[#allocation2 + $0x180] sm:$0xf] }
 0x3c9   : > { %5247 = vmatmul.bf16.gmra.mxu0 %v6386_v10  ;;  %v10509_v10 = vpop.f32.mrf.mxu0  ;;  %v6318_v2 = vor.u32 %v6834_v51, %v6317_v8 }
 0x3cb   : > { %5108 = vmatmul.bf16.gmra.mxu3 %v6358_v37 }
 0x3cc   : > { %v10507_v7 = vpop.f32.mrf.mxu1 }
 0x3cd   : > { %11654 = vst [vmem:[#allocation228_spill] sm:$0xff] %v10507_v7 }
 0x3cf   : > { %v10505_v56 = vpop.f32.mrf.mxu2 }
 0x3d0   : > { %11653 = vst [vmem:[#allocation227_spill] sm:$0xff] %v10505_v56  ;;  %v10514_v56 = vpop.f32.mrf.mxu3 }
 0x3d1   : > { %v10518_v13 = vpop.f32.mrf.mxu0 }
 0x3d2   : > { %11657 = vst [vmem:[#allocation231_spill] sm:$0xff] %v10518_v13  ;;  %v11759_v13 = vld [vmem:[#allocation15_spill] sm:$0xff] }
 0x3d4   : > { %4498 = vmatmul.bf16.gmra.mxu2 %v9875_v63  ;;  %v10516_v7 = vpop.f32.mrf.mxu1 }
 0x3d5   : > { %11656 = vst [vmem:[#allocation230_spill] sm:$0xff] %v10516_v7 }
 0x3d7   : > { %5341 = vmatmul.bf16.gmra.mxu1 %v6306_v28  ;;  %v10512_v37 = vpop.f32.mrf.mxu2 }
 0x3d8   : > { %11655 = vst [vmem:[#allocation229_spill] sm:$0xff] %v10512_v37  ;;  %v10522_v63 = vpop.f32.mrf.mxu3 }
 0x3d9   : > { %5252 = vmatmul.bf16.gmra.mxu0 %v6398_v58  ;;  %v6923_v58 = vld [vmem:[%s11203_s4 + $0x140] sm:$0xff] }
 0x3da   : > { %4923 = vmatpush.bf16.msra.mxu2 %v6923_v58 }
 0x3db   : > { %5113 = vmatmul.bf16.gmra.mxu3 %v6370_v24  ;;  %v6382_v24 = vor.u32 %v6851_v45, %v6381_v35  ;;  %v6393_v35 = vld [vmem:[#allocation2 + $0x198] sm:$0xf]  ;;  %v6854_v45 = vld [vmem:[#allocation2 + $0x1a0] sm:$0xf0] }
 0x3dc   : > { %v10524_v28 = vpop.f32.mrf.mxu1 }
 0x3dd   : > { %11659 = vst [vmem:[#allocation233_spill] sm:$0xff] %v10524_v28 }
 0x3df   : > { %v10520_v4 = vpop.f32.mrf.mxu2 }
 0x3e0   : > { %11658 = vst [vmem:[#allocation232_spill] sm:$0xff] %v10520_v4  ;;  %v10532_v4 = vpop.f32.mrf.mxu0  ;;  %v10534_v8 = vpop.f32.mrf.mxu3 }
 0x3e1   : > { %11661 = vst [vmem:[#allocation235_spill] sm:$0xff] %v10532_v4 }
 0x3e4   : > { %4503 = vmatmul.bf16.gmra.mxu2 %v9883_v5  ;;  %v10536_v51 = vpop.f32.mrf.mxu1  ;;  %v6837_v5 = vld [vmem:[#allocation2 + $0x118] sm:$0xf0] }
 0x3e5   : > { %11662 = vst [vmem:[#allocation236_spill] sm:$0xff] %v10536_v51 }
 0x3e7   : > { %5346 = vmatmul.bf16.gmra.mxu1 %v6318_v2  ;;  %v10530_v7 = vpop.f32.mrf.mxu2  ;;  %v6419_v2 = vld [vmem:[#allocation2 + $0x1d4] sm:$0xf0] }
 0x3e8   : > { %11660 = vst [vmem:[#allocation234_spill] sm:$0xff] %v10530_v7  ;;  %v10540_v37 = vpop.f32.mrf.mxu0  ;;  %v6422_v58 = vor.u32 %v6859_v1, %v6419_v2  ;;  %v6394_v7 = vor.u32 %v6854_v45, %v6393_v35  ;;  %v6857_v35 = vld [vmem:[#allocation2 + $0x1b8] sm:$0xf0] }
 0x3e9   : > { %5257 = vmatmul.bf16.gmra.mxu0 %v6410_v22  ;;  %11664 = vst [vmem:[#allocation238_spill] sm:$0xff] %v10540_v37  ;;  %v6330_v22 = vor.u32 %v6837_v5, %v6329_v23  ;;  %v6840_v5 = vld [vmem:[#allocation2 + $0x130] sm:$0xf0]  ;;  %v6863_v37 = vld [vmem:[#allocation2 + $0x1e8] sm:$0xf0] }
 0x3ea   : > { %v6342_v2 = vor.u32 %v6840_v5, %v6341_v27  ;;  %v6843_v27 = vld [vmem:[#allocation2 + $0x148] sm:$0xf0] }
 0x3eb   : > { %5118 = vmatmul.bf16.gmra.mxu3 %v6382_v24  ;;  %v10543_v24 = vpop.f32.mrf.mxu3 }
 0x3ef   : > { %v10538_v28 = vpop.f32.mrf.mxu2 }
 0x3f0   : > { %11663 = vst [vmem:[#allocation237_spill] sm:$0xff] %v10538_v28  ;;  %v10547_v28 = vpop.f32.mrf.mxu1  ;;  %v10549_v52 = vpop.f32.mrf.mxu0 }
 0x3f1   : > { %11666 = vst [vmem:[#allocation240_spill] sm:$0xff] %v10547_v28 }
 0x3f2   : > { %11667 = vst [vmem:[#allocation241_spill] sm:$0xff] %v10549_v52  ;;  %v6353_v52 = vld [vmem:[#allocation2 + $0x140] sm:$0xf] }
 0x3f3   : > { %v10553_v23 = vpop.f32.mrf.mxu3 }
 0x3f4   : > { %4508 = vmatmul.bf16.gmra.mxu2 %v9892_v49  ;;  %v6862_v49 = vld [vmem:[#allocation2 + $0x1e4] sm:$0xf] }
 0x3f7   : > { %5351 = vmatmul.bf16.gmra.mxu1 %v6330_v22  ;;  %v10545_v51 = vpop.f32.mrf.mxu2  ;;  %v6431_v22 = vld [vmem:[#allocation2 + $0x1ec] sm:$0xf0] }
 0x3f8   : > { %11665 = vst [vmem:[#allocation239_spill] sm:$0xff] %v10545_v51  ;;  %v10555_v1 = vpop.f32.mrf.mxu1  ;;  %v6434_v45 = vor.u32 %v6862_v49, %v6431_v22  ;;  %v6865_v49 = vld [vmem:[#allocation2 + $0x1fc] sm:$0xf]  ;;  %v6417_v22 = vld [vmem:[#allocation2 + $0x1c8] sm:$0xf] }
 0x3f9   : > { %5262 = vmatmul.bf16.gmra.mxu0 %v6422_v58  ;;  %v6405_v58 = vld [vmem:[#allocation2 + $0x1b0] sm:$0xf] }
 0x3fa   : > { %v6406_v28 = vor.u32 %v6857_v35, %v6405_v58 }
 0x3fb   : > { %5123 = vmatmul.bf16.gmra.mxu3 %v6394_v7  ;;  %v10558_v7 = vpop.f32.mrf.mxu0  ;;  %v10562_v51 = vpop.f32.mrf.mxu3 }
 0x3fc   : > { %11669 = vst [vmem:[#allocation243_spill] sm:$0xff] %v10558_v7  ;;  %v6860_v7 = vld [vmem:[#allocation2 + $0x1d0] sm:$0xf0] }
 0x3fd   : > { %11671 = vst [vmem:[#allocation245_spill] sm:$0xff] %v10562_v51  ;;  %v6418_v35 = vor.u32 %v6860_v7, %v6417_v22 }
 0x3ff   : > { %v10551_v48 = vpop.f32.mrf.mxu2 }
 0x400   : > { %11668 = vst [vmem:[#allocation242_spill] sm:$0xff] %v10551_v48  ;;  %v10564_v60 = vpop.f32.mrf.mxu1 }
 0x403   : > { %v10568_v5 = vpop.f32.mrf.mxu0 }
 0x404   : > { %4513 = vmatmul.bf16.gmra.mxu2 %v9996_v25  ;;  %11673 = vst [vmem:[#allocation247_spill] sm:$0xff] %v10568_v5  ;;  %v6443_v25 = vld [vmem:[#allocation2 + $0x204] sm:$0xf0] }
 0x407   : > { %5356 = vmatmul.bf16.gmra.mxu1 %v6342_v2  ;;  %v10560_v48 = vpop.f32.mrf.mxu2  ;;  %v6354_v2 = vor.u32 %v6843_v27, %v6353_v52  ;;  %v6365_v27 = vld [vmem:[#allocation2 + $0x158] sm:$0xf] }
 0x408   : > { %11670 = vst [vmem:[#allocation244_spill] sm:$0xff] %v10560_v48  ;;  %v10573_v58 = vpop.f32.mrf.mxu1 }
 0x409   : > { %5267 = vmatmul.bf16.gmra.mxu0 %v6434_v45  ;;  %v10570_v45 = vpop.f32.mrf.mxu3 }
 0x40a   : > { %11674 = vst [vmem:[#allocation248_spill] sm:$0xff] %v10570_v45 }
 0x40b   : > { %5128 = vmatmul.bf16.gmra.mxu3 %v6406_v28  ;;  %v6446_v28 = vor.u32 %v6865_v49, %v6443_v25  ;;  %v10577_v48 = vpop.f32.mrf.mxu0  ;;  %v6868_v25 = vld [vmem:[#allocation2 + $0x214] sm:$0xf]  ;;  %v6429_v49 = vld [vmem:[#allocation2 + $0x1e0] sm:$0xf] }
 0x40c   : > { %11676 = vst [vmem:[#allocation250_spill] sm:$0xff] %v10577_v48  ;;  %v6430_v22 = vor.u32 %v6863_v37, %v6429_v49  ;;  %v6441_v49 = vld [vmem:[#allocation2 + $0x1f8] sm:$0xf] }
 0x40f   : > { %v10566_v18 = vpop.f32.mrf.mxu2 }
 0x410   : > { %11672 = vst [vmem:[#allocation246_spill] sm:$0xff] %v10566_v18  ;;  %v10583_v0 = vpop.f32.mrf.mxu1 }
 0x411   : > { %v10579_v5 = vpop.f32.mrf.mxu3 }
 0x412   : > { %11677 = vst [vmem:[#allocation251_spill] sm:$0xff] %v10579_v5  ;;  %v6849_v5 = vld [vmem:[#allocation2 + $0x178] sm:$0xf0] }
 0x414   : > { %4518 = vmatmul.bf16.gmra.mxu2 %v10059_v34  ;;  %v6455_v34 = vld [vmem:[#allocation2 + $0x21c] sm:$0xf0] }
 0x415   : > { %v6458_v7 = vor.u32 %v6868_v25, %v6455_v34  ;;  %v6871_v34 = vld [vmem:[#allocation2 + $0x22c] sm:$0xf] }
 0x417   : > { %5361 = vmatmul.bf16.gmra.mxu1 %v6354_v2  ;;  %v10575_v18 = vpop.f32.mrf.mxu2  ;;  %v6366_v2 = vor.u32 %v6846_v16, %v6365_v27  ;;  %v6377_v27 = vld [vmem:[#allocation2 + $0x170] sm:$0xf] }
 0x418   : > { %11675 = vst [vmem:[#allocation249_spill] sm:$0xff] %v10575_v18  ;;  %v10592_v18 = vpop.f32.mrf.mxu1 }
 0x419   : > { %5272 = vmatmul.bf16.gmra.mxu0 %v6446_v28  ;;  %v10585_v28 = vpop.f32.mrf.mxu0 }
 0x41a   : > { %11679 = vst [vmem:[#allocation253_spill] sm:$0xff] %v10585_v28  ;;  %v6467_v28 = vld [vmem:[#allocation2 + $0x234] sm:$0xf0] }
 0x41b   : > { %5133 = vmatmul.bf16.gmra.mxu3 %v6418_v35  ;;  %v6470_v25 = vor.u32 %v6871_v34, %v6467_v28  ;;  %v11690_v28 = vld [vmem:[#allocation9_spill] sm:$0xff]  ;;  %v11692_v34 = vld [vmem:[#allocation10_spill] sm:$0xff] }
 0x41f   : > { %v10581_v52 = vpop.f32.mrf.mxu2 }
 0x420   : > { %11678 = vst [vmem:[#allocation252_spill] sm:$0xff] %v10581_v52  ;;  %v10590_v52 = vpop.f32.mrf.mxu3  ;;  %v10600_v37 = vpop.f32.mrf.mxu1 }
 0x421   : > { %11681 = vst [vmem:[#allocation255_spill] sm:$0xff] %v10590_v52  ;;  %v10594_v48 = vpop.f32.mrf.mxu0  ;;  %v6479_v52 = vld [vmem:[#allocation2 + $0x24c] sm:$0xf0] }
 0x422   : > { %11682 = vst [vmem:[#allocation256_spill] sm:$0xff] %v10594_v48 }
 0x424   : > { %4523 = vmatmul.bf16.gmra.mxu2 %v10109_v33  ;;  %v6378_v33 = vor.u32 %v6849_v5, %v6377_v27  ;;  %v6389_v27 = vld [vmem:[#allocation2 + $0x188] sm:$0xf] }
 0x427   : > { %5366 = vmatmul.bf16.gmra.mxu1 %v6366_v2  ;;  %v10588_v35 = vpop.f32.mrf.mxu2  ;;  %v6866_v2 = vld [vmem:[#allocation2 + $0x200] sm:$0xf0] }
 0x428   : > { %11680 = vst [vmem:[#allocation254_spill] sm:$0xff] %v10588_v35  ;;  %v10598_v45 = vpop.f32.mrf.mxu3  ;;  %v10609_v48 = vpop.f32.mrf.mxu1 }
 0x429   : > { %5277 = vmatmul.bf16.gmra.mxu0 %v6458_v7  ;;  %11684 = vst [vmem:[#allocation258_spill] sm:$0xff] %v10598_v45  ;;  %v6442_v7 = vor.u32 %v6866_v2, %v6441_v49  ;;  %v6852_v45 = vld [vmem:[#allocation2 + $0x190] sm:$0xf0]  ;;  %v11693_v2 = vunpack.c.l.b16 %v11692_v34 }
 0x42a   : > { %v6390_v49 = vor.u32 %v6852_v45, %v6389_v27  ;;  %v6401_v45 = vld [vmem:[#allocation2 + $0x1a0] sm:$0xf]  ;;  %v6855_v27 = vld [vmem:[#allocation2 + $0x1a8] sm:$0xf0] }
 0x42b   : > { %5138 = vmatmul.bf16.gmra.mxu3 %v6430_v22 }
 0x42f   : > { %v10596_v16 = vpop.f32.mrf.mxu2 }
 0x430   : > { %11683 = vst [vmem:[#allocation257_spill] sm:$0xff] %v10596_v16  ;;  %v10605_v16 = vpop.f32.mrf.mxu0  ;;  %v10607_v35 = vpop.f32.mrf.mxu3 }
 0x431   : > { %11686 = vst [vmem:[#allocation260_spill] sm:$0xff] %v10605_v16  ;;  %v6869_v16 = vld [vmem:[#allocation2 + $0x218] sm:$0xf0]  ;;  %v10623_v4 = vpop.f32.mrf.mxu1 }
 0x432   : > { %11687 = vst [vmem:[#allocation261_spill] sm:$0xff] %v10607_v35  ;;  %v6453_v35 = vld [vmem:[#allocation2 + $0x210] sm:$0xf] }
 0x434   : > { %4924 = vmatmul.bf16.vlgmr.msra.gmra.mxu2 %v8427_v11 }
 0x437   : > { %5371 = vmatmul.bf16.gmra.mxu1 %v6378_v33  ;;  %v10603_v22 = vpop.f32.mrf.mxu2  ;;  %v11691_v33 = vunpack.c.l.b16 %v11690_v28 }
 0x438   : > { %11685 = vst [vmem:[#allocation259_spill] sm:$0xff] %v10603_v22  ;;  %v10613_v11 = vpop.f32.mrf.mxu0  ;;  %v6874_v22 = vld [vmem:[#allocation2 + $0x244] sm:$0xf]  ;;  %v10619_v6 = vpop.f32.mrf.mxu3 }
 0x439   : > { %5282 = vmatmul.bf16.gmra.mxu0 %v6470_v25  ;;  %11689 = vst [vmem:[#allocation263_spill] sm:$0xff] %v10613_v11  ;;  %v3172_v25 = vpack.c.b16 %v11693_v2, %v11691_v33  ;;  %v6877_v2 = vld [vmem:[#allocation2 + $0x25c] sm:$0xf]  ;;  %v6872_v11 = vld [vmem:[#allocation2 + $0x230] sm:$0xf0] }
 0x43a   : > { %11694 = vst [vmem:[#allocation9_spill] sm:$0xff] %v10619_v6 }
 0x43b   : > { %5143 = vmatmul.bf16.gmra.mxu3 %v6442_v7  ;;  %v6482_v7 = vor.u32 %v6874_v22, %v6479_v52  ;;  %v6491_v52 = vld [vmem:[#allocation2 + $0x264] sm:$0xf0]  ;;  %v10631_v22 = vpop.f32.mrf.mxu1 }
 0x43f   : > { %v10611_v5 = vpop.f32.mrf.mxu2 }
 0x440   : > { %11688 = vst [vmem:[#allocation262_spill] sm:$0xff] %v10611_v5  ;;  %v6454_v5 = vor.u32 %v6869_v16, %v6453_v35  ;;  %v10625_v28 = vpop.f32.mrf.mxu0  ;;  %v10629_v33 = vpop.f32.mrf.mxu3  ;;  %v11701_v35 = vld [vmem:[#allocation13_spill] sm:$0xff] }
 0x441   : > { %11696 = vst [vmem:[#allocation264_spill] sm:$0xff] %v10625_v28  ;;  %v11702_v16 = vunpack.c.l.b16 %v11701_v35  ;;  %v6465_v28 = vld [vmem:[#allocation2 + $0x228] sm:$0xf] }
 0x442   : > { %11698 = vst [vmem:[#allocation266_spill] sm:$0xff] %v10629_v33  ;;  %v6466_v6 = vor.u32 %v6872_v11, %v6465_v28 }
 0x443   : > { %v10643_v53 = vpop.f32.mrf.mxu1 }
 0x444   : > { %4929 = vmatmul.bf16.gmra.mxu2 %v3172_v25  ;;  %v11699_v25 = vld [vmem:[#allocation11_spill] sm:$0xff]  ;;  %11706 = vst [vmem:[#allocation268_spill] sm:$0xff] %v10643_v53 }
 0x447   : > { %5376 = vmatmul.bf16.gmra.mxu1 %v6390_v49  ;;  %v10621_v3 = vpop.f32.mrf.mxu2  ;;  %v11700_v49 = vunpack.c.l.b16 %v11699_v25 }
 0x448   : > { %11695 = vst [vmem:[#allocation10_spill] sm:$0xff] %v10621_v3  ;;  %v6402_v3 = vor.u32 %v6855_v27, %v6401_v45  ;;  %v10641_v51 = vpop.f32.mrf.mxu3  ;;  %v6858_v45 = vld [vmem:[#allocation2 + $0x1c0] sm:$0xf0]  ;;  %v11708_v27 = vld [vmem:[#allocation16_spill] sm:$0xff] }
 0x449   : > { %5287 = vmatmul.bf16.gmra.mxu0 %v6482_v7  ;;  %v3175_v7 = vpack.c.b16 %v11702_v16, %v11700_v49  ;;  %11705 = vst [vmem:[#allocation267_spill] sm:$0xff] %v10641_v51  ;;  %v6413_v49 = vld [vmem:[#allocation2 + $0x1b8] sm:$0xf]  ;;  %v11709_v35 = vunpack.c.l.b16 %v11708_v27  ;;  %v6425_v27 = vld [vmem:[#allocation2 + $0x1d0] sm:$0xf] }
 0x44a   : > { %v6414_v16 = vor.u32 %v6858_v45, %v6413_v49  ;;  %v11718_v49 = vld [vmem:[#allocation22_spill] sm:$0xff]  ;;  %v6489_v51 = vld [vmem:[#allocation2 + $0x258] sm:$0xf] }
 0x44b   : > { %5148 = vmatmul.bf16.gmra.mxu3 %v6454_v5  ;;  %v6494_v5 = vor.u32 %v6877_v2, %v6491_v52  ;;  %v10653_v11 = vpop.f32.mrf.mxu1  ;;  %v11719_v45 = vunpack.c.l.b16 %v11718_v49  ;;  %v6864_v49 = vld [vmem:[#allocation2 + $0x1f0] sm:$0xf0] }
 0x44f   : > { %v10627_v34 = vpop.f32.mrf.mxu2 }
 0x450   : > { %11697 = vst [vmem:[#allocation265_spill] sm:$0xff] %v10627_v34  ;;  %v10637_v34 = vpop.f32.mrf.mxu0 }
 0x451   : > { %11703 = vst [vmem:[#allocation11_spill] sm:$0xff] %v10637_v34 }
 0x454   : > { %4934 = vmatmul.bf16.gmra.mxu2 %v3175_v7  ;;  %v6875_v7 = vld [vmem:[#allocation2 + $0x248] sm:$0xf0] }
 0x457   : > { %5381 = vmatmul.bf16.gmra.mxu1 %v6402_v3  ;;  %v10639_v33 = vpop.f32.mrf.mxu2  ;;  %v11710_v3 = vld [vmem:[#allocation20_spill] sm:$0xff] }
 0x458   : > { %11704 = vst [vmem:[#allocation13_spill] sm:$0xff] %v10639_v33  ;;  %v11711_v2 = vunpack.c.l.b16 %v11710_v3  ;;  %v6861_v3 = vld [vmem:[#allocation2 + $0x1d8] sm:$0xf0] }
 0x459   : > { %5292 = vmatmul.bf16.gmra.mxu0 %v6494_v5  ;;  %v10651_v5 = vpop.f32.mrf.mxu3  ;;  %11713 = vst [vmem:[#allocation20_spill] sm:$0xff] %v10653_v11  ;;  %v6878_v11 = vld [vmem:[#allocation2 + $0x260] sm:$0xf0] }
 0x45a   : > { %v3178_v52 = vpack.c.b16 %v11711_v2, %v11709_v35  ;;  %11712 = vst [vmem:[#allocation16_spill] sm:$0xff] %v10651_v5  ;;  %v10661_v35 = vpop.f32.mrf.mxu1  ;;  %v11720_v2 = vld [vmem:[#allocation25_spill] sm:$0xff]  ;;  %v6426_v5 = vor.u32 %v6861_v3, %v6425_v27 }
 0x45b   : > { %5153 = vmatmul.bf16.gmra.mxu3 %v6466_v6  ;;  %v6477_v6 = vld [vmem:[#allocation2 + $0x240] sm:$0xf]  ;;  %11717 = vst [vmem:[#allocation273_spill] sm:$0xff] %v10661_v35 }
 0x45c   : > { %v6478_v28 = vor.u32 %v6875_v7, %v6477_v6  ;;  %v6490_v7 = vor.u32 %v6878_v11, %v6489_v51  ;;  %v11726_v35 = vld [vmem:[#allocation26_spill] sm:$0xff] }
 0x45f   : > { %v10645_v25 = vpop.f32.mrf.mxu2 }
 0x460   : > { %11707 = vst [vmem:[#allocation269_spill] sm:$0xff] %v10645_v25 }
 0x461   : > { %v10657_v25 = vpop.f32.mrf.mxu3 }
 0x462   : > { %11715 = vst [vmem:[#allocation271_spill] sm:$0xff] %v10657_v25  ;;  %v6437_v25 = vld [vmem:[#allocation2 + $0x1e8] sm:$0xf] }
 0x464   : > { %4939 = vmatmul.bf16.gmra.mxu2 %v3178_v52  ;;  %v11721_v52 = vunpack.c.l.b16 %v11720_v2  ;;  %v11727_v2 = vunpack.c.l.b16 %v11726_v35 }
 0x467   : > { %5386 = vmatmul.bf16.gmra.mxu1 %v6414_v16  ;;  %v10655_v33 = vpop.f32.mrf.mxu2  ;;  %v3181_v16 = vpack.c.b16 %v11721_v52, %v11719_v45  ;;  %v11728_v45 = vld [vmem:[#allocation31_spill] sm:$0xff]  ;;  %v6438_v52 = vor.u32 %v6864_v49, %v6437_v25 }
 0x468   : > { %11714 = vst [vmem:[#allocation270_spill] sm:$0xff] %v10655_v33  ;;  %v11729_v27 = vunpack.c.l.b16 %v11728_v45 }
 0x46a   : > { %v3184_v3 = vpack.c.b16 %v11729_v27, %v11727_v2  ;;  %v6870_v27 = vld [vmem:[#allocation2 + $0x220] sm:$0xf0] }
 0x46b   : > { %5158 = vmatmul.bf16.gmra.mxu3 %v6478_v28  ;;  %v10669_v28 = vpop.f32.mrf.mxu3 }
 0x46c   : > { %11723 = vst [vmem:[#allocation25_spill] sm:$0xff] %v10669_v28 }
 0x46f   : > { %v10659_v34 = vpop.f32.mrf.mxu2 }
 0x470   : > { %11716 = vst [vmem:[#allocation272_spill] sm:$0xff] %v10659_v34  ;;  %v10671_v34 = vpop.f32.mrf.mxu1 }
 0x471   : > { %11724 = vst [vmem:[#allocation274_spill] sm:$0xff] %v10671_v34  ;;  %v11736_v34 = vld [vmem:[#allocation38_spill] sm:$0xff] }
 0x472   : > { %v11737_v35 = vunpack.c.l.b16 %v11736_v34 }
 0x474   : > { %4944 = vmatmul.bf16.gmra.mxu2 %v3181_v16 }
 0x477   : > { %5391 = vmatmul.bf16.gmra.mxu1 %v6426_v5  ;;  %v10667_v6 = vpop.f32.mrf.mxu2 }
 0x478   : > { %11722 = vst [vmem:[#allocation22_spill] sm:$0xff] %v10667_v6  ;;  %v10679_v16 = vpop.f32.mrf.mxu1  ;;  %v11734_v6 = vld [vmem:[#allocation30_spill] sm:$0xff] }
 0x479   : > { %11730 = vst [vmem:[#allocation26_spill] sm:$0xff] %v10679_v16  ;;  %v11735_v28 = vunpack.c.l.b16 %v11734_v6 }
 0x47b   : > { %5163 = vmatmul.bf16.gmra.mxu3 %v6490_v7  ;;  %v6867_v7 = vld [vmem:[#allocation2 + $0x208] sm:$0xf0]  ;;  %v3187_v41 = vpack.c.b16 %v11737_v35, %v11735_v28  ;;  %v11749_v35 = vld [vmem:[#allocation36_spill] sm:$0xff] }
 0x47f   : > { %v10673_v33 = vpop.f32.mrf.mxu2 }
 0x480   : > { %11725 = vst [vmem:[#allocation275_spill] sm:$0xff] %v10673_v33  ;;  %v10683_v5 = vpop.f32.mrf.mxu1  ;;  %v6449_v33 = vld [vmem:[#allocation2 + $0x200] sm:$0xf] }
 0x481   : > { %11732 = vst [vmem:[#allocation276_spill] sm:$0xff] %v10683_v5  ;;  %v6450_v45 = vor.u32 %v6867_v7, %v6449_v33  ;;  %v11744_v5 = vld [vmem:[#allocation44_spill] sm:$0xff] }
 0x482   : > { %v11745_v6 = vunpack.c.l.b16 %v11744_v5  ;;  %v11747_v33 = vld [vmem:[#allocation12_spill] sm:$0xff] }
 0x483   : > { %v4410_v28 = vadd.f32 %v10335_v9, %v11747_v33  ;;  %v11757_v9 = vld [vmem:[#allocation39_spill] sm:$0xff] }
 0x484   : > { %4949 = vmatmul.bf16.gmra.mxu2 %v3184_v3  ;;  %v6461_v3 = vld [vmem:[#allocation2 + $0x218] sm:$0xf] }
 0x485   : > { %v6462_v34 = vor.u32 %v6870_v27, %v6461_v3 }
 0x487   : > { %5396 = vmatmul.bf16.gmra.mxu1 %v6438_v52  ;;  %v10681_v51 = vpop.f32.mrf.mxu2 }
 0x488   : > { %11731 = vst [vmem:[#allocation31_spill] sm:$0xff] %v10681_v51  ;;  %v10693_v49 = vpop.f32.mrf.mxu1 }
 0x489   : > { %11739 = vst [vmem:[#allocation38_spill] sm:$0xff] %v10693_v49 }
 0x48f   : > { %v10685_v11 = vpop.f32.mrf.mxu2 }
 0x490   : > { %11733 = vst [vmem:[#allocation277_spill] sm:$0xff] %v10685_v11  ;;  %v10697_v52 = vpop.f32.mrf.mxu1  ;;  %v11742_v11 = vld [vmem:[#allocation35_spill] sm:$0xff] }
 0x491   : > { %11741 = vst [vmem:[#allocation279_spill] sm:$0xff] %v10697_v52  ;;  %v11743_v51 = vunpack.c.l.b16 %v11742_v11  ;;  %v6473_v52 = vld [vmem:[#allocation2 + $0x230] sm:$0xf]  ;;  %v11751_v11 = vld [vmem:[#allocation14_spill] sm:$0xff] }
 0x492   : > { %v4412_v5 = vadd.f32 %v10343_v12, %v11751_v11  ;;  %v4415_v12 = vadd.f32 %v10354_v39, %v11759_v13  ;;  %v11764_v13 = vld [vmem:[#allocation51_spill] sm:$0xff] }
 0x493   : > { %v3190_v16 = vpack.c.b16 %v11745_v6, %v11743_v51  ;;  %v11752_v51 = vld [vmem:[#allocation43_spill] sm:$0xff]  ;;  %v11765_v39 = vunpack.c.l.b16 %v11764_v13  ;;  %v5584_v13 = vpop.permute.xlu2 %5583 }
 0x494   : > { %4954 = vmatmul.bf16.gmra.mxu2 %v3187_v41  ;;  %v11753_v27 = vunpack.c.l.b16 %v11752_v51  ;;  %v4541_v33 = vadd.f32 %v11757_v9, %v4412_v5  ;;  %v11760_v51 = vld [vmem:[#allocation23_spill] sm:$0xff] }
 0x495   : > { %v6485_v9 = vld [vmem:[#allocation2 + $0x248] sm:$0xf] }
 0x497   : > { %5401 = vmatmul.bf16.gmra.mxu1 %v6450_v45  ;;  %v10691_v25 = vpop.f32.mrf.mxu2  ;;  %v4539_v45 = vadd.f32 %v11749_v35, %v4410_v28  ;;  %v11758_v35 = vld [vmem:[#allocation78_spill] sm:$0xff] }
 0x498   : > { %11738 = vst [vmem:[#allocation30_spill] sm:$0xff] %v10691_v25  ;;  %v10707_v7 = vpop.f32.mrf.mxu1  ;;  %v6873_v25 = vld [vmem:[#allocation2 + $0x238] sm:$0xf0] }
 0x499   : > { %11748 = vst [vmem:[#allocation44_spill] sm:$0xff] %v10707_v7 }
 0x49f   : > { %v10695_v2 = vpop.f32.mrf.mxu2 }
 0x4a0   : > { %11740 = vst [vmem:[#allocation278_spill] sm:$0xff] %v10695_v2  ;;  %v10720_v28 = vpop.f32.mrf.mxu1 }
 0x4a4   : > { %4959 = vmatmul.bf16.gmra.mxu2 %v3190_v16  ;;  %v11754_v16 = vld [vmem:[#allocation52_spill] sm:$0xff] }
 0x4a5   : > { %v11755_v3 = vunpack.c.l.b16 %v11754_v16 }
 0x4a7   : > { %5406 = vmatmul.bf16.gmra.mxu1 %v6462_v34  ;;  %v10703_v41 = vpop.f32.mrf.mxu2  ;;  %v3193_v6 = vpack.c.b16 %v11755_v3, %v11753_v27  ;;  %v6474_v34 = vor.u32 %v6873_v25, %v6473_v52  ;;  %v4670_v25 = vadd.f32 %v11760_v51, %v4541_v33  ;;  %v11761_v52 = vld [vmem:[#allocation7_spill] sm:$0xff]  ;;  %v11762_v27 = vld [vmem:[#allocation82_spill] sm:$0xff]  ;;  %v6876_v3 = vld [vmem:[#allocation2 + $0x250] sm:$0xf0] }
 0x4a8   : > { %11746 = vst [vmem:[#allocation35_spill] sm:$0xff] %v10703_v41  ;;  %v11756_v41 = vld [vmem:[#allocation21_spill] sm:$0xff] }
 0x4a9   : > { %v4668_v49 = vadd.f32 %v11756_v41, %v4539_v45  ;;  %v4544_v41 = vadd.f32 %v11761_v52, %v4415_v12  ;;  %v4799_v5 = vadd.f32 %v11762_v27, %v4670_v25  ;;  %v11768_v12 = vld [vmem:[#allocation8_spill] sm:$0xff]  ;;  %v5579_v25 = vpop.permute.xlu1 %5578 }
 0x4af   : > { %v10710_v2 = vpop.f32.mrf.mxu2 }
 0x4b0   : > { %11750 = vst [vmem:[#allocation12_spill] sm:$0xff] %v10710_v2  ;;  %v4797_v2 = vadd.f32 %v11758_v35, %v4668_v49  ;;  %v6486_v35 = vor.u32 %v6876_v3, %v6485_v9 }
 0x4b4   : > { %4964 = vmatmul.bf16.gmra.mxu2 %v3193_v6  ;;  %v10730_v6 = vpop.f32.mrf.mxu1 }
 0x4b7   : > { %5411 = vmatmul.bf16.gmra.mxu1 %v6474_v34  ;;  %v4925_v7 = vpop.f32.mrf.mxu2 }
 0x4b8   : > { %v4926_v53 = vadd.f32 %v4925_v7, %v4797_v2  ;;  %v11763_v2 = vld [vmem:[#allocation17_spill] sm:$0xff] }
 0x4b9   : > { %v4417_v7 = vadd.f32 %v10368_v30, %v11763_v2  ;;  %v11769_v30 = vld [vmem:[#allocation46_spill] sm:$0xff] }
 0x4ba   : > { %v5055_v11 = vadd.f32 %v10464_v42, %v4926_v53  ;;  %v11766_v53 = vld [vmem:[#allocation59_spill] sm:$0xff] }
 0x4bb   : > { %v11767_v42 = vunpack.c.l.b16 %v11766_v53  ;;  %v4546_v52 = vadd.f32 %v11769_v30, %v4417_v7  ;;  %v6879_v30 = vld [vmem:[#allocation2 + $0x268] sm:$0xf0] }
 0x4bc   : > { %v5184_v45 = vadd.f32 %v10428_v62, %v5055_v11  ;;  %v4673_v11 = vadd.f32 %v11768_v12, %v4544_v41 }
 0x4bd   : > { %v3196_v34 = vpack.c.b16 %v11767_v42, %v11765_v39  ;;  %v10754_v39 = vpop.f32.mrf.mxu1 }
 0x4be   : > { %v5313_v33 = vadd.f32 %v10555_v1, %v5184_v45  ;;  %v11771_v45 = vld [vmem:[#allocation18_spill] sm:$0xff] }
 0x4bf   : > { %v4927_v16 = vpop.f32.mrf.mxu2  ;;  %v4420_v3 = vadd.f32 %v10384_v47, %v11771_v45  ;;  %v6497_v47 = vld [vmem:[#allocation2 + $0x260] sm:$0xf] }
 0x4c0   : > { %v4928_v49 = vadd.f32 %v4927_v16, %v4799_v5  ;;  %v5816_v27 = vmul.f32 %v5579_v25, %v5313_v33  ;;  %v11770_v16 = vld [vmem:[#allocation86_spill] sm:$0xff] }
 0x4c1   : > { %v4802_v2 = vadd.f32 %v11770_v16, %v4673_v11 }
 0x4c2   : > { %v5057_v62 = vadd.f32 %v10474_v26, %v4928_v49  ;;  %v11772_v49 = vld [vmem:[#allocation27_spill] sm:$0xff] }
 0x4c3   : > { %v4675_v7 = vadd.f32 %v11772_v49, %v4546_v52  ;;  %v5589_v52 = vpop.permute.xlu0 %5588 }
 0x4c4   : > { %v5186_v51 = vadd.f32 %v10440_v43, %v5057_v62  ;;  %4969 = vmatmul.bf16.gmra.mxu2 %v3196_v34 }
 0x4c6   : > { %v5315_v5 = vadd.f32 %v10564_v60, %v5186_v51  ;;  %v5911_v60 = vmul.f32 %v5816_v27, %v5313_v33  ;;  %v11774_v51 = vld [vmem:[#allocation90_spill] sm:$0xff] }
 0x4c7   : > { %5416 = vmatmul.bf16.gmra.mxu1 %v6486_v35  ;;  %v4930_v26 = vpop.f32.mrf.mxu2  ;;  %v11773_v35 = vld [vmem:[#allocation49_spill] sm:$0xff]  ;;  %v4804_v25 = vadd.f32 %v11774_v51, %v4675_v7  ;;  %v10770_v7 = vpop.f32.mrf.mxu1 }
 0x4c8   : > { %v7058_v1 = vpack.c.bf16 %v5315_v5, %v5313_v33  ;;  %v5817_v43 = vmul.f32 %v5584_v13, %v5315_v5  ;;  %v4931_v41 = vadd.f32 %v4930_v26, %v4802_v2  ;;  %v4549_v12 = vadd.f32 %v11773_v35, %v4420_v3  ;;  %v11775_v13 = vld [vmem:[#allocation19_spill] sm:$0xff]  ;;  %v11778_v26 = vld [vmem:[#allocation65_spill] sm:$0xff] }
 0x4c9   : > { %v11780_v3 = vld [vmem:[#allocation29_spill] sm:$0xff] }
 0x4ca   : > { %7059 = vst [vmem:[%s10749_s15] sm:$0xff] %v7058_v1   ;;  %v5864_v53 = vadd.f32 %v5817_v43, %v5816_v27  ;;  %v5912_v42 = vmul.f32 %v5817_v43, %v5315_v5  ;;  %v5060_v34 = vadd.f32 %v10486_v32, %v4931_v41  ;;  %v4422_v27 = vadd.f32 %v10392_v29, %v11775_v13  ;;  %v11776_v5 = vld [vmem:[#allocation57_spill] sm:$0xff]  ;;  %v11781_v29 = vld [vmem:[#allocation55_spill] sm:$0xff]  ;;  %v11784_v13 = vld [vmem:[#allocation60_spill] sm:$0xff] }
 0x4cb   : > { %v11777_v32 = vunpack.c.l.b16 %v11776_v5  ;;  %v11779_v1 = vunpack.c.l.b16 %v11778_v26  ;;  %v6498_v43 = vor.u32 %v6879_v30, %v6497_v47  ;;  %v4678_v49 = vadd.f32 %v11780_v3, %v4549_v12  ;;  %v11782_v30 = vld [vmem:[#allocation3_spill] sm:$0xff] }
 0x4cc   : > { %v5959_v9 = vadd.f32 %v5912_v42, %v5911_v60  ;;  %v5189_v62 = vadd.f32 %v10451_v57, %v5060_v34  ;;  %v4551_v34 = vadd.f32 %v11781_v29, %v4422_v27  ;;  %v4425_v12 = vadd.f32 %v10401_v54, %v11782_v30 }
 0x4cd   : > { %v3199_v57 = vpack.c.b16 %v11779_v1, %v11777_v32  ;;  %v4807_v35 = vadd.f32 %v9913_v31, %v4678_v49  ;;  %v5599_v32 = vpop.permute.xlu2 %5598 }
 0x4ce   : > { %v5318_v11 = vadd.f32 %v10573_v58, %v5189_v62  ;;  %v4554_v31 = vadd.f32 %v11784_v13, %v4425_v12 }
 0x4cf   : > { %v4932_v16 = vpop.f32.mrf.mxu2 }
 0x4d0   : > { %v5818_v2 = vmul.f32 %v5589_v52, %v5318_v11  ;;  %v4933_v33 = vadd.f32 %v4932_v16, %v4804_v25  ;;  %v11783_v16 = vld [vmem:[#allocation33_spill] sm:$0xff] }
 0x4d2   : > { %v5865_v41 = vadd.f32 %v5864_v53, %v5818_v2  ;;  %v5913_v45 = vmul.f32 %v5818_v2, %v5318_v11  ;;  %v5062_v58 = vadd.f32 %v10494_v38, %v4933_v33  ;;  %v5594_v53 = vpop.permute.xlu1 %5593  ;;  %v4680_v2 = vadd.f32 %v11783_v16, %v4551_v34  ;;  %v11795_v16 = vld [vmem:[#allocation41_spill] sm:$0xff] }
 0x4d4   : > { %v5960_v60 = vadd.f32 %v5959_v9, %v5913_v45  ;;  %v5191_v42 = vadd.f32 %v10461_v44, %v5062_v58  ;;  %4974 = vmatmul.bf16.gmra.mxu2 %v3199_v57  ;;  %v11786_v57 = vld [vmem:[#allocation5_spill] sm:$0xff] }
 0x4d5   : > { %v11789_v45 = vld [vmem:[#allocation73_spill] sm:$0xff] }
 0x4d6   : > { %v5320_v62 = vadd.f32 %v10583_v0, %v5191_v42  ;;  %v11790_v58 = vunpack.c.l.b16 %v11789_v45 }
 0x4d7   : > { %5421 = vmatmul.bf16.gmra.mxu1 %v6498_v43  ;;  %v4935_v51 = vpop.f32.mrf.mxu2  ;;  %v4427_v43 = vadd.f32 %v10407_v20, %v11786_v57  ;;  %v11800_v57 = vld [vmem:[#allocation77_spill] sm:$0xff] }
 0x4d8   : > { %v7063_v25 = vpack.c.bf16 %v5320_v62, %v5318_v11  ;;  %v5819_v38 = vmul.f32 %v5594_v53, %v5320_v62  ;;  %v4936_v47 = vadd.f32 %v4935_v51, %v4807_v35  ;;  %v11785_v11 = vld [vmem:[#allocation103_spill] sm:$0xff]  ;;  %v11793_v53 = vld [vmem:[#allocation108_spill] sm:$0xff] }
 0x4d9   : > { %v4809_v5 = vadd.f32 %v11785_v11, %v4680_v2 }
 0x4da   : > { %7310 = vst [vmem:[%s10749_s15 + $0x8] sm:$0xff] %v7063_v25   ;;  %v5866_v9 = vadd.f32 %v5865_v41, %v5819_v38  ;;  %v5914_v52 = vmul.f32 %v5819_v38, %v5320_v62  ;;  %v5065_v44 = vadd.f32 %v10503_v14, %v4936_v47  ;;  %v11787_v41 = vld [vmem:[#allocation64_spill] sm:$0xff]  ;;  %v11792_v62 = vld [vmem:[#allocation63_spill] sm:$0xff]  ;;  %v5604_v25 = vpop.permute.xlu0 %5603  ;;  %v5609_v11 = vpop.permute.xlu1 %5608 }
 0x4db   : > { %v11788_v14 = vunpack.c.l.b16 %v11787_v41  ;;  %v4556_v35 = vadd.f32 %v11792_v62, %v4427_v43  ;;  %v11801_v43 = vunpack.c.l.b16 %v11800_v57 }
 0x4dc   : > { %v5961_v33 = vadd.f32 %v5960_v60, %v5914_v52  ;;  %v5194_v0 = vadd.f32 %v10470_v59, %v5065_v44 }
 0x4dd   : > { %v3202_v3 = vpack.c.b16 %v11790_v58, %v11788_v14  ;;  %v4685_v2 = vadd.f32 %v11795_v16, %v4556_v35  ;;  %v11804_v35 = vld [vmem:[#allocation24_spill] sm:$0xff] }
 0x4de   : > { %v5323_v27 = vadd.f32 %v10592_v18, %v5194_v0  ;;  %v11791_v18 = vld [vmem:[#allocation37_spill] sm:$0xff]  ;;  %v11796_v0 = vld [vmem:[#allocation68_spill] sm:$0xff] }
 0x4df   : > { %v4937_v26 = vpop.f32.mrf.mxu2  ;;  %v4683_v42 = vadd.f32 %v11791_v18, %v4554_v31  ;;  %v5614_v18 = vpop.permute.xlu2 %5613 }
 0x4e0   : > { %v5820_v1 = vmul.f32 %v5599_v32, %v5323_v27  ;;  %v4938_v54 = vadd.f32 %v4937_v26, %v4809_v5  ;;  %v11797_v26 = vld [vmem:[#allocation4_spill] sm:$0xff] }
 0x4e1   : > { %v4812_v51 = vadd.f32 %v11793_v53, %v4683_v42 }
 0x4e2   : > { %v5867_v49 = vadd.f32 %v5866_v9, %v5820_v1  ;;  %v5915_v59 = vmul.f32 %v5820_v1, %v5323_v27  ;;  %v5067_v60 = vadd.f32 %v10514_v56, %v4938_v54  ;;  %v11794_v9 = vld [vmem:[#allocation6_spill] sm:$0xff]  ;;  %v4432_v1 = vadd.f32 %v10424_v19, %v11797_v26  ;;  %v11798_v54 = vld [vmem:[#allocation72_spill] sm:$0xff] }
 0x4e3   : > { %v4430_v56 = vadd.f32 %v10416_v36, %v11794_v9  ;;  %v5619_v9 = vpop.permute.xlu0 %5618 }
 0x4e4   : > { %v5962_v29 = vadd.f32 %v5961_v33, %v5915_v59  ;;  %v5196_v34 = vadd.f32 %v10482_v46, %v5067_v60  ;;  %4979 = vmatmul.bf16.gmra.mxu2 %v3202_v3 }
 0x4e5   : > { %v4559_v13 = vadd.f32 %v11796_v0, %v4430_v56  ;;  %v11809_v0 = vld [vmem:[#allocation231_spill] sm:$0xff] }
 0x4e6   : > { %v5325_v20 = vadd.f32 %v10600_v37, %v5196_v34 }
 0x4e7   : > { %v4940_v38 = vpop.f32.mrf.mxu2 }
 0x4e8   : > { %v7068_v47 = vpack.c.bf16 %v5325_v20, %v5323_v27  ;;  %v5821_v30 = vmul.f32 %v5604_v25, %v5325_v20  ;;  %v4941_v12 = vadd.f32 %v4940_v38, %v4812_v51  ;;  %v4814_v27 = vadd.f32 %v10047_v17, %v4685_v2  ;;  %v11805_v51 = vld [vmem:[#allocation48_spill] sm:$0xff] }
 0x4ea   : > { %7311 = vst [vmem:[%s10749_s15 + $0x10] sm:$0xff] %v7068_v47   ;;  %v5868_v52 = vadd.f32 %v5867_v49, %v5821_v30  ;;  %v5916_v44 = vmul.f32 %v5821_v30, %v5325_v20  ;;  %v5070_v46 = vadd.f32 %v10522_v63, %v4941_v12  ;;  %v11799_v63 = vunpack.c.l.b16 %v11798_v54  ;;  %v11803_v49 = vld [vmem:[#allocation71_spill] sm:$0xff]  ;;  %v11806_v47 = vld [vmem:[#allocation76_spill] sm:$0xff] }
 0x4eb   : > { %v4561_v59 = vadd.f32 %v11803_v49, %v4432_v1  ;;  %v11819_v49 = vld [vmem:[#allocation84_spill] sm:$0xff] }
 0x4ec   : > { %v5963_v33 = vadd.f32 %v5962_v29, %v5916_v44  ;;  %v5199_v37 = vadd.f32 %v10492_v61, %v5070_v46  ;;  %v3205_v41 = vpack.c.b16 %v11801_v43, %v11799_v63  ;;  %v11807_v44 = vld [vmem:[#allocation28_spill] sm:$0xff] }
 0x4ed   : > { %v4690_v25 = vadd.f32 %v11805_v51, %v4561_v59  ;;  %v4437_v46 = vadd.f32 %v10442_v21, %v11807_v44  ;;  %v11814_v63 = vld [vmem:[#allocation32_spill] sm:$0xff] }
 0x4ee   : > { %v5328_v31 = vadd.f32 %v10609_v48, %v5199_v37  ;;  %v11802_v48 = vld [vmem:[#allocation45_spill] sm:$0xff] }
 0x4ef   : > { %v4942_v5 = vpop.f32.mrf.mxu2  ;;  %v4688_v58 = vadd.f32 %v11802_v48, %v4559_v13  ;;  %v4819_v12 = vadd.f32 %v10094_v55, %v4690_v25  ;;  %v11811_v55 = vld [vmem:[#allocation79_spill] sm:$0xff]  ;;  %v11824_v25 = vld [vmem:[#allocation248_spill] sm:$0xff] }
 0x4f0   : > { %v5822_v32 = vmul.f32 %v5609_v11, %v5328_v31  ;;  %v4943_v36 = vadd.f32 %v4942_v5, %v4814_v27  ;;  %v11812_v27 = vld [vmem:[#allocation268_spill] sm:$0xff]  ;;  %v11813_v5 = vld [vmem:[#allocation123_spill] sm:$0xff] }
 0x4f1   : > { %v4817_v60 = vadd.f32 %v10068_v15, %v4688_v58 }
 0x4f2   : > { %v5869_v14 = vadd.f32 %v5868_v52, %v5822_v32  ;;  %v5917_v61 = vmul.f32 %v5822_v32, %v5328_v31  ;;  %v5072_v45 = vadd.f32 %v10534_v8, %v4943_v36  ;;  %v4435_v8 = vadd.f32 %v10434_v50, %v11804_v35  ;;  %v5624_v36 = vpop.permute.xlu1 %5623 }
 0x4f4   : > { %v5964_v17 = vadd.f32 %v5963_v33, %v5917_v61  ;;  %v5201_v3 = vadd.f32 %v10501_v40, %v5072_v45  ;;  %4984 = vmatmul.bf16.gmra.mxu2 %v3205_v41  ;;  %v4564_v15 = vadd.f32 %v11806_v47, %v4435_v8  ;;  %v11808_v33 = vld [vmem:[#allocation53_spill] sm:$0xff]  ;;  %v11817_v45 = vld [vmem:[#allocation58_spill] sm:$0xff] }
 0x4f5   : > { %v11822_v8 = vld [vmem:[#allocation34_spill] sm:$0xff] }
 0x4f6   : > { %v5330_v19 = vadd.f32 %v10623_v4, %v5201_v3 }
 0x4f7   : > { %v4945_v42 = vpop.f32.mrf.mxu2 }
 0x4f8   : > { %v7073_v29 = vpack.c.bf16 %v5330_v19, %v5328_v31  ;;  %v5823_v34 = vmul.f32 %v5614_v18, %v5330_v19  ;;  %v4946_v62 = vadd.f32 %v4945_v42, %v4817_v60  ;;  %v4566_v31 = vadd.f32 %v11811_v55, %v4437_v46  ;;  %v11821_v18 = vld [vmem:[#allocation127_spill] sm:$0xff] }
 0x4f9   : > { %v11830_v46 = vld [vmem:[#allocation131_spill] sm:$0xff] }
 0x4fa   : > { %7312 = vst [vmem:[%s10749_s15 + $0x18] sm:$0xff] %v7073_v29   ;;  %v5870_v20 = vadd.f32 %v5869_v14, %v5823_v34  ;;  %v5918_v53 = vmul.f32 %v5823_v34, %v5330_v19  ;;  %v5075_v40 = vadd.f32 %v10543_v24, %v4946_v62  ;;  %v11816_v14 = vld [vmem:[#allocation245_spill] sm:$0xff]  ;;  %v4695_v48 = vadd.f32 %v11817_v45, %v4566_v31  ;;  %v11820_v19 = vld [vmem:[#allocation20_spill] sm:$0xff]  ;;  %v5629_v29 = vpop.permute.xlu2 %5628 }
 0x4fc   : > { %v5965_v38 = vadd.f32 %v5964_v17, %v5918_v53  ;;  %v5204_v4 = vadd.f32 %v10509_v10, %v5075_v40  ;;  %v4693_v10 = vadd.f32 %v11808_v33, %v4564_v15  ;;  %v11818_v17 = vld [vmem:[#allocation235_spill] sm:$0xff]  ;;  %v4824_v42 = vadd.f32 %v11821_v18, %v4695_v48  ;;  %v11839_v48 = vld [vmem:[#allocation42_spill] sm:$0xff] }
 0x4fe   : > { %v5333_v30 = vadd.f32 %v10631_v22, %v5204_v4  ;;  %v11810_v22 = vld [vmem:[#allocation94_spill] sm:$0xff]  ;;  %v4822_v32 = vadd.f32 %v11813_v5, %v4693_v10  ;;  %v11834_v5 = vld [vmem:[#allocation67_spill] sm:$0xff] }
 0x4ff   : > { %v4947_v56 = vpop.f32.mrf.mxu2  ;;  %v11825_v4 = vld [vmem:[#allocation62_spill] sm:$0xff] }
 0x500   : > { %v5824_v52 = vmul.f32 %v5619_v9, %v5333_v30  ;;  %v4948_v50 = vadd.f32 %v4947_v56, %v4819_v12  ;;  %v11827_v9 = vld [vmem:[#allocation95_spill] sm:$0xff]  ;;  %v11828_v56 = vld [vmem:[#allocation88_spill] sm:$0xff] }
 0x502   : > { %v5871_v16 = vadd.f32 %v5870_v20, %v5824_v52  ;;  %v5919_v24 = vmul.f32 %v5824_v52, %v5333_v30  ;;  %v5077_v2 = vadd.f32 %v10553_v23, %v4948_v50  ;;  %v11815_v23 = vld [vmem:[#allocation213_spill] sm:$0xff]  ;;  %v11823_v20 = vld [vmem:[#allocation216_spill] sm:$0xff] }
 0x503   : > { %v4440_v57 = vadd.f32 %v11815_v23, %v11814_v63  ;;  %v4442_v53 = vadd.f32 %v11823_v20, %v11822_v8  ;;  %v11829_v50 = vld [vmem:[#allocation273_spill] sm:$0xff]  ;;  %v11837_v63 = vld [vmem:[#allocation274_spill] sm:$0xff] }
 0x504   : > { %v5966_v37 = vadd.f32 %v5965_v38, %v5919_v24  ;;  %v5206_v13 = vadd.f32 %v11809_v0, %v5077_v2  ;;  %4989 = vmatmul.bf16.gmra.mxu2 %v11810_v22  ;;  %v5634_v24 = vpop.permute.xlu0 %5633  ;;  %v11831_v0 = vld [vmem:[#allocation40_spill] sm:$0xff]  ;;  %v11846_v20 = vld [vmem:[#allocation26_spill] sm:$0xff] }
 0x505   : > { %v4569_v59 = vadd.f32 %v11819_v49, %v4440_v57  ;;  %v4571_v52 = vadd.f32 %v11828_v56, %v4442_v53  ;;  %v11838_v57 = vld [vmem:[#allocation135_spill] sm:$0xff] }
 0x506   : > { %v5335_v11 = vadd.f32 %v11812_v27, %v5206_v13  ;;  %v11832_v13 = vld [vmem:[#allocation218_spill] sm:$0xff]  ;;  %v11833_v27 = vld [vmem:[#allocation251_spill] sm:$0xff] }
 0x507   : > { %v4950_v21 = vpop.f32.mrf.mxu2  ;;  %v4698_v47 = vadd.f32 %v11825_v4, %v4569_v59  ;;  %v4445_v22 = vadd.f32 %v11832_v13, %v11831_v0  ;;  %v11841_v59 = vld [vmem:[#allocation255_spill] sm:$0xff]  ;;  %v11854_v0 = vld [vmem:[#allocation276_spill] sm:$0xff] }
 0x508   : > { %v7078_v26 = vpack.c.bf16 %v5335_v11, %v5333_v30  ;;  %v5825_v1 = vmul.f32 %v5624_v36, %v5335_v11  ;;  %v4951_v54 = vadd.f32 %v4950_v21, %v4822_v32  ;;  %v11826_v30 = vld [vmem:[#allocation238_spill] sm:$0xff]  ;;  %v4700_v32 = vadd.f32 %v11834_v5, %v4571_v52  ;;  %v11835_v21 = vld [vmem:[#allocation241_spill] sm:$0xff] }
 0x50a   : > { %7313 = vst [vmem:[%s10749_s15 + $0x20] sm:$0xff] %v7078_v26   ;;  %v5872_v43 = vadd.f32 %v5871_v16, %v5825_v1  ;;  %v5920_v41 = vmul.f32 %v5825_v1, %v5335_v11  ;;  %v5080_v61 = vadd.f32 %v11816_v14, %v4951_v54  ;;  %v4827_v16 = vadd.f32 %v11830_v46, %v4698_v47  ;;  %v11836_v1 = vld [vmem:[#allocation92_spill] sm:$0xff]  ;;  %v11851_v46 = vld [vmem:[#allocation75_spill] sm:$0xff] }
 0x50b   : > { %v4574_v54 = vadd.f32 %v11836_v1, %v4445_v22  ;;  %v11855_v22 = vld [vmem:[#allocation143_spill] sm:$0xff] }
 0x50c   : > { %v5967_v58 = vadd.f32 %v5966_v37, %v5920_v41  ;;  %v5209_v3 = vadd.f32 %v11818_v17, %v5080_v61  ;;  %v5639_v41 = vpop.permute.xlu1 %5638 }
 0x50e   : > { %v5338_v60 = vadd.f32 %v11820_v19, %v5209_v3 }
 0x50f   : > { %v4952_v34 = vpop.f32.mrf.mxu2 }
 0x510   : > { %v5826_v62 = vmul.f32 %v5629_v29, %v5338_v60  ;;  %v4953_v35 = vadd.f32 %v4952_v34, %v4824_v42  ;;  %v11843_v29 = vld [vmem:[#allocation243_spill] sm:$0xff] }
 0x512   : > { %v5873_v40 = vadd.f32 %v5872_v43, %v5826_v62  ;;  %v5921_v51 = vmul.f32 %v5826_v62, %v5338_v60  ;;  %v5082_v38 = vadd.f32 %v11824_v25, %v4953_v35  ;;  %v4829_v43 = vadd.f32 %v11838_v57, %v4700_v32  ;;  %v11844_v62 = vld [vmem:[#allocation96_spill] sm:$0xff]  ;;  %v11845_v35 = vld [vmem:[#allocation99_spill] sm:$0xff]  ;;  %v5644_v25 = vpop.permute.xlu2 %5643  ;;  %v11856_v32 = vld [vmem:[#allocation50_spill] sm:$0xff] }
 0x514   : > { %v5968_v15 = vadd.f32 %v5967_v58, %v5921_v51  ;;  %v5211_v12 = vadd.f32 %v11826_v30, %v5082_v38  ;;  %4994 = vmatmul.bf16.gmra.mxu2 %v11827_v9  ;;  %v11840_v58 = vld [vmem:[#allocation220_spill] sm:$0xff]  ;;  %v11848_v30 = vld [vmem:[#allocation47_spill] sm:$0xff] }
 0x515   : > { %v4447_v17 = vadd.f32 %v11840_v58, %v11839_v48  ;;  %v11863_v58 = vld [vmem:[#allocation38_spill] sm:$0xff] }
 0x516   : > { %v5340_v44 = vadd.f32 %v11829_v50, %v5211_v12  ;;  %v11849_v12 = vld [vmem:[#allocation222_spill] sm:$0xff] }
 0x517   : > { %v4955_v2 = vpop.f32.mrf.mxu2  ;;  %v4576_v8 = vadd.f32 %v11845_v35, %v4447_v17  ;;  %v4450_v9 = vadd.f32 %v11849_v12, %v11848_v30  ;;  %v11850_v50 = vld [vmem:[#allocation258_spill] sm:$0xff]  ;;  %v10892_v35 = vpop.f32.mrf.mxu3 }
 0x518   : > { %v7083_v33 = vpack.c.bf16 %v5340_v44, %v5338_v60  ;;  %v5827_v10 = vmul.f32 %v5634_v24, %v5340_v44  ;;  %v4956_v37 = vadd.f32 %v4955_v2, %v4827_v16  ;;  %v11842_v60 = vld [vmem:[#allocation70_spill] sm:$0xff]  ;;  %v11852_v2 = vld [vmem:[#allocation247_spill] sm:$0xff]  ;;  %v10900_v30 = vpop.f32.mrf.mxu1 }
 0x519   : > { %v4703_v18 = vadd.f32 %v11842_v60, %v4574_v54  ;;  %v4705_v16 = vadd.f32 %v11851_v46, %v4576_v8  ;;  %v11858_v54 = vld [vmem:[#allocation261_spill] sm:$0xff]  ;;  %v11870_v12 = vld [vmem:[#allocation114_spill] sm:$0xff] }
 0x51a   : > { %7314 = vst [vmem:[%s10749_s15 + $0x28] sm:$0xff] %v7083_v33   ;;  %v5874_v55 = vadd.f32 %v5873_v40, %v5827_v10  ;;  %v5922_v31 = vmul.f32 %v5827_v10, %v5340_v44  ;;  %v5085_v11 = vadd.f32 %v11833_v27, %v4956_v37  ;;  %v11847_v40 = vld [vmem:[#allocation139_spill] sm:$0xff]  ;;  %v11853_v10 = vld [vmem:[#allocation106_spill] sm:$0xff]  ;;  %v5659_v46 = vpop.permute.xlu2 %5658 }
 0x51b   : > { %v4832_v51 = vadd.f32 %v11847_v40, %v4703_v18  ;;  %v4579_v37 = vadd.f32 %v11853_v10, %v4450_v9  ;;  %v11874_v10 = vld [vmem:[#allocation227_spill] sm:$0xff] }
 0x51c   : > { %v5969_v36 = vadd.f32 %v5968_v15, %v5922_v31  ;;  %v5214_v26 = vadd.f32 %v11835_v21, %v5085_v11  ;;  %v5649_v31 = vpop.permute.xlu0 %5648 }
 0x51e   : > { %v5343_v23 = vadd.f32 %v11837_v63, %v5214_v26 }
 0x51f   : > { %v4957_v14 = vpop.f32.mrf.mxu2 }
 0x520   : > { %v5828_v61 = vmul.f32 %v5639_v41, %v5343_v23  ;;  %v4958_v45 = vadd.f32 %v4957_v14, %v4829_v43  ;;  %v11860_v41 = vld [vmem:[#allocation250_spill] sm:$0xff] }
 0x522   : > { %v5875_v3 = vadd.f32 %v5874_v55, %v5828_v61  ;;  %v5923_v49 = vmul.f32 %v5828_v61, %v5343_v23  ;;  %v5087_v19 = vadd.f32 %v11841_v59, %v4958_v45  ;;  %v4834_v55 = vadd.f32 %v11855_v22, %v4705_v16  ;;  %v11861_v61 = vld [vmem:[#allocation97_spill] sm:$0xff]  ;;  %v11862_v45 = vld [vmem:[#allocation110_spill] sm:$0xff]  ;;  %v5654_v59 = vpop.permute.xlu1 %5653 }
 0x523   : > { %v11875_v22 = vld [vmem:[#allocation266_spill] sm:$0xff] }
 0x524   : > { %v5970_v42 = vadd.f32 %v5969_v36, %v5923_v49  ;;  %v5216_v34 = vadd.f32 %v11843_v29, %v5087_v19  ;;  %4999 = vmatmul.bf16.gmra.mxu2 %v11844_v62  ;;  %v11857_v36 = vld [vmem:[#allocation224_spill] sm:$0xff]  ;;  %v11865_v29 = vld [vmem:[#allocation54_spill] sm:$0xff] }
 0x525   : > { %v4452_v21 = vadd.f32 %v11857_v36, %v11856_v32  ;;  %v11877_v32 = vld [vmem:[#allocation256_spill] sm:$0xff] }
 0x526   : > { %v5345_v53 = vadd.f32 %v11846_v20, %v5216_v34  ;;  %v11866_v34 = vld [vmem:[#allocation226_spill] sm:$0xff] }
 0x527   : > { %v4960_v38 = vpop.f32.mrf.mxu2  ;;  %v4581_v48 = vadd.f32 %v11862_v45, %v4452_v21  ;;  %v4455_v62 = vadd.f32 %v11866_v34, %v11865_v29  ;;  %v11878_v21 = vld [vmem:[#allocation100_spill] sm:$0xff] }
 0x528   : > { %v7088_v4 = vpack.c.bf16 %v5345_v53, %v5343_v23  ;;  %v5829_v47 = vmul.f32 %v5644_v25, %v5345_v53  ;;  %v4961_v15 = vadd.f32 %v4960_v38, %v4832_v51  ;;  %v11859_v23 = vld [vmem:[#allocation80_spill] sm:$0xff]  ;;  %v11868_v51 = vld [vmem:[#allocation83_spill] sm:$0xff]  ;;  %v10897_v38 = vpop.f32.mrf.mxu0 }
 0x529   : > { %v4708_v57 = vadd.f32 %v11859_v23, %v4579_v37  ;;  %v4710_v25 = vadd.f32 %v11868_v51, %v4581_v48  ;;  %v4584_v9 = vadd.f32 %v11870_v12, %v4455_v62  ;;  %v11880_v23 = vld [vmem:[#allocation44_spill] sm:$0xff] }
 0x52a   : > { %7315 = vst [vmem:[%s10749_s15 + $0x30] sm:$0xff] %v7088_v4   ;;  %v5876_v56 = vadd.f32 %v5875_v3, %v5829_v47  ;;  %v5924_v52 = vmul.f32 %v5829_v47, %v5345_v53  ;;  %v5090_v44 = vadd.f32 %v11850_v50, %v4961_v15  ;;  %v11864_v3 = vld [vmem:[#allocation147_spill] sm:$0xff]  ;;  %v11867_v53 = vld [vmem:[#allocation9_spill] sm:$0xff]  ;;  %v11886_v62 = vld [vmem:[#allocation260_spill] sm:$0xff] }
 0x52b   : > { %v4837_v49 = vadd.f32 %v11864_v3, %v4708_v57  ;;  %v11869_v47 = vld [vmem:[#allocation253_spill] sm:$0xff]  ;;  %v11872_v50 = vld [vmem:[#allocation151_spill] sm:$0xff] }
 0x52c   : > { %v5971_v24 = vadd.f32 %v5970_v42, %v5924_v52  ;;  %v5219_v33 = vadd.f32 %v11852_v2, %v5090_v44  ;;  %v4839_v44 = vadd.f32 %v11872_v50, %v4710_v25  ;;  %v11883_v3 = vld [vmem:[#allocation229_spill] sm:$0xff]  ;;  %v11890_v50 = vld [vmem:[#allocation232_spill] sm:$0xff] }
 0x52e   : > { %v5348_v13 = vadd.f32 %v11854_v0, %v5219_v33  ;;  %v11873_v33 = vld [vmem:[#allocation56_spill] sm:$0xff] }
 0x52f   : > { %v4962_v27 = vpop.f32.mrf.mxu2  ;;  %v4457_v37 = vadd.f32 %v11874_v10, %v11873_v33  ;;  %v11892_v10 = vld [vmem:[#allocation98_spill] sm:$0xff] }
 0x530   : > { %v5830_v11 = vmul.f32 %v5649_v31, %v5348_v13  ;;  %v4963_v5 = vadd.f32 %v4962_v27, %v4834_v55  ;;  %v11876_v31 = vld [vmem:[#allocation87_spill] sm:$0xff] }
 0x531   : > { %v4713_v27 = vadd.f32 %v11876_v31, %v4584_v9  ;;  %v11895_v31 = vld [vmem:[#allocation125_spill] sm:$0xff] }
 0x532   : > { %v5877_v26 = vadd.f32 %v5876_v56, %v5830_v11  ;;  %v5925_v1 = vmul.f32 %v5830_v11, %v5348_v13  ;;  %v5092_v63 = vadd.f32 %v11858_v54, %v4963_v5  ;;  %v11871_v56 = vld [vmem:[#allocation279_spill] sm:$0xff]  ;;  %v10909_v11 = vpop.f32.mrf.mxu3  ;;  %v11879_v54 = vld [vmem:[#allocation117_spill] sm:$0xff] }
 0x534   : > { %v5972_v43 = vadd.f32 %v5971_v24, %v5925_v1  ;;  %v5221_v14 = vadd.f32 %v11860_v41, %v5092_v63  ;;  %5004 = vmatmul.bf16.gmra.mxu2 %v11861_v61  ;;  %v5664_v1 = vpop.permute.xlu0 %5663  ;;  %v4586_v63 = vadd.f32 %v11879_v54, %v4457_v37 }
 0x536   : > { %v5350_v17 = vadd.f32 %v11863_v58, %v5221_v14  ;;  %v10918_v14 = vpop.f32.mrf.mxu1 }
 0x537   : > { %v4965_v19 = vpop.f32.mrf.mxu2 }
 0x538   : > { %v7093_v60 = vpack.c.bf16 %v5350_v17, %v5348_v13  ;;  %v5831_v18 = vmul.f32 %v5654_v59, %v5350_v17  ;;  %v4966_v42 = vadd.f32 %v4965_v19, %v4837_v49 }
 0x53a   : > { %7316 = vst [vmem:[%s10749_s15 + $0x38] sm:$0xff] %v7093_v60   ;;  %v5878_v8 = vadd.f32 %v5877_v26, %v5831_v18  ;;  %v5926_v20 = vmul.f32 %v5831_v18, %v5350_v17  ;;  %v5095_v40 = vadd.f32 %v11867_v53, %v4966_v42  ;;  %v10913_v26 = vpop.f32.mrf.mxu0  ;;  %v11882_v17 = vld [vmem:[#allocation61_spill] sm:$0xff]  ;;  %v11884_v60 = vld [vmem:[#allocation267_spill] sm:$0xff]  ;;  %v5669_v53 = vpop.permute.xlu1 %5668 }
 0x53b   : > { %v4460_v49 = vadd.f32 %v11883_v3, %v11882_v17  ;;  %v11885_v42 = vld [vmem:[#allocation91_spill] sm:$0xff]  ;;  %v11900_v3 = vld [vmem:[#allocation105_spill] sm:$0xff] }
 0x53c   : > { %v5973_v4 = vadd.f32 %v5972_v43, %v5926_v20  ;;  %v5224_v15 = vadd.f32 %v11869_v47, %v5095_v40  ;;  %v11881_v43 = vld [vmem:[#allocation156_spill] sm:$0xff]  ;;  %v4715_v29 = vadd.f32 %v11885_v42, %v4586_v63  ;;  %v10926_v20 = vpop.f32.mrf.mxu3  ;;  %v11887_v40 = vld [vmem:[#allocation121_spill] sm:$0xff] }
 0x53d   : > { %v4842_v41 = vadd.f32 %v11881_v43, %v4713_v27  ;;  %v4589_v51 = vadd.f32 %v11887_v40, %v4460_v49  ;;  %v11898_v43 = vld [vmem:[#allocation234_spill] sm:$0xff] }
 0x53e   : > { %v5353_v52 = vadd.f32 %v11871_v56, %v5224_v15 }
 0x53f   : > { %v4967_v16 = vpop.f32.mrf.mxu2  ;;  %v4718_v37 = vadd.f32 %v11892_v10, %v4589_v51  ;;  %v11909_v10 = vld [vmem:[#allocation104_spill] sm:$0xff] }
 0x540   : > { %v5832_v24 = vmul.f32 %v5659_v46, %v5353_v52  ;;  %v4968_v2 = vadd.f32 %v4967_v16, %v4839_v44  ;;  %v10935_v46 = vpop.f32.mrf.mxu1 }
 0x542   : > { %v5879_v0 = vadd.f32 %v5878_v8, %v5832_v24  ;;  %v5927_v13 = vmul.f32 %v5832_v24, %v5353_v52  ;;  %v5097_v55 = vadd.f32 %v11875_v22, %v4968_v2  ;;  %v10931_v15 = vpop.f32.mrf.mxu0  ;;  %v11891_v2 = vld [vmem:[#allocation16_spill] sm:$0xff]  ;;  %v11894_v22 = vld [vmem:[#allocation101_spill] sm:$0xff] }
 0x544   : > { %v5974_v5 = vadd.f32 %v5973_v4, %v5927_v13  ;;  %v5226_v36 = vadd.f32 %v11877_v32, %v5097_v55  ;;  %5009 = vmatmul.bf16.gmra.mxu2 %v11878_v21  ;;  %v11888_v4 = vld [vmem:[#allocation160_spill] sm:$0xff]  ;;  %v5674_v55 = vpop.permute.xlu2 %5673  ;;  %v10944_v21 = vpop.f32.mrf.mxu3 }
 0x545   : > { %v4844_v47 = vadd.f32 %v11888_v4, %v4715_v29  ;;  %v11896_v32 = vld [vmem:[#allocation164_spill] sm:$0xff]  ;;  %v11905_v4 = vld [vmem:[#allocation237_spill] sm:$0xff] }
 0x546   : > { %v5355_v57 = vadd.f32 %v11880_v23, %v5226_v36  ;;  %v4847_v36 = vadd.f32 %v11896_v32, %v4718_v37 }
 0x547   : > { %v4970_v61 = vpop.f32.mrf.mxu2 }
 0x548   : > { %v7098_v45 = vpack.c.bf16 %v5355_v57, %v5353_v52  ;;  %v5833_v48 = vmul.f32 %v5664_v1, %v5355_v57  ;;  %v4971_v58 = vadd.f32 %v4970_v61, %v4842_v41  ;;  %v11889_v52 = vld [vmem:[#allocation66_spill] sm:$0xff]  ;;  %v10953_v49 = vpop.f32.mrf.mxu1 }
 0x549   : > { %v4462_v44 = vadd.f32 %v11890_v50, %v11889_v52  ;;  %v11906_v52 = vld [vmem:[#allocation25_spill] sm:$0xff] }
 0x54a   : > { %7317 = vst [vmem:[%s10749_s15 + $0x40] sm:$0xff] %v7098_v45   ;;  %v5880_v59 = vadd.f32 %v5879_v0, %v5833_v48  ;;  %v5928_v19 = vmul.f32 %v5833_v48, %v5355_v57  ;;  %v5100_v18 = vadd.f32 %v11884_v60, %v4971_v58  ;;  %v11893_v0 = vld [vmem:[#allocation263_spill] sm:$0xff]  ;;  %v11897_v57 = vld [vmem:[#allocation69_spill] sm:$0xff]  ;;  %v10948_v61 = vpop.f32.mrf.mxu0 }
 0x54b   : > { %v4591_v27 = vadd.f32 %v11895_v31, %v4462_v44  ;;  %v4465_v41 = vadd.f32 %v11898_v43, %v11897_v57  ;;  %v11899_v58 = vld [vmem:[#allocation271_spill] sm:$0xff]  ;;  %v11907_v44 = vld [vmem:[#allocation109_spill] sm:$0xff]  ;;  %v5684_v31 = vpop.permute.xlu1 %5683 }
 0x54c   : > { %v5975_v34 = vadd.f32 %v5974_v5, %v5928_v19  ;;  %v5229_v8 = vadd.f32 %v11886_v62, %v5100_v18  ;;  %v11901_v19 = vld [vmem:[#allocation264_spill] sm:$0xff]  ;;  %v11902_v18 = vld [vmem:[#allocation129_spill] sm:$0xff] }
 0x54d   : > { %v4594_v42 = vadd.f32 %v11902_v18, %v4465_v41  ;;  %v11914_v41 = vld [vmem:[#allocation113_spill] sm:$0xff] }
 0x54e   : > { %v5358_v25 = vadd.f32 %v10720_v28, %v5229_v8  ;;  %v5679_v8 = vpop.permute.xlu0 %5678 }
 0x54f   : > { %v4972_v12 = vpop.f32.mrf.mxu2 }
 0x550   : > { %v5834_v9 = vmul.f32 %v5669_v53, %v5358_v25  ;;  %v4973_v56 = vadd.f32 %v4972_v12, %v4844_v47  ;;  %v10961_v12 = vpop.f32.mrf.mxu3  ;;  %v10969_v37 = vpop.f32.mrf.mxu1 }
 0x552   : > { %v5881_v16 = vadd.f32 %v5880_v59, %v5834_v9  ;;  %v5929_v24 = vmul.f32 %v5834_v9, %v5358_v25  ;;  %v5102_v33 = vadd.f32 %v11891_v2, %v4973_v56  ;;  %v11908_v2 = vld [vmem:[#allocation11_spill] sm:$0xff] }
 0x554   : > { %v5976_v28 = vadd.f32 %v5975_v34, %v5929_v24  ;;  %v5231_v13 = vadd.f32 %v11893_v0, %v5102_v33  ;;  %5014 = vmatmul.bf16.gmra.mxu2 %v11894_v22  ;;  %v11903_v34 = vld [vmem:[#allocation168_spill] sm:$0xff]  ;;  %v10965_v24 = vpop.f32.mrf.mxu0 }
 0x555   : > { %v11911_v22 = vld [vmem:[#allocation172_spill] sm:$0xff] }
 0x556   : > { %v5360_v5 = vadd.f32 %v10730_v6, %v5231_v13  ;;  %v4720_v6 = vadd.f32 %v11900_v3, %v4591_v27  ;;  %v5689_v3 = vpop.permute.xlu2 %5688 }
 0x557   : > { %v4975_v1 = vpop.f32.mrf.mxu2 }
 0x558   : > { %v7103_v54 = vpack.c.bf16 %v5360_v5, %v5358_v25  ;;  %v5835_v63 = vmul.f32 %v5674_v55, %v5360_v5  ;;  %v4976_v23 = vadd.f32 %v4975_v1, %v4847_v36  ;;  %v4849_v62 = vadd.f32 %v11903_v34, %v4720_v6  ;;  %v11904_v25 = vld [vmem:[#allocation74_spill] sm:$0xff]  ;;  %v11912_v1 = vld [vmem:[#allocation81_spill] sm:$0xff] }
 0x559   : > { %v4467_v47 = vadd.f32 %v11905_v4, %v11904_v25  ;;  %v11915_v6 = vld [vmem:[#allocation137_spill] sm:$0xff]  ;;  %v11919_v25 = vld [vmem:[#allocation116_spill] sm:$0xff] }
 0x55a   : > { %7318 = vst [vmem:[%s10749_s15 + $0x48] sm:$0xff] %v7103_v54   ;;  %v5882_v45 = vadd.f32 %v5881_v16, %v5835_v63  ;;  %v5930_v48 = vmul.f32 %v5835_v63, %v5360_v5  ;;  %v5105_v17 = vadd.f32 %v11899_v58, %v4976_v23  ;;  %v4723_v16 = vadd.f32 %v11907_v44, %v4594_v42  ;;  %v11913_v54 = vld [vmem:[#allocation239_spill] sm:$0xff]  ;;  %v10987_v42 = vpop.f32.mrf.mxu1 }
 0x55b   : > { %v4470_v63 = vadd.f32 %v11913_v54, %v11912_v1  ;;  %v5699_v54 = vpop.permute.xlu1 %5698 }
 0x55c   : > { %v5977_v59 = vadd.f32 %v5976_v28, %v5930_v48  ;;  %v5234_v60 = vadd.f32 %v11901_v19, %v5105_v17  ;;  %v11910_v28 = vld [vmem:[#allocation133_spill] sm:$0xff]  ;;  %v4852_v55 = vadd.f32 %v11911_v22, %v4723_v16  ;;  %v10979_v48 = vpop.f32.mrf.mxu3  ;;  %v10982_v17 = vpop.f32.mrf.mxu0  ;;  %v11924_v22 = vld [vmem:[#allocation244_spill] sm:$0xff] }
 0x55d   : > { %v4596_v0 = vadd.f32 %v11910_v28, %v4467_v47 }
 0x55e   : > { %v5363_v29 = vadd.f32 %v10754_v39, %v5234_v60  ;;  %v11916_v60 = vld [vmem:[#allocation176_spill] sm:$0xff] }
 0x55f   : > { %v4977_v53 = vpop.f32.mrf.mxu2 }
 0x560   : > { %v5836_v40 = vmul.f32 %v5679_v8, %v5363_v29  ;;  %v4978_v51 = vadd.f32 %v4977_v53, %v4849_v62  ;;  %v11917_v62 = vld [vmem:[#allocation85_spill] sm:$0xff]  ;;  %v11918_v8 = vld [vmem:[#allocation242_spill] sm:$0xff] }
 0x561   : > { %v4472_v53 = vadd.f32 %v11918_v8, %v11917_v62  ;;  %v11931_v8 = vld [vmem:[#allocation119_spill] sm:$0xff] }
 0x562   : > { %v5883_v9 = vadd.f32 %v5882_v45, %v5836_v40  ;;  %v5931_v56 = vmul.f32 %v5836_v40, %v5363_v29  ;;  %v5107_v50 = vadd.f32 %v11906_v52, %v4978_v51  ;;  %v4725_v45 = vadd.f32 %v11914_v41, %v4596_v0  ;;  %v5694_v52 = vpop.permute.xlu0 %5693 }
 0x564   : > { %v5978_v39 = vadd.f32 %v5977_v59, %v5931_v56  ;;  %v5236_v33 = vadd.f32 %v11908_v2, %v5107_v50  ;;  %5019 = vmatmul.bf16.gmra.mxu2 %v11909_v10  ;;  %v4599_v59 = vadd.f32 %v11915_v6, %v4470_v63  ;;  %v4854_v18 = vadd.f32 %v11916_v60, %v4725_v45  ;;  %v10995_v56 = vpop.f32.mrf.mxu3  ;;  %v11921_v50 = vld [vmem:[#allocation141_spill] sm:$0xff] }
 0x565   : > { %v4601_v44 = vadd.f32 %v11921_v50, %v4472_v53  ;;  %v11926_v63 = vld [vmem:[#allocation145_spill] sm:$0xff]  ;;  %v6501_v53 = vld [vmem:[#allocation2 + $0x270] sm:$0xf] }
 0x566   : > { %v5365_v13 = vadd.f32 %v10770_v7, %v5236_v33  ;;  %v4728_v4 = vadd.f32 %v11919_v25, %v4599_v59  ;;  %v11000_v33 = vpop.f32.mrf.mxu0  ;;  %v11928_v6 = vld [vmem:[#allocation93_spill] sm:$0xff]  ;;  %v11929_v59 = vld [vmem:[#allocation246_spill] sm:$0xff] }
 0x567   : > { %v4980_v27 = vpop.f32.mrf.mxu2 }
 0x568   : > { %v7108_v5 = vpack.c.bf16 %v5365_v13, %v5363_v29  ;;  %v5837_v32 = vmul.f32 %v5684_v31, %v5365_v13  ;;  %v4981_v36 = vadd.f32 %v4980_v27, %v4852_v55  ;;  %v11004_v55 = vpop.f32.mrf.mxu1 }
 0x56a   : > { %7319 = vst [vmem:[%s10749_s15 + $0x50] sm:$0xff] %v7108_v5   ;;  %v5884_v23 = vadd.f32 %v5883_v9, %v5837_v32  ;;  %v5932_v57 = vmul.f32 %v5837_v32, %v5365_v13  ;;  %v5110_v43 = vadd.f32 %v10892_v35, %v4981_v36  ;;  %v11920_v9 = vld [vmem:[#allocation112_spill] sm:$0xff]  ;;  %v11923_v13 = vld [vmem:[#allocation89_spill] sm:$0xff] }
 0x56b   : > { %v11925_v32 = vld [vmem:[#allocation120_spill] sm:$0xff] }
 0x56c   : > { %v5979_v7 = vadd.f32 %v5978_v39, %v5932_v57  ;;  %v5239_v58 = vadd.f32 %v10897_v38, %v5110_v43  ;;  %v11922_v39 = vld [vmem:[#allocation180_spill] sm:$0xff]  ;;  %v11927_v43 = vld [vmem:[#allocation183_spill] sm:$0xff]  ;;  %v11013_v45 = vpop.f32.mrf.mxu3 }
 0x56d   : > { %v4857_v2 = vadd.f32 %v11922_v39, %v4728_v4 }
 0x56e   : > { %v5368_v19 = vadd.f32 %v10900_v30, %v5239_v58 }
 0x56f   : > { %v4982_v29 = vpop.f32.mrf.mxu2 }
 0x570   : > { %v5838_v35 = vmul.f32 %v5689_v3, %v5368_v19  ;;  %v4983_v34 = vadd.f32 %v4982_v29, %v4854_v18  ;;  %v11930_v29 = vld [vmem:[#allocation124_spill] sm:$0xff] }
 0x572   : > { %v5885_v40 = vadd.f32 %v5884_v23, %v5838_v35  ;;  %v5933_v51 = vmul.f32 %v5838_v35, %v5368_v19  ;;  %v5112_v38 = vadd.f32 %v10909_v11, %v4983_v34  ;;  %v11021_v34 = vpop.f32.mrf.mxu1 }
 0x574   : > { %v5980_v47 = vadd.f32 %v5979_v7, %v5933_v51  ;;  %v5241_v30 = vadd.f32 %v10913_v26, %v5112_v38  ;;  %5024 = vmatmul.bf16.gmra.mxu2 %v11920_v9  ;;  %v4475_v26 = vadd.f32 %v11924_v22, %v11923_v13  ;;  %v11932_v38 = vld [vmem:[#allocation149_spill] sm:$0xff]  ;;  %v2667_v13 = vld [vmem:[#allocation2 + $0x248] sm:$0xf] }
 0x576   : > { %v5370_v16 = vadd.f32 %v10918_v14, %v5241_v30  ;;  %v4730_v14 = vadd.f32 %v11925_v32, %v4601_v44  ;;  %v4604_v23 = vadd.f32 %v11926_v63, %v4475_v26 }
 0x577   : > { %v4985_v11 = vpop.f32.mrf.mxu2 }
 0x578   : > { %v7113_v10 = vpack.c.bf16 %v5370_v16, %v5368_v19  ;;  %v5839_v28 = vmul.f32 %v5694_v52, %v5370_v16  ;;  %v4986_v0 = vadd.f32 %v4985_v11, %v4857_v2  ;;  %v4859_v41 = vadd.f32 %v11927_v43, %v4730_v14  ;;  %v11017_v19 = vpop.f32.mrf.mxu0  ;;  %v11030_v2 = vpop.f32.mrf.mxu3 }
 0x579   : > { %v4733_v35 = vadd.f32 %v11930_v29, %v4604_v23  ;;  %v3160_v14 = vunpack.c.l.b16 %v2667_v13  ;;  %v11938_v23 = vld [vmem:[#allocation189_spill] sm:$0xff]  ;;  %v11943_v29 = vld [vmem:[#allocation132_spill] sm:$0xff] }
 0x57a   : > { %7320 = vst [vmem:[%s10749_s15 + $0x58] sm:$0xff] %v7113_v10   ;;  %v5886_v31 = vadd.f32 %v5885_v40, %v5839_v28  ;;  %v5934_v27 = vmul.f32 %v5839_v28, %v5370_v16  ;;  %v5115_v5 = vadd.f32 %v10926_v20, %v4986_v0  ;;  %v4477_v20 = vadd.f32 %v11929_v59, %v11928_v6  ;;  %v6881_v40 = vld [vmem:[#allocation2 + $0x278] sm:$0xf0]  ;;  %v11934_v16 = vld [vmem:[#allocation102_spill] sm:$0xff]  ;;  %v11936_v0 = vld [vmem:[#allocation128_spill] sm:$0xff]  ;;  %v11038_v32 = vpop.f32.mrf.mxu1 }
 0x57b   : > { %v6502_v51 = vor.u32 %v6881_v40, %v6501_v53  ;;  %v11941_v6 = vld [vmem:[#allocation155_spill] sm:$0xff]  ;;  %v6882_v53 = vld [vmem:[#allocation2 + $0x280] sm:$0xf0] }
 0x57c   : > { %v5981_v36 = vadd.f32 %v5980_v47, %v5934_v27  ;;  %v5244_v1 = vadd.f32 %v10931_v15, %v5115_v5  ;;  %v4606_v25 = vadd.f32 %v11932_v38, %v4477_v20  ;;  %v11933_v47 = vld [vmem:[#allocation186_spill] sm:$0xff]  ;;  %v6880_v27 = vld [vmem:[#allocation2 + $0x274] sm:$0xf]  ;;  %v11942_v59 = vunpack.c.l.b16 %v11941_v6  ;;  %v5714_v38 = vpop.permute.xlu1 %5713 }
 0x57d   : > { %v4862_v30 = vadd.f32 %v11933_v47, %v4733_v35  ;;  %5168 = vmatmul.bf16.gmra.mxu3 %v6502_v51  ;;  %v6503_v5 = vld [vmem:[#allocation2 + $0x27c] sm:$0xf0] }
 0x57e   : > { %v5373_v57 = vadd.f32 %v10935_v46, %v5244_v1  ;;  %v11937_v1 = vld [vmem:[#allocation153_spill] sm:$0xff]  ;;  %v3235_v20 = vpack.c.b16 %v3160_v14, %v11942_v59  ;;  %v11950_v14 = vld [vmem:[#allocation194_spill] sm:$0xff] }
 0x57f   : > { %v4987_v7 = vpop.f32.mrf.mxu2 }
 0x580   : > { %v5840_v58 = vmul.f32 %v5699_v54, %v5373_v57  ;;  %v4988_v3 = vadd.f32 %v4987_v7, %v4859_v41  ;;  %v11035_v22 = vpop.f32.mrf.mxu0 }
 0x582   : > { %v5887_v60 = vadd.f32 %v5886_v31, %v5840_v58  ;;  %v5935_v18 = vmul.f32 %v5840_v58, %v5373_v57  ;;  %v5117_v15 = vadd.f32 %v10944_v21, %v4988_v3  ;;  %v5704_v21 = vpop.permute.xlu2 %5703  ;;  %v11939_v58 = vld [vmem:[#allocation107_spill] sm:$0xff]  ;;  %v11940_v3 = vld [vmem:[#allocation252_spill] sm:$0xff] }
 0x584   : > { %v5982_v46 = vadd.f32 %v5981_v36, %v5935_v18  ;;  %v5246_v62 = vadd.f32 %v10948_v61, %v5117_v15  ;;  %5029 = vmatmul.bf16.gmra.mxu2 %v11931_v8  ;;  %v11935_v61 = vld [vmem:[#allocation249_spill] sm:$0xff]  ;;  %v6506_v36 = vor.u32 %v6880_v27, %v6503_v5 }
 0x585   : > { %v4480_v39 = vadd.f32 %v11935_v61, %v11934_v16  ;;  %v6509_v8 = vld [vmem:[#allocation2 + $0x278] sm:$0xf]  ;;  %v11947_v16 = vld [vmem:[#allocation254_spill] sm:$0xff] }
 0x586   : > { %v5375_v4 = vadd.f32 %v10953_v49, %v5246_v62  ;;  %v4735_v49 = vadd.f32 %v11936_v0, %v4606_v25  ;;  %5297 = vmatmul.bf16.gmra.mxu0 %v6506_v36  ;;  %v6510_v51 = vor.u32 %v6882_v53, %v6509_v8  ;;  %v11944_v25 = vld [vmem:[#allocation158_spill] sm:$0xff] }
 0x587   : > { %v4990_v9 = vpop.f32.mrf.mxu2  ;;  %v4609_v54 = vadd.f32 %v11937_v1, %v4480_v39  ;;  %v6810_v1 = vld [vmem:[#allocation2 + $0x25c] sm:$0xf0] }
 0x588   : > { %v7118_v52 = vpack.c.bf16 %v5375_v4, %v5373_v57  ;;  %v5841_v50 = vmul.f32 %v5704_v21, %v5375_v4  ;;  %v4991_v44 = vadd.f32 %v4990_v9, %v4862_v30  ;;  %v5709_v57 = vpop.permute.xlu0 %5708  ;;  %v11052_v40 = vpop.f32.mrf.mxu0  ;;  %5426 = vmatmul.bf16.gmra.mxu1 %v6510_v51 }
 0x589   : > { %v4738_v35 = vadd.f32 %v11943_v29, %v4609_v54  ;;  %v11057_v21 = vpop.f32.mrf.mxu1 }
 0x58a   : > { %7321 = vst [vmem:[%s10749_s15 + $0x60] sm:$0xff] %v7118_v52   ;;  %v5888_v11 = vadd.f32 %v5887_v60, %v5841_v50  ;;  %v5936_v10 = vmul.f32 %v5841_v50, %v5375_v4  ;;  %v5120_v28 = vadd.f32 %v10961_v12, %v4991_v44  ;;  %v4864_v12 = vadd.f32 %v11938_v23, %v4735_v49  ;;  %v11946_v44 = vld [vmem:[#allocation111_spill] sm:$0xff] }
 0x58b   : > { %v4485_v61 = vadd.f32 %v11947_v16, %v11946_v44  ;;  %v11959_v44 = vld [vmem:[#allocation170_spill] sm:$0xff] }
 0x58c   : > { %v5983_v26 = vadd.f32 %v5982_v46, %v5936_v10  ;;  %v5249_v31 = vadd.f32 %v10965_v24, %v5120_v28  ;;  %v4482_v24 = vadd.f32 %v11940_v3, %v11939_v58  ;;  %v11948_v28 = vld [vmem:[#allocation136_spill] sm:$0xff] }
 0x58e   : > { %v5378_v63 = vadd.f32 %v10969_v37, %v5249_v31  ;;  %v11049_v37 = vpop.f32.mrf.mxu3  ;;  %v4611_v4 = vadd.f32 %v11944_v25, %v4482_v24  ;;  %v11949_v31 = vld [vmem:[#allocation162_spill] sm:$0xff]  ;;  %v11957_v25 = vld [vmem:[#allocation259_spill] sm:$0xff] }
 0x58f   : > { %v4992_v43 = vpop.f32.mrf.mxu2  ;;  %v4614_v27 = vadd.f32 %v11949_v31, %v4485_v61 }
 0x590   : > { %v5842_v41 = vmul.f32 %v5709_v57, %v5378_v63  ;;  %v4993_v7 = vadd.f32 %v4992_v43, %v4864_v12  ;;  %v4740_v0 = vadd.f32 %v11948_v28, %v4611_v4  ;;  %v11070_v54 = vpop.f32.mrf.mxu0  ;;  %v6221_v12 = vld [vmem:[#allocation2 + $0x254] sm:$0xf]  ;;  %v11951_v57 = vld [vmem:[#allocation115_spill] sm:$0xff]  ;;  %v11952_v43 = vld [vmem:[#allocation257_spill] sm:$0xff] }
 0x592   : > { %v5889_v60 = vadd.f32 %v5888_v11, %v5842_v41  ;;  %v5937_v18 = vmul.f32 %v5842_v41, %v5378_v63  ;;  %v5122_v15 = vadd.f32 %v10979_v48, %v4993_v7  ;;  %v11945_v48 = vld [vmem:[#allocation191_spill] sm:$0xff]  ;;  %v4869_v36 = vadd.f32 %v11950_v14, %v4740_v0 }
 0x593   : > { %v4867_v30 = vadd.f32 %v11945_v48, %v4738_v35  ;;  %v4487_v41 = vadd.f32 %v11952_v43, %v11951_v57  ;;  %v6222_v7 = vor.u32 %v6810_v1, %v6221_v12  ;;  %v11955_v35 = vld [vmem:[#allocation197_spill] sm:$0xff]  ;;  %v11965_v43 = vld [vmem:[#allocation203_spill] sm:$0xff] }
 0x594   : > { %v5984_v46 = vadd.f32 %v5983_v26, %v5937_v18  ;;  %v5251_v62 = vadd.f32 %v10982_v17, %v5122_v15  ;;  %5034 = vmatmul.bf16.gmra.mxu2 %v3235_v20  ;;  %v5719_v26 = vpop.permute.xlu2 %5718  ;;  %v11954_v18 = vld [vmem:[#allocation166_spill] sm:$0xff] }
 0x595   : > { %v4616_v15 = vadd.f32 %v11954_v18, %v4487_v41  ;;  %v11968_v18 = vld [vmem:[#allocation152_spill] sm:$0xff] }
 0x596   : > { %v5380_v47 = vadd.f32 %v10987_v42, %v5251_v62  ;;  %v11065_v13 = vpop.f32.mrf.mxu3 }
 0x597   : > { %v4995_v9 = vpop.f32.mrf.mxu2 }
 0x598   : > { %v7123_v52 = vpack.c.bf16 %v5380_v47, %v5378_v63  ;;  %v5843_v17 = vmul.f32 %v5714_v38, %v5380_v47  ;;  %v4996_v50 = vadd.f32 %v4995_v9, %v4867_v30  ;;  %v11958_v9 = vld [vmem:[#allocation144_spill] sm:$0xff] }
 0x59a   : > { %7322 = vst [vmem:[%s10749_s15 + $0x68] sm:$0xff] %v7123_v52   ;;  %v5890_v39 = vadd.f32 %v5889_v60, %v5843_v17  ;;  %v5938_v11 = vmul.f32 %v5843_v17, %v5380_v47  ;;  %v5125_v10 = vadd.f32 %v10995_v56, %v4996_v50  ;;  %v5724_v60 = vpop.permute.xlu0 %5723  ;;  %v5265_v47 = vpop.f32.mrf.mxu0  ;;  %v4745_v52 = vadd.f32 %v11958_v9, %v4616_v15  ;;  %v11971_v9 = vld [vmem:[#allocation130_spill] sm:$0xff] }
 0x59c   : > { %v5985_v42 = vadd.f32 %v5984_v46, %v5938_v11  ;;  %v5254_v49 = vadd.f32 %v11000_v33, %v5125_v10  ;;  %v11074_v33 = vpop.f32.mrf.mxu1  ;;  %v5729_v10 = vpop.permute.xlu1 %5728 }
 0x59e   : > { %v5383_v5 = vadd.f32 %v11004_v55, %v5254_v49  ;;  %v11953_v55 = vld [vmem:[#allocation140_spill] sm:$0xff]  ;;  %v5136_v62 = vpop.f32.mrf.mxu3  ;;  %v11961_v49 = vld [vmem:[#allocation122_spill] sm:$0xff] }
 0x59f   : > { %v4997_v63 = vpop.f32.mrf.mxu2  ;;  %v4743_v6 = vadd.f32 %v11953_v55, %v4614_v27 }
 0x5a0   : > { %v5844_v23 = vmul.f32 %v5719_v26, %v5383_v5  ;;  %v4998_v56 = vadd.f32 %v4997_v63, %v4869_v36  ;;  %v11962_v26 = vld [vmem:[#allocation262_spill] sm:$0xff] }
 0x5a1   : > { %v4872_v46 = vadd.f32 %v11955_v35, %v4743_v6  ;;  %v4492_v31 = vadd.f32 %v11962_v26, %v11961_v49  ;;  %v11966_v6 = vld [vmem:[#allocation126_spill] sm:$0xff] }
 0x5a2   : > { %v5891_v58 = vadd.f32 %v5890_v39, %v5844_v23  ;;  %v5939_v3 = vmul.f32 %v5844_v23, %v5383_v5  ;;  %v5127_v24 = vadd.f32 %v11013_v45, %v4998_v56  ;;  %v11956_v45 = vld [vmem:[#allocation118_spill] sm:$0xff]  ;;  %v11960_v39 = vld [vmem:[#allocation200_spill] sm:$0xff]  ;;  %v5268_v1 = vpop.f32.mrf.mxu0 }
 0x5a3   : > { %v4490_v4 = vadd.f32 %v11957_v25, %v11956_v45  ;;  %v4874_v11 = vadd.f32 %v11960_v39, %v4745_v52  ;;  %v11964_v56 = vld [vmem:[#allocation174_spill] sm:$0xff]  ;;  %v11970_v45 = vld [vmem:[#allocation205_spill] sm:$0xff] }
 0x5a4   : > { %v5986_v59 = vadd.f32 %v5985_v42, %v5939_v3  ;;  %v5256_v20 = vadd.f32 %v11017_v19, %v5127_v24  ;;  %5039 = vmatmul.bf16.gmra.mxu2 %v6222_v7  ;;  %v5394_v17 = vpop.f32.mrf.mxu1  ;;  %v4621_v12 = vadd.f32 %v11964_v56, %v4492_v31  ;;  %v5734_v7 = vpop.permute.xlu2 %5733 }
 0x5a5   : > { %v4619_v16 = vadd.f32 %v11959_v44, %v4490_v4 }
 0x5a6   : > { %v5385_v29 = vadd.f32 %v11021_v34, %v5256_v20  ;;  %v4750_v15 = vadd.f32 %v11968_v18, %v4621_v12  ;;  %v11978_v12 = vld [vmem:[#allocation161_spill] sm:$0xff] }
 0x5a7   : > { %v5000_v8 = vpop.f32.mrf.mxu2 }
 0x5a8   : > { %v7128_v53 = vpack.c.bf16 %v5385_v29, %v5383_v5  ;;  %v5845_v51 = vmul.f32 %v5724_v60, %v5385_v29  ;;  %v5001_v38 = vadd.f32 %v5000_v8, %v4872_v46  ;;  %v5739_v8 = vpop.permute.xlu0 %5738  ;;  %v4879_v25 = vadd.f32 %v11970_v45, %v4750_v15 }
 0x5aa   : > { %7323 = vst [vmem:[%s10749_s15 + $0x70] sm:$0xff] %v7128_v53   ;;  %v5892_v48 = vadd.f32 %v5891_v58, %v5845_v51  ;;  %v5940_v19 = vmul.f32 %v5845_v51, %v5385_v29  ;;  %v5130_v30 = vadd.f32 %v11030_v2, %v5001_v38  ;;  %v5139_v2 = vpop.f32.mrf.mxu3  ;;  %v5270_v46 = vpop.f32.mrf.mxu0  ;;  %v11969_v53 = vld [vmem:[#allocation178_spill] sm:$0xff] }
 0x5ac   : > { %v5987_v34 = vadd.f32 %v5986_v59, %v5940_v19  ;;  %v5259_v50 = vadd.f32 %v11035_v22, %v5130_v30  ;;  %v11963_v22 = vld [vmem:[#allocation148_spill] sm:$0xff]  ;;  %v5397_v23 = vpop.f32.mrf.mxu1 }
 0x5ad   : > { %v4748_v36 = vadd.f32 %v11963_v22, %v4619_v16  ;;  %v11973_v16 = vld [vmem:[#allocation157_spill] sm:$0xff]  ;;  %v11976_v22 = vld [vmem:[#allocation134_spill] sm:$0xff] }
 0x5ae   : > { %v5388_v61 = vadd.f32 %v11038_v32, %v5259_v50 }
 0x5af   : > { %v5002_v28 = vpop.f32.mrf.mxu2  ;;  %v4877_v41 = vadd.f32 %v11965_v43, %v4748_v36  ;;  %v11977_v36 = vld [vmem:[#allocation13_spill] sm:$0xff] }
 0x5b0   : > { %v5846_v0 = vmul.f32 %v5729_v10, %v5388_v61  ;;  %v5003_v42 = vadd.f32 %v5002_v28, %v4874_v11  ;;  %v5744_v10 = vpop.permute.xlu1 %5743 }
 0x5b2   : > { %v5893_v27 = vadd.f32 %v5892_v48, %v5846_v0  ;;  %v5941_v5 = vmul.f32 %v5846_v0, %v5388_v61  ;;  %v5132_v14 = vadd.f32 %v11049_v37, %v5003_v42  ;;  %v11967_v37 = vld [vmem:[#allocation10_spill] sm:$0xff]  ;;  %v5141_v29 = vpop.f32.mrf.mxu3  ;;  %v11975_v42 = vld [vmem:[#allocation208_spill] sm:$0xff]  ;;  %v5273_v26 = vpop.f32.mrf.mxu0 }
 0x5b3   : > { %v4495_v59 = vadd.f32 %v11967_v37, %v11966_v6 }
 0x5b4   : > { %v5988_v63 = vadd.f32 %v5987_v34, %v5941_v5  ;;  %v5261_v32 = vadd.f32 %v11052_v40, %v5132_v14  ;;  %v5399_v4 = vpop.f32.mrf.mxu1 }
 0x5b5   : > { %v4624_v51 = vadd.f32 %v11969_v53, %v4495_v59 }
 0x5b6   : > { %v5390_v57 = vadd.f32 %v11057_v21, %v5261_v32 }
 0x5b7   : > { %v5005_v58 = vpop.f32.mrf.mxu2 }
 0x5b8   : > { %v7133_v3 = vpack.c.bf16 %v5390_v57, %v5388_v61  ;;  %v5847_v24 = vmul.f32 %v5734_v7, %v5390_v57  ;;  %v5006_v55 = vadd.f32 %v5005_v58, %v4877_v41  ;;  %v11979_v7 = vld [vmem:[#allocation184_spill] sm:$0xff] }
 0x5ba   : > { %7324 = vst [vmem:[%s10749_s15 + $0x78] sm:$0xff] %v7133_v3   ;;  %v5894_v20 = vadd.f32 %v5893_v27, %v5847_v24  ;;  %v5942_v60 = vmul.f32 %v5847_v24, %v5390_v57  ;;  %v5135_v40 = vadd.f32 %v11065_v13, %v5006_v55  ;;  %v11972_v13 = vld [vmem:[#allocation265_spill] sm:$0xff]  ;;  %v5144_v11 = vpop.f32.mrf.mxu3  ;;  %v11980_v24 = vld [vmem:[#allocation210_spill] sm:$0xff]  ;;  %v5275_v15 = vpop.f32.mrf.mxu0 }
 0x5bb   : > { %v4497_v52 = vadd.f32 %v11972_v13, %v11971_v9 }
 0x5bc   : > { %v5989_v35 = vadd.f32 %v5988_v63, %v5942_v60  ;;  %v5264_v21 = vadd.f32 %v11070_v54, %v5135_v40  ;;  %v4753_v54 = vadd.f32 %v11973_v16, %v4624_v51  ;;  %v5402_v63 = vpop.f32.mrf.mxu1  ;;  %v11981_v60 = vld [vmem:[#allocation138_spill] sm:$0xff]  ;;  %v11982_v40 = vld [vmem:[#allocation269_spill] sm:$0xff] }
 0x5bd   : > { %v4502_v18 = vadd.f32 %v11982_v40, %v11981_v60 }
 0x5be   : > { %v5393_v38 = vadd.f32 %v11074_v33, %v5264_v21  ;;  %v11974_v33 = vld [vmem:[#allocation181_spill] sm:$0xff]  ;;  %v4882_v49 = vadd.f32 %v11975_v42, %v4753_v54  ;;  %v11989_v42 = vld [vmem:[#allocation190_spill] sm:$0xff] }
 0x5bf   : > { %v5007_v48 = vpop.f32.mrf.mxu2  ;;  %v4626_v28 = vadd.f32 %v11974_v33, %v4497_v52 }
 0x5c0   : > { %v5848_v19 = vmul.f32 %v5739_v8, %v5393_v38  ;;  %v5008_v30 = vadd.f32 %v5007_v48, %v4879_v25  ;;  %v11983_v8 = vld [vmem:[#allocation165_spill] sm:$0xff]  ;;  %v11985_v48 = vld [vmem:[#allocation211_spill] sm:$0xff] }
 0x5c1   : > { %v4755_v57 = vadd.f32 %v11978_v12, %v4626_v28 }
 0x5c2   : > { %v5895_v34 = vadd.f32 %v5894_v20, %v5848_v19  ;;  %v5943_v50 = vmul.f32 %v5848_v19, %v5393_v38  ;;  %v5137_v44 = vadd.f32 %v5136_v62, %v5008_v30  ;;  %v4500_v62 = vadd.f32 %v11977_v36, %v11976_v22  ;;  %v5146_v6 = vpop.f32.mrf.mxu3  ;;  %v5754_v30 = vpop.permute.xlu0 %5753 }
 0x5c3   : > { %v4884_v55 = vadd.f32 %v11980_v24, %v4755_v57  ;;  %v5278_v33 = vpop.f32.mrf.mxu0 }
 0x5c4   : > { %v5990_v61 = vadd.f32 %v5989_v35, %v5943_v50  ;;  %v5266_v39 = vadd.f32 %v5265_v47, %v5137_v44  ;;  %v4629_v58 = vadd.f32 %v11979_v7, %v4500_v62  ;;  %v5404_v53 = vpop.f32.mrf.mxu1  ;;  %v11986_v50 = vld [vmem:[#allocation142_spill] sm:$0xff] }
 0x5c5   : > { %v11987_v44 = vld [vmem:[#allocation270_spill] sm:$0xff] }
 0x5c6   : > { %v5395_v0 = vadd.f32 %v5394_v17, %v5266_v39  ;;  %v5749_v17 = vpop.permute.xlu2 %5748  ;;  %v4505_v16 = vadd.f32 %v11987_v44, %v11986_v50 }
 0x5c7   : > { %v5010_v31 = vpop.f32.mrf.mxu2 }
 0x5c8   : > { %v7138_v27 = vpack.c.bf16 %v5395_v0, %v5393_v38  ;;  %v5849_v5 = vmul.f32 %v5744_v10, %v5395_v0  ;;  %v5011_v14 = vadd.f32 %v5010_v31, %v4882_v49  ;;  %v11988_v10 = vld [vmem:[#allocation169_spill] sm:$0xff]  ;;  %v4634_v49 = vadd.f32 %v11989_v42, %v4505_v16  ;;  %v12001_v16 = vld [vmem:[#allocation154_spill] sm:$0xff] }
 0x5ca   : > { %7325 = vst [vmem:[%s10749_s15 + $0x80] sm:$0xff] %v7138_v27   ;;  %v5896_v32 = vadd.f32 %v5895_v34, %v5849_v5  ;;  %v5944_v56 = vmul.f32 %v5849_v5, %v5395_v0  ;;  %v5140_v47 = vadd.f32 %v5139_v2, %v5011_v14  ;;  %v5149_v54 = vpop.f32.mrf.mxu3  ;;  %v11990_v27 = vld [vmem:[#allocation214_spill] sm:$0xff]  ;;  %v5759_v14 = vpop.permute.xlu1 %5758 }
 0x5cc   : > { %v5991_v43 = vadd.f32 %v5990_v61, %v5944_v56  ;;  %v5269_v41 = vadd.f32 %v5268_v1, %v5140_v47  ;;  %v4758_v1 = vadd.f32 %v11983_v8, %v4629_v58  ;;  %v5407_v0 = vpop.f32.mrf.mxu1  ;;  %v11992_v56 = vld [vmem:[#allocation272_spill] sm:$0xff]  ;;  %v5280_v58 = vpop.f32.mrf.mxu0 }
 0x5ce   : > { %v5398_v3 = vadd.f32 %v5397_v23, %v5269_v41  ;;  %v11984_v23 = vld [vmem:[#allocation187_spill] sm:$0xff]  ;;  %v4887_v19 = vadd.f32 %v11985_v48, %v4758_v1 }
 0x5cf   : > { %v5012_v37 = vpop.f32.mrf.mxu2  ;;  %v4631_v45 = vadd.f32 %v11984_v23, %v4502_v18  ;;  %v11999_v48 = vld [vmem:[#allocation195_spill] sm:$0xff] }
 0x5d0   : > { %v5850_v59 = vmul.f32 %v5749_v17, %v5398_v3  ;;  %v5013_v20 = vadd.f32 %v5012_v37, %v4884_v55  ;;  %v11995_v37 = vld [vmem:[#allocation217_spill] sm:$0xff] }
 0x5d2   : > { %v5897_v35 = vadd.f32 %v5896_v32, %v5850_v59  ;;  %v5945_v2 = vmul.f32 %v5850_v59, %v5398_v3  ;;  %v5142_v21 = vadd.f32 %v5141_v29, %v5013_v20  ;;  %v11991_v32 = vld [vmem:[#allocation146_spill] sm:$0xff] }
 0x5d3   : > { %v4507_v47 = vadd.f32 %v11992_v56, %v11991_v32 }
 0x5d4   : > { %v5992_v51 = vadd.f32 %v5991_v43, %v5945_v2  ;;  %v5271_v38 = vadd.f32 %v5270_v46, %v5142_v21  ;;  %v4760_v46 = vadd.f32 %v11988_v10, %v4631_v45  ;;  %v11993_v43 = vld [vmem:[#allocation173_spill] sm:$0xff]  ;;  %v5409_v20 = vpop.f32.mrf.mxu1  ;;  %v11996_v2 = vld [vmem:[#allocation150_spill] sm:$0xff] }
 0x5d5   : > { %v4763_v41 = vadd.f32 %v11993_v43, %v4634_v49  ;;  %v5774_v49 = vpop.permute.xlu1 %5773 }
 0x5d6   : > { %v5400_v25 = vadd.f32 %v5399_v4, %v5271_v38  ;;  %v4889_v5 = vadd.f32 %v11990_v27, %v4760_v46 }
 0x5d7   : > { %v5015_v9 = vpop.f32.mrf.mxu2  ;;  %v4892_v59 = vadd.f32 %v11995_v37, %v4763_v41 }
 0x5d8   : > { %v7143_v13 = vpack.c.bf16 %v5400_v25, %v5398_v3  ;;  %v5851_v52 = vmul.f32 %v5754_v30, %v5400_v25  ;;  %v5016_v34 = vadd.f32 %v5015_v9, %v4887_v19  ;;  %v11994_v3 = vld [vmem:[#allocation193_spill] sm:$0xff]  ;;  %v12000_v9 = vld [vmem:[#allocation219_spill] sm:$0xff] }
 0x5d9   : > { %v4636_v24 = vadd.f32 %v11994_v3, %v4507_v47  ;;  %v12006_v47 = vld [vmem:[#allocation159_spill] sm:$0xff] }
 0x5da   : > { %7326 = vst [vmem:[%s10749_s15 + $0x88] sm:$0xff] %v7143_v13   ;;  %v5898_v29 = vadd.f32 %v5897_v35, %v5851_v52  ;;  %v5946_v61 = vmul.f32 %v5851_v52, %v5400_v25  ;;  %v5145_v39 = vadd.f32 %v5144_v11, %v5016_v34  ;;  %v5283_v52 = vpop.f32.mrf.mxu0 }
 0x5dc   : > { %v5993_v28 = vadd.f32 %v5992_v51, %v5946_v61  ;;  %v5274_v4 = vadd.f32 %v5273_v26, %v5145_v39  ;;  %v5151_v26 = vpop.f32.mrf.mxu3  ;;  %v5412_v39 = vpop.f32.mrf.mxu1 }
 0x5de   : > { %v5403_v31 = vadd.f32 %v5402_v63, %v5274_v4  ;;  %v5764_v63 = vpop.permute.xlu2 %5763 }
 0x5df   : > { %v5017_v22 = vpop.f32.mrf.mxu2 }
 0x5e0   : > { %v5852_v36 = vmul.f32 %v5759_v14, %v5403_v31  ;;  %v5018_v62 = vadd.f32 %v5017_v22, %v4889_v5  ;;  %v12005_v5 = vld [vmem:[#allocation221_spill] sm:$0xff] }
 0x5e2   : > { %v5899_v12 = vadd.f32 %v5898_v29, %v5852_v36  ;;  %v5947_v11 = vmul.f32 %v5852_v36, %v5403_v31  ;;  %v5147_v57 = vadd.f32 %v5146_v6, %v5018_v62  ;;  %v11997_v6 = vld [vmem:[#allocation22_spill] sm:$0xff]  ;;  %v12002_v29 = vld [vmem:[#allocation275_spill] sm:$0xff] }
 0x5e3   : > { %v4510_v21 = vadd.f32 %v11997_v6, %v11996_v2  ;;  %v4512_v61 = vadd.f32 %v12002_v29, %v12001_v16  ;;  %v12011_v2 = vld [vmem:[#allocation163_spill] sm:$0xff]  ;;  %v12012_v6 = vld [vmem:[#allocation277_spill] sm:$0xff] }
 0x5e4   : > { %v5994_v17 = vadd.f32 %v5993_v28, %v5947_v11  ;;  %v5276_v7 = vadd.f32 %v5275_v15, %v5147_v57  ;;  %v11998_v15 = vld [vmem:[#allocation177_spill] sm:$0xff]  ;;  %v5154_v25 = vpop.f32.mrf.mxu3  ;;  %v5285_v57 = vpop.f32.mrf.mxu0 }
 0x5e5   : > { %v4765_v38 = vadd.f32 %v11998_v15, %v4636_v24  ;;  %v4639_v19 = vadd.f32 %v11999_v48, %v4510_v21  ;;  %v12009_v24 = vld [vmem:[#allocation201_spill] sm:$0xff]  ;;  %v4517_v21 = vadd.f32 %v12012_v6, %v12011_v2 }
 0x5e6   : > { %v5405_v55 = vadd.f32 %v5404_v53, %v5276_v7  ;;  %v5769_v53 = vpop.permute.xlu0 %5768 }
 0x5e7   : > { %v5020_v60 = vpop.f32.mrf.mxu2  ;;  %v4894_v13 = vadd.f32 %v12000_v9, %v4765_v38  ;;  %v12013_v38 = vld [vmem:[#allocation188_spill] sm:$0xff] }
 0x5e8   : > { %v7148_v40 = vpack.c.bf16 %v5405_v55, %v5403_v31  ;;  %v5853_v18 = vmul.f32 %v5764_v63, %v5405_v55  ;;  %v5021_v35 = vadd.f32 %v5020_v60, %v4892_v59  ;;  %v12010_v59 = vld [vmem:[#allocation223_spill] sm:$0xff]  ;;  %v5779_v60 = vpop.permute.xlu2 %5778 }
 0x5ea   : > { %7327 = vst [vmem:[%s10749_s15 + $0x90] sm:$0xff] %v7148_v40   ;;  %v5900_v8 = vadd.f32 %v5899_v12, %v5853_v18  ;;  %v5948_v1 = vmul.f32 %v5853_v18, %v5405_v55  ;;  %v5150_v51 = vadd.f32 %v5149_v54, %v5021_v35  ;;  %v12007_v12 = vld [vmem:[#allocation31_spill] sm:$0xff] }
 0x5eb   : > { %v4515_v11 = vadd.f32 %v12007_v12, %v12006_v47 }
 0x5ec   : > { %v5995_v23 = vadd.f32 %v5994_v17, %v5948_v1  ;;  %v5279_v45 = vadd.f32 %v5278_v33, %v5150_v51  ;;  %v12003_v33 = vld [vmem:[#allocation182_spill] sm:$0xff]  ;;  %v5156_v22 = vpop.f32.mrf.mxu3  ;;  %v12008_v17 = vld [vmem:[#allocation185_spill] sm:$0xff] }
 0x5ed   : > { %v4768_v28 = vadd.f32 %v12003_v33, %v4639_v19  ;;  %v4644_v55 = vadd.f32 %v12009_v24, %v4515_v11  ;;  %v12014_v19 = vld [vmem:[#allocation204_spill] sm:$0xff]  ;;  %v12021_v11 = vld [vmem:[#allocation171_spill] sm:$0xff] }
 0x5ee   : > { %v5408_v30 = vadd.f32 %v5407_v0, %v5279_v45  ;;  %v12004_v0 = vld [vmem:[#allocation198_spill] sm:$0xff]  ;;  %v5288_v45 = vpop.f32.mrf.mxu0 }
 0x5ef   : > { %v5022_v34 = vpop.f32.mrf.mxu2  ;;  %v4641_v31 = vadd.f32 %v12004_v0, %v4512_v61  ;;  %v4897_v14 = vadd.f32 %v12005_v5, %v4768_v28  ;;  %v12016_v61 = vld [vmem:[#allocation167_spill] sm:$0xff]  ;;  %v12018_v28 = vld [vmem:[#allocation192_spill] sm:$0xff] }
 0x5f0   : > { %v5854_v50 = vmul.f32 %v5769_v53, %v5408_v30  ;;  %v5023_v44 = vadd.f32 %v5022_v34, %v4894_v13  ;;  %v12015_v13 = vld [vmem:[#allocation225_spill] sm:$0xff]  ;;  %v5784_v34 = vpop.permute.xlu0 %5783  ;;  %v12019_v5 = vld [vmem:[#allocation207_spill] sm:$0xff] }
 0x5f1   : > { %v4770_v7 = vadd.f32 %v12008_v17, %v4641_v31 }
 0x5f2   : > { %v5901_v54 = vadd.f32 %v5900_v8, %v5854_v50  ;;  %v5949_v10 = vmul.f32 %v5854_v50, %v5408_v30  ;;  %v5152_v46 = vadd.f32 %v5151_v26, %v5023_v44 }
 0x5f4   : > { %v5996_v4 = vadd.f32 %v5995_v23, %v5949_v10  ;;  %v5281_v42 = vadd.f32 %v5280_v58, %v5152_v46  ;;  %v5414_v58 = vpop.f32.mrf.mxu1  ;;  %v5159_v8 = vpop.f32.mrf.mxu3  ;;  %v4773_v23 = vadd.f32 %v12013_v38, %v4644_v55 }
 0x5f5   : > { %v5794_v55 = vpop.permute.xlu2 %5793 }
 0x5f6   : > { %v5410_v27 = vadd.f32 %v5409_v20, %v5281_v42  ;;  %v4899_v20 = vadd.f32 %v12010_v59, %v4770_v7  ;;  %v5290_v31 = vpop.f32.mrf.mxu0  ;;  %v12023_v7 = vld [vmem:[#allocation196_spill] sm:$0xff] }
 0x5f7   : > { %v5025_v36 = vpop.f32.mrf.mxu2 }
 0x5f8   : > { %v7153_v62 = vpack.c.bf16 %v5410_v27, %v5408_v30  ;;  %v5855_v32 = vmul.f32 %v5774_v49, %v5410_v27  ;;  %v5026_v56 = vadd.f32 %v5025_v36, %v4897_v14  ;;  %v4646_v30 = vadd.f32 %v12014_v19, %v4517_v21  ;;  %v12020_v36 = vld [vmem:[#allocation228_spill] sm:$0xff] }
 0x5fa   : > { %7328 = vst [vmem:[%s10749_s15 + $0x98] sm:$0xff] %v7153_v62   ;;  %v5902_v43 = vadd.f32 %v5901_v54, %v5855_v32  ;;  %v5950_v41 = vmul.f32 %v5855_v32, %v5410_v27  ;;  %v5155_v26 = vadd.f32 %v5154_v25, %v5026_v56  ;;  %v5789_v27 = vpop.permute.xlu1 %5788 }
 0x5fc   : > { %v5997_v63 = vadd.f32 %v5996_v4, %v5950_v41  ;;  %v5284_v3 = vadd.f32 %v5283_v52, %v5155_v26  ;;  %v5417_v48 = vpop.f32.mrf.mxu1  ;;  %v4902_v52 = vadd.f32 %v12015_v13, %v4773_v23  ;;  %v4775_v4 = vadd.f32 %v12018_v28, %v4646_v30  ;;  %v5161_v42 = vpop.f32.mrf.mxu3 }
 0x5fd   : > { %v5799_v30 = vpop.permute.xlu0 %5798 }
 0x5fe   : > { %v5413_v37 = vadd.f32 %v5412_v39, %v5284_v3  ;;  %v12017_v39 = vld [vmem:[#allocation30_spill] sm:$0xff]  ;;  %v4904_v62 = vadd.f32 %v12020_v36, %v4775_v4 }
 0x5ff   : > { %v5027_v40 = vpop.f32.mrf.mxu2  ;;  %v4520_v54 = vadd.f32 %v12017_v39, %v12016_v61  ;;  %v12031_v39 = vld [vmem:[#allocation179_spill] sm:$0xff] }
 0x600   : > { %v5856_v18 = vmul.f32 %v5779_v60, %v5413_v37  ;;  %v5028_v35 = vadd.f32 %v5027_v40, %v4899_v20  ;;  %v12025_v60 = vld [vmem:[#allocation230_spill] sm:$0xff] }
 0x601   : > { %v4649_v14 = vadd.f32 %v12019_v5, %v4520_v54  ;;  %v12032_v54 = vld [vmem:[#allocation12_spill] sm:$0xff] }
 0x602   : > { %v5903_v1 = vadd.f32 %v5902_v43, %v5856_v18  ;;  %v5951_v51 = vmul.f32 %v5856_v18, %v5413_v37  ;;  %v5157_v15 = vadd.f32 %v5156_v22, %v5028_v35  ;;  %v5293_v18 = vpop.f32.mrf.mxu0  ;;  %v5804_v5 = vpop.permute.xlu1 %5803 }
 0x604   : > { %v5998_v25 = vadd.f32 %v5997_v63, %v5951_v51  ;;  %v5286_v53 = vadd.f32 %v5285_v57, %v5157_v15  ;;  %v5419_v32 = vpop.f32.mrf.mxu1  ;;  %v12022_v57 = vld [vmem:[#allocation278_spill] sm:$0xff]  ;;  %v5164_v24 = vpop.f32.mrf.mxu3 }
 0x605   : > { %v4522_v43 = vadd.f32 %v12022_v57, %v12021_v11 }
 0x606   : > { %v5415_v9 = vadd.f32 %v5414_v58, %v5286_v53  ;;  %v4778_v58 = vadd.f32 %v12023_v7, %v4649_v14  ;;  %v12034_v14 = vld [vmem:[#allocation215_spill] sm:$0xff]  ;;  %v12036_v7 = vld [vmem:[#allocation206_spill] sm:$0xff] }
 0x607   : > { %v5030_v50 = vpop.f32.mrf.mxu2 }
 0x608   : > { %v7158_v44 = vpack.c.bf16 %v5415_v9, %v5413_v37  ;;  %v5857_v16 = vmul.f32 %v5784_v34, %v5415_v9  ;;  %v5031_v29 = vadd.f32 %v5030_v50, %v4902_v52  ;;  %v12024_v37 = vld [vmem:[#allocation209_spill] sm:$0xff]  ;;  %v4907_v40 = vadd.f32 %v12025_v60, %v4778_v58 }
 0x609   : > { %v4651_v59 = vadd.f32 %v12024_v37, %v4522_v43  ;;  %v12030_v34 = vld [vmem:[#allocation233_spill] sm:$0xff]  ;;  %v12037_v37 = vld [vmem:[#allocation240_spill] sm:$0xff] }
 0x60a   : > { %7329 = vst [vmem:[%s10749_s15 + $0xa0] sm:$0xff] %v7158_v44   ;;  %v5904_v10 = vadd.f32 %v5903_v1, %v5857_v16  ;;  %v5952_v46 = vmul.f32 %v5857_v16, %v5415_v9  ;;  %v5160_v33 = vadd.f32 %v5159_v8, %v5031_v29  ;;  %v12026_v8 = vld [vmem:[#allocation175_spill] sm:$0xff]  ;;  %v12029_v9 = vld [vmem:[#allocation212_spill] sm:$0xff] }
 0x60b   : > { %v12027_v1 = vld [vmem:[#allocation35_spill] sm:$0xff] }
 0x60c   : > { %v5999_v49 = vadd.f32 %v5998_v25, %v5952_v46  ;;  %v5289_v0 = vadd.f32 %v5288_v45, %v5160_v33  ;;  %v4525_v51 = vadd.f32 %v12027_v1, %v12026_v8  ;;  %v5422_v15 = vpop.f32.mrf.mxu1  ;;  %v12028_v25 = vld [vmem:[#allocation199_spill] sm:$0xff]  ;;  %v5166_v44 = vpop.f32.mrf.mxu3 }
 0x60d   : > { %v4780_v53 = vadd.f32 %v12028_v25, %v4651_v59  ;;  %v5295_v46 = vpop.f32.mrf.mxu0 }
 0x60e   : > { %v5418_v22 = vadd.f32 %v5417_v48, %v5289_v0  ;;  %v4654_v13 = vadd.f32 %v12029_v9, %v4525_v51 }
 0x60f   : > { %v5032_v56 = vpop.f32.mrf.mxu2  ;;  %v4909_v50 = vadd.f32 %v12030_v34, %v4780_v53 }
 0x610   : > { %v5858_v47 = vmul.f32 %v5789_v27, %v5418_v22  ;;  %v5033_v12 = vadd.f32 %v5032_v56, %v4904_v62  ;;  %v12035_v62 = vld [vmem:[#allocation236_spill] sm:$0xff] }
 0x612   : > { %v5905_v41 = vadd.f32 %v5904_v10, %v5858_v47  ;;  %v5953_v26 = vmul.f32 %v5858_v47, %v5418_v22  ;;  %v5162_v17 = vadd.f32 %v5161_v42, %v5033_v12  ;;  %v4527_v10 = vadd.f32 %v12032_v54, %v12031_v39  ;;  %v12033_v42 = vld [vmem:[#allocation202_spill] sm:$0xff] }
 0x614   : > { %v6000_v63 = vadd.f32 %v5999_v49, %v5953_v26  ;;  %v5291_v3 = vadd.f32 %v5290_v31, %v5162_v17  ;;  %v4783_v49 = vadd.f32 %v12033_v42, %v4654_v13  ;;  %v5424_v0 = vpop.f32.mrf.mxu1  ;;  %v5169_v56 = vpop.f32.mrf.mxu3 }
 0x615   : > { %v5298_v43 = vpop.f32.mrf.mxu0 }
 0x616   : > { %v5420_v20 = vadd.f32 %v5419_v32, %v5291_v3  ;;  %v4912_v32 = vadd.f32 %v12035_v62, %v4783_v49 }
 0x617   : > { %v5035_v35 = vpop.f32.mrf.mxu2 }
 0x618   : > { %v7163_v2 = vpack.c.bf16 %v5420_v20, %v5418_v22  ;;  %v5859_v6 = vmul.f32 %v5794_v55, %v5420_v20  ;;  %v5036_v21 = vadd.f32 %v5035_v35, %v4907_v40  ;;  %v4656_v22 = vadd.f32 %v12034_v14, %v4527_v10 }
 0x61a   : > { %7330 = vst [vmem:[%s10749_s15 + $0xa8] sm:$0xff] %v7163_v2   ;;  %v5906_v38 = vadd.f32 %v5905_v41, %v5859_v6  ;;  %v5954_v23 = vmul.f32 %v5859_v6, %v5420_v20  ;;  %v5165_v45 = vadd.f32 %v5164_v24, %v5036_v21  ;;  %v4785_v58 = vadd.f32 %v12036_v7, %v4656_v22  ;;  %v5809_v20 = vpop.permute.xlu2 %5808 }
 0x61c   : > { %v6001_v48 = vadd.f32 %v6000_v63, %v5954_v23  ;;  %v5294_v19 = vadd.f32 %v5293_v18, %v5165_v45  ;;  %v5427_v63 = vpop.f32.mrf.mxu1  ;;  %v4914_v59 = vadd.f32 %v12037_v37, %v4785_v58  ;;  %v5171_v35 = vpop.f32.mrf.mxu3 }
 0x61d   : > { %v5300_v8 = vpop.f32.mrf.mxu0  ;;  %v5814_v23 = vpop.permute.xlu0 %5813 }
 0x61e   : > { %v5423_v52 = vadd.f32 %v5422_v15, %v5294_v19 }
 0x61f   : > { %v5037_v16 = vpop.f32.mrf.mxu2 }
 0x620   : > { %v5860_v29 = vmul.f32 %v5799_v30, %v5423_v52  ;;  %v5038_v61 = vadd.f32 %v5037_v16, %v4909_v50 }
 0x622   : > { %v5907_v33 = vadd.f32 %v5906_v38, %v5860_v29  ;;  %v5955_v28 = vmul.f32 %v5860_v29, %v5423_v52  ;;  %v5167_v4 = vadd.f32 %v5166_v44, %v5038_v61 }
 0x624   : > { %v6002_v31 = vadd.f32 %v6001_v48, %v5955_v28  ;;  %v5296_v27 = vadd.f32 %v5295_v46, %v5167_v4  ;;  %v5429_v15 = vpop.f32.mrf.mxu1 }
 0x626   : > { %v5425_v36 = vadd.f32 %v5424_v0, %v5296_v27 }
 0x627   : > { %v5040_v47 = vpop.f32.mrf.mxu2 }
 0x628   : > { %v7168_v12 = vpack.c.bf16 %v5425_v36, %v5423_v52  ;;  %v5861_v11 = vmul.f32 %v5804_v5, %v5425_v36  ;;  %v5041_v57 = vadd.f32 %v5040_v47, %v4912_v32 }
 0x62a   : > { %7331 = vst [vmem:[%s10749_s15 + $0xb0] sm:$0xff] %v7168_v12   ;;  %v5908_v41 = vadd.f32 %v5907_v33, %v5861_v11  ;;  %v5956_v26 = vmul.f32 %v5861_v11, %v5425_v36  ;;  %v5170_v17 = vadd.f32 %v5169_v56, %v5041_v57 }
 0x62c   : > { %v6003_v3 = vadd.f32 %v6002_v31, %v5956_v26  ;;  %v5299_v24 = vadd.f32 %v5298_v43, %v5170_v17 }
 0x62e   : > { %v5428_v55 = vadd.f32 %v5427_v63, %v5299_v24 }
 0x62f   : > { %v5042_v60 = vpop.f32.mrf.mxu2 }
 0x630   : > { %v5862_v40 = vmul.f32 %v5809_v20, %v5428_v55  ;;  %v5043_v18 = vadd.f32 %v5042_v60, %v4914_v59 }
 0x632   : > { %v5909_v2 = vadd.f32 %v5908_v41, %v5862_v40  ;;  %v5957_v6 = vmul.f32 %v5862_v40, %v5428_v55  ;;  %v5172_v21 = vadd.f32 %v5171_v35, %v5043_v18 }
 0x634   : > { %v6004_v1 = vadd.f32 %v6003_v3, %v5957_v6  ;;  %v5301_v51 = vadd.f32 %v5300_v8, %v5172_v21 }
 0x636   : > { %v5430_v38 = vadd.f32 %v5429_v15, %v5301_v51 }
 0x638   : > { %v7173_v45 = vpack.c.bf16 %v5430_v38, %v5428_v55  ;;  %v5863_v25 = vmul.f32 %v5814_v23, %v5430_v38 }
 0x63a   : > { %7332 = vst [vmem:[%s10749_s15 + $0xb8] sm:$0xff] %v7173_v45   ;;  %v5910_v53 = vadd.f32 %v5909_v2, %v5863_v25  ;;  %v5958_v48 = vmul.f32 %v5863_v25, %v5430_v38 }
 0x63c   : > { %v6005_v19 = vadd.f32 %v6004_v1, %v5958_v48  ;;  %6009 = vst [vmem:[%s346_s19] sm:$0xff] %v5910_v53 }
 0x63e   : > { %6010 = vst [vmem:[%s350_s22] sm:$0xff] %v6005_v19 }
 0x63f PF: > { %s19_s29 = sadd.s32 1, %s7486_s29   ;;  %s12038_s27 = smov %s7482_s28 }
 0x640   : > { %p16_p5 = scmp.ge.s32.totalorder %s19_s29, 4   ;;  %s12039_s28 = smov %s12041_s30 }
 0x642   :  { %18 = sbr.rel (!%p16_p5) target bundleno = 2 (0x2), region = 110 }

</bundles_post_ra>
